<compile_context>
chip_gen: v6e
topology: v6e:2x2x1
jax: 0.10.0
libtpu: 0.0.40
codegen_flags: <defaults>
</compile_context>

<pallas_src>
import functools

import jax
import jax.numpy as jnp
from jax.experimental import pallas as pl
from jax.experimental.pallas import tpu as pltpu

LEAKY_SLOPE = 0.01
BN_EPS = 1e-5
VMEM_LIMIT = 32 * 1024 * 1024  # conservative; fits v5e/v6e/v7x scoped defaults


def _round_up(x, m):
    return (x + m - 1) // m * m


def _pick_tm(m, tm_max=512):
    # Large M tiles, but keep >= 2 parallel tiles when M allows (v7x has 2 TCs).
    return min(tm_max, max(8, _round_up((m + 1) // 2, 8)))


# ----------------------------------------------------------------------------
# Pallas kernels
# ----------------------------------------------------------------------------
def _mm_kernel(a_ref, b_ref, scale_ref, shift_ref, o_ref, *, act):
    """One M-tile matmul with weight-resident B and fused scale/shift (+LeakyReLU)."""
    y = jnp.dot(a_ref[...], b_ref[...], preferred_element_type=jnp.float32)
    y = y * scale_ref[...] + shift_ref[...]
    if act == "leaky":
        y = jnp.where(y > 0, y, LEAKY_SLOPE * y)
    o_ref[...] = y.astype(o_ref.dtype)


def fused_matmul(a, b, scale, shift, act=None, out_dtype=jnp.bfloat16, tm_max=512):
    """out[m, n] = act( (sum_k a[m,k] b[k,n]) * scale[n] + shift[n] ).

    A/B are fed to the MXU in bf16, accumulation and epilogue in f32.  B, scale and
    shift stay resident in VMEM (constant index_map); 1-D grid over M only.
    """
    M, K = a.shape
    _, Nc = b.shape
    a = a.astype(jnp.bfloat16)
    b = b.astype(jnp.bfloat16)
    sc = scale.astype(jnp.float32).reshape(1, Nc)
    sh = shift.astype(jnp.float32).reshape(1, Nc)
    tm = _pick_tm(M, tm_max)

    return pl.pallas_call(
        functools.partial(_mm_kernel, act=act),
        out_shape=jax.ShapeDtypeStruct((M, Nc), out_dtype),
        grid_spec=pltpu.PrefetchScalarGridSpec(
            num_scalar_prefetch=0,
            grid=(pl.cdiv(M, tm),),
            in_specs=[
                pl.BlockSpec((tm, K), lambda i: (i, 0)),
                pl.BlockSpec((K, Nc), lambda i: (0, 0)),
                pl.BlockSpec((1, Nc), lambda i: (0, 0)),
                pl.BlockSpec((1, Nc), lambda i: (0, 0)),
            ],
            out_specs=pl.BlockSpec((tm, Nc), lambda i: (i, 0)),
        ),
        compiler_params=pltpu.CompilerParams(
            dimension_semantics=("parallel",),
            vmem_limit_bytes=VMEM_LIMIT),
    )(a, b, sc, sh)


def _att_mlp_kernel(x_ref, w1_ref, s1_ref, b1_ref, w2_ref, b2_ref, o_ref):
    """channelAtt: (1x1 conv + BN + LeakyReLU) -> 1x1 conv, fused; h stays in VMEM."""
    h = jnp.dot(x_ref[...], w1_ref[...], preferred_element_type=jnp.float32)
    h = h * s1_ref[...] + b1_ref[...]
    h = jnp.where(h > 0, h, LEAKY_SLOPE * h)
    a = jnp.dot(h.astype(jnp.bfloat16), w2_ref[...], preferred_element_type=jnp.float32)
    o_ref[...] = (a + b2_ref[...]).astype(o_ref.dtype)


def _gate_kernel(a_ref, c_ref, o_ref):
    # sigmoid via tanh: overflow-safe and routed to the EUP slot.
    att = a_ref[...].astype(jnp.float32)
    sig = 0.5 * (jnp.tanh(0.5 * att) + 1.0)
    o_ref[...] = (c_ref[...].astype(jnp.float32) * sig).astype(o_ref.dtype)


def sigmoid_gate(att, cv):
    """cv[n,d,h,w,c] * sigmoid(att[n,h,w,c]) without materializing the D-broadcast."""
    N, D, H, W, C = cv.shape
    hwc = H * W * C
    cv3 = cv.reshape(N, D, hwc)
    att3 = att.reshape(N, 1, hwc)

    row_bytes = hwc * cv.dtype.itemsize
    if D < 8 or D * row_bytes <= (2 << 20):
        dblk = D
    else:
        dblk = max(8, min(D, (2 << 20) // row_bytes) // 8 * 8)

    out = pl.pallas_call(
        _gate_kernel,
        out_shape=jax.ShapeDtypeStruct((N, D, hwc), cv.dtype),
        grid_spec=pltpu.PrefetchScalarGridSpec(
            num_scalar_prefetch=0,
            grid=(N, pl.cdiv(D, dblk)),
            in_specs=[
                pl.BlockSpec((1, 1, hwc), lambda n, d: (n, 0, 0)),   # att reused over D
                pl.BlockSpec((1, dblk, hwc), lambda n, d: (n, d, 0)),
            ],
            out_specs=pl.BlockSpec((1, dblk, hwc), lambda n, d: (n, d, 0)),
        ),
        compiler_params=pltpu.CompilerParams(
            dimension_semantics=("parallel", "parallel"),
            vmem_limit_bytes=VMEM_LIMIT),
    )(att3, cv3)
    return out.reshape(N, D, H, W, C)


# ----------------------------------------------------------------------------
# Conv lowering glue (channels-last im2col + Pallas matmul)
# ----------------------------------------------------------------------------
def _extract_patches_3d_cl(x, ksize, stride, padding):
    # x: (N, D, H, W, C) channels-last -> (N*Do*Ho*Wo, kvol*C), kvol-major / C-minor.
    N, D, H, W, C = x.shape
    kd, kh, kw = ksize
    sd, sh, sw = stride
    pd, ph, pw = padding
    xp = jnp.pad(x, ((0, 0), (pd, pd), (ph, ph), (pw, pw), (0, 0)))
    Do = (D + 2 * pd - kd) // sd + 1
    Ho = (H + 2 * ph - kh) // sh + 1
    Wo = (W + 2 * pw - kw) // sw + 1
    cols = []
    for dz in range(kd):
        for dy in range(kh):
            for dx in range(kw):
                cols.append(xp[:, dz:dz + Do * sd:sd,
                               dy:dy + Ho * sh:sh,
                               dx:dx + Wo * sw:sw, :])
    patches = jnp.stack(cols, axis=4)                 # (N, Do, Ho, Wo, kvol, C)
    patches = patches.reshape(N * Do * Ho * Wo, kd * kh * kw * C)
    return patches, (Do, Ho, Wo)


def conv3d_fused(x, w, scale, shift, act, stride, padding):
    # x: (N, D, H, W, Cin) channels-last; w: (Cout, Cin, kd, kh, kw) [PyTorch layout]
    N = x.shape[0]
    Cout = w.shape[0]
    patches, (Do, Ho, Wo) = _extract_patches_3d_cl(x, w.shape[2:], stride, padding)
    wm = jnp.transpose(w, (2, 3, 4, 1, 0)).reshape(-1, Cout)   # (kvol*Cin, Cout)
    y = fused_matmul(patches, wm, scale, shift, act)
    return y.reshape(N, Do, Ho, Wo, Cout)


def conv_transpose3d_fused(x, w, scale, shift, act):
    """Phase-split ConvTranspose3d, hard-wired for kernel (1,4,4), stride (1,2,2),
    padding (0,1,1) as used by hourglass_att.  One matmul produces all 4 phases."""
    N, D, H, W, Cin = x.shape
    Cout = w.shape[1]   # w: (Cin, Cout, 1, 4, 4) [PyTorch ConvTranspose3d layout]

    # (1,3,3) patches over the 1-padded input cover every tap needed by all phases.
    patches, _ = _extract_patches_3d_cl(x, (1, 3, 3), (1, 1, 1), (0, 1, 1))

    # Combined weight (9*Cin, 4*Cout): patch position q contributes kernel tap
    # k = phase + 3 - 2*q (when 0 <= k < 4).
    wcomb = jnp.zeros((3, 3, Cin, 2, 2, Cout), w.dtype)
    for qh in range(3):
        for qw in range(3):
            for ph in range(2):
                for pw in range(2):
                    kh = ph + 3 - 2 * qh
                    kw = pw + 3 - 2 * qw
                    if 0 <= kh < 4 and 0 <= kw < 4:
                        wcomb = wcomb.at[qh, qw, :, ph, pw, :].set(w[:, :, 0, kh, kw])
    wcomb = wcomb.reshape(9 * Cin, 4 * Cout)

    y = fused_matmul(patches, wcomb, jnp.tile(scale, 4), jnp.tile(shift, 4), act)
    y = y.reshape(N, D, H, W, 2, 2, Cout)
    y = jnp.transpose(y, (0, 1, 2, 4, 3, 5, 6)).reshape(N, D, 2 * H, 2 * W, Cout)
    return y


def channel_att(cv, im, ap):
    # cv: (N, D, H, W, Ccv) channels-last; im: (N, Cim, Him, Wim) NCHW.
    # TODO(synk): bilinear resize of `im` when im/cv spatial sizes differ
    # (inputs are constructed so they already match, as in the common use case).
    N, D, H, W, Ccv = cv.shape
    Cim = im.shape[1]
    mid = ap["w1"].shape[0]

    x2 = jnp.transpose(im, (0, 2, 3, 1)).reshape(N * H * W, Cim).astype(jnp.bfloat16)
    M = x2.shape[0]
    tm = _pick_tm(M)

    att = pl.pallas_call(
        _att_mlp_kernel,
        out_shape=jax.ShapeDtypeStruct((M, Ccv), jnp.bfloat16),
        grid_spec=pltpu.PrefetchScalarGridSpec(
            num_scalar_prefetch=0,
            grid=(pl.cdiv(M, tm),),
            in_specs=[
                pl.BlockSpec((tm, Cim), lambda i: (i, 0)),
                pl.BlockSpec((Cim, mid), lambda i: (0, 0)),
                pl.BlockSpec((1, mid), lambda i: (0, 0)),
                pl.BlockSpec((1, mid), lambda i: (0, 0)),
                pl.BlockSpec((mid, Ccv), lambda i: (0, 0)),
                pl.BlockSpec((1, Ccv), lambda i: (0, 0)),
            ],
            out_specs=pl.BlockSpec((tm, Ccv), lambda i: (i, 0)),
        ),
        compiler_params=pltpu.CompilerParams(
            dimension_semantics=("parallel",),
            vmem_limit_bytes=VMEM_LIMIT),
    )(x2,
      ap["w1"].T.astype(jnp.bfloat16),
      ap["scale1"].reshape(1, mid).astype(jnp.float32),
      ap["shift1"].reshape(1, mid).astype(jnp.float32),
      ap["w2"].T.astype(jnp.bfloat16),
      ap["b2"].reshape(1, Ccv).astype(jnp.float32))

    att = att.reshape(N, H, W, Ccv)
    return sigmoid_gate(att, cv)


# ----------------------------------------------------------------------------
# Parameters + forward
# ----------------------------------------------------------------------------
def init_params(key, c0, im_chans):
    kit = iter(jax.random.split(key, 256))

    def nk():
        return next(kit)

    def bn(c):
        gamma = 1.0 + 0.1 * jax.random.normal(nk(), (c,), jnp.float32)
        beta = 0.1 * jax.random.normal(nk(), (c,), jnp.float32)
        mean = 0.1 * jax.random.normal(nk(), (c,), jnp.float32)
        var = 1.0 + 0.1 * jnp.abs(jax.random.normal(nk(), (c,), jnp.float32))
        scale = gamma / jnp.sqrt(var + BN_EPS)
        shift = beta - mean * scale
        return scale, shift

    def bconv3d(cin, cout, k):
        s, b = bn(cout)
        return {"w": 0.1 * jax.random.normal(nk(), (cout, cin) + k, jnp.float32),
                "scale": s, "shift": b}

    def bdeconv3d(cin, cout, k, use_bn=True):
        if use_bn:
            s, b = bn(cout)
        else:
            s, b = jnp.ones((cout,), jnp.float32), jnp.zeros((cout,), jnp.float32)
        return {"w": 0.1 * jax.random.normal(nk(), (cin, cout) + k, jnp.float32),
                "scale": s, "shift": b}

    def att(cv_chan, im_chan):
        mid = max(1, im_chan // 2)
        s1, b1 = bn(mid)
        return {"w1": 0.1 * jax.random.normal(nk(), (mid, im_chan), jnp.float32),
                "scale1": s1, "shift1": b1,
                "w2": 0.1 * jax.random.normal(nk(), (cv_chan, mid), jnp.float32),
                "b2": 0.1 * jax.random.normal(nk(), (cv_chan,), jnp.float32)}

    k3, k1, ku = (3, 3, 3), (1, 1, 1), (1, 4, 4)
    return {
        "c1a": bconv3d(c0, 2 * c0, k3), "c1b": bconv3d(2 * c0, 2 * c0, k3),
        "c2a": bconv3d(2 * c0, 4 * c0, k3), "c2b": bconv3d(4 * c0, 4 * c0, k3),
        "c3a": bconv3d(4 * c0, 6 * c0, k3), "c3b": bconv3d(6 * c0, 6 * c0, k3),
        "c3u": bdeconv3d(6 * c0, 4 * c0, ku),
        "c2u": bdeconv3d(4 * c0, 2 * c0, ku),
        "c1u": bdeconv3d(2 * c0, 1, ku, use_bn=False),
        "a0a": bconv3d(8 * c0, 4 * c0, k1),
        "a0b": bconv3d(4 * c0, 4 * c0, k3),
        "a0c": bconv3d(4 * c0, 4 * c0, k3),
        "a1a": bconv3d(4 * c0, 2 * c0, k1),
        "a1b": bconv3d(2 * c0, 2 * c0, k3),
        "a1c": bconv3d(2 * c0, 2 * c0, k3),
        "att8": att(2 * c0, im_chans[1]),
        "att16": att(4 * c0, im_chans[2]),
        "att32": att(6 * c0, im_chans[3]),
        "att_up16": att(4 * c0, im_chans[2]),
        "att_up8": att(2 * c0, im_chans[1]),
    }


def hourglass_att_forward(p, x, imgs):
    # NCDHW -> channels-last bf16 at the module boundary only.
    y = jnp.transpose(x, (0, 2, 3, 4, 1)).astype(jnp.bfloat16)

    def bconv(name, v, stride=(1, 1, 1), pad=(1, 1, 1), act="leaky"):
        q = p[name]
        return conv3d_fused(v, q["w"], q["scale"], q["shift"], act, stride, pad)

    def bdeconv(name, v, act="leaky"):
        q = p[name]
        return conv_transpose3d_fused(v, q["w"], q["scale"], q["shift"], act)

    c = bconv("c1a", y, stride=(1, 2, 2))
    conv1 = bconv("c1b", c)
    conv1 = channel_att(conv1, imgs[1], p["att8"])

    c = bconv("c2a", conv1, stride=(1, 2, 2))
    conv2 = bconv("c2b", c)
    conv2 = channel_att(conv2, imgs[2], p["att16"])

    c = bconv("c3a", conv2, stride=(1, 2, 2))
    conv3 = bconv("c3b", c)
    conv3 = channel_att(conv3, imgs[3], p["att32"])

    conv3_up = bdeconv("c3u", conv3)
    # TODO(synk): trilinear resize when deconv output spatial != skip spatial
    # (shapes used here always match, like the typical even-sized inputs).
    conv2 = jnp.concatenate([conv3_up, conv2], axis=-1)
    conv2 = bconv("a0a", conv2, pad=(0, 0, 0))
    conv2 = bconv("a0b", conv2)
    conv2 = bconv("a0c", conv2)
    conv2 = channel_att(conv2, imgs[2], p["att_up16"])

    conv2_up = bdeconv("c2u", conv2)
    conv1 = jnp.concatenate([conv2_up, conv1], axis=-1)
    conv1 = bconv("a1a", conv1, pad=(0, 0, 0))
    conv1 = bconv("a1b", conv1)
    conv1 = bconv("a1c", conv1)
    conv1 = channel_att(conv1, imgs[1], p["att_up8"])

    out = bdeconv("c1u", conv1, act=None)   # bn=False, relu=False
    # back to NCDHW f32 at the boundary.
    return jnp.transpose(out, (0, 4, 1, 2, 3)).astype(jnp.float32)


if __name__ == "__main__":
    key = jax.random.PRNGKey(0)
    c0 = 4                      # in_channels of the hourglass
    N, D, H, W = 2, 8, 16, 16   # cost volume: (N, c0, D, H, W)
    im_chans = [3, 6, 8, 10]    # imgs[0] is unused by the module
    k_x, k_i0, k_i1, k_i2, k_i3, k_p = jax.random.split(key, 6)

    x = jax.random.normal(k_x, (N, c0, D, H, W), jnp.float32)
    imgs = [
        jax.random.normal(k_i0, (N, im_chans[0], H, W), jnp.float32),
        jax.random.normal(k_i1, (N, im_chans[1], H // 2, W // 2), jnp.float32),
        jax.random.normal(k_i2, (N, im_chans[2], H // 4, W // 4), jnp.float32),
        jax.random.normal(k_i3, (N, im_chans[3], H // 8, W // 8), jnp.float32),
    ]
    params = init_params(k_p, c0, im_chans)

    fwd = jax.jit(hourglass_att_forward)
    out = fwd(params, x, imgs)
    jax.block_until_ready(out)
    assert out.shape == (N, 1, D, H, W), out.shape
    assert bool(jnp.all(jnp.isfinite(out)))
    print("KERNEL_OK")
</pallas_src>

<mosaic_0001>
module attributes {stable_mosaic.version = 11 : i64} {
  func.func @_att_mlp_kernel(%arg0: i32, %arg1: memref<64x6xbf16, #tpu.memory_space<vmem>>, %arg2: memref<6x3xbf16, #tpu.memory_space<vmem>>, %arg3: memref<1x3xf32, #tpu.memory_space<vmem>>, %arg4: memref<1x3xf32, #tpu.memory_space<vmem>>, %arg5: memref<3x8xbf16, #tpu.memory_space<vmem>>, %arg6: memref<1x8xf32, #tpu.memory_space<vmem>>, %arg7: memref<64x8xbf16, #tpu.memory_space<vmem>>) attributes {dimension_semantics = [#tpu.dimension_semantics<parallel>], iteration_bounds = array<i64: 2>, scalar_prefetch = 0 : i64, scratch_operands = 0 : i64, tpu.core_type = #tpu.core_type<tc>, window_params = [{transform_indices = @transform_0, window_bounds = array<i64: 64, 6>}, {pipeline_mode = #tpu.pipeline_mode<synchronous>, transform_indices = @transform_1, window_bounds = array<i64: 6, 3>}, {pipeline_mode = #tpu.pipeline_mode<synchronous>, transform_indices = @transform_2, window_bounds = array<i64: 1, 3>}, {pipeline_mode = #tpu.pipeline_mode<synchronous>, transform_indices = @transform_3, window_bounds = array<i64: 1, 3>}, {pipeline_mode = #tpu.pipeline_mode<synchronous>, transform_indices = @transform_4, window_bounds = array<i64: 3, 8>}, {pipeline_mode = #tpu.pipeline_mode<synchronous>, transform_indices = @transform_5, window_bounds = array<i64: 1, 8>}, {transform_indices = @transform_6, window_bounds = array<i64: 64, 8>}]} {
    %c0 = arith.constant 0 : index
    %c0_0 = arith.constant 0 : index
    %0 = vector.load %arg1[%c0, %c0_0] : memref<64x6xbf16, #tpu.memory_space<vmem>>, vector<64x6xbf16>
    %c0_1 = arith.constant 0 : index
    %c0_2 = arith.constant 0 : index
    %1 = vector.load %arg2[%c0_1, %c0_2] : memref<6x3xbf16, #tpu.memory_space<vmem>>, vector<6x3xbf16>
    %cst = arith.constant dense<0.000000e+00> : vector<64x3xf32>
    %2 = tpu.matmul %0, %1, %cst {dimension_numbers = #tpu.dot_dimension_numbers<[1], [0], [0], [1], [0, 0, 1, 1], [], []>} : vector<64x6xbf16>, vector<6x3xbf16>, vector<64x3xf32> -> vector<64x3xf32>
    %c0_3 = arith.constant 0 : index
    %c0_4 = arith.constant 0 : index
    %3 = vector.load %arg3[%c0_3, %c0_4] : memref<1x3xf32, #tpu.memory_space<vmem>>, vector<1x3xf32>
    %4 = vector.broadcast %3 : vector<1x3xf32> to vector<64x3xf32>
    %5 = arith.mulf %2, %4 : vector<64x3xf32>
    %c0_5 = arith.constant 0 : index
    %c0_6 = arith.constant 0 : index
    %6 = vector.load %arg4[%c0_5, %c0_6] : memref<1x3xf32, #tpu.memory_space<vmem>>, vector<1x3xf32>
    %7 = vector.broadcast %6 : vector<1x3xf32> to vector<64x3xf32>
    %8 = arith.addf %5, %7 : vector<64x3xf32>
    %cst_7 = arith.constant 0.000000e+00 : f32
    %9 = vector.broadcast %cst_7 : f32 to vector<64x3xf32>
    %10 = arith.cmpf ogt, %8, %9 : vector<64x3xf32>
    %cst_8 = arith.constant 0.00999999977 : f32
    %11 = vector.broadcast %cst_8 : f32 to vector<64x3xf32>
    %12 = arith.mulf %11, %8 : vector<64x3xf32>
    %13 = arith.select %10, %8, %12 : vector<64x3xi1>, vector<64x3xf32>
    %14 = arith.truncf %13 : vector<64x3xf32> to vector<64x3xbf16>
    %c0_9 = arith.constant 0 : index
    %c0_10 = arith.constant 0 : index
    %15 = vector.load %arg5[%c0_9, %c0_10] : memref<3x8xbf16, #tpu.memory_space<vmem>>, vector<3x8xbf16>
    %cst_11 = arith.constant dense<0.000000e+00> : vector<64x8xf32>
    %16 = tpu.matmul %14, %15, %cst_11 {dimension_numbers = #tpu.dot_dimension_numbers<[1], [0], [0], [1], [0, 0, 1, 1], [], []>} : vector<64x3xbf16>, vector<3x8xbf16>, vector<64x8xf32> -> vector<64x8xf32>
    %c0_12 = arith.constant 0 : index
    %c0_13 = arith.constant 0 : index
    %17 = vector.load %arg6[%c0_12, %c0_13] : memref<1x8xf32, #tpu.memory_space<vmem>>, vector<1x8xf32>
    %18 = vector.broadcast %17 : vector<1x8xf32> to vector<64x8xf32>
    %19 = arith.addf %16, %18 : vector<64x8xf32>
    %20 = arith.truncf %19 : vector<64x8xf32> to vector<64x8xbf16>
    %c0_14 = arith.constant 0 : index
    %c0_15 = arith.constant 0 : index
    %21 = vector.load %arg7[%c0_14, %c0_15] : memref<64x8xbf16, #tpu.memory_space<vmem>>, vector<64x8xbf16>
    tpu.vector_store %arg7[%c0_14, %c0_15], %20 {strides = array<i32>} : memref<64x8xbf16, #tpu.memory_space<vmem>>, vector<64x8xbf16>,
    return
  }
  func.func @transform_0(%arg0: i32) -> (i32, i32) {
    %c0_i32 = arith.constant 0 : i32
    %c0_i32_0 = arith.constant 0 : i32
    return %arg0, %c0_i32 : i32, i32
  }
  func.func @transform_1(%arg0: i32) -> (i32, i32) {
    %c0_i32 = arith.constant 0 : i32
    %c0_i32_0 = arith.constant 0 : i32
    %c0_i32_1 = arith.constant 0 : i32
    return %c0_i32, %c0_i32_0 : i32, i32
  }
  func.func @transform_2(%arg0: i32) -> (i32, i32) {
    %c0_i32 = arith.constant 0 : i32
    %c0_i32_0 = arith.constant 0 : i32
    %c0_i32_1 = arith.constant 0 : i32
    return %c0_i32, %c0_i32_0 : i32, i32
  }
  func.func @transform_3(%arg0: i32) -> (i32, i32) {
    %c0_i32 = arith.constant 0 : i32
    %c0_i32_0 = arith.constant 0 : i32
    %c0_i32_1 = arith.constant 0 : i32
    return %c0_i32, %c0_i32_0 : i32, i32
  }
  func.func @transform_4(%arg0: i32) -> (i32, i32) {
    %c0_i32 = arith.constant 0 : i32
    %c0_i32_0 = arith.constant 0 : i32
    %c0_i32_1 = arith.constant 0 : i32
    return %c0_i32, %c0_i32_0 : i32, i32
  }
  func.func @transform_5(%arg0: i32) -> (i32, i32) {
    %c0_i32 = arith.constant 0 : i32
    %c0_i32_0 = arith.constant 0 : i32
    %c0_i32_1 = arith.constant 0 : i32
    return %c0_i32, %c0_i32_0 : i32, i32
  }
  func.func @transform_6(%arg0: i32) -> (i32, i32) {
    %c0_i32 = arith.constant 0 : i32
    %c0_i32_0 = arith.constant 0 : i32
    return %arg0, %c0_i32 : i32, i32
  }
}

module attributes {stable_mosaic.version = 11 : i64} {
  func.func @_mm_kernel(%arg0: i32, %arg1: memref<512x108xbf16, #tpu.memory_space<vmem>>, %arg2: memref<108x8xbf16, #tpu.memory_space<vmem>>, %arg3: memref<1x8xf32, #tpu.memory_space<vmem>>, %arg4: memref<1x8xf32, #tpu.memory_space<vmem>>, %arg5: memref<512x8xbf16, #tpu.memory_space<vmem>>) attributes {dimension_semantics = [#tpu.dimension_semantics<parallel>], iteration_bounds = array<i64: 2>, scalar_prefetch = 0 : i64, scratch_operands = 0 : i64, tpu.core_type = #tpu.core_type<tc>, window_params = [{transform_indices = @transform_0, window_bounds = array<i64: 512, 108>}, {pipeline_mode = #tpu.pipeline_mode<synchronous>, transform_indices = @transform_1, window_bounds = array<i64: 108, 8>}, {pipeline_mode = #tpu.pipeline_mode<synchronous>, transform_indices = @transform_2, window_bounds = array<i64: 1, 8>}, {pipeline_mode = #tpu.pipeline_mode<synchronous>, transform_indices = @transform_3, window_bounds = array<i64: 1, 8>}, {transform_indices = @transform_4, window_bounds = array<i64: 512, 8>}]} {
    %c0 = arith.constant 0 : index
    %c0_0 = arith.constant 0 : index
    %0 = vector.load %arg1[%c0, %c0_0] : memref<512x108xbf16, #tpu.memory_space<vmem>>, vector<512x108xbf16>
    %c0_1 = arith.constant 0 : index
    %c0_2 = arith.constant 0 : index
    %1 = vector.load %arg2[%c0_1, %c0_2] : memref<108x8xbf16, #tpu.memory_space<vmem>>, vector<108x8xbf16>
    %cst = arith.constant dense<0.000000e+00> : vector<512x8xf32>
    %2 = tpu.matmul %0, %1, %cst {dimension_numbers = #tpu.dot_dimension_numbers<[1], [0], [0], [1], [0, 0, 1, 1], [], []>} : vector<512x108xbf16>, vector<108x8xbf16>, vector<512x8xf32> -> vector<512x8xf32>
    %c0_3 = arith.constant 0 : index
    %c0_4 = arith.constant 0 : index
    %3 = vector.load %arg3[%c0_3, %c0_4] : memref<1x8xf32, #tpu.memory_space<vmem>>, vector<1x8xf32>
    %4 = vector.broadcast %3 : vector<1x8xf32> to vector<512x8xf32>
    %5 = arith.mulf %2, %4 : vector<512x8xf32>
    %c0_5 = arith.constant 0 : index
    %c0_6 = arith.constant 0 : index
    %6 = vector.load %arg4[%c0_5, %c0_6] : memref<1x8xf32, #tpu.memory_space<vmem>>, vector<1x8xf32>
    %7 = vector.broadcast %6 : vector<1x8xf32> to vector<512x8xf32>
    %8 = arith.addf %5, %7 : vector<512x8xf32>
    %cst_7 = arith.constant 0.000000e+00 : f32
    %9 = vector.broadcast %cst_7 : f32 to vector<512x8xf32>
    %10 = arith.cmpf ogt, %8, %9 : vector<512x8xf32>
    %cst_8 = arith.constant 0.00999999977 : f32
    %11 = vector.broadcast %cst_8 : f32 to vector<512x8xf32>
    %12 = arith.mulf %11, %8 : vector<512x8xf32>
    %13 = arith.select %10, %8, %12 : vector<512x8xi1>, vector<512x8xf32>
    %14 = arith.truncf %13 : vector<512x8xf32> to vector<512x8xbf16>
    %c0_9 = arith.constant 0 : index
    %c0_10 = arith.constant 0 : index
    %15 = vector.load %arg5[%c0_9, %c0_10] : memref<512x8xbf16, #tpu.memory_space<vmem>>, vector<512x8xbf16>
    tpu.vector_store %arg5[%c0_9, %c0_10], %14 {strides = array<i32>} : memref<512x8xbf16, #tpu.memory_space<vmem>>, vector<512x8xbf16>,
    return
  }
  func.func @transform_0(%arg0: i32) -> (i32, i32) {
    %c0_i32 = arith.constant 0 : i32
    %c0_i32_0 = arith.constant 0 : i32
    return %arg0, %c0_i32 : i32, i32
  }
  func.func @transform_1(%arg0: i32) -> (i32, i32) {
    %c0_i32 = arith.constant 0 : i32
    %c0_i32_0 = arith.constant 0 : i32
    %c0_i32_1 = arith.constant 0 : i32
    return %c0_i32, %c0_i32_0 : i32, i32
  }
  func.func @transform_2(%arg0: i32) -> (i32, i32) {
    %c0_i32 = arith.constant 0 : i32
    %c0_i32_0 = arith.constant 0 : i32
    %c0_i32_1 = arith.constant 0 : i32
    return %c0_i32, %c0_i32_0 : i32, i32
  }
  func.func @transform_3(%arg0: i32) -> (i32, i32) {
    %c0_i32 = arith.constant 0 : i32
    %c0_i32_0 = arith.constant 0 : i32
    %c0_i32_1 = arith.constant 0 : i32
    return %c0_i32, %c0_i32_0 : i32, i32
  }
  func.func @transform_4(%arg0: i32) -> (i32, i32) {
    %c0_i32 = arith.constant 0 : i32
    %c0_i32_0 = arith.constant 0 : i32
    return %arg0, %c0_i32 : i32, i32
  }
}

module attributes {stable_mosaic.version = 11 : i64} {
  func.func @_mm_kernel(%arg0: i32, %arg1: memref<512x216xbf16, #tpu.memory_space<vmem>>, %arg2: memref<216x8xbf16, #tpu.memory_space<vmem>>, %arg3: memref<1x8xf32, #tpu.memory_space<vmem>>, %arg4: memref<1x8xf32, #tpu.memory_space<vmem>>, %arg5: memref<512x8xbf16, #tpu.memory_space<vmem>>) attributes {dimension_semantics = [#tpu.dimension_semantics<parallel>], iteration_bounds = array<i64: 2>, scalar_prefetch = 0 : i64, scratch_operands = 0 : i64, tpu.core_type = #tpu.core_type<tc>, window_params = [{transform_indices = @transform_0, window_bounds = array<i64: 512, 216>}, {pipeline_mode = #tpu.pipeline_mode<synchronous>, transform_indices = @transform_1, window_bounds = array<i64: 216, 8>}, {pipeline_mode = #tpu.pipeline_mode<synchronous>, transform_indices = @transform_2, window_bounds = array<i64: 1, 8>}, {pipeline_mode = #tpu.pipeline_mode<synchronous>, transform_indices = @transform_3, window_bounds = array<i64: 1, 8>}, {transform_indices = @transform_4, window_bounds = array<i64: 512, 8>}]} {
    %c0 = arith.constant 0 : index
    %c0_0 = arith.constant 0 : index
    %0 = vector.load %arg1[%c0, %c0_0] : memref<512x216xbf16, #tpu.memory_space<vmem>>, vector<512x216xbf16>
    %c0_1 = arith.constant 0 : index
    %c0_2 = arith.constant 0 : index
    %1 = vector.load %arg2[%c0_1, %c0_2] : memref<216x8xbf16, #tpu.memory_space<vmem>>, vector<216x8xbf16>
    %cst = arith.constant dense<0.000000e+00> : vector<512x8xf32>
    %2 = tpu.matmul %0, %1, %cst {dimension_numbers = #tpu.dot_dimension_numbers<[1], [0], [0], [1], [0, 0, 1, 1], [], []>} : vector<512x216xbf16>, vector<216x8xbf16>, vector<512x8xf32> -> vector<512x8xf32>
    %c0_3 = arith.constant 0 : index
    %c0_4 = arith.constant 0 : index
    %3 = vector.load %arg3[%c0_3, %c0_4] : memref<1x8xf32, #tpu.memory_space<vmem>>, vector<1x8xf32>
    %4 = vector.broadcast %3 : vector<1x8xf32> to vector<512x8xf32>
    %5 = arith.mulf %2, %4 : vector<512x8xf32>
    %c0_5 = arith.constant 0 : index
    %c0_6 = arith.constant 0 : index
    %6 = vector.load %arg4[%c0_5, %c0_6] : memref<1x8xf32, #tpu.memory_space<vmem>>, vector<1x8xf32>
    %7 = vector.broadcast %6 : vector<1x8xf32> to vector<512x8xf32>
    %8 = arith.addf %5, %7 : vector<512x8xf32>
    %cst_7 = arith.constant 0.000000e+00 : f32
    %9 = vector.broadcast %cst_7 : f32 to vector<512x8xf32>
    %10 = arith.cmpf ogt, %8, %9 : vector<512x8xf32>
    %cst_8 = arith.constant 0.00999999977 : f32
    %11 = vector.broadcast %cst_8 : f32 to vector<512x8xf32>
    %12 = arith.mulf %11, %8 : vector<512x8xf32>
    %13 = arith.select %10, %8, %12 : vector<512x8xi1>, vector<512x8xf32>
    %14 = arith.truncf %13 : vector<512x8xf32> to vector<512x8xbf16>
    %c0_9 = arith.constant 0 : index
    %c0_10 = arith.constant 0 : index
    %15 = vector.load %arg5[%c0_9, %c0_10] : memref<512x8xbf16, #tpu.memory_space<vmem>>, vector<512x8xbf16>
    tpu.vector_store %arg5[%c0_9, %c0_10], %14 {strides = array<i32>} : memref<512x8xbf16, #tpu.memory_space<vmem>>, vector<512x8xbf16>,
    return
  }
  func.func @transform_0(%arg0: i32) -> (i32, i32) {
    %c0_i32 = arith.constant 0 : i32
    %c0_i32_0 = arith.constant 0 : i32
    return %arg0, %c0_i32 : i32, i32
  }
  func.func @transform_1(%arg0: i32) -> (i32, i32) {
    %c0_i32 = arith.constant 0 : i32
    %c0_i32_0 = arith.constant 0 : i32
    %c0_i32_1 = arith.constant 0 : i32
    return %c0_i32, %c0_i32_0 : i32, i32
  }
  func.func @transform_2(%arg0: i32) -> (i32, i32) {
    %c0_i32 = arith.constant 0 : i32
    %c0_i32_0 = arith.constant 0 : i32
    %c0_i32_1 = arith.constant 0 : i32
    return %c0_i32, %c0_i32_0 : i32, i32
  }
  func.func @transform_3(%arg0: i32) -> (i32, i32) {
    %c0_i32 = arith.constant 0 : i32
    %c0_i32_0 = arith.constant 0 : i32
    %c0_i32_1 = arith.constant 0 : i32
    return %c0_i32, %c0_i32_0 : i32, i32
  }
  func.func @transform_4(%arg0: i32) -> (i32, i32) {
    %c0_i32 = arith.constant 0 : i32
    %c0_i32_0 = arith.constant 0 : i32
    return %arg0, %c0_i32 : i32, i32
  }
}

module attributes {stable_mosaic.version = 11 : i64} {
  func.func @_gate_kernel(%arg0: i32, %arg1: i32, %arg2: memref<1x1x512xbf16, #tpu.memory_space<vmem>>, %arg3: memref<1x8x512xbf16, #tpu.memory_space<vmem>>, %arg4: memref<1x8x512xbf16, #tpu.memory_space<vmem>>) attributes {dimension_semantics = [#tpu.dimension_semantics<parallel>, #tpu.dimension_semantics<parallel>], iteration_bounds = array<i64: 2, 1>, scalar_prefetch = 0 : i64, scratch_operands = 0 : i64, tpu.core_type = #tpu.core_type<tc>, window_params = [{transform_indices = @transform_0, window_bounds = array<i64: 1, 1, 512>}, {transform_indices = @transform_1, window_bounds = array<i64: 1, 8, 512>}, {transform_indices = @transform_2, window_bounds = array<i64: 1, 8, 512>}]} {
    %c0 = arith.constant 0 : index
    %c0_0 = arith.constant 0 : index
    %c0_1 = arith.constant 0 : index
    %0 = vector.load %arg2[%c0, %c0_0, %c0_1] : memref<1x1x512xbf16, #tpu.memory_space<vmem>>, vector<1x1x512xbf16>
    %1 = arith.extf %0 : vector<1x1x512xbf16> to vector<1x1x512xf32>
    %cst = arith.constant 5.000000e-01 : f32
    %2 = vector.broadcast %cst : f32 to vector<1x1x512xf32>
    %3 = arith.mulf %2, %1 : vector<1x1x512xf32>
    %4 = math.tanh %3 : vector<1x1x512xf32>
    %cst_2 = arith.constant 1.000000e+00 : f32
    %5 = vector.broadcast %cst_2 : f32 to vector<1x1x512xf32>
    %6 = arith.addf %4, %5 : vector<1x1x512xf32>
    %cst_3 = arith.constant 5.000000e-01 : f32
    %7 = vector.broadcast %cst_3 : f32 to vector<1x1x512xf32>
    %8 = arith.mulf %7, %6 : vector<1x1x512xf32>
    %c0_4 = arith.constant 0 : index
    %c0_5 = arith.constant 0 : index
    %c0_6 = arith.constant 0 : index
    %9 = vector.load %arg3[%c0_4, %c0_5, %c0_6] : memref<1x8x512xbf16, #tpu.memory_space<vmem>>, vector<1x8x512xbf16>
    %10 = arith.extf %9 : vector<1x8x512xbf16> to vector<1x8x512xf32>
    %11 = vector.broadcast %8 : vector<1x1x512xf32> to vector<1x8x512xf32>
    %12 = arith.mulf %10, %11 : vector<1x8x512xf32>
    %13 = arith.truncf %12 : vector<1x8x512xf32> to vector<1x8x512xbf16>
    %c0_7 = arith.constant 0 : index
    %c0_8 = arith.constant 0 : index
    %c0_9 = arith.constant 0 : index
    %14 = vector.load %arg4[%c0_7, %c0_8, %c0_9] : memref<1x8x512xbf16, #tpu.memory_space<vmem>>, vector<1x8x512xbf16>
    tpu.vector_store %arg4[%c0_7, %c0_8, %c0_9], %13 {strides = array<i32>} : memref<1x8x512xbf16, #tpu.memory_space<vmem>>, vector<1x8x512xbf16>,
    return
  }
  func.func @transform_0(%arg0: i32, %arg1: i32) -> (i32, i32, i32) {
    %c0_i32 = arith.constant 0 : i32
    %c0_i32_0 = arith.constant 0 : i32
    %c0_i32_1 = arith.constant 0 : i32
    return %arg0, %c0_i32, %c0_i32_0 : i32, i32, i32
  }
  func.func @transform_1(%arg0: i32, %arg1: i32) -> (i32, i32, i32) {
    %c0_i32 = arith.constant 0 : i32
    %c0_i32_0 = arith.constant 0 : i32
    return %arg0, %arg1, %c0_i32 : i32, i32, i32
  }
  func.func @transform_2(%arg0: i32, %arg1: i32) -> (i32, i32, i32) {
    %c0_i32 = arith.constant 0 : i32
    %c0_i32_0 = arith.constant 0 : i32
    return %arg0, %arg1, %c0_i32 : i32, i32, i32
  }
}

module attributes {stable_mosaic.version = 11 : i64} {
  func.func @_att_mlp_kernel(%arg0: i32, %arg1: memref<16x8xbf16, #tpu.memory_space<vmem>>, %arg2: memref<8x4xbf16, #tpu.memory_space<vmem>>, %arg3: memref<1x4xf32, #tpu.memory_space<vmem>>, %arg4: memref<1x4xf32, #tpu.memory_space<vmem>>, %arg5: memref<4x16xbf16, #tpu.memory_space<vmem>>, %arg6: memref<1x16xf32, #tpu.memory_space<vmem>>, %arg7: memref<16x16xbf16, #tpu.memory_space<vmem>>) attributes {dimension_semantics = [#tpu.dimension_semantics<parallel>], iteration_bounds = array<i64: 2>, scalar_prefetch = 0 : i64, scratch_operands = 0 : i64, tpu.core_type = #tpu.core_type<tc>, window_params = [{transform_indices = @transform_0, window_bounds = array<i64: 16, 8>}, {pipeline_mode = #tpu.pipeline_mode<synchronous>, transform_indices = @transform_1, window_bounds = array<i64: 8, 4>}, {pipeline_mode = #tpu.pipeline_mode<synchronous>, transform_indices = @transform_2, window_bounds = array<i64: 1, 4>}, {pipeline_mode = #tpu.pipeline_mode<synchronous>, transform_indices = @transform_3, window_bounds = array<i64: 1, 4>}, {pipeline_mode = #tpu.pipeline_mode<synchronous>, transform_indices = @transform_4, window_bounds = array<i64: 4, 16>}, {pipeline_mode = #tpu.pipeline_mode<synchronous>, transform_indices = @transform_5, window_bounds = array<i64: 1, 16>}, {transform_indices = @transform_6, window_bounds = array<i64: 16, 16>}]} {
    %c0 = arith.constant 0 : index
    %c0_0 = arith.constant 0 : index
    %0 = vector.load %arg1[%c0, %c0_0] : memref<16x8xbf16, #tpu.memory_space<vmem>>, vector<16x8xbf16>
    %c0_1 = arith.constant 0 : index
    %c0_2 = arith.constant 0 : index
    %1 = vector.load %arg2[%c0_1, %c0_2] : memref<8x4xbf16, #tpu.memory_space<vmem>>, vector<8x4xbf16>
    %cst = arith.constant dense<0.000000e+00> : vector<16x4xf32>
    %2 = tpu.matmul %0, %1, %cst {dimension_numbers = #tpu.dot_dimension_numbers<[1], [0], [0], [1], [0, 0, 1, 1], [], []>} : vector<16x8xbf16>, vector<8x4xbf16>, vector<16x4xf32> -> vector<16x4xf32>
    %c0_3 = arith.constant 0 : index
    %c0_4 = arith.constant 0 : index
    %3 = vector.load %arg3[%c0_3, %c0_4] : memref<1x4xf32, #tpu.memory_space<vmem>>, vector<1x4xf32>
    %4 = vector.broadcast %3 : vector<1x4xf32> to vector<16x4xf32>
    %5 = arith.mulf %2, %4 : vector<16x4xf32>
    %c0_5 = arith.constant 0 : index
    %c0_6 = arith.constant 0 : index
    %6 = vector.load %arg4[%c0_5, %c0_6] : memref<1x4xf32, #tpu.memory_space<vmem>>, vector<1x4xf32>
    %7 = vector.broadcast %6 : vector<1x4xf32> to vector<16x4xf32>
    %8 = arith.addf %5, %7 : vector<16x4xf32>
    %cst_7 = arith.constant 0.000000e+00 : f32
    %9 = vector.broadcast %cst_7 : f32 to vector<16x4xf32>
    %10 = arith.cmpf ogt, %8, %9 : vector<16x4xf32>
    %cst_8 = arith.constant 0.00999999977 : f32
    %11 = vector.broadcast %cst_8 : f32 to vector<16x4xf32>
    %12 = arith.mulf %11, %8 : vector<16x4xf32>
    %13 = arith.select %10, %8, %12 : vector<16x4xi1>, vector<16x4xf32>
    %14 = arith.truncf %13 : vector<16x4xf32> to vector<16x4xbf16>
    %c0_9 = arith.constant 0 : index
    %c0_10 = arith.constant 0 : index
    %15 = vector.load %arg5[%c0_9, %c0_10] : memref<4x16xbf16, #tpu.memory_space<vmem>>, vector<4x16xbf16>
    %cst_11 = arith.constant dense<0.000000e+00> : vector<16x16xf32>
    %16 = tpu.matmul %14, %15, %cst_11 {dimension_numbers = #tpu.dot_dimension_numbers<[1], [0], [0], [1], [0, 0, 1, 1], [], []>} : vector<16x4xbf16>, vector<4x16xbf16>, vector<16x16xf32> -> vector<16x16xf32>
    %c0_12 = arith.constant 0 : index
    %c0_13 = arith.constant 0 : index
    %17 = vector.load %arg6[%c0_12, %c0_13] : memref<1x16xf32, #tpu.memory_space<vmem>>, vector<1x16xf32>
    %18 = vector.broadcast %17 : vector<1x16xf32> to vector<16x16xf32>
    %19 = arith.addf %16, %18 : vector<16x16xf32>
    %20 = arith.truncf %19 : vector<16x16xf32> to vector<16x16xbf16>
    %c0_14 = arith.constant 0 : index
    %c0_15 = arith.constant 0 : index
    %21 = vector.load %arg7[%c0_14, %c0_15] : memref<16x16xbf16, #tpu.memory_space<vmem>>, vector<16x16xbf16>
    tpu.vector_store %arg7[%c0_14, %c0_15], %20 {strides = array<i32>} : memref<16x16xbf16, #tpu.memory_space<vmem>>, vector<16x16xbf16>,
    return
  }
  func.func @transform_0(%arg0: i32) -> (i32, i32) {
    %c0_i32 = arith.constant 0 : i32
    %c0_i32_0 = arith.constant 0 : i32
    return %arg0, %c0_i32 : i32, i32
  }
  func.func @transform_1(%arg0: i32) -> (i32, i32) {
    %c0_i32 = arith.constant 0 : i32
    %c0_i32_0 = arith.constant 0 : i32
    %c0_i32_1 = arith.constant 0 : i32
    return %c0_i32, %c0_i32_0 : i32, i32
  }
  func.func @transform_2(%arg0: i32) -> (i32, i32) {
    %c0_i32 = arith.constant 0 : i32
    %c0_i32_0 = arith.constant 0 : i32
    %c0_i32_1 = arith.constant 0 : i32
    return %c0_i32, %c0_i32_0 : i32, i32
  }
  func.func @transform_3(%arg0: i32) -> (i32, i32) {
    %c0_i32 = arith.constant 0 : i32
    %c0_i32_0 = arith.constant 0 : i32
    %c0_i32_1 = arith.constant 0 : i32
    return %c0_i32, %c0_i32_0 : i32, i32
  }
  func.func @transform_4(%arg0: i32) -> (i32, i32) {
    %c0_i32 = arith.constant 0 : i32
    %c0_i32_0 = arith.constant 0 : i32
    %c0_i32_1 = arith.constant 0 : i32
    return %c0_i32, %c0_i32_0 : i32, i32
  }
  func.func @transform_5(%arg0: i32) -> (i32, i32) {
    %c0_i32 = arith.constant 0 : i32
    %c0_i32_0 = arith.constant 0 : i32
    %c0_i32_1 = arith.constant 0 : i32
    return %c0_i32, %c0_i32_0 : i32, i32
  }
  func.func @transform_6(%arg0: i32) -> (i32, i32) {
    %c0_i32 = arith.constant 0 : i32
    %c0_i32_0 = arith.constant 0 : i32
    return %arg0, %c0_i32 : i32, i32
  }
}

module attributes {stable_mosaic.version = 11 : i64} {
  func.func @_mm_kernel(%arg0: i32, %arg1: memref<128x216xbf16, #tpu.memory_space<vmem>>, %arg2: memref<216x16xbf16, #tpu.memory_space<vmem>>, %arg3: memref<1x16xf32, #tpu.memory_space<vmem>>, %arg4: memref<1x16xf32, #tpu.memory_space<vmem>>, %arg5: memref<128x16xbf16, #tpu.memory_space<vmem>>) attributes {dimension_semantics = [#tpu.dimension_semantics<parallel>], iteration_bounds = array<i64: 2>, scalar_prefetch = 0 : i64, scratch_operands = 0 : i64, tpu.core_type = #tpu.core_type<tc>, window_params = [{transform_indices = @transform_0, window_bounds = array<i64: 128, 216>}, {pipeline_mode = #tpu.pipeline_mode<synchronous>, transform_indices = @transform_1, window_bounds = array<i64: 216, 16>}, {pipeline_mode = #tpu.pipeline_mode<synchronous>, transform_indices = @transform_2, window_bounds = array<i64: 1, 16>}, {pipeline_mode = #tpu.pipeline_mode<synchronous>, transform_indices = @transform_3, window_bounds = array<i64: 1, 16>}, {transform_indices = @transform_4, window_bounds = array<i64: 128, 16>}]} {
    %c0 = arith.constant 0 : index
    %c0_0 = arith.constant 0 : index
    %0 = vector.load %arg1[%c0, %c0_0] : memref<128x216xbf16, #tpu.memory_space<vmem>>, vector<128x216xbf16>
    %c0_1 = arith.constant 0 : index
    %c0_2 = arith.constant 0 : index
    %1 = vector.load %arg2[%c0_1, %c0_2] : memref<216x16xbf16, #tpu.memory_space<vmem>>, vector<216x16xbf16>
    %cst = arith.constant dense<0.000000e+00> : vector<128x16xf32>
    %2 = tpu.matmul %0, %1, %cst {dimension_numbers = #tpu.dot_dimension_numbers<[1], [0], [0], [1], [0, 0, 1, 1], [], []>} : vector<128x216xbf16>, vector<216x16xbf16>, vector<128x16xf32> -> vector<128x16xf32>
    %c0_3 = arith.constant 0 : index
    %c0_4 = arith.constant 0 : index
    %3 = vector.load %arg3[%c0_3, %c0_4] : memref<1x16xf32, #tpu.memory_space<vmem>>, vector<1x16xf32>
    %4 = vector.broadcast %3 : vector<1x16xf32> to vector<128x16xf32>
    %5 = arith.mulf %2, %4 : vector<128x16xf32>
    %c0_5 = arith.constant 0 : index
    %c0_6 = arith.constant 0 : index
    %6 = vector.load %arg4[%c0_5, %c0_6] : memref<1x16xf32, #tpu.memory_space<vmem>>, vector<1x16xf32>
    %7 = vector.broadcast %6 : vector<1x16xf32> to vector<128x16xf32>
    %8 = arith.addf %5, %7 : vector<128x16xf32>
    %cst_7 = arith.constant 0.000000e+00 : f32
    %9 = vector.broadcast %cst_7 : f32 to vector<128x16xf32>
    %10 = arith.cmpf ogt, %8, %9 : vector<128x16xf32>
    %cst_8 = arith.constant 0.00999999977 : f32
    %11 = vector.broadcast %cst_8 : f32 to vector<128x16xf32>
    %12 = arith.mulf %11, %8 : vector<128x16xf32>
    %13 = arith.select %10, %8, %12 : vector<128x16xi1>, vector<128x16xf32>
    %14 = arith.truncf %13 : vector<128x16xf32> to vector<128x16xbf16>
    %c0_9 = arith.constant 0 : index
    %c0_10 = arith.constant 0 : index
    %15 = vector.load %arg5[%c0_9, %c0_10] : memref<128x16xbf16, #tpu.memory_space<vmem>>, vector<128x16xbf16>
    tpu.vector_store %arg5[%c0_9, %c0_10], %14 {strides = array<i32>} : memref<128x16xbf16, #tpu.memory_space<vmem>>, vector<128x16xbf16>,
    return
  }
  func.func @transform_0(%arg0: i32) -> (i32, i32) {
    %c0_i32 = arith.constant 0 : i32
    %c0_i32_0 = arith.constant 0 : i32
    return %arg0, %c0_i32 : i32, i32
  }
  func.func @transform_1(%arg0: i32) -> (i32, i32) {
    %c0_i32 = arith.constant 0 : i32
    %c0_i32_0 = arith.constant 0 : i32
    %c0_i32_1 = arith.constant 0 : i32
    return %c0_i32, %c0_i32_0 : i32, i32
  }
  func.func @transform_2(%arg0: i32) -> (i32, i32) {
    %c0_i32 = arith.constant 0 : i32
    %c0_i32_0 = arith.constant 0 : i32
    %c0_i32_1 = arith.constant 0 : i32
    return %c0_i32, %c0_i32_0 : i32, i32
  }
  func.func @transform_3(%arg0: i32) -> (i32, i32) {
    %c0_i32 = arith.constant 0 : i32
    %c0_i32_0 = arith.constant 0 : i32
    %c0_i32_1 = arith.constant 0 : i32
    return %c0_i32, %c0_i32_0 : i32, i32
  }
  func.func @transform_4(%arg0: i32) -> (i32, i32) {
    %c0_i32 = arith.constant 0 : i32
    %c0_i32_0 = arith.constant 0 : i32
    return %arg0, %c0_i32 : i32, i32
  }
}

module attributes {stable_mosaic.version = 11 : i64} {
  func.func @_mm_kernel(%arg0: i32, %arg1: memref<128x432xbf16, #tpu.memory_space<vmem>>, %arg2: memref<432x16xbf16, #tpu.memory_space<vmem>>, %arg3: memref<1x16xf32, #tpu.memory_space<vmem>>, %arg4: memref<1x16xf32, #tpu.memory_space<vmem>>, %arg5: memref<128x16xbf16, #tpu.memory_space<vmem>>) attributes {dimension_semantics = [#tpu.dimension_semantics<parallel>], iteration_bounds = array<i64: 2>, scalar_prefetch = 0 : i64, scratch_operands = 0 : i64, tpu.core_type = #tpu.core_type<tc>, window_params = [{transform_indices = @transform_0, window_bounds = array<i64: 128, 432>}, {pipeline_mode = #tpu.pipeline_mode<synchronous>, transform_indices = @transform_1, window_bounds = array<i64: 432, 16>}, {pipeline_mode = #tpu.pipeline_mode<synchronous>, transform_indices = @transform_2, window_bounds = array<i64: 1, 16>}, {pipeline_mode = #tpu.pipeline_mode<synchronous>, transform_indices = @transform_3, window_bounds = array<i64: 1, 16>}, {transform_indices = @transform_4, window_bounds = array<i64: 128, 16>}]} {
    %c0 = arith.constant 0 : index
    %c0_0 = arith.constant 0 : index
    %0 = vector.load %arg1[%c0, %c0_0] : memref<128x432xbf16, #tpu.memory_space<vmem>>, vector<128x432xbf16>
    %c0_1 = arith.constant 0 : index
    %c0_2 = arith.constant 0 : index
    %1 = vector.load %arg2[%c0_1, %c0_2] : memref<432x16xbf16, #tpu.memory_space<vmem>>, vector<432x16xbf16>
    %cst = arith.constant dense<0.000000e+00> : vector<128x16xf32>
    %2 = tpu.matmul %0, %1, %cst {dimension_numbers = #tpu.dot_dimension_numbers<[1], [0], [0], [1], [0, 0, 1, 1], [], []>} : vector<128x432xbf16>, vector<432x16xbf16>, vector<128x16xf32> -> vector<128x16xf32>
    %c0_3 = arith.constant 0 : index
    %c0_4 = arith.constant 0 : index
    %3 = vector.load %arg3[%c0_3, %c0_4] : memref<1x16xf32, #tpu.memory_space<vmem>>, vector<1x16xf32>
    %4 = vector.broadcast %3 : vector<1x16xf32> to vector<128x16xf32>
    %5 = arith.mulf %2, %4 : vector<128x16xf32>
    %c0_5 = arith.constant 0 : index
    %c0_6 = arith.constant 0 : index
    %6 = vector.load %arg4[%c0_5, %c0_6] : memref<1x16xf32, #tpu.memory_space<vmem>>, vector<1x16xf32>
    %7 = vector.broadcast %6 : vector<1x16xf32> to vector<128x16xf32>
    %8 = arith.addf %5, %7 : vector<128x16xf32>
    %cst_7 = arith.constant 0.000000e+00 : f32
    %9 = vector.broadcast %cst_7 : f32 to vector<128x16xf32>
    %10 = arith.cmpf ogt, %8, %9 : vector<128x16xf32>
    %cst_8 = arith.constant 0.00999999977 : f32
    %11 = vector.broadcast %cst_8 : f32 to vector<128x16xf32>
    %12 = arith.mulf %11, %8 : vector<128x16xf32>
    %13 = arith.select %10, %8, %12 : vector<128x16xi1>, vector<128x16xf32>
    %14 = arith.truncf %13 : vector<128x16xf32> to vector<128x16xbf16>
    %c0_9 = arith.constant 0 : index
    %c0_10 = arith.constant 0 : index
    %15 = vector.load %arg5[%c0_9, %c0_10] : memref<128x16xbf16, #tpu.memory_space<vmem>>, vector<128x16xbf16>
    tpu.vector_store %arg5[%c0_9, %c0_10], %14 {strides = array<i32>} : memref<128x16xbf16, #tpu.memory_space<vmem>>, vector<128x16xbf16>,
    return
  }
  func.func @transform_0(%arg0: i32) -> (i32, i32) {
    %c0_i32 = arith.constant 0 : i32
    %c0_i32_0 = arith.constant 0 : i32
    return %arg0, %c0_i32 : i32, i32
  }
  func.func @transform_1(%arg0: i32) -> (i32, i32) {
    %c0_i32 = arith.constant 0 : i32
    %c0_i32_0 = arith.constant 0 : i32
    %c0_i32_1 = arith.constant 0 : i32
    return %c0_i32, %c0_i32_0 : i32, i32
  }
  func.func @transform_2(%arg0: i32) -> (i32, i32) {
    %c0_i32 = arith.constant 0 : i32
    %c0_i32_0 = arith.constant 0 : i32
    %c0_i32_1 = arith.constant 0 : i32
    return %c0_i32, %c0_i32_0 : i32, i32
  }
  func.func @transform_3(%arg0: i32) -> (i32, i32) {
    %c0_i32 = arith.constant 0 : i32
    %c0_i32_0 = arith.constant 0 : i32
    %c0_i32_1 = arith.constant 0 : i32
    return %c0_i32, %c0_i32_0 : i32, i32
  }
  func.func @transform_4(%arg0: i32) -> (i32, i32) {
    %c0_i32 = arith.constant 0 : i32
    %c0_i32_0 = arith.constant 0 : i32
    return %arg0, %c0_i32 : i32, i32
  }
}

module attributes {stable_mosaic.version = 11 : i64} {
  func.func @_gate_kernel(%arg0: i32, %arg1: i32, %arg2: memref<1x1x256xbf16, #tpu.memory_space<vmem>>, %arg3: memref<1x8x256xbf16, #tpu.memory_space<vmem>>, %arg4: memref<1x8x256xbf16, #tpu.memory_space<vmem>>) attributes {dimension_semantics = [#tpu.dimension_semantics<parallel>, #tpu.dimension_semantics<parallel>], iteration_bounds = array<i64: 2, 1>, scalar_prefetch = 0 : i64, scratch_operands = 0 : i64, tpu.core_type = #tpu.core_type<tc>, window_params = [{transform_indices = @transform_0, window_bounds = array<i64: 1, 1, 256>}, {transform_indices = @transform_1, window_bounds = array<i64: 1, 8, 256>}, {transform_indices = @transform_2, window_bounds = array<i64: 1, 8, 256>}]} {
    %c0 = arith.constant 0 : index
    %c0_0 = arith.constant 0 : index
    %c0_1 = arith.constant 0 : index
    %0 = vector.load %arg2[%c0, %c0_0, %c0_1] : memref<1x1x256xbf16, #tpu.memory_space<vmem>>, vector<1x1x256xbf16>
    %1 = arith.extf %0 : vector<1x1x256xbf16> to vector<1x1x256xf32>
    %cst = arith.constant 5.000000e-01 : f32
    %2 = vector.broadcast %cst : f32 to vector<1x1x256xf32>
    %3 = arith.mulf %2, %1 : vector<1x1x256xf32>
    %4 = math.tanh %3 : vector<1x1x256xf32>
    %cst_2 = arith.constant 1.000000e+00 : f32
    %5 = vector.broadcast %cst_2 : f32 to vector<1x1x256xf32>
    %6 = arith.addf %4, %5 : vector<1x1x256xf32>
    %cst_3 = arith.constant 5.000000e-01 : f32
    %7 = vector.broadcast %cst_3 : f32 to vector<1x1x256xf32>
    %8 = arith.mulf %7, %6 : vector<1x1x256xf32>
    %c0_4 = arith.constant 0 : index
    %c0_5 = arith.constant 0 : index
    %c0_6 = arith.constant 0 : index
    %9 = vector.load %arg3[%c0_4, %c0_5, %c0_6] : memref<1x8x256xbf16, #tpu.memory_space<vmem>>, vector<1x8x256xbf16>
    %10 = arith.extf %9 : vector<1x8x256xbf16> to vector<1x8x256xf32>
    %11 = vector.broadcast %8 : vector<1x1x256xf32> to vector<1x8x256xf32>
    %12 = arith.mulf %10, %11 : vector<1x8x256xf32>
    %13 = arith.truncf %12 : vector<1x8x256xf32> to vector<1x8x256xbf16>
    %c0_7 = arith.constant 0 : index
    %c0_8 = arith.constant 0 : index
    %c0_9 = arith.constant 0 : index
    %14 = vector.load %arg4[%c0_7, %c0_8, %c0_9] : memref<1x8x256xbf16, #tpu.memory_space<vmem>>, vector<1x8x256xbf16>
    tpu.vector_store %arg4[%c0_7, %c0_8, %c0_9], %13 {strides = array<i32>} : memref<1x8x256xbf16, #tpu.memory_space<vmem>>, vector<1x8x256xbf16>,
    return
  }
  func.func @transform_0(%arg0: i32, %arg1: i32) -> (i32, i32, i32) {
    %c0_i32 = arith.constant 0 : i32
    %c0_i32_0 = arith.constant 0 : i32
    %c0_i32_1 = arith.constant 0 : i32
    return %arg0, %c0_i32, %c0_i32_0 : i32, i32, i32
  }
  func.func @transform_1(%arg0: i32, %arg1: i32) -> (i32, i32, i32) {
    %c0_i32 = arith.constant 0 : i32
    %c0_i32_0 = arith.constant 0 : i32
    return %arg0, %arg1, %c0_i32 : i32, i32, i32
  }
  func.func @transform_2(%arg0: i32, %arg1: i32) -> (i32, i32, i32) {
    %c0_i32 = arith.constant 0 : i32
    %c0_i32_0 = arith.constant 0 : i32
    return %arg0, %arg1, %c0_i32 : i32, i32, i32
  }
}

module attributes {stable_mosaic.version = 11 : i64} {
  func.func @_att_mlp_kernel(%arg0: i32, %arg1: memref<8x10xbf16, #tpu.memory_space<vmem>>, %arg2: memref<10x5xbf16, #tpu.memory_space<vmem>>, %arg3: memref<1x5xf32, #tpu.memory_space<vmem>>, %arg4: memref<1x5xf32, #tpu.memory_space<vmem>>, %arg5: memref<5x24xbf16, #tpu.memory_space<vmem>>, %arg6: memref<1x24xf32, #tpu.memory_space<vmem>>, %arg7: memref<8x24xbf16, #tpu.memory_space<vmem>>) attributes {dimension_semantics = [#tpu.dimension_semantics<parallel>], iteration_bounds = array<i64: 1>, scalar_prefetch = 0 : i64, scratch_operands = 0 : i64, tpu.core_type = #tpu.core_type<tc>, window_params = [{transform_indices = @transform_0, window_bounds = array<i64: 8, 10>}, {pipeline_mode = #tpu.pipeline_mode<synchronous>, transform_indices = @transform_1, window_bounds = array<i64: 10, 5>}, {pipeline_mode = #tpu.pipeline_mode<synchronous>, transform_indices = @transform_2, window_bounds = array<i64: 1, 5>}, {pipeline_mode = #tpu.pipeline_mode<synchronous>, transform_indices = @transform_3, window_bounds = array<i64: 1, 5>}, {pipeline_mode = #tpu.pipeline_mode<synchronous>, transform_indices = @transform_4, window_bounds = array<i64: 5, 24>}, {pipeline_mode = #tpu.pipeline_mode<synchronous>, transform_indices = @transform_5, window_bounds = array<i64: 1, 24>}, {transform_indices = @transform_6, window_bounds = array<i64: 8, 24>}]} {
    %c0 = arith.constant 0 : index
    %c0_0 = arith.constant 0 : index
    %0 = vector.load %arg1[%c0, %c0_0] : memref<8x10xbf16, #tpu.memory_space<vmem>>, vector<8x10xbf16>
    %c0_1 = arith.constant 0 : index
    %c0_2 = arith.constant 0 : index
    %1 = vector.load %arg2[%c0_1, %c0_2] : memref<10x5xbf16, #tpu.memory_space<vmem>>, vector<10x5xbf16>
    %cst = arith.constant dense<0.000000e+00> : vector<8x5xf32>
    %2 = tpu.matmul %0, %1, %cst {dimension_numbers = #tpu.dot_dimension_numbers<[1], [0], [0], [1], [0, 0, 1, 1], [], []>} : vector<8x10xbf16>, vector<10x5xbf16>, vector<8x5xf32> -> vector<8x5xf32>
    %c0_3 = arith.constant 0 : index
    %c0_4 = arith.constant 0 : index
    %3 = vector.load %arg3[%c0_3, %c0_4] : memref<1x5xf32, #tpu.memory_space<vmem>>, vector<1x5xf32>
    %4 = vector.broadcast %3 : vector<1x5xf32> to vector<8x5xf32>
    %5 = arith.mulf %2, %4 : vector<8x5xf32>
    %c0_5 = arith.constant 0 : index
    %c0_6 = arith.constant 0 : index
    %6 = vector.load %arg4[%c0_5, %c0_6] : memref<1x5xf32, #tpu.memory_space<vmem>>, vector<1x5xf32>
    %7 = vector.broadcast %6 : vector<1x5xf32> to vector<8x5xf32>
    %8 = arith.addf %5, %7 : vector<8x5xf32>
    %cst_7 = arith.constant 0.000000e+00 : f32
    %9 = vector.broadcast %cst_7 : f32 to vector<8x5xf32>
    %10 = arith.cmpf ogt, %8, %9 : vector<8x5xf32>
    %cst_8 = arith.constant 0.00999999977 : f32
    %11 = vector.broadcast %cst_8 : f32 to vector<8x5xf32>
    %12 = arith.mulf %11, %8 : vector<8x5xf32>
    %13 = arith.select %10, %8, %12 : vector<8x5xi1>, vector<8x5xf32>
    %14 = arith.truncf %13 : vector<8x5xf32> to vector<8x5xbf16>
    %c0_9 = arith.constant 0 : index
    %c0_10 = arith.constant 0 : index
    %15 = vector.load %arg5[%c0_9, %c0_10] : memref<5x24xbf16, #tpu.memory_space<vmem>>, vector<5x24xbf16>
    %cst_11 = arith.constant dense<0.000000e+00> : vector<8x24xf32>
    %16 = tpu.matmul %14, %15, %cst_11 {dimension_numbers = #tpu.dot_dimension_numbers<[1], [0], [0], [1], [0, 0, 1, 1], [], []>} : vector<8x5xbf16>, vector<5x24xbf16>, vector<8x24xf32> -> vector<8x24xf32>
    %c0_12 = arith.constant 0 : index
    %c0_13 = arith.constant 0 : index
    %17 = vector.load %arg6[%c0_12, %c0_13] : memref<1x24xf32, #tpu.memory_space<vmem>>, vector<1x24xf32>
    %18 = vector.broadcast %17 : vector<1x24xf32> to vector<8x24xf32>
    %19 = arith.addf %16, %18 : vector<8x24xf32>
    %20 = arith.truncf %19 : vector<8x24xf32> to vector<8x24xbf16>
    %c0_14 = arith.constant 0 : index
    %c0_15 = arith.constant 0 : index
    %21 = vector.load %arg7[%c0_14, %c0_15] : memref<8x24xbf16, #tpu.memory_space<vmem>>, vector<8x24xbf16>
    tpu.vector_store %arg7[%c0_14, %c0_15], %20 {strides = array<i32>} : memref<8x24xbf16, #tpu.memory_space<vmem>>, vector<8x24xbf16>,
    return
  }
  func.func @transform_0(%arg0: i32) -> (i32, i32) {
    %c0_i32 = arith.constant 0 : i32
    %c0_i32_0 = arith.constant 0 : i32
    return %arg0, %c0_i32 : i32, i32
  }
  func.func @transform_1(%arg0: i32) -> (i32, i32) {
    %c0_i32 = arith.constant 0 : i32
    %c0_i32_0 = arith.constant 0 : i32
    %c0_i32_1 = arith.constant 0 : i32
    return %c0_i32, %c0_i32_0 : i32, i32
  }
  func.func @transform_2(%arg0: i32) -> (i32, i32) {
    %c0_i32 = arith.constant 0 : i32
    %c0_i32_0 = arith.constant 0 : i32
    %c0_i32_1 = arith.constant 0 : i32
    return %c0_i32, %c0_i32_0 : i32, i32
  }
  func.func @transform_3(%arg0: i32) -> (i32, i32) {
    %c0_i32 = arith.constant 0 : i32
    %c0_i32_0 = arith.constant 0 : i32
    %c0_i32_1 = arith.constant 0 : i32
    return %c0_i32, %c0_i32_0 : i32, i32
  }
  func.func @transform_4(%arg0: i32) -> (i32, i32) {
    %c0_i32 = arith.constant 0 : i32
    %c0_i32_0 = arith.constant 0 : i32
    %c0_i32_1 = arith.constant 0 : i32
    return %c0_i32, %c0_i32_0 : i32, i32
  }
  func.func @transform_5(%arg0: i32) -> (i32, i32) {
    %c0_i32 = arith.constant 0 : i32
    %c0_i32_0 = arith.constant 0 : i32
    %c0_i32_1 = arith.constant 0 : i32
    return %c0_i32, %c0_i32_0 : i32, i32
  }
  func.func @transform_6(%arg0: i32) -> (i32, i32) {
    %c0_i32 = arith.constant 0 : i32
    %c0_i32_0 = arith.constant 0 : i32
    return %arg0, %c0_i32 : i32, i32
  }
}

module attributes {stable_mosaic.version = 11 : i64} {
  func.func @_mm_kernel(%arg0: i32, %arg1: memref<32x432xbf16, #tpu.memory_space<vmem>>, %arg2: memref<432x24xbf16, #tpu.memory_space<vmem>>, %arg3: memref<1x24xf32, #tpu.memory_space<vmem>>, %arg4: memref<1x24xf32, #tpu.memory_space<vmem>>, %arg5: memref<32x24xbf16, #tpu.memory_space<vmem>>) attributes {dimension_semantics = [#tpu.dimension_semantics<parallel>], iteration_bounds = array<i64: 2>, scalar_prefetch = 0 : i64, scratch_operands = 0 : i64, tpu.core_type = #tpu.core_type<tc>, window_params = [{transform_indices = @transform_0, window_bounds = array<i64: 32, 432>}, {pipeline_mode = #tpu.pipeline_mode<synchronous>, transform_indices = @transform_1, window_bounds = array<i64: 432, 24>}, {pipeline_mode = #tpu.pipeline_mode<synchronous>, transform_indices = @transform_2, window_bounds = array<i64: 1, 24>}, {pipeline_mode = #tpu.pipeline_mode<synchronous>, transform_indices = @transform_3, window_bounds = array<i64: 1, 24>}, {transform_indices = @transform_4, window_bounds = array<i64: 32, 24>}]} {
    %c0 = arith.constant 0 : index
    %c0_0 = arith.constant 0 : index
    %0 = vector.load %arg1[%c0, %c0_0] : memref<32x432xbf16, #tpu.memory_space<vmem>>, vector<32x432xbf16>
    %c0_1 = arith.constant 0 : index
    %c0_2 = arith.constant 0 : index
    %1 = vector.load %arg2[%c0_1, %c0_2] : memref<432x24xbf16, #tpu.memory_space<vmem>>, vector<432x24xbf16>
    %cst = arith.constant dense<0.000000e+00> : vector<32x24xf32>
    %2 = tpu.matmul %0, %1, %cst {dimension_numbers = #tpu.dot_dimension_numbers<[1], [0], [0], [1], [0, 0, 1, 1], [], []>} : vector<32x432xbf16>, vector<432x24xbf16>, vector<32x24xf32> -> vector<32x24xf32>
    %c0_3 = arith.constant 0 : index
    %c0_4 = arith.constant 0 : index
    %3 = vector.load %arg3[%c0_3, %c0_4] : memref<1x24xf32, #tpu.memory_space<vmem>>, vector<1x24xf32>
    %4 = vector.broadcast %3 : vector<1x24xf32> to vector<32x24xf32>
    %5 = arith.mulf %2, %4 : vector<32x24xf32>
    %c0_5 = arith.constant 0 : index
    %c0_6 = arith.constant 0 : index
    %6 = vector.load %arg4[%c0_5, %c0_6] : memref<1x24xf32, #tpu.memory_space<vmem>>, vector<1x24xf32>
    %7 = vector.broadcast %6 : vector<1x24xf32> to vector<32x24xf32>
    %8 = arith.addf %5, %7 : vector<32x24xf32>
    %cst_7 = arith.constant 0.000000e+00 : f32
    %9 = vector.broadcast %cst_7 : f32 to vector<32x24xf32>
    %10 = arith.cmpf ogt, %8, %9 : vector<32x24xf32>
    %cst_8 = arith.constant 0.00999999977 : f32
    %11 = vector.broadcast %cst_8 : f32 to vector<32x24xf32>
    %12 = arith.mulf %11, %8 : vector<32x24xf32>
    %13 = arith.select %10, %8, %12 : vector<32x24xi1>, vector<32x24xf32>
    %14 = arith.truncf %13 : vector<32x24xf32> to vector<32x24xbf16>
    %c0_9 = arith.constant 0 : index
    %c0_10 = arith.constant 0 : index
    %15 = vector.load %arg5[%c0_9, %c0_10] : memref<32x24xbf16, #tpu.memory_space<vmem>>, vector<32x24xbf16>
    tpu.vector_store %arg5[%c0_9, %c0_10], %14 {strides = array<i32>} : memref<32x24xbf16, #tpu.memory_space<vmem>>, vector<32x24xbf16>,
    return
  }
  func.func @transform_0(%arg0: i32) -> (i32, i32) {
    %c0_i32 = arith.constant 0 : i32
    %c0_i32_0 = arith.constant 0 : i32
    return %arg0, %c0_i32 : i32, i32
  }
  func.func @transform_1(%arg0: i32) -> (i32, i32) {
    %c0_i32 = arith.constant 0 : i32
    %c0_i32_0 = arith.constant 0 : i32
    %c0_i32_1 = arith.constant 0 : i32
    return %c0_i32, %c0_i32_0 : i32, i32
  }
  func.func @transform_2(%arg0: i32) -> (i32, i32) {
    %c0_i32 = arith.constant 0 : i32
    %c0_i32_0 = arith.constant 0 : i32
    %c0_i32_1 = arith.constant 0 : i32
    return %c0_i32, %c0_i32_0 : i32, i32
  }
  func.func @transform_3(%arg0: i32) -> (i32, i32) {
    %c0_i32 = arith.constant 0 : i32
    %c0_i32_0 = arith.constant 0 : i32
    %c0_i32_1 = arith.constant 0 : i32
    return %c0_i32, %c0_i32_0 : i32, i32
  }
  func.func @transform_4(%arg0: i32) -> (i32, i32) {
    %c0_i32 = arith.constant 0 : i32
    %c0_i32_0 = arith.constant 0 : i32
    return %arg0, %c0_i32 : i32, i32
  }
}

module attributes {stable_mosaic.version = 11 : i64} {
  func.func @_mm_kernel(%arg0: i32, %arg1: memref<32x648xbf16, #tpu.memory_space<vmem>>, %arg2: memref<648x24xbf16, #tpu.memory_space<vmem>>, %arg3: memref<1x24xf32, #tpu.memory_space<vmem>>, %arg4: memref<1x24xf32, #tpu.memory_space<vmem>>, %arg5: memref<32x24xbf16, #tpu.memory_space<vmem>>) attributes {dimension_semantics = [#tpu.dimension_semantics<parallel>], iteration_bounds = array<i64: 2>, scalar_prefetch = 0 : i64, scratch_operands = 0 : i64, tpu.core_type = #tpu.core_type<tc>, window_params = [{transform_indices = @transform_0, window_bounds = array<i64: 32, 648>}, {pipeline_mode = #tpu.pipeline_mode<synchronous>, transform_indices = @transform_1, window_bounds = array<i64: 648, 24>}, {pipeline_mode = #tpu.pipeline_mode<synchronous>, transform_indices = @transform_2, window_bounds = array<i64: 1, 24>}, {pipeline_mode = #tpu.pipeline_mode<synchronous>, transform_indices = @transform_3, window_bounds = array<i64: 1, 24>}, {transform_indices = @transform_4, window_bounds = array<i64: 32, 24>}]} {
    %c0 = arith.constant 0 : index
    %c0_0 = arith.constant 0 : index
    %0 = vector.load %arg1[%c0, %c0_0] : memref<32x648xbf16, #tpu.memory_space<vmem>>, vector<32x648xbf16>
    %c0_1 = arith.constant 0 : index
    %c0_2 = arith.constant 0 : index
    %1 = vector.load %arg2[%c0_1, %c0_2] : memref<648x24xbf16, #tpu.memory_space<vmem>>, vector<648x24xbf16>
    %cst = arith.constant dense<0.000000e+00> : vector<32x24xf32>
    %2 = tpu.matmul %0, %1, %cst {dimension_numbers = #tpu.dot_dimension_numbers<[1], [0], [0], [1], [0, 0, 1, 1], [], []>} : vector<32x648xbf16>, vector<648x24xbf16>, vector<32x24xf32> -> vector<32x24xf32>
    %c0_3 = arith.constant 0 : index
    %c0_4 = arith.constant 0 : index
    %3 = vector.load %arg3[%c0_3, %c0_4] : memref<1x24xf32, #tpu.memory_space<vmem>>, vector<1x24xf32>
    %4 = vector.broadcast %3 : vector<1x24xf32> to vector<32x24xf32>
    %5 = arith.mulf %2, %4 : vector<32x24xf32>
    %c0_5 = arith.constant 0 : index
    %c0_6 = arith.constant 0 : index
    %6 = vector.load %arg4[%c0_5, %c0_6] : memref<1x24xf32, #tpu.memory_space<vmem>>, vector<1x24xf32>
    %7 = vector.broadcast %6 : vector<1x24xf32> to vector<32x24xf32>
    %8 = arith.addf %5, %7 : vector<32x24xf32>
    %cst_7 = arith.constant 0.000000e+00 : f32
    %9 = vector.broadcast %cst_7 : f32 to vector<32x24xf32>
    %10 = arith.cmpf ogt, %8, %9 : vector<32x24xf32>
    %cst_8 = arith.constant 0.00999999977 : f32
    %11 = vector.broadcast %cst_8 : f32 to vector<32x24xf32>
    %12 = arith.mulf %11, %8 : vector<32x24xf32>
    %13 = arith.select %10, %8, %12 : vector<32x24xi1>, vector<32x24xf32>
    %14 = arith.truncf %13 : vector<32x24xf32> to vector<32x24xbf16>
    %c0_9 = arith.constant 0 : index
    %c0_10 = arith.constant 0 : index
    %15 = vector.load %arg5[%c0_9, %c0_10] : memref<32x24xbf16, #tpu.memory_space<vmem>>, vector<32x24xbf16>
    tpu.vector_store %arg5[%c0_9, %c0_10], %14 {strides = array<i32>} : memref<32x24xbf16, #tpu.memory_space<vmem>>, vector<32x24xbf16>,
    return
  }
  func.func @transform_0(%arg0: i32) -> (i32, i32) {
    %c0_i32 = arith.constant 0 : i32
    %c0_i32_0 = arith.constant 0 : i32
    return %arg0, %c0_i32 : i32, i32
  }
  func.func @transform_1(%arg0: i32) -> (i32, i32) {
    %c0_i32 = arith.constant 0 : i32
    %c0_i32_0 = arith.constant 0 : i32
    %c0_i32_1 = arith.constant 0 : i32
    return %c0_i32, %c0_i32_0 : i32, i32
  }
  func.func @transform_2(%arg0: i32) -> (i32, i32) {
    %c0_i32 = arith.constant 0 : i32
    %c0_i32_0 = arith.constant 0 : i32
    %c0_i32_1 = arith.constant 0 : i32
    return %c0_i32, %c0_i32_0 : i32, i32
  }
  func.func @transform_3(%arg0: i32) -> (i32, i32) {
    %c0_i32 = arith.constant 0 : i32
    %c0_i32_0 = arith.constant 0 : i32
    %c0_i32_1 = arith.constant 0 : i32
    return %c0_i32, %c0_i32_0 : i32, i32
  }
  func.func @transform_4(%arg0: i32) -> (i32, i32) {
    %c0_i32 = arith.constant 0 : i32
    %c0_i32_0 = arith.constant 0 : i32
    return %arg0, %c0_i32 : i32, i32
  }
}

module attributes {stable_mosaic.version = 11 : i64} {
  func.func @_gate_kernel(%arg0: i32, %arg1: i32, %arg2: memref<1x1x96xbf16, #tpu.memory_space<vmem>>, %arg3: memref<1x8x96xbf16, #tpu.memory_space<vmem>>, %arg4: memref<1x8x96xbf16, #tpu.memory_space<vmem>>) attributes {dimension_semantics = [#tpu.dimension_semantics<parallel>, #tpu.dimension_semantics<parallel>], iteration_bounds = array<i64: 2, 1>, scalar_prefetch = 0 : i64, scratch_operands = 0 : i64, tpu.core_type = #tpu.core_type<tc>, window_params = [{transform_indices = @transform_0, window_bounds = array<i64: 1, 1, 96>}, {transform_indices = @transform_1, window_bounds = array<i64: 1, 8, 96>}, {transform_indices = @transform_2, window_bounds = array<i64: 1, 8, 96>}]} {
    %c0 = arith.constant 0 : index
    %c0_0 = arith.constant 0 : index
    %c0_1 = arith.constant 0 : index
    %0 = vector.load %arg2[%c0, %c0_0, %c0_1] : memref<1x1x96xbf16, #tpu.memory_space<vmem>>, vector<1x1x96xbf16>
    %1 = arith.extf %0 : vector<1x1x96xbf16> to vector<1x1x96xf32>
    %cst = arith.constant 5.000000e-01 : f32
    %2 = vector.broadcast %cst : f32 to vector<1x1x96xf32>
    %3 = arith.mulf %2, %1 : vector<1x1x96xf32>
    %4 = math.tanh %3 : vector<1x1x96xf32>
    %cst_2 = arith.constant 1.000000e+00 : f32
    %5 = vector.broadcast %cst_2 : f32 to vector<1x1x96xf32>
    %6 = arith.addf %4, %5 : vector<1x1x96xf32>
    %cst_3 = arith.constant 5.000000e-01 : f32
    %7 = vector.broadcast %cst_3 : f32 to vector<1x1x96xf32>
    %8 = arith.mulf %7, %6 : vector<1x1x96xf32>
    %c0_4 = arith.constant 0 : index
    %c0_5 = arith.constant 0 : index
    %c0_6 = arith.constant 0 : index
    %9 = vector.load %arg3[%c0_4, %c0_5, %c0_6] : memref<1x8x96xbf16, #tpu.memory_space<vmem>>, vector<1x8x96xbf16>
    %10 = arith.extf %9 : vector<1x8x96xbf16> to vector<1x8x96xf32>
    %11 = vector.broadcast %8 : vector<1x1x96xf32> to vector<1x8x96xf32>
    %12 = arith.mulf %10, %11 : vector<1x8x96xf32>
    %13 = arith.truncf %12 : vector<1x8x96xf32> to vector<1x8x96xbf16>
    %c0_7 = arith.constant 0 : index
    %c0_8 = arith.constant 0 : index
    %c0_9 = arith.constant 0 : index
    %14 = vector.load %arg4[%c0_7, %c0_8, %c0_9] : memref<1x8x96xbf16, #tpu.memory_space<vmem>>, vector<1x8x96xbf16>
    tpu.vector_store %arg4[%c0_7, %c0_8, %c0_9], %13 {strides = array<i32>} : memref<1x8x96xbf16, #tpu.memory_space<vmem>>, vector<1x8x96xbf16>,
    return
  }
  func.func @transform_0(%arg0: i32, %arg1: i32) -> (i32, i32, i32) {
    %c0_i32 = arith.constant 0 : i32
    %c0_i32_0 = arith.constant 0 : i32
    %c0_i32_1 = arith.constant 0 : i32
    return %arg0, %c0_i32, %c0_i32_0 : i32, i32, i32
  }
  func.func @transform_1(%arg0: i32, %arg1: i32) -> (i32, i32, i32) {
    %c0_i32 = arith.constant 0 : i32
    %c0_i32_0 = arith.constant 0 : i32
    return %arg0, %arg1, %c0_i32 : i32, i32, i32
  }
  func.func @transform_2(%arg0: i32, %arg1: i32) -> (i32, i32, i32) {
    %c0_i32 = arith.constant 0 : i32
    %c0_i32_0 = arith.constant 0 : i32
    return %arg0, %arg1, %c0_i32 : i32, i32, i32
  }
}

module attributes {stable_mosaic.version = 11 : i64} {
  func.func @_mm_kernel(%arg0: i32, %arg1: memref<32x216xbf16, #tpu.memory_space<vmem>>, %arg2: memref<216x64xbf16, #tpu.memory_space<vmem>>, %arg3: memref<1x64xf32, #tpu.memory_space<vmem>>, %arg4: memref<1x64xf32, #tpu.memory_space<vmem>>, %arg5: memref<32x64xbf16, #tpu.memory_space<vmem>>) attributes {dimension_semantics = [#tpu.dimension_semantics<parallel>], iteration_bounds = array<i64: 2>, scalar_prefetch = 0 : i64, scratch_operands = 0 : i64, tpu.core_type = #tpu.core_type<tc>, window_params = [{transform_indices = @transform_0, window_bounds = array<i64: 32, 216>}, {pipeline_mode = #tpu.pipeline_mode<synchronous>, transform_indices = @transform_1, window_bounds = array<i64: 216, 64>}, {pipeline_mode = #tpu.pipeline_mode<synchronous>, transform_indices = @transform_2, window_bounds = array<i64: 1, 64>}, {pipeline_mode = #tpu.pipeline_mode<synchronous>, transform_indices = @transform_3, window_bounds = array<i64: 1, 64>}, {transform_indices = @transform_4, window_bounds = array<i64: 32, 64>}]} {
    %c0 = arith.constant 0 : index
    %c0_0 = arith.constant 0 : index
    %0 = vector.load %arg1[%c0, %c0_0] : memref<32x216xbf16, #tpu.memory_space<vmem>>, vector<32x216xbf16>
    %c0_1 = arith.constant 0 : index
    %c0_2 = arith.constant 0 : index
    %1 = vector.load %arg2[%c0_1, %c0_2] : memref<216x64xbf16, #tpu.memory_space<vmem>>, vector<216x64xbf16>
    %cst = arith.constant dense<0.000000e+00> : vector<32x64xf32>
    %2 = tpu.matmul %0, %1, %cst {dimension_numbers = #tpu.dot_dimension_numbers<[1], [0], [0], [1], [0, 0, 1, 1], [], []>} : vector<32x216xbf16>, vector<216x64xbf16>, vector<32x64xf32> -> vector<32x64xf32>
    %c0_3 = arith.constant 0 : index
    %c0_4 = arith.constant 0 : index
    %3 = vector.load %arg3[%c0_3, %c0_4] : memref<1x64xf32, #tpu.memory_space<vmem>>, vector<1x64xf32>
    %4 = vector.broadcast %3 : vector<1x64xf32> to vector<32x64xf32>
    %5 = arith.mulf %2, %4 : vector<32x64xf32>
    %c0_5 = arith.constant 0 : index
    %c0_6 = arith.constant 0 : index
    %6 = vector.load %arg4[%c0_5, %c0_6] : memref<1x64xf32, #tpu.memory_space<vmem>>, vector<1x64xf32>
    %7 = vector.broadcast %6 : vector<1x64xf32> to vector<32x64xf32>
    %8 = arith.addf %5, %7 : vector<32x64xf32>
    %cst_7 = arith.constant 0.000000e+00 : f32
    %9 = vector.broadcast %cst_7 : f32 to vector<32x64xf32>
    %10 = arith.cmpf ogt, %8, %9 : vector<32x64xf32>
    %cst_8 = arith.constant 0.00999999977 : f32
    %11 = vector.broadcast %cst_8 : f32 to vector<32x64xf32>
    %12 = arith.mulf %11, %8 : vector<32x64xf32>
    %13 = arith.select %10, %8, %12 : vector<32x64xi1>, vector<32x64xf32>
    %14 = arith.truncf %13 : vector<32x64xf32> to vector<32x64xbf16>
    %c0_9 = arith.constant 0 : index
    %c0_10 = arith.constant 0 : index
    %15 = vector.load %arg5[%c0_9, %c0_10] : memref<32x64xbf16, #tpu.memory_space<vmem>>, vector<32x64xbf16>
    tpu.vector_store %arg5[%c0_9, %c0_10], %14 {strides = array<i32>} : memref<32x64xbf16, #tpu.memory_space<vmem>>, vector<32x64xbf16>,
    return
  }
  func.func @transform_0(%arg0: i32) -> (i32, i32) {
    %c0_i32 = arith.constant 0 : i32
    %c0_i32_0 = arith.constant 0 : i32
    return %arg0, %c0_i32 : i32, i32
  }
  func.func @transform_1(%arg0: i32) -> (i32, i32) {
    %c0_i32 = arith.constant 0 : i32
    %c0_i32_0 = arith.constant 0 : i32
    %c0_i32_1 = arith.constant 0 : i32
    return %c0_i32, %c0_i32_0 : i32, i32
  }
  func.func @transform_2(%arg0: i32) -> (i32, i32) {
    %c0_i32 = arith.constant 0 : i32
    %c0_i32_0 = arith.constant 0 : i32
    %c0_i32_1 = arith.constant 0 : i32
    return %c0_i32, %c0_i32_0 : i32, i32
  }
  func.func @transform_3(%arg0: i32) -> (i32, i32) {
    %c0_i32 = arith.constant 0 : i32
    %c0_i32_0 = arith.constant 0 : i32
    %c0_i32_1 = arith.constant 0 : i32
    return %c0_i32, %c0_i32_0 : i32, i32
  }
  func.func @transform_4(%arg0: i32) -> (i32, i32) {
    %c0_i32 = arith.constant 0 : i32
    %c0_i32_0 = arith.constant 0 : i32
    return %arg0, %c0_i32 : i32, i32
  }
}

module attributes {stable_mosaic.version = 11 : i64} {
  func.func @_mm_kernel(%arg0: i32, %arg1: memref<128x32xbf16, #tpu.memory_space<vmem>>, %arg2: memref<32x16xbf16, #tpu.memory_space<vmem>>, %arg3: memref<1x16xf32, #tpu.memory_space<vmem>>, %arg4: memref<1x16xf32, #tpu.memory_space<vmem>>, %arg5: memref<128x16xbf16, #tpu.memory_space<vmem>>) attributes {dimension_semantics = [#tpu.dimension_semantics<parallel>], iteration_bounds = array<i64: 2>, scalar_prefetch = 0 : i64, scratch_operands = 0 : i64, tpu.core_type = #tpu.core_type<tc>, window_params = [{transform_indices = @transform_0, window_bounds = array<i64: 128, 32>}, {pipeline_mode = #tpu.pipeline_mode<synchronous>, transform_indices = @transform_1, window_bounds = array<i64: 32, 16>}, {pipeline_mode = #tpu.pipeline_mode<synchronous>, transform_indices = @transform_2, window_bounds = array<i64: 1, 16>}, {pipeline_mode = #tpu.pipeline_mode<synchronous>, transform_indices = @transform_3, window_bounds = array<i64: 1, 16>}, {transform_indices = @transform_4, window_bounds = array<i64: 128, 16>}]} {
    %c0 = arith.constant 0 : index
    %c0_0 = arith.constant 0 : index
    %0 = vector.load %arg1[%c0, %c0_0] : memref<128x32xbf16, #tpu.memory_space<vmem>>, vector<128x32xbf16>
    %c0_1 = arith.constant 0 : index
    %c0_2 = arith.constant 0 : index
    %1 = vector.load %arg2[%c0_1, %c0_2] : memref<32x16xbf16, #tpu.memory_space<vmem>>, vector<32x16xbf16>
    %cst = arith.constant dense<0.000000e+00> : vector<128x16xf32>
    %2 = tpu.matmul %0, %1, %cst {dimension_numbers = #tpu.dot_dimension_numbers<[1], [0], [0], [1], [0, 0, 1, 1], [], []>} : vector<128x32xbf16>, vector<32x16xbf16>, vector<128x16xf32> -> vector<128x16xf32>
    %c0_3 = arith.constant 0 : index
    %c0_4 = arith.constant 0 : index
    %3 = vector.load %arg3[%c0_3, %c0_4] : memref<1x16xf32, #tpu.memory_space<vmem>>, vector<1x16xf32>
    %4 = vector.broadcast %3 : vector<1x16xf32> to vector<128x16xf32>
    %5 = arith.mulf %2, %4 : vector<128x16xf32>
    %c0_5 = arith.constant 0 : index
    %c0_6 = arith.constant 0 : index
    %6 = vector.load %arg4[%c0_5, %c0_6] : memref<1x16xf32, #tpu.memory_space<vmem>>, vector<1x16xf32>
    %7 = vector.broadcast %6 : vector<1x16xf32> to vector<128x16xf32>
    %8 = arith.addf %5, %7 : vector<128x16xf32>
    %cst_7 = arith.constant 0.000000e+00 : f32
    %9 = vector.broadcast %cst_7 : f32 to vector<128x16xf32>
    %10 = arith.cmpf ogt, %8, %9 : vector<128x16xf32>
    %cst_8 = arith.constant 0.00999999977 : f32
    %11 = vector.broadcast %cst_8 : f32 to vector<128x16xf32>
    %12 = arith.mulf %11, %8 : vector<128x16xf32>
    %13 = arith.select %10, %8, %12 : vector<128x16xi1>, vector<128x16xf32>
    %14 = arith.truncf %13 : vector<128x16xf32> to vector<128x16xbf16>
    %c0_9 = arith.constant 0 : index
    %c0_10 = arith.constant 0 : index
    %15 = vector.load %arg5[%c0_9, %c0_10] : memref<128x16xbf16, #tpu.memory_space<vmem>>, vector<128x16xbf16>
    tpu.vector_store %arg5[%c0_9, %c0_10], %14 {strides = array<i32>} : memref<128x16xbf16, #tpu.memory_space<vmem>>, vector<128x16xbf16>,
    return
  }
  func.func @transform_0(%arg0: i32) -> (i32, i32) {
    %c0_i32 = arith.constant 0 : i32
    %c0_i32_0 = arith.constant 0 : i32
    return %arg0, %c0_i32 : i32, i32
  }
  func.func @transform_1(%arg0: i32) -> (i32, i32) {
    %c0_i32 = arith.constant 0 : i32
    %c0_i32_0 = arith.constant 0 : i32
    %c0_i32_1 = arith.constant 0 : i32
    return %c0_i32, %c0_i32_0 : i32, i32
  }
  func.func @transform_2(%arg0: i32) -> (i32, i32) {
    %c0_i32 = arith.constant 0 : i32
    %c0_i32_0 = arith.constant 0 : i32
    %c0_i32_1 = arith.constant 0 : i32
    return %c0_i32, %c0_i32_0 : i32, i32
  }
  func.func @transform_3(%arg0: i32) -> (i32, i32) {
    %c0_i32 = arith.constant 0 : i32
    %c0_i32_0 = arith.constant 0 : i32
    %c0_i32_1 = arith.constant 0 : i32
    return %c0_i32, %c0_i32_0 : i32, i32
  }
  func.func @transform_4(%arg0: i32) -> (i32, i32) {
    %c0_i32 = arith.constant 0 : i32
    %c0_i32_0 = arith.constant 0 : i32
    return %arg0, %c0_i32 : i32, i32
  }
}

module attributes {stable_mosaic.version = 11 : i64} {
  func.func @_mm_kernel(%arg0: i32, %arg1: memref<128x144xbf16, #tpu.memory_space<vmem>>, %arg2: memref<144x32xbf16, #tpu.memory_space<vmem>>, %arg3: memref<1x32xf32, #tpu.memory_space<vmem>>, %arg4: memref<1x32xf32, #tpu.memory_space<vmem>>, %arg5: memref<128x32xbf16, #tpu.memory_space<vmem>>) attributes {dimension_semantics = [#tpu.dimension_semantics<parallel>], iteration_bounds = array<i64: 2>, scalar_prefetch = 0 : i64, scratch_operands = 0 : i64, tpu.core_type = #tpu.core_type<tc>, window_params = [{transform_indices = @transform_0, window_bounds = array<i64: 128, 144>}, {pipeline_mode = #tpu.pipeline_mode<synchronous>, transform_indices = @transform_1, window_bounds = array<i64: 144, 32>}, {pipeline_mode = #tpu.pipeline_mode<synchronous>, transform_indices = @transform_2, window_bounds = array<i64: 1, 32>}, {pipeline_mode = #tpu.pipeline_mode<synchronous>, transform_indices = @transform_3, window_bounds = array<i64: 1, 32>}, {transform_indices = @transform_4, window_bounds = array<i64: 128, 32>}]} {
    %c0 = arith.constant 0 : index
    %c0_0 = arith.constant 0 : index
    %0 = vector.load %arg1[%c0, %c0_0] : memref<128x144xbf16, #tpu.memory_space<vmem>>, vector<128x144xbf16>
    %c0_1 = arith.constant 0 : index
    %c0_2 = arith.constant 0 : index
    %1 = vector.load %arg2[%c0_1, %c0_2] : memref<144x32xbf16, #tpu.memory_space<vmem>>, vector<144x32xbf16>
    %cst = arith.constant dense<0.000000e+00> : vector<128x32xf32>
    %2 = tpu.matmul %0, %1, %cst {dimension_numbers = #tpu.dot_dimension_numbers<[1], [0], [0], [1], [0, 0, 1, 1], [], []>} : vector<128x144xbf16>, vector<144x32xbf16>, vector<128x32xf32> -> vector<128x32xf32>
    %c0_3 = arith.constant 0 : index
    %c0_4 = arith.constant 0 : index
    %3 = vector.load %arg3[%c0_3, %c0_4] : memref<1x32xf32, #tpu.memory_space<vmem>>, vector<1x32xf32>
    %4 = vector.broadcast %3 : vector<1x32xf32> to vector<128x32xf32>
    %5 = arith.mulf %2, %4 : vector<128x32xf32>
    %c0_5 = arith.constant 0 : index
    %c0_6 = arith.constant 0 : index
    %6 = vector.load %arg4[%c0_5, %c0_6] : memref<1x32xf32, #tpu.memory_space<vmem>>, vector<1x32xf32>
    %7 = vector.broadcast %6 : vector<1x32xf32> to vector<128x32xf32>
    %8 = arith.addf %5, %7 : vector<128x32xf32>
    %cst_7 = arith.constant 0.000000e+00 : f32
    %9 = vector.broadcast %cst_7 : f32 to vector<128x32xf32>
    %10 = arith.cmpf ogt, %8, %9 : vector<128x32xf32>
    %cst_8 = arith.constant 0.00999999977 : f32
    %11 = vector.broadcast %cst_8 : f32 to vector<128x32xf32>
    %12 = arith.mulf %11, %8 : vector<128x32xf32>
    %13 = arith.select %10, %8, %12 : vector<128x32xi1>, vector<128x32xf32>
    %14 = arith.truncf %13 : vector<128x32xf32> to vector<128x32xbf16>
    %c0_9 = arith.constant 0 : index
    %c0_10 = arith.constant 0 : index
    %15 = vector.load %arg5[%c0_9, %c0_10] : memref<128x32xbf16, #tpu.memory_space<vmem>>, vector<128x32xbf16>
    tpu.vector_store %arg5[%c0_9, %c0_10], %14 {strides = array<i32>} : memref<128x32xbf16, #tpu.memory_space<vmem>>, vector<128x32xbf16>,
    return
  }
  func.func @transform_0(%arg0: i32) -> (i32, i32) {
    %c0_i32 = arith.constant 0 : i32
    %c0_i32_0 = arith.constant 0 : i32
    return %arg0, %c0_i32 : i32, i32
  }
  func.func @transform_1(%arg0: i32) -> (i32, i32) {
    %c0_i32 = arith.constant 0 : i32
    %c0_i32_0 = arith.constant 0 : i32
    %c0_i32_1 = arith.constant 0 : i32
    return %c0_i32, %c0_i32_0 : i32, i32
  }
  func.func @transform_2(%arg0: i32) -> (i32, i32) {
    %c0_i32 = arith.constant 0 : i32
    %c0_i32_0 = arith.constant 0 : i32
    %c0_i32_1 = arith.constant 0 : i32
    return %c0_i32, %c0_i32_0 : i32, i32
  }
  func.func @transform_3(%arg0: i32) -> (i32, i32) {
    %c0_i32 = arith.constant 0 : i32
    %c0_i32_0 = arith.constant 0 : i32
    %c0_i32_1 = arith.constant 0 : i32
    return %c0_i32, %c0_i32_0 : i32, i32
  }
  func.func @transform_4(%arg0: i32) -> (i32, i32) {
    %c0_i32 = arith.constant 0 : i32
    %c0_i32_0 = arith.constant 0 : i32
    return %arg0, %c0_i32 : i32, i32
  }
}

module attributes {stable_mosaic.version = 11 : i64} {
  func.func @_mm_kernel(%arg0: i32, %arg1: memref<512x16xbf16, #tpu.memory_space<vmem>>, %arg2: memref<16x8xbf16, #tpu.memory_space<vmem>>, %arg3: memref<1x8xf32, #tpu.memory_space<vmem>>, %arg4: memref<1x8xf32, #tpu.memory_space<vmem>>, %arg5: memref<512x8xbf16, #tpu.memory_space<vmem>>) attributes {dimension_semantics = [#tpu.dimension_semantics<parallel>], iteration_bounds = array<i64: 2>, scalar_prefetch = 0 : i64, scratch_operands = 0 : i64, tpu.core_type = #tpu.core_type<tc>, window_params = [{transform_indices = @transform_0, window_bounds = array<i64: 512, 16>}, {pipeline_mode = #tpu.pipeline_mode<synchronous>, transform_indices = @transform_1, window_bounds = array<i64: 16, 8>}, {pipeline_mode = #tpu.pipeline_mode<synchronous>, transform_indices = @transform_2, window_bounds = array<i64: 1, 8>}, {pipeline_mode = #tpu.pipeline_mode<synchronous>, transform_indices = @transform_3, window_bounds = array<i64: 1, 8>}, {transform_indices = @transform_4, window_bounds = array<i64: 512, 8>}]} {
    %c0 = arith.constant 0 : index
    %c0_0 = arith.constant 0 : index
    %0 = vector.load %arg1[%c0, %c0_0] : memref<512x16xbf16, #tpu.memory_space<vmem>>, vector<512x16xbf16>
    %c0_1 = arith.constant 0 : index
    %c0_2 = arith.constant 0 : index
    %1 = vector.load %arg2[%c0_1, %c0_2] : memref<16x8xbf16, #tpu.memory_space<vmem>>, vector<16x8xbf16>
    %cst = arith.constant dense<0.000000e+00> : vector<512x8xf32>
    %2 = tpu.matmul %0, %1, %cst {dimension_numbers = #tpu.dot_dimension_numbers<[1], [0], [0], [1], [0, 0, 1, 1], [], []>} : vector<512x16xbf16>, vector<16x8xbf16>, vector<512x8xf32> -> vector<512x8xf32>
    %c0_3 = arith.constant 0 : index
    %c0_4 = arith.constant 0 : index
    %3 = vector.load %arg3[%c0_3, %c0_4] : memref<1x8xf32, #tpu.memory_space<vmem>>, vector<1x8xf32>
    %4 = vector.broadcast %3 : vector<1x8xf32> to vector<512x8xf32>
    %5 = arith.mulf %2, %4 : vector<512x8xf32>
    %c0_5 = arith.constant 0 : index
    %c0_6 = arith.constant 0 : index
    %6 = vector.load %arg4[%c0_5, %c0_6] : memref<1x8xf32, #tpu.memory_space<vmem>>, vector<1x8xf32>
    %7 = vector.broadcast %6 : vector<1x8xf32> to vector<512x8xf32>
    %8 = arith.addf %5, %7 : vector<512x8xf32>
    %cst_7 = arith.constant 0.000000e+00 : f32
    %9 = vector.broadcast %cst_7 : f32 to vector<512x8xf32>
    %10 = arith.cmpf ogt, %8, %9 : vector<512x8xf32>
    %cst_8 = arith.constant 0.00999999977 : f32
    %11 = vector.broadcast %cst_8 : f32 to vector<512x8xf32>
    %12 = arith.mulf %11, %8 : vector<512x8xf32>
    %13 = arith.select %10, %8, %12 : vector<512x8xi1>, vector<512x8xf32>
    %14 = arith.truncf %13 : vector<512x8xf32> to vector<512x8xbf16>
    %c0_9 = arith.constant 0 : index
    %c0_10 = arith.constant 0 : index
    %15 = vector.load %arg5[%c0_9, %c0_10] : memref<512x8xbf16, #tpu.memory_space<vmem>>, vector<512x8xbf16>
    tpu.vector_store %arg5[%c0_9, %c0_10], %14 {strides = array<i32>} : memref<512x8xbf16, #tpu.memory_space<vmem>>, vector<512x8xbf16>,
    return
  }
  func.func @transform_0(%arg0: i32) -> (i32, i32) {
    %c0_i32 = arith.constant 0 : i32
    %c0_i32_0 = arith.constant 0 : i32
    return %arg0, %c0_i32 : i32, i32
  }
  func.func @transform_1(%arg0: i32) -> (i32, i32) {
    %c0_i32 = arith.constant 0 : i32
    %c0_i32_0 = arith.constant 0 : i32
    %c0_i32_1 = arith.constant 0 : i32
    return %c0_i32, %c0_i32_0 : i32, i32
  }
  func.func @transform_2(%arg0: i32) -> (i32, i32) {
    %c0_i32 = arith.constant 0 : i32
    %c0_i32_0 = arith.constant 0 : i32
    %c0_i32_1 = arith.constant 0 : i32
    return %c0_i32, %c0_i32_0 : i32, i32
  }
  func.func @transform_3(%arg0: i32) -> (i32, i32) {
    %c0_i32 = arith.constant 0 : i32
    %c0_i32_0 = arith.constant 0 : i32
    %c0_i32_1 = arith.constant 0 : i32
    return %c0_i32, %c0_i32_0 : i32, i32
  }
  func.func @transform_4(%arg0: i32) -> (i32, i32) {
    %c0_i32 = arith.constant 0 : i32
    %c0_i32_0 = arith.constant 0 : i32
    return %arg0, %c0_i32 : i32, i32
  }
}

module attributes {stable_mosaic.version = 11 : i64} {
  func.func @_mm_kernel(%arg0: i32, %arg1: memref<512x72xbf16, #tpu.memory_space<vmem>>, %arg2: memref<72x4xbf16, #tpu.memory_space<vmem>>, %arg3: memref<1x4xf32, #tpu.memory_space<vmem>>, %arg4: memref<1x4xf32, #tpu.memory_space<vmem>>, %arg5: memref<512x4xbf16, #tpu.memory_space<vmem>>) attributes {dimension_semantics = [#tpu.dimension_semantics<parallel>], iteration_bounds = array<i64: 2>, scalar_prefetch = 0 : i64, scratch_operands = 0 : i64, tpu.core_type = #tpu.core_type<tc>, window_params = [{transform_indices = @transform_0, window_bounds = array<i64: 512, 72>}, {pipeline_mode = #tpu.pipeline_mode<synchronous>, transform_indices = @transform_1, window_bounds = array<i64: 72, 4>}, {pipeline_mode = #tpu.pipeline_mode<synchronous>, transform_indices = @transform_2, window_bounds = array<i64: 1, 4>}, {pipeline_mode = #tpu.pipeline_mode<synchronous>, transform_indices = @transform_3, window_bounds = array<i64: 1, 4>}, {transform_indices = @transform_4, window_bounds = array<i64: 512, 4>}]} {
    %c0 = arith.constant 0 : index
    %c0_0 = arith.constant 0 : index
    %0 = vector.load %arg1[%c0, %c0_0] : memref<512x72xbf16, #tpu.memory_space<vmem>>, vector<512x72xbf16>
    %c0_1 = arith.constant 0 : index
    %c0_2 = arith.constant 0 : index
    %1 = vector.load %arg2[%c0_1, %c0_2] : memref<72x4xbf16, #tpu.memory_space<vmem>>, vector<72x4xbf16>
    %cst = arith.constant dense<0.000000e+00> : vector<512x4xf32>
    %2 = tpu.matmul %0, %1, %cst {dimension_numbers = #tpu.dot_dimension_numbers<[1], [0], [0], [1], [0, 0, 1, 1], [], []>} : vector<512x72xbf16>, vector<72x4xbf16>, vector<512x4xf32> -> vector<512x4xf32>
    %c0_3 = arith.constant 0 : index
    %c0_4 = arith.constant 0 : index
    %3 = vector.load %arg3[%c0_3, %c0_4] : memref<1x4xf32, #tpu.memory_space<vmem>>, vector<1x4xf32>
    %4 = vector.broadcast %3 : vector<1x4xf32> to vector<512x4xf32>
    %5 = arith.mulf %2, %4 : vector<512x4xf32>
    %c0_5 = arith.constant 0 : index
    %c0_6 = arith.constant 0 : index
    %6 = vector.load %arg4[%c0_5, %c0_6] : memref<1x4xf32, #tpu.memory_space<vmem>>, vector<1x4xf32>
    %7 = vector.broadcast %6 : vector<1x4xf32> to vector<512x4xf32>
    %8 = arith.addf %5, %7 : vector<512x4xf32>
    %9 = arith.truncf %8 : vector<512x4xf32> to vector<512x4xbf16>
    %c0_7 = arith.constant 0 : index
    %c0_8 = arith.constant 0 : index
    %10 = vector.load %arg5[%c0_7, %c0_8] : memref<512x4xbf16, #tpu.memory_space<vmem>>, vector<512x4xbf16>
    tpu.vector_store %arg5[%c0_7, %c0_8], %9 {strides = array<i32>} : memref<512x4xbf16, #tpu.memory_space<vmem>>, vector<512x4xbf16>,
    return
  }
  func.func @transform_0(%arg0: i32) -> (i32, i32) {
    %c0_i32 = arith.constant 0 : i32
    %c0_i32_0 = arith.constant 0 : i32
    return %arg0, %c0_i32 : i32, i32
  }
  func.func @transform_1(%arg0: i32) -> (i32, i32) {
    %c0_i32 = arith.constant 0 : i32
    %c0_i32_0 = arith.constant 0 : i32
    %c0_i32_1 = arith.constant 0 : i32
    return %c0_i32, %c0_i32_0 : i32, i32
  }
  func.func @transform_2(%arg0: i32) -> (i32, i32) {
    %c0_i32 = arith.constant 0 : i32
    %c0_i32_0 = arith.constant 0 : i32
    %c0_i32_1 = arith.constant 0 : i32
    return %c0_i32, %c0_i32_0 : i32, i32
  }
  func.func @transform_3(%arg0: i32) -> (i32, i32) {
    %c0_i32 = arith.constant 0 : i32
    %c0_i32_0 = arith.constant 0 : i32
    %c0_i32_1 = arith.constant 0 : i32
    return %c0_i32, %c0_i32_0 : i32, i32
  }
  func.func @transform_4(%arg0: i32) -> (i32, i32) {
    %c0_i32 = arith.constant 0 : i32
    %c0_i32_0 = arith.constant 0 : i32
    return %arg0, %c0_i32 : i32, i32
  }
}

</mosaic_0001>

<bundles_post_ra>
// kernel: hourglass_att_forward.47
= control target key start
LH: loop header
LB: loop body
LE: loop exit
PB: predicated region body
PF: predicated region fallthrough
CT: control target
= control target key end

     0   :  { %11 = vsyncpa [#allocation3], 0  ;;  %s1056_s0 = inlined_call_operand.vmem [shape: bf16[128,6], index: 0, kind: input, shape index: {}]   ;;  %s1057_s1 = inlined_call_operand.vmem [shape: bf16[6,3], index: 1, kind: input, shape index: {}]   ;;  %s1058_s2 = inlined_call_operand.hbm [shape: f32[1,3], index: 2, kind: input, shape index: {}]   ;;  %s1059_s3 = inlined_call_operand.hbm [shape: f32[1,3], index: 3, kind: input, shape index: {}]   ;;  %s1060_s4 = inlined_call_operand.vmem [shape: bf16[3,8], index: 4, kind: input, shape index: {}]   ;;  %s1061_s5 = inlined_call_operand.hbm [shape: f32[1,8], index: 5, kind: input, shape index: {}]   ;;  %s1062_s6 = inlined_call_operand.vmem [shape: bf16[128,8], index: 6, kind: output, shape index: {}]  }
   0x1   :  { %12 = vsyncpa [#allocation5], 0  ;;  %s940_s21 = smov 0  }
   0x2 LB: > { %s684_s22 = sadd.s32 4294967295, %s899_s21   ;;  %p686_p0 = scmp.ge.s32.totalorder %s899_s21, 1  ;;  %s899_s21 = sphi %s940_s21, %s18_s21  }
   0x3   : > { %p180_p1 = scmp.lt.s32.totalorder %s899_s21, 3  ;;  %p950_p2 = scmp.eq.s32.totalorder %s684_s22, 0 }
   0x4   : > { %s901_s25 = smov [#allocation4]   ;;  %s902_s27 = smov [#allocation2]  }
   0x5   : > { %s1065_s23 = scalar_select %p950_p2, 1, 0 }
   0x6   : > { %p954_p3 = pnand %p686_p0, %p180_p1  ;;  %s207_s26 = sshll.u32 %s901_s25, 4  ;;  %s208_s26 = int_to_ptr.vmem [resolvable:$true] %s207_s26 }
   0x7   : > { %s196_s28 = sshll.u32 %s902_s27, 4  ;;  %s903_s29 = smov [#allocation6]   ;;  %s197_s28 = int_to_ptr.vmem [resolvable:$true] %s196_s28 }
   0x8   : > { %p775_p4 = pneg %p954_p3  ;;  %s221_s30 = sshll.u32 %s903_s29, 4  ;;  %s966_s30 = int_to_ptr.vmem [resolvable:$true] %s221_s30 }
   0x9   : > { %s818_s8 = scalar_lea.vmem %s208_s26, 16  ;;  %s825_s9 = scalar_lea.vmem %s208_s26, 32 }
   0xa   : > { %p962_p5 = pnand %p950_p2, %p775_p4  ;;  %p819_p7 = scmp.ne.s32.totalorder %s208_s26, %s818_s8 }
   0xb   : > { %p826_p10 = scmp.lt.s32.totalorder %s208_s26, %s208_s26  ;;  %p827_p11 = scmp.lt.s32.totalorder %s825_s9, %s818_s8 }
   0xc   : > { %p809_p6 = pneg %p962_p5 }
   0xd   : > { %p828_p12 = por %p827_p11, %p826_p10 }
   0xe   : > { %p821_p8 = pnand %p819_p7, %p809_p6 }
  0x10   : > { %p822_p9 = pneg %p821_p8 }
  0x12   : > { %p829_p13 = pnand %p828_p12, %p822_p9 }
  0x14   : > { %832 = shalt.err (!%p829_p13)
}
  0x15   : > { %781 = dma.hbm_to_vmem [thread:$0]  (!%p962_p5), %s1059_s3, 16, %s208_s26, [#allocation5]  }
  0x16   : > { %s844_s12 = scalar_lea.vmem %s197_s28, 16  ;;  %s851_s13 = scalar_lea.vmem %s197_s28, 32 }
  0x17   : > { %p845_p0 = scmp.ne.s32.totalorder %s197_s28, %s844_s12  ;;  %p852_p7 = scmp.lt.s32.totalorder %s197_s28, %s197_s28 }
  0x18   : > { %p853_p8 = scmp.lt.s32.totalorder %s851_s13, %s844_s12 }
  0x19   : > { %p847_p1 = pnand %p845_p0, %p809_p6 }
  0x1a   : > { %p854_p2 = por %p853_p8, %p852_p7 }
  0x1b   : > { %p848_p4 = pneg %p847_p1 }
  0x1d   : > { %p855_p10 = pnand %p854_p2, %p848_p4 }
  0x1f   : > { %858 = shalt.err (!%p855_p10)
}
  0x20   : > { %778 = dma.hbm_to_vmem [thread:$0]  (!%p962_p5), %s1058_s2, 16, %s197_s28, [#allocation3]  }
  0x21   : > { %s870_s16 = scalar_lea.vmem %s966_s30, 16  ;;  %s877_s17 = scalar_lea.vmem %s966_s30, 32 }
  0x22   : > { %p871_p9 = scmp.ne.s32.totalorder %s966_s30, %s870_s16  ;;  %p878_p2 = scmp.lt.s32.totalorder %s966_s30, %s966_s30 }
  0x23   : > { %p879_p13 = scmp.lt.s32.totalorder %s877_s17, %s870_s16 }
  0x24   : > { %p873_p11 = pnand %p871_p9, %p809_p6 }
  0x25   : > { %p880_p0 = por %p879_p13, %p878_p2 }
  0x26   : > { %p874_p12 = pneg %p873_p11 }
  0x28   : > { %p881_p1 = pnand %p880_p0, %p874_p12 }
  0x2a   : > { %884 = shalt.err (!%p881_p1)
}
  0x2b   : > { %784 = dma.hbm_to_vmem [thread:$0]  (!%p962_p5), %s1061_s5, 16, %s966_s30, [#allocation5]  }
  0x2c   : > { %243 = sbr.rel (%p954_p3) target bundleno = 481 (0x1e1), region = 44  ;;  %p1068_p6 = scmp.ne.s32.totalorder (!%p954_p3), %s1065_s23, 0 }
  0x31   : > { %890 = dma.done.wait (%p1068_p6), [#allocation3], 16  }
  0x32   : > { %892 = vsyncadd (%p1068_p6), [#allocation3], 4294967280 }
  0x33   : > { %894 = dma.done.wait (%p1068_p6), [#allocation5], 32  }
  0x34   : > { %896 = vsyncadd (%p1068_p6), [#allocation5], 4294967264  ;;  %s695_s20 = sshll.u32 %s684_s22, 3  ;;  %vm336_vm0 = vcmask 1042432   ;;  %vm323_vm1 = vcmask 48128   ;;  %vm484_vm2 = vcmask 1040384  }
  0x35   : > { %p282_p4 = scmp.lt.s32.totalorder %s695_s20, 15  ;;  %v302_v0 = vld [vmem:[%s1057_s1] sm:$0x7]  ;;  %vm485_vm3 = vcmask 1041408   ;;  %v904_v6 = vmov 65535   ;;  %vm471_vm8 = vcmask 23552  }
  0x36   : > { %762 = vmatprep.subr.msk.bf16.mxu0 %vm336_vm0, %v302_v0  ;;  %v338_v1 = vsel %vm336_vm0, %v302_v0, 0  ;;  %v486_v7 = vsel %vm484_vm2, 4294967295, %v904_v6  ;;  %v463_v8 = vld [vmem:[%s1060_s4] sm:$0x3]  ;;  %v708_v17 = vld [vmem:[#allocation4] ss:$0 sm:$0xff] }
  0x37   : > { %s1070_s20 = smov (!%p282_p4, %s695_s20), 15  ;;  %743 = vmatpush3.bf16.msra.mxu0 %v338_v1  ;;  %v487_v9 = vsel %vm485_vm3, %v486_v7, 0  ;;  %v707_v12 = vld [vmem:[#allocation2] ss:$0 sm:$0xff]  ;;  %v709_v57 = vld [vmem:[#allocation6] ss:$0 sm:$0xff] }
  0x38   : > { %s696_s24 = sshll.u32 %s1070_s20, 2  ;;  %v489_v10 = vand.u32 %v487_v9, %v463_v8  ;;  %vm588_vm13 = vcmask 60416  }
  0x39   : > { %s285_s27 = scalar_lea.vmem %s1056_s0, %s696_s24  ;;  %s1035_s8 = scalar_lea.vmem %s1062_s6, %s696_s24 }
  0x3a   : > { %v803_v2 = vld [vmem:[%s285_s27] sm:$0xff]   ;;  %v804_v3 = vld [vmem:[%s285_s27 + $0x8] sm:$0xff]   ;;  %v805_v4 = vld [vmem:[%s285_s27 + $0x10] sm:$0xff]   ;;  %752 = vmatprep.subr.bf16.mxu1 %v489_v10 }
  0x3b   : > { %744 = vmatprep.mubr.msk.bf16.mxu0 %vm323_vm1, %v803_v2  ;;  %v806_v5 = vld [vmem:[%s285_s27 + $0x18] sm:$0xff]   ;;  %753 = vmatpush3.bf16.msra.mxu1 %v489_v10 }
  0x3c   : > { %745 = vmatmul.mubr.msk.bf16.vlgmr.msra.gmra.mxu0 %vm323_vm1, %v804_v3 }
  0x3d   : > { %748 = vmatprep.mubr.msk.bf16.mxu0 %vm323_vm1, %v805_v4 }
  0x44   : > { %749 = vmatmul.mubr.msk.bf16.gmra.mxu0 %vm323_vm1, %v806_v5 }
  0xfc   : > { %v746_v11 = vpop.f32.mrf.mxu0 }
  0xfd   : > { %v414_v15 = vmul.f32 %v746_v11, %v707_v12 }
  0xfe   : > { %v374_v13 = vpop.f32.mrf.mxu0 }
  0xff   : > { %v412_v14 = vmul.f32 %v707_v12, %v374_v13  ;;  %v429_v23 = vadd.f32 %v708_v17, %v414_v15 }
 0x100   : > { %v747_v16 = vpop.f32.mrf.mxu0 }
 0x101   : > { %v415_v18 = vmul.f32 %v747_v16, %v707_v12  ;;  %v427_v20 = vadd.f32 %v708_v17, %v412_v14  ;;  %v445_v30 = vmul.f32 0.01, %v429_v23  ;;  %vm437_vm7 = vcmp.gt.f32.partialorder %v429_v23, 0.0 }
 0x102   : > { %v377_v19 = vpop.f32.mrf.mxu0 }
 0x103   : > { %v430_v21 = vadd.f32 %v708_v17, %v415_v18  ;;  %v413_v22 = vmul.f32 %v707_v12, %v377_v19  ;;  %v443_v29 = vmul.f32 0.01, %v427_v20  ;;  %vm435_vm6 = vcmp.gt.f32.partialorder %v427_v20, 0.0 }
 0x104   : > { %v750_v24 = vpop.f32.mrf.mxu0  ;;  %v453_v41 = vsel %vm437_vm7, %v429_v23, %v445_v30 }
 0x105   : > { %v428_v25 = vadd.f32 %v708_v17, %v413_v22  ;;  %v446_v26 = vmul.f32 0.01, %v430_v21  ;;  %vm438_vm4 = vcmp.gt.f32.partialorder %v430_v21, 0.0  ;;  %v418_v31 = vmul.f32 %v750_v24, %v707_v12 }
 0x106   : > { %v390_v27 = vpop.f32.mrf.mxu0  ;;  %v451_v40 = vsel %vm435_vm6, %v427_v20, %v443_v29 }
 0x107   : > { %v416_v28 = vmul.f32 %v707_v12, %v390_v27  ;;  %vm436_vm5 = vcmp.gt.f32.partialorder %v428_v25, 0.0  ;;  %v444_v33 = vmul.f32 0.01, %v428_v25  ;;  %v454_v35 = vsel %vm438_vm4, %v430_v21, %v446_v26 }
 0x108   : > { %v751_v32 = vpop.f32.mrf.mxu0  ;;  %v433_v42 = vadd.f32 %v708_v17, %v418_v31  ;;  %v460_v45 = vpack.c.bf16 %v454_v35, %v453_v41 }
 0x109   : > { %v419_v34 = vmul.f32 %v751_v32, %v707_v12  ;;  %v431_v36 = vadd.f32 %v708_v17, %v416_v28  ;;  %v452_v38 = vsel %vm436_vm5, %v428_v25, %v444_v33 }
 0x10a   : > { %v393_v37 = vpop.f32.mrf.mxu0  ;;  %v459_v44 = vpack.c.bf16 %v452_v38, %v451_v40  ;;  %v449_v49 = vmul.f32 0.01, %v433_v42  ;;  %vm441_vm12 = vcmp.gt.f32.partialorder %v433_v42, 0.0 }
 0x10b   : > { %v434_v39 = vadd.f32 %v708_v17, %v419_v34  ;;  %v417_v43 = vmul.f32 %v707_v12, %v393_v37  ;;  %v447_v46 = vmul.f32 0.01, %v431_v36  ;;  %vm439_vm9 = vcmp.gt.f32.partialorder %v431_v36, 0.0 }
 0x10c   : > { %754 = vmatprep.mubr.msk.bf16.mxu1 %vm471_vm8, %v459_v44  ;;  %v457_v55 = vsel %vm441_vm12, %v433_v42, %v449_v49 }
 0x10d   : > { %v450_v47 = vmul.f32 0.01, %v434_v39  ;;  %v432_v48 = vadd.f32 %v708_v17, %v417_v43  ;;  %vm442_vm10 = vcmp.gt.f32.partialorder %v434_v39, 0.0  ;;  %755 = vmatmul.mubr.msk.bf16.vlgmr.msra.gmra.mxu1 %vm471_vm8, %v460_v45  ;;  %v455_v51 = vsel %vm439_vm9, %v431_v36, %v447_v46 }
 0x10f   : > { %vm440_vm11 = vcmp.gt.f32.partialorder %v432_v48, 0.0  ;;  %v448_v50 = vmul.f32 0.01, %v432_v48  ;;  %v458_v52 = vsel %vm442_vm10, %v434_v39, %v450_v47 }
 0x110   : > { %v462_v56 = vpack.c.bf16 %v458_v52, %v457_v55 }
 0x111   : > { %v456_v53 = vsel %vm440_vm11, %v432_v48, %v448_v50 }
 0x112   : > { %v461_v54 = vpack.c.bf16 %v456_v53, %v455_v51 }
 0x114   : > { %758 = vmatprep.mubr.msk.bf16.mxu1 %vm471_vm8, %v461_v54 }
 0x115   : > { %759 = vmatmul.mubr.msk.bf16.gmra.mxu1 %vm471_vm8, %v462_v56 }
 0x1cd   : > { %v756_v58 = vpop.f32.mrf.mxu1 }
 0x1ce   : > { %v534_v59 = vadd.f32 %v756_v58, %v709_v57 }
 0x1cf   : > { %v525_v60 = vpop.f32.mrf.mxu1 }
 0x1d0   : > { %v726_v61 = vpack.c.bf16 %v534_v59, %v534_v59  ;;  %v526_v62 = vadd.f32 %v709_v57, %v525_v60 }
 0x1d1   : > { %v757_v63 = vpop.f32.mrf.mxu1 }
 0x1d2   : > { %591 = vst.msk [vmem:[%s1035_s8 + $0x8] sm:$0xf] %vm588_vm13, %v726_v61  ;;  %v724_v0 = vpack.c.bf16 %v526_v62, %v526_v62  ;;  %v537_v1 = vadd.f32 %v757_v63, %v709_v57 }
 0x1d3   : > { %v528_v2 = vpop.f32.mrf.mxu1 }
 0x1d4   : > { %589 = vst.msk [vmem:[%s1035_s8] sm:$0xf] %vm588_vm13, %v724_v0  ;;  %v727_v3 = vpack.c.bf16 %v537_v1, %v537_v1  ;;  %v529_v4 = vadd.f32 %v709_v57, %v528_v2 }
 0x1d5   : > { %v760_v5 = vpop.f32.mrf.mxu1 }
 0x1d6   : > { %592 = vst.msk [vmem:[%s1035_s8 + $0xc] sm:$0xf] %vm588_vm13, %v727_v3  ;;  %v725_v6 = vpack.c.bf16 %v529_v4, %v529_v4  ;;  %v550_v7 = vadd.f32 %v760_v5, %v709_v57 }
 0x1d7   : > { %v541_v8 = vpop.f32.mrf.mxu1 }
 0x1d8   : > { %590 = vst.msk [vmem:[%s1035_s8 + $0x4] sm:$0xf] %vm588_vm13, %v725_v6  ;;  %v730_v9 = vpack.c.bf16 %v550_v7, %v550_v7  ;;  %v542_v10 = vadd.f32 %v709_v57, %v541_v8 }
 0x1d9   : > { %v761_v11 = vpop.f32.mrf.mxu1 }
 0x1da   : > { %595 = vst.msk [vmem:[%s1035_s8 + $0x18] sm:$0xf] %vm588_vm13, %v730_v9  ;;  %v728_v12 = vpack.c.bf16 %v542_v10, %v542_v10  ;;  %v553_v13 = vadd.f32 %v761_v11, %v709_v57 }
 0x1db   : > { %v544_v14 = vpop.f32.mrf.mxu1 }
 0x1dc   : > { %593 = vst.msk [vmem:[%s1035_s8 + $0x10] sm:$0xf] %vm588_vm13, %v728_v12  ;;  %v731_v15 = vpack.c.bf16 %v553_v13, %v553_v13  ;;  %v545_v16 = vadd.f32 %v709_v57, %v544_v14 }
 0x1de   : > { %596 = vst.msk [vmem:[%s1035_s8 + $0x1c] sm:$0xf] %vm588_vm13, %v731_v15  ;;  %v729_v17 = vpack.c.bf16 %v545_v16, %v545_v16 }
 0x1e0   : > { %594 = vst.msk [vmem:[%s1035_s8 + $0x14] sm:$0xf] %vm588_vm13, %v729_v17 }
 0x1e1 PF: > { %s18_s21 = sadd.s32 1, %s899_s21  }
 0x1e2   : > { %p15_p3 = scmp.ge.s32.totalorder %s18_s21, 4  }
 0x1e4   :  { %17 = sbr.rel (!%p15_p3) target bundleno = 2 (0x2), region = 87 }
 0x1e9   :  { %619 = vsyncpa [#allocation3], 1 }
 0x1ea   :  { %621 = vsyncpa [#allocation3 + $0x1], 1 }
 0x1eb   :  { %622 = vsyncpa [#allocation5], 1 }

// kernel: hourglass_att_forward.25
= control target key start
LH: loop header
LB: loop body
LE: loop exit
PB: predicated region body
PF: predicated region fallthrough
CT: control target
= control target key end

     0   :  { %s2007_s15 = smov 0   ;;  %s2441_s0 = inlined_call_operand.vmem [shape: bf16[1024,108], index: 0, kind: input, shape index: {}]   ;;  %s2442_s1 = inlined_call_operand.vmem [shape: bf16[108,8], index: 1, kind: input, shape index: {}]   ;;  %s2443_s2 = inlined_call_operand.vmem [shape: f32[1,8], index: 2, kind: input, shape index: {}]   ;;  %s2444_s3 = inlined_call_operand.vmem [shape: f32[1,8], index: 3, kind: input, shape index: {}]   ;;  %s2445_s4 = inlined_call_operand.vmem [shape: bf16[1024,8], index: 4, kind: output, shape index: {}]  }
   0x1 LB: > { %s1582_s16 = sadd.s32 4294967295, %s1980_s15   ;;  %p1586_p0 = scmp.ge.s32.totalorder %s1980_s15, 1  ;;  %s1980_s15 = sphi %s2007_s15, %s14_s15  }
   0x2   : > { %p163_p1 = scmp.lt.s32.totalorder %s1980_s15, 3 }
   0x4   : > { %p164_p2 = pnand %p1586_p0, %p163_p1 }
   0x5   : > { %s1587_s21 = sshll.u32 (!%p164_p2), %s1582_s16, 6 }
   0x6   : > { %167 = sbr.rel (%p164_p2) target bundleno = 337 (0x151), region = 36  ;;  %p190_p3 = scmp.lt.s32.totalorder (!%p164_p2), %s1587_s21, 127 }
   0xb   : > { %v1935_v0 = vld [vmem:[%s2442_s1 + $0x30] sm:$0x3f]   ;;  %vm578_vm0 = vcmask 1045504   ;;  %v1936_v1 = vld [vmem:[%s2442_s1 + $0x28] sm:$0xff]   ;;  %v1937_v3 = vld [vmem:[%s2442_s1 + $0x20] sm:$0xff]   ;;  %s2447_s21 = smov (!%p190_p3, %s1587_s21), 127 }
   0xc   : > { %1925 = vmatprep.subr.msk.bf16.mxu0 %vm578_vm0, %v1935_v0  ;;  %1926 = vmatprep.subr.msk.bf16.mxu1 %vm578_vm0, %v1935_v0  ;;  %v580_v2 = vsel %vm578_vm0, %v1935_v0, 0  ;;  %v1938_v4 = vld [vmem:[%s2442_s1 + $0x18] sm:$0xff]   ;;  %s1588_s26 = sshll.u32 %s2447_s21, 2  ;;  %vm481_vm1 = vcmask 883712   ;;  %v1939_v7 = vld [vmem:[%s2442_s1 + $0x10] sm:$0xff]   ;;  %v1940_v8 = vld [vmem:[%s2442_s1 + $0x8] sm:$0xff]  }
   0xd   : > { %1834 = vmatpush3.bf16.msra.mxu0 %v580_v2  ;;  %1918 = vmatpush3.bf16.msra.mxu1 %v580_v2  ;;  %s2035_s29 = scalar_lea.vmem %s2441_s0, %s1588_s26  ;;  %v1941_v9 = vld [vmem:[%s2442_s1] sm:$0xff]   ;;  %vm1461_vm2 = vcmask 60416   ;;  %s2135_s17 = scalar_lea.vmem %s2445_s4, %s1588_s26 }
   0xe   : > { %1835 = vmatprep.subr.bf16.mxu0 %v1936_v1  ;;  %1912 = vmatprep.subr.bf16.mxu1 %v1936_v1  ;;  %v1942_v5 = vld [vmem:[%s2035_s29] sm:$0xff]   ;;  %v1944_v10 = vld [vmem:[%s2035_s29 + $0x8] sm:$0xff]   ;;  %v1946_v12 = vld [vmem:[%s2035_s29 + $0x10] sm:$0xff]  }
   0xf   : > { %v1943_v6 = vld [vmem:[%s2035_s29 + $0x80] sm:$0xff]   ;;  %1847 = vmatprep.mubr.msk.bf16.mxu0 %vm481_vm1, %v1942_v5  ;;  %v1945_v11 = vld [vmem:[%s2035_s29 + $0x88] sm:$0xff]   ;;  %v1947_v13 = vld [vmem:[%s2035_s29 + $0x90] sm:$0xff]  }
  0x10   : > { %1879 = vmatprep.mubr.msk.bf16.mxu1 %vm481_vm1, %v1943_v6  ;;  %v1948_v14 = vld [vmem:[%s2035_s29 + $0x18] sm:$0xff]   ;;  %v1950_v16 = vld [vmem:[%s2035_s29 + $0x20] sm:$0xff]   ;;  %v1952_v18 = vld [vmem:[%s2035_s29 + $0x28] sm:$0xff]  }
  0x11   : > { %1836 = vmatpush3.bf16.msra.mxu0 %v1936_v1  ;;  %1919 = vmatpush3.bf16.msra.mxu1 %v1936_v1  ;;  %v1949_v15 = vld [vmem:[%s2035_s29 + $0x98] sm:$0xff]   ;;  %v1951_v17 = vld [vmem:[%s2035_s29 + $0xa0] sm:$0xff]   ;;  %v1953_v19 = vld [vmem:[%s2035_s29 + $0xa8] sm:$0xff]  }
  0x12   : > { %1837 = vmatprep.subr.bf16.mxu0 %v1937_v3  ;;  %1913 = vmatprep.subr.bf16.mxu1 %v1937_v3  ;;  %v1954_v20 = vld [vmem:[%s2035_s29 + $0x30] sm:$0xff]   ;;  %v1956_v22 = vld [vmem:[%s2035_s29 + $0x38] sm:$0xff]   ;;  %v1958_v24 = vld [vmem:[%s2035_s29 + $0x40] sm:$0xff]  }
  0x13   : > { %v1955_v21 = vld [vmem:[%s2035_s29 + $0xb0] sm:$0xff]   ;;  %v1957_v23 = vld [vmem:[%s2035_s29 + $0xb8] sm:$0xff]   ;;  %v1959_v25 = vld [vmem:[%s2035_s29 + $0xc0] sm:$0xff]  }
  0x14   : > { %v1960_v26 = vld [vmem:[%s2035_s29 + $0x48] sm:$0xff]   ;;  %v1962_v28 = vld [vmem:[%s2035_s29 + $0x50] sm:$0xff]   ;;  %v1964_v30 = vld [vmem:[%s2035_s29 + $0x58] sm:$0xff]  }
  0x15   : > { %1838 = vmatpush3.bf16.msra.mxu0 %v1937_v3  ;;  %1920 = vmatpush3.bf16.msra.mxu1 %v1937_v3  ;;  %v1961_v27 = vld [vmem:[%s2035_s29 + $0xc8] sm:$0xff]   ;;  %v1963_v29 = vld [vmem:[%s2035_s29 + $0xd0] sm:$0xff]   ;;  %v1965_v31 = vld [vmem:[%s2035_s29 + $0xd8] sm:$0xff]  }
  0x16   : > { %1839 = vmatprep.subr.bf16.mxu0 %v1938_v4  ;;  %1914 = vmatprep.subr.bf16.mxu1 %v1938_v4  ;;  %v1966_v32 = vld [vmem:[%s2035_s29 + $0x60] sm:$0xff]   ;;  %v1968_v34 = vld [vmem:[%s2035_s29 + $0x68] sm:$0xff]   ;;  %v1970_v36 = vld [vmem:[%s2035_s29 + $0x70] sm:$0xff]  }
  0x17   : > { %v1967_v33 = vld [vmem:[%s2035_s29 + $0xe0] sm:$0xff]   ;;  %v1969_v35 = vld [vmem:[%s2035_s29 + $0xe8] sm:$0xff]   ;;  %v1971_v37 = vld [vmem:[%s2035_s29 + $0xf0] sm:$0xff]  }
  0x18   : > { %v1972_v38 = vld [vmem:[%s2035_s29 + $0x78] sm:$0xff]   ;;  %v2113_v40 = vld [vmem:[%s2443_s2] ss:$0 sm:$0xff] }
  0x19   : > { %1840 = vmatpush3.bf16.msra.mxu0 %v1938_v4  ;;  %1921 = vmatpush3.bf16.msra.mxu1 %v1938_v4  ;;  %v1973_v39 = vld [vmem:[%s2035_s29 + $0xf8] sm:$0xff]   ;;  %v2118_v42 = vld [vmem:[%s2444_s3] ss:$0 sm:$0xff] }
  0x1a   : > { %1841 = vmatprep.subr.bf16.mxu0 %v1939_v7  ;;  %1915 = vmatprep.subr.bf16.mxu1 %v1939_v7 }
  0x1d   : > { %1842 = vmatpush3.bf16.msra.mxu0 %v1939_v7  ;;  %1922 = vmatpush3.bf16.msra.mxu1 %v1939_v7 }
  0x1e   : > { %1843 = vmatprep.subr.bf16.mxu0 %v1940_v8  ;;  %1916 = vmatprep.subr.bf16.mxu1 %v1940_v8 }
  0x21   : > { %1844 = vmatpush3.bf16.msra.mxu0 %v1940_v8  ;;  %1923 = vmatpush3.bf16.msra.mxu1 %v1940_v8 }
  0x22   : > { %1845 = vmatprep.subr.bf16.mxu0 %v1941_v9  ;;  %1917 = vmatprep.subr.bf16.mxu1 %v1941_v9 }
  0x25   : > { %1846 = vmatpush3.bf16.msra.mxu0 %v1941_v9  ;;  %1924 = vmatpush3.bf16.msra.mxu1 %v1941_v9 }
  0x28   : > { %1848 = vmatmul.mubr.msk.bf16.vlgmr.msra.gmra.mxu0 %vm481_vm1, %v1944_v10  ;;  %1880 = vmatmul.mubr.msk.bf16.vlgmr.msra.gmra.mxu1 %vm481_vm1, %v1945_v11 }
  0x29   : > { %1851 = vmatprep.mubr.msk.bf16.mxu0 %vm481_vm1, %v1946_v12  ;;  %1883 = vmatprep.mubr.msk.bf16.mxu1 %vm481_vm1, %v1947_v13 }
  0x30   : > { %1852 = vmatmul.mubr.msk.bf16.gmra.mxu0 %vm481_vm1, %v1948_v14  ;;  %1884 = vmatmul.mubr.msk.bf16.gmra.mxu1 %vm481_vm1, %v1949_v15 }
  0x31   : > { %1855 = vmatprep.mubr.msk.bf16.mxu0 %vm481_vm1, %v1950_v16  ;;  %1887 = vmatprep.mubr.msk.bf16.mxu1 %vm481_vm1, %v1951_v17 }
  0x38   : > { %1856 = vmatmul.mubr.msk.bf16.gmra.mxu0 %vm481_vm1, %v1952_v18  ;;  %1888 = vmatmul.mubr.msk.bf16.gmra.mxu1 %vm481_vm1, %v1953_v19 }
  0x39   : > { %1859 = vmatprep.mubr.msk.bf16.mxu0 %vm481_vm1, %v1954_v20  ;;  %1891 = vmatprep.mubr.msk.bf16.mxu1 %vm481_vm1, %v1955_v21 }
  0x40   : > { %1860 = vmatmul.mubr.msk.bf16.gmra.mxu0 %vm481_vm1, %v1956_v22  ;;  %1892 = vmatmul.mubr.msk.bf16.gmra.mxu1 %vm481_vm1, %v1957_v23 }
  0x41   : > { %1863 = vmatprep.mubr.msk.bf16.mxu0 %vm481_vm1, %v1958_v24  ;;  %1895 = vmatprep.mubr.msk.bf16.mxu1 %vm481_vm1, %v1959_v25 }
  0x48   : > { %1864 = vmatmul.mubr.msk.bf16.gmra.mxu0 %vm481_vm1, %v1960_v26  ;;  %1896 = vmatmul.mubr.msk.bf16.gmra.mxu1 %vm481_vm1, %v1961_v27 }
  0x49   : > { %1867 = vmatprep.mubr.msk.bf16.mxu0 %vm481_vm1, %v1962_v28  ;;  %1899 = vmatprep.mubr.msk.bf16.mxu1 %vm481_vm1, %v1963_v29 }
  0x50   : > { %1868 = vmatmul.mubr.msk.bf16.gmra.mxu0 %vm481_vm1, %v1964_v30  ;;  %1900 = vmatmul.mubr.msk.bf16.gmra.mxu1 %vm481_vm1, %v1965_v31 }
  0x51   : > { %1871 = vmatprep.mubr.msk.bf16.mxu0 %vm481_vm1, %v1966_v32  ;;  %1903 = vmatprep.mubr.msk.bf16.mxu1 %vm481_vm1, %v1967_v33 }
  0x58   : > { %1872 = vmatmul.mubr.msk.bf16.gmra.mxu0 %vm481_vm1, %v1968_v34  ;;  %1904 = vmatmul.mubr.msk.bf16.gmra.mxu1 %vm481_vm1, %v1969_v35 }
  0x59   : > { %1875 = vmatprep.mubr.msk.bf16.mxu0 %vm481_vm1, %v1970_v36  ;;  %1907 = vmatprep.mubr.msk.bf16.mxu1 %vm481_vm1, %v1971_v37 }
  0x60   : > { %1876 = vmatmul.mubr.msk.bf16.gmra.mxu0 %vm481_vm1, %v1972_v38  ;;  %1908 = vmatmul.mubr.msk.bf16.gmra.mxu1 %vm481_vm1, %v1973_v39 }
  0xe8   : > { %v1849_v41 = vpop.f32.mrf.mxu0  ;;  %v1881_v43 = vpop.f32.mrf.mxu1 }
  0xe9   : > { %v880_v44 = vmul.f32 %v1849_v41, %v2113_v40  ;;  %v912_v45 = vmul.f32 %v1881_v43, %v2113_v40 }
  0xea   : > { %v616_v46 = vpop.f32.mrf.mxu0  ;;  %v744_v47 = vpop.f32.mrf.mxu1 }
  0xeb   : > { %v951_v48 = vadd.f32 %v2118_v42, %v880_v44  ;;  %v983_v49 = vadd.f32 %v2118_v42, %v912_v45  ;;  %v878_v50 = vmul.f32 %v2113_v40, %v616_v46  ;;  %v910_v51 = vmul.f32 %v2113_v40, %v744_v47 }
  0xec   : > { %v1850_v52 = vpop.f32.mrf.mxu0  ;;  %v1882_v53 = vpop.f32.mrf.mxu1 }
  0xed   : > { %vm1015_vm3 = vcmp.gt.f32.partialorder %v951_v48, 0.0  ;;  %v1079_v54 = vmul.f32 0.01, %v951_v48  ;;  %vm1047_vm4 = vcmp.gt.f32.partialorder %v983_v49, 0.0  ;;  %v1111_v55 = vmul.f32 0.01, %v983_v49 }
  0xee   : > { %v949_v56 = vadd.f32 %v2118_v42, %v878_v50  ;;  %v981_v57 = vadd.f32 %v2118_v42, %v910_v51  ;;  %v881_v58 = vmul.f32 %v1850_v52, %v2113_v40  ;;  %v913_v59 = vmul.f32 %v1882_v53, %v2113_v40  ;;  %v619_v60 = vpop.f32.mrf.mxu0  ;;  %v747_v61 = vpop.f32.mrf.mxu1 }
  0xef   : > { %v1143_v62 = vsel %vm1015_vm3, %v951_v48, %v1079_v54  ;;  %v1175_v63 = vsel %vm1047_vm4, %v983_v49, %v1111_v55  ;;  %v879_v0 = vmul.f32 %v2113_v40, %v619_v60  ;;  %v911_v1 = vmul.f32 %v2113_v40, %v747_v61 }
  0xf0   : > { %v1732_v2 = vpack.c.bf16 %v1143_v62, %v1143_v62  ;;  %v1764_v3 = vpack.c.bf16 %v1175_v63, %v1175_v63  ;;  %vm1013_vm5 = vcmp.gt.f32.partialorder %v949_v56, 0.0  ;;  %v1077_v4 = vmul.f32 0.01, %v949_v56  ;;  %v1853_v5 = vpop.f32.mrf.mxu0  ;;  %v1885_v6 = vpop.f32.mrf.mxu1 }
  0xf1   : > { %vm1045_vm6 = vcmp.gt.f32.partialorder %v981_v57, 0.0  ;;  %v1109_v7 = vmul.f32 0.01, %v981_v57  ;;  %v952_v8 = vadd.f32 %v2118_v42, %v881_v58  ;;  %v984_v9 = vadd.f32 %v2118_v42, %v913_v59 }
  0xf2   : > { %1464 = vst.msk [vmem:[%s2135_s17 + $0x8] sm:$0xf] %vm1461_vm2, %v1732_v2  ;;  %1496 = vst.msk [vmem:[%s2135_s17 + $0x88] sm:$0xf] %vm1461_vm2, %v1764_v3  ;;  %v1141_v10 = vsel %vm1013_vm5, %v949_v56, %v1077_v4  ;;  %v950_v11 = vadd.f32 %v2118_v42, %v879_v0  ;;  %v982_v12 = vadd.f32 %v2118_v42, %v911_v1  ;;  %v632_v14 = vpop.f32.mrf.mxu0  ;;  %v760_v15 = vpop.f32.mrf.mxu1 }
  0xf3   : > { %v884_v13 = vmul.f32 %v1853_v5, %v2113_v40  ;;  %v1730_v16 = vpack.c.bf16 %v1141_v10, %v1141_v10  ;;  %v1173_v17 = vsel %vm1045_vm6, %v981_v57, %v1109_v7  ;;  %vm1016_vm7 = vcmp.gt.f32.partialorder %v952_v8, 0.0 }
  0xf4   : > { %v1080_v18 = vmul.f32 0.01, %v952_v8  ;;  %v1762_v19 = vpack.c.bf16 %v1173_v17, %v1173_v17  ;;  %vm1048_vm8 = vcmp.gt.f32.partialorder %v984_v9, 0.0  ;;  %v1112_v20 = vmul.f32 0.01, %v984_v9  ;;  %v1854_v21 = vpop.f32.mrf.mxu0  ;;  %v1886_v22 = vpop.f32.mrf.mxu1 }
  0xf5   : > { %vm1014_vm9 = vcmp.gt.f32.partialorder %v950_v11, 0.0  ;;  %1462 = vst.msk [vmem:[%s2135_s17] sm:$0xf] %vm1461_vm2, %v1730_v16  ;;  %v1078_v24 = vmul.f32 0.01, %v950_v11  ;;  %vm1046_vm10 = vcmp.gt.f32.partialorder %v982_v12, 0.0  ;;  %v955_v28 = vadd.f32 %v2118_v42, %v884_v13 }
  0xf6   : > { %v1144_v23 = vsel %vm1016_vm7, %v952_v8, %v1080_v18  ;;  %v1110_v25 = vmul.f32 0.01, %v982_v12  ;;  %1494 = vst.msk [vmem:[%s2135_s17 + $0x80] sm:$0xf] %vm1461_vm2, %v1762_v19  ;;  %v1176_v27 = vsel %vm1048_vm8, %v984_v9, %v1112_v20  ;;  %v916_v29 = vmul.f32 %v1885_v6, %v2113_v40  ;;  %v635_v30 = vpop.f32.mrf.mxu0  ;;  %v763_v31 = vpop.f32.mrf.mxu1 }
  0xf7   : > { %v1733_v26 = vpack.c.bf16 %v1144_v23, %v1144_v23  ;;  %v1765_v32 = vpack.c.bf16 %v1176_v27, %v1176_v27  ;;  %v1142_v33 = vsel %vm1014_vm9, %v950_v11, %v1078_v24  ;;  %v882_v35 = vmul.f32 %v2113_v40, %v632_v14 }
  0xf8   : > { %v1174_v34 = vsel %vm1046_vm10, %v982_v12, %v1110_v25  ;;  %v1731_v36 = vpack.c.bf16 %v1142_v33, %v1142_v33  ;;  %vm1019_vm11 = vcmp.gt.f32.partialorder %v955_v28, 0.0  ;;  %v1083_v38 = vmul.f32 0.01, %v955_v28  ;;  %v1857_v39 = vpop.f32.mrf.mxu0  ;;  %v1889_v41 = vpop.f32.mrf.mxu1 }
  0xf9   : > { %1465 = vst.msk [vmem:[%s2135_s17 + $0xc] sm:$0xf] %vm1461_vm2, %v1733_v26  ;;  %v1763_v37 = vpack.c.bf16 %v1174_v34, %v1174_v34  ;;  %1497 = vst.msk [vmem:[%s2135_s17 + $0x8c] sm:$0xf] %vm1461_vm2, %v1765_v32  ;;  %v987_v43 = vadd.f32 %v2118_v42, %v916_v29  ;;  %v953_v44 = vadd.f32 %v2118_v42, %v882_v35 }
  0xfa   : > { %v914_v45 = vmul.f32 %v2113_v40, %v760_v15  ;;  %v885_v46 = vmul.f32 %v1854_v21, %v2113_v40  ;;  %1463 = vst.msk [vmem:[%s2135_s17 + $0x4] sm:$0xf] %vm1461_vm2, %v1731_v36  ;;  %v1147_v47 = vsel %vm1019_vm11, %v955_v28, %v1083_v38  ;;  %v917_v48 = vmul.f32 %v1886_v22, %v2113_v40  ;;  %v648_v51 = vpop.f32.mrf.mxu0  ;;  %v776_v52 = vpop.f32.mrf.mxu1 }
  0xfb   : > { %1495 = vst.msk [vmem:[%s2135_s17 + $0x84] sm:$0xf] %vm1461_vm2, %v1763_v37  ;;  %v883_v49 = vmul.f32 %v2113_v40, %v635_v30  ;;  %v915_v50 = vmul.f32 %v2113_v40, %v763_v31  ;;  %v1736_v53 = vpack.c.bf16 %v1147_v47, %v1147_v47  ;;  %vm1051_vm12 = vcmp.gt.f32.partialorder %v987_v43, 0.0 }
  0xfc   : > { %v1115_v54 = vmul.f32 0.01, %v987_v43  ;;  %vm1017_vm13 = vcmp.gt.f32.partialorder %v953_v44, 0.0  ;;  %v1081_v55 = vmul.f32 0.01, %v953_v44  ;;  %v985_v56 = vadd.f32 %v2118_v42, %v914_v45  ;;  %v1858_v59 = vpop.f32.mrf.mxu0  ;;  %v1890_v60 = vpop.f32.mrf.mxu1 }
  0xfd   : > { %v956_v57 = vadd.f32 %v2118_v42, %v885_v46  ;;  %v988_v58 = vadd.f32 %v2118_v42, %v917_v48  ;;  %1468 = vst.msk [vmem:[%s2135_s17 + $0x18] sm:$0xf] %vm1461_vm2, %v1736_v53  ;;  %v954_v62 = vadd.f32 %v2118_v42, %v883_v49  ;;  %v986_v63 = vadd.f32 %v2118_v42, %v915_v50 }
  0xfe   : > { %v1179_v61 = vsel %vm1051_vm12, %v987_v43, %v1115_v54  ;;  %v888_v0 = vmul.f32 %v1857_v39, %v2113_v40  ;;  %v1145_v2 = vsel %vm1017_vm13, %v953_v44, %v1081_v55  ;;  %vm1049_vm14 = vcmp.gt.f32.partialorder %v985_v56, 0.0  ;;  %v651_v4 = vpop.f32.mrf.mxu0  ;;  %v779_v5 = vpop.f32.mrf.mxu1 }
  0xff   : > { %v1768_v1 = vpack.c.bf16 %v1179_v61, %v1179_v61  ;;  %v1113_v3 = vmul.f32 0.01, %v985_v56  ;;  %v1734_v6 = vpack.c.bf16 %v1145_v2, %v1145_v2  ;;  %vm1020_vm15 = vcmp.gt.f32.partialorder %v956_v57, 0.0 }
 0x100   : > { %v1084_v7 = vmul.f32 0.01, %v956_v57  ;;  %vm1052_vm0 = vcmp.gt.f32.partialorder %v988_v58, 0.0  ;;  %v1116_v9 = vmul.f32 0.01, %v988_v58  ;;  %vm1018_vm1 = vcmp.gt.f32.partialorder %v954_v62, 0.0  ;;  %v2181_v11 = vpop.f32.mrf.mxu0  ;;  %v2183_v12 = vpop.f32.mrf.mxu1 }
 0x101   : > { %1500 = vst.msk [vmem:[%s2135_s17 + $0x98] sm:$0xf] %vm1461_vm2, %v1768_v1  ;;  %v1177_v8 = vsel %vm1049_vm14, %v985_v56, %v1113_v3  ;;  %v1082_v10 = vmul.f32 0.01, %v954_v62  ;;  %1466 = vst.msk [vmem:[%s2135_s17 + $0x10] sm:$0xf] %vm1461_vm2, %v1734_v6  ;;  %v959_v19 = vadd.f32 %v2118_v42, %v888_v0  ;;  %v920_v25 = vmul.f32 %v1889_v41, %v2113_v40 }
 0x102   : > { %v1766_v13 = vpack.c.bf16 %v1177_v8, %v1177_v8  ;;  %v1148_v14 = vsel %vm1020_vm15, %v956_v57, %v1084_v7  ;;  %vm1050_vm3 = vcmp.gt.f32.partialorder %v986_v63, 0.0  ;;  %v1114_v15 = vmul.f32 0.01, %v986_v63  ;;  %v2188_v20 = vpop.f32.mrf.mxu0  ;;  %v2190_v21 = vpop.f32.mrf.mxu1 }
 0x103   : > { %v1737_v16 = vpack.c.bf16 %v1148_v14, %v1148_v14  ;;  %v1180_v17 = vsel %vm1052_vm0, %v988_v58, %v1116_v9  ;;  %v1146_v18 = vsel %vm1018_vm1, %v954_v62, %v1082_v10  ;;  %vm1023_vm4 = vcmp.gt.f32.partialorder %v959_v19, 0.0 }
 0x104   : > { %1498 = vst.msk [vmem:[%s2135_s17 + $0x90] sm:$0xf] %vm1461_vm2, %v1766_v13  ;;  %v1769_v22 = vpack.c.bf16 %v1180_v17, %v1180_v17  ;;  %v1735_v23 = vpack.c.bf16 %v1146_v18, %v1146_v18  ;;  %v1178_v24 = vsel %vm1050_vm3, %v986_v63, %v1114_v15  ;;  %v1087_v27 = vmul.f32 0.01, %v959_v19  ;;  %v2198_v29 = vpop.f32.mrf.mxu0  ;;  %v2200_v30 = vpop.f32.mrf.mxu1 }
 0x105   : > { %1469 = vst.msk [vmem:[%s2135_s17 + $0x1c] sm:$0xf] %vm1461_vm2, %v1737_v16  ;;  %v1767_v26 = vpack.c.bf16 %v1178_v24, %v1178_v24  ;;  %v886_v28 = vmul.f32 %v2113_v40, %v648_v51  ;;  %v991_v31 = vadd.f32 %v2118_v42, %v920_v25  ;;  %v918_v32 = vmul.f32 %v2113_v40, %v776_v52 }
 0x106   : > { %1501 = vst.msk [vmem:[%s2135_s17 + $0x9c] sm:$0xf] %vm1461_vm2, %v1769_v22  ;;  %1467 = vst.msk [vmem:[%s2135_s17 + $0x14] sm:$0xf] %vm1461_vm2, %v1735_v23  ;;  %v889_v33 = vmul.f32 %v1858_v59, %v2113_v40  ;;  %v921_v34 = vmul.f32 %v1890_v60, %v2113_v40  ;;  %v1151_v35 = vsel %vm1023_vm4, %v959_v19, %v1087_v27  ;;  %v2215_v39 = vpop.f32.mrf.mxu0  ;;  %v2217_v41 = vpop.f32.mrf.mxu1 }
 0x107   : > { %1499 = vst.msk [vmem:[%s2135_s17 + $0x94] sm:$0xf] %vm1461_vm2, %v1767_v26  ;;  %v957_v36 = vadd.f32 %v2118_v42, %v886_v28  ;;  %v887_v37 = vmul.f32 %v2113_v40, %v651_v4  ;;  %v919_v38 = vmul.f32 %v2113_v40, %v779_v5  ;;  %v1740_v43 = vpack.c.bf16 %v1151_v35, %v1151_v35 }
 0x108   : > { %vm1055_vm5 = vcmp.gt.f32.partialorder %v991_v31, 0.0  ;;  %v1119_v44 = vmul.f32 0.01, %v991_v31  ;;  %v989_v45 = vadd.f32 %v2118_v42, %v918_v32  ;;  %v960_v47 = vadd.f32 %v2118_v42, %v889_v33  ;;  %v2222_v49 = vpop.f32.mrf.mxu0  ;;  %v2224_v50 = vpop.f32.mrf.mxu1 }
 0x109   : > { %vm1021_vm6 = vcmp.gt.f32.partialorder %v957_v36, 0.0  ;;  %v1085_v46 = vmul.f32 0.01, %v957_v36  ;;  %v992_v48 = vadd.f32 %v2118_v42, %v921_v34  ;;  %1472 = vst.msk [vmem:[%s2135_s17 + $0x28] sm:$0xf] %vm1461_vm2, %v1740_v43  ;;  %v958_v53 = vadd.f32 %v2118_v42, %v887_v37 }
 0x10a   : > { %v1183_v51 = vsel %vm1055_vm5, %v991_v31, %v1119_v44  ;;  %vm1053_vm7 = vcmp.gt.f32.partialorder %v989_v45, 0.0  ;;  %v1117_v52 = vmul.f32 0.01, %v989_v45  ;;  %vm1024_vm8 = vcmp.gt.f32.partialorder %v960_v47, 0.0  ;;  %v2229_v57 = vpop.f32.mrf.mxu0  ;;  %v2231_v58 = vpop.f32.mrf.mxu1 }
 0x10b   : > { %v1772_v54 = vpack.c.bf16 %v1183_v51, %v1183_v51  ;;  %v1149_v55 = vsel %vm1021_vm6, %v957_v36, %v1085_v46  ;;  %v1088_v56 = vmul.f32 0.01, %v960_v47  ;;  %vm1056_vm9 = vcmp.gt.f32.partialorder %v992_v48, 0.0 }
 0x10c   : > { %v1738_v59 = vpack.c.bf16 %v1149_v55, %v1149_v55  ;;  %v1181_v60 = vsel %vm1053_vm7, %v989_v45, %v1117_v52  ;;  %v1120_v61 = vmul.f32 0.01, %v992_v48  ;;  %vm1022_vm10 = vcmp.gt.f32.partialorder %v958_v53, 0.0  ;;  %v2246_v9 = vpop.f32.mrf.mxu0  ;;  %v2248_v10 = vpop.f32.mrf.mxu1 }
 0x10d   : > { %1504 = vst.msk [vmem:[%s2135_s17 + $0xa8] sm:$0xf] %vm1461_vm2, %v1772_v54  ;;  %v1770_v62 = vpack.c.bf16 %v1181_v60, %v1181_v60  ;;  %v1152_v63 = vsel %vm1024_vm8, %v960_v47, %v1088_v56  ;;  %v1086_v0 = vmul.f32 0.01, %v958_v53  ;;  %v990_v3 = vadd.f32 %v2118_v42, %v919_v38 }
 0x10e   : > { %1470 = vst.msk [vmem:[%s2135_s17 + $0x20] sm:$0xf] %vm1461_vm2, %v1738_v59  ;;  %v1741_v1 = vpack.c.bf16 %v1152_v63, %v1152_v63  ;;  %v1184_v2 = vsel %vm1056_vm9, %v992_v48, %v1120_v61  ;;  %v892_v4 = vmul.f32 %v2181_v11, %v2113_v40  ;;  %v924_v7 = vmul.f32 %v2183_v12, %v2113_v40  ;;  %v2265_v24 = vpop.f32.mrf.mxu0 }
 0x10f   : > { %1502 = vst.msk [vmem:[%s2135_s17 + $0xa0] sm:$0xf] %vm1461_vm2, %v1770_v62  ;;  %v1773_v5 = vpack.c.bf16 %v1184_v2, %v1184_v2  ;;  %v1150_v6 = vsel %vm1022_vm10, %v958_v53, %v1086_v0  ;;  %v890_v8 = vmul.f32 %v2113_v40, %v2188_v20  ;;  %vm1054_vm11 = vcmp.gt.f32.partialorder %v990_v3, 0.0 }
 0x110   : > { %1473 = vst.msk [vmem:[%s2135_s17 + $0x2c] sm:$0xf] %vm1461_vm2, %v1741_v1  ;;  %v1739_v13 = vpack.c.bf16 %v1150_v6, %v1150_v6  ;;  %v1118_v11 = vmul.f32 0.01, %v990_v3  ;;  %v963_v14 = vadd.f32 %v2118_v42, %v892_v4  ;;  %v995_v15 = vadd.f32 %v2118_v42, %v924_v7  ;;  %v1869_v38 = vpop.f32.mrf.mxu0 }
 0x111   : > { %1505 = vst.msk [vmem:[%s2135_s17 + $0xac] sm:$0xf] %vm1461_vm2, %v1773_v5  ;;  %v961_v12 = vadd.f32 %v2118_v42, %v890_v8  ;;  %v922_v16 = vmul.f32 %v2113_v40, %v2190_v21  ;;  %v893_v17 = vmul.f32 %v2198_v29, %v2113_v40  ;;  %v925_v20 = vmul.f32 %v2200_v30, %v2113_v40  ;;  %v2267_v21 = vpop.f32.mrf.mxu1 }
 0x112   : > { %1471 = vst.msk [vmem:[%s2135_s17 + $0x24] sm:$0xf] %vm1461_vm2, %v1739_v13  ;;  %v1182_v18 = vsel %vm1054_vm11, %v990_v3, %v1118_v11  ;;  %vm1027_vm12 = vcmp.gt.f32.partialorder %v963_v14, 0.0  ;;  %v1091_v19 = vmul.f32 0.01, %v963_v14  ;;  %vm1059_vm13 = vcmp.gt.f32.partialorder %v995_v15, 0.0  ;;  %v696_v61 = vpop.f32.mrf.mxu0 }
 0x113   : > { %v1771_v22 = vpack.c.bf16 %v1182_v18, %v1182_v18  ;;  %v1123_v23 = vmul.f32 0.01, %v995_v15  ;;  %vm1025_vm14 = vcmp.gt.f32.partialorder %v961_v12, 0.0  ;;  %v1089_v26 = vmul.f32 0.01, %v961_v12  ;;  %v2278_v43 = vpop.f32.mrf.mxu1 }
 0x114   : > { %v1155_v25 = vsel %vm1027_vm12, %v963_v14, %v1091_v19  ;;  %v993_v27 = vadd.f32 %v2118_v42, %v922_v16  ;;  %v964_v28 = vadd.f32 %v2118_v42, %v893_v17  ;;  %v996_v31 = vadd.f32 %v2118_v42, %v925_v20  ;;  %v1870_v8 = vpop.f32.mrf.mxu0 }
 0x115   : > { %1503 = vst.msk [vmem:[%s2135_s17 + $0xa4] sm:$0xf] %vm1461_vm2, %v1771_v22  ;;  %v1744_v29 = vpack.c.bf16 %v1155_v25, %v1155_v25  ;;  %v1187_v30 = vsel %vm1059_vm13, %v995_v15, %v1123_v23  ;;  %v891_v32 = vmul.f32 %v2113_v40, %v2215_v39  ;;  %v1153_v34 = vsel %vm1025_vm14, %v961_v12, %v1089_v26 }
 0x116   : > { %v1776_v33 = vpack.c.bf16 %v1187_v30, %v1187_v30  ;;  %vm1057_vm15 = vcmp.gt.f32.partialorder %v993_v27, 0.0  ;;  %v1121_v35 = vmul.f32 0.01, %v993_v27  ;;  %v1742_v36 = vpack.c.bf16 %v1153_v34, %v1153_v34  ;;  %v699_v25 = vpop.f32.mrf.mxu0 }
 0x117   : > { %1476 = vst.msk [vmem:[%s2135_s17 + $0x38] sm:$0xf] %vm1461_vm2, %v1744_v29  ;;  %vm1028_vm0 = vcmp.gt.f32.partialorder %v964_v28, 0.0  ;;  %v1092_v37 = vmul.f32 0.01, %v964_v28  ;;  %vm1060_vm1 = vcmp.gt.f32.partialorder %v996_v31, 0.0  ;;  %v962_v39 = vadd.f32 %v2118_v42, %v891_v32 }
 0x118   : > { %1508 = vst.msk [vmem:[%s2135_s17 + $0xb8] sm:$0xf] %vm1461_vm2, %v1776_v33  ;;  %v1185_v44 = vsel %vm1057_vm15, %v993_v27, %v1121_v35  ;;  %v1124_v45 = vmul.f32 0.01, %v996_v31  ;;  %v923_v46 = vmul.f32 %v2113_v40, %v2217_v41  ;;  %1474 = vst.msk [vmem:[%s2135_s17 + $0x30] sm:$0xf] %vm1461_vm2, %v1742_v36  ;;  %v896_v51 = vmul.f32 %v2222_v49, %v2113_v40  ;;  %v824_v49 = vpop.f32.mrf.mxu1 }
 0x119   : > { %v1774_v47 = vpack.c.bf16 %v1185_v44, %v1185_v44  ;;  %v1156_v48 = vsel %vm1028_vm0, %v964_v28, %v1092_v37  ;;  %v928_v52 = vmul.f32 %v2224_v50, %v2113_v40  ;;  %vm1026_vm3 = vcmp.gt.f32.partialorder %v962_v39, 0.0  ;;  %v1873_v44 = vpop.f32.mrf.mxu0 }
 0x11a   : > { %v1745_v53 = vpack.c.bf16 %v1156_v48, %v1156_v48  ;;  %v1188_v54 = vsel %vm1060_vm1, %v996_v31, %v1124_v45  ;;  %v1090_v55 = vmul.f32 0.01, %v962_v39  ;;  %v994_v41 = vadd.f32 %v2118_v42, %v923_v46 }
 0x11b   : > { %1506 = vst.msk [vmem:[%s2135_s17 + $0xb0] sm:$0xf] %vm1461_vm2, %v1774_v47  ;;  %v1777_v56 = vpack.c.bf16 %v1188_v54, %v1188_v54  ;;  %v967_v59 = vadd.f32 %v2118_v42, %v896_v51  ;;  %v999_v60 = vadd.f32 %v2118_v42, %v928_v52  ;;  %v894_v62 = vmul.f32 %v2113_v40, %v2229_v57 }
 0x11c   : > { %1477 = vst.msk [vmem:[%s2135_s17 + $0x3c] sm:$0xf] %vm1461_vm2, %v1745_v53  ;;  %v1154_v50 = vsel %vm1026_vm3, %v962_v39, %v1090_v55  ;;  %v926_v63 = vmul.f32 %v2113_v40, %v2231_v58  ;;  %v897_v0 = vmul.f32 %v2246_v9, %v2113_v40  ;;  %vm1058_vm4 = vcmp.gt.f32.partialorder %v994_v41, 0.0  ;;  %v2313_v9 = vpop.f32.mrf.mxu1 }
 0x11d   : > { %1509 = vst.msk [vmem:[%s2135_s17 + $0xbc] sm:$0xf] %vm1461_vm2, %v1777_v56  ;;  %v1743_v1 = vpack.c.bf16 %v1154_v50, %v1154_v50  ;;  %v1122_v2 = vmul.f32 0.01, %v994_v41  ;;  %vm1031_vm5 = vcmp.gt.f32.partialorder %v967_v59, 0.0  ;;  %vm1063_vm6 = vcmp.gt.f32.partialorder %v999_v60, 0.0 }
 0x11e   : > { %v1095_v3 = vmul.f32 0.01, %v967_v59  ;;  %v1127_v4 = vmul.f32 0.01, %v999_v60  ;;  %v965_v5 = vadd.f32 %v2118_v42, %v894_v62  ;;  %v997_v58 = vadd.f32 %v2118_v42, %v926_v63  ;;  %v827_v26 = vpop.f32.mrf.mxu1 }
 0x11f   : > { %1475 = vst.msk [vmem:[%s2135_s17 + $0x34] sm:$0xf] %vm1461_vm2, %v1743_v1  ;;  %v1186_v57 = vsel %vm1058_vm4, %v994_v41, %v1122_v2  ;;  %v968_v6 = vadd.f32 %v2118_v42, %v897_v0  ;;  %v929_v7 = vmul.f32 %v2248_v10, %v2113_v40  ;;  %v895_v20 = vmul.f32 %v2113_v40, %v2265_v24 }
 0x120   : > { %v1775_v13 = vpack.c.bf16 %v1186_v57, %v1186_v57  ;;  %v1159_v11 = vsel %vm1031_vm5, %v967_v59, %v1095_v3  ;;  %v1191_v14 = vsel %vm1063_vm6, %v999_v60, %v1127_v4  ;;  %vm1029_vm7 = vcmp.gt.f32.partialorder %v965_v5, 0.0  ;;  %v1905_v45 = vpop.f32.mrf.mxu1  ;;  %v712_v60 = vpop.f32.mrf.mxu0 }
 0x121   : > { %v1748_v15 = vpack.c.bf16 %v1159_v11, %v1159_v11  ;;  %v1780_v12 = vpack.c.bf16 %v1191_v14, %v1191_v14  ;;  %v1093_v16 = vmul.f32 0.01, %v965_v5  ;;  %vm1061_vm8 = vcmp.gt.f32.partialorder %v997_v58, 0.0 }
 0x122   : > { %1507 = vst.msk [vmem:[%s2135_s17 + $0xb4] sm:$0xf] %vm1461_vm2, %v1775_v13  ;;  %v1125_v17 = vmul.f32 0.01, %v997_v58  ;;  %vm1032_vm9 = vcmp.gt.f32.partialorder %v968_v6, 0.0  ;;  %v1000_v10 = vadd.f32 %v2118_v42, %v929_v7  ;;  %v927_v22 = vmul.f32 %v2113_v40, %v2267_v21  ;;  %v1874_v7 = vpop.f32.mrf.mxu0 }
 0x123   : > { %v1096_v18 = vmul.f32 0.01, %v968_v6  ;;  %1480 = vst.msk [vmem:[%s2135_s17 + $0x48] sm:$0xf] %vm1461_vm2, %v1748_v15  ;;  %1512 = vst.msk [vmem:[%s2135_s17 + $0xc8] sm:$0xf] %vm1461_vm2, %v1780_v12  ;;  %v1157_v19 = vsel %vm1029_vm7, %v965_v5, %v1093_v16  ;;  %v900_v23 = vmul.f32 %v1869_v38, %v2113_v40  ;;  %v966_v33 = vadd.f32 %v2118_v42, %v895_v20 }
 0x124   : > { %v1746_v27 = vpack.c.bf16 %v1157_v19, %v1157_v19  ;;  %v1189_v28 = vsel %vm1061_vm8, %v997_v58, %v1125_v17  ;;  %vm1064_vm10 = vcmp.gt.f32.partialorder %v1000_v10, 0.0  ;;  %v1128_v32 = vmul.f32 0.01, %v1000_v10 }
 0x125   : > { %v1160_v29 = vsel %vm1032_vm9, %v968_v6, %v1096_v18  ;;  %v1778_v30 = vpack.c.bf16 %v1189_v28, %v1189_v28  ;;  %v998_v24 = vadd.f32 %v2118_v42, %v927_v22  ;;  %v971_v21 = vadd.f32 %v2118_v42, %v900_v23  ;;  %v715_v23 = vpop.f32.mrf.mxu0 }
 0x126   : > { %v1749_v31 = vpack.c.bf16 %v1160_v29, %v1160_v29  ;;  %1478 = vst.msk [vmem:[%s2135_s17 + $0x40] sm:$0xf] %vm1461_vm2, %v1746_v27  ;;  %v932_v34 = vmul.f32 %v2278_v43, %v2113_v40  ;;  %v898_v35 = vmul.f32 %v2113_v40, %v696_v61  ;;  %v1192_v36 = vsel %vm1064_vm10, %v1000_v10, %v1128_v32  ;;  %v840_v61 = vpop.f32.mrf.mxu1 }
 0x127   : > { %1510 = vst.msk [vmem:[%s2135_s17 + $0xc0] sm:$0xf] %vm1461_vm2, %v1778_v30  ;;  %vm1030_vm11 = vcmp.gt.f32.partialorder %v966_v33, 0.0  ;;  %v1094_v37 = vmul.f32 0.01, %v966_v33  ;;  %v930_v38 = vmul.f32 %v2113_v40, %v824_v49  ;;  %v1781_v39 = vpack.c.bf16 %v1192_v36, %v1192_v36 }
 0x128   : > { %1481 = vst.msk [vmem:[%s2135_s17 + $0x4c] sm:$0xf] %vm1461_vm2, %v1749_v31  ;;  %vm1062_vm12 = vcmp.gt.f32.partialorder %v998_v24, 0.0  ;;  %v1126_v46 = vmul.f32 0.01, %v998_v24  ;;  %vm1035_vm13 = vcmp.gt.f32.partialorder %v971_v21, 0.0  ;;  %v1003_v48 = vadd.f32 %v2118_v42, %v932_v34 }
 0x129   : > { %v1158_v43 = vsel %vm1030_vm11, %v966_v33, %v1094_v37  ;;  %v1099_v47 = vmul.f32 0.01, %v971_v21  ;;  %v969_v51 = vadd.f32 %v2118_v42, %v898_v35  ;;  %1513 = vst.msk [vmem:[%s2135_s17 + $0xcc] sm:$0xf] %vm1461_vm2, %v1781_v39  ;;  %v1001_v54 = vadd.f32 %v2118_v42, %v930_v38  ;;  %v1877_v37 = vpop.f32.mrf.mxu0 }
 0x12a   : > { %v1747_v52 = vpack.c.bf16 %v1158_v43, %v1158_v43  ;;  %v1190_v53 = vsel %vm1062_vm12, %v998_v24, %v1126_v46  ;;  %v901_v55 = vmul.f32 %v1870_v8, %v2113_v40  ;;  %vm1067_vm14 = vcmp.gt.f32.partialorder %v1003_v48, 0.0  ;;  %v1906_v8 = vpop.f32.mrf.mxu1 }
 0x12b   : > { %v1779_v56 = vpack.c.bf16 %v1190_v53, %v1190_v53  ;;  %v1163_v41 = vsel %vm1035_vm13, %v971_v21, %v1099_v47  ;;  %v1131_v59 = vmul.f32 0.01, %v1003_v48  ;;  %vm1033_vm15 = vcmp.gt.f32.partialorder %v969_v51, 0.0 }
 0x12c   : > { %1479 = vst.msk [vmem:[%s2135_s17 + $0x44] sm:$0xf] %vm1461_vm2, %v1747_v52  ;;  %v1752_v49 = vpack.c.bf16 %v1163_v41, %v1163_v41  ;;  %v1097_v50 = vmul.f32 0.01, %v969_v51  ;;  %vm1065_vm0 = vcmp.gt.f32.partialorder %v1001_v54, 0.0  ;;  %v972_v0 = vadd.f32 %v2118_v42, %v901_v55 }
 0x12d   : > { %1511 = vst.msk [vmem:[%s2135_s17 + $0xc4] sm:$0xf] %vm1461_vm2, %v1779_v56  ;;  %v1195_v62 = vsel %vm1067_vm14, %v1003_v48, %v1131_v59  ;;  %v1129_v63 = vmul.f32 0.01, %v1001_v54  ;;  %v933_v1 = vmul.f32 %v2313_v9, %v2113_v40  ;;  %v899_v4 = vmul.f32 %v2113_v40, %v699_v25  ;;  %v843_v25 = vpop.f32.mrf.mxu1 }
 0x12e   : > { %1484 = vst.msk [vmem:[%s2135_s17 + $0x58] sm:$0xf] %vm1461_vm2, %v1752_v49  ;;  %v1784_v2 = vpack.c.bf16 %v1195_v62, %v1195_v62  ;;  %v1161_v3 = vsel %vm1033_vm15, %v969_v51, %v1097_v50  ;;  %v931_v5 = vmul.f32 %v2113_v40, %v827_v26  ;;  %vm1036_vm1 = vcmp.gt.f32.partialorder %v972_v0, 0.0 }
 0x12f   : > { %v1750_v57 = vpack.c.bf16 %v1161_v3, %v1161_v3  ;;  %v1193_v58 = vsel %vm1065_vm0, %v1001_v54, %v1129_v63  ;;  %v1100_v6 = vmul.f32 0.01, %v972_v0  ;;  %v1004_v9 = vadd.f32 %v2118_v42, %v933_v1  ;;  %v1909_v38 = vpop.f32.mrf.mxu1 }
 0x130   : > { %1516 = vst.msk [vmem:[%s2135_s17 + $0xd8] sm:$0xf] %vm1461_vm2, %v1784_v2  ;;  %v1782_v13 = vpack.c.bf16 %v1193_v58, %v1193_v58  ;;  %v970_v11 = vadd.f32 %v2118_v42, %v899_v4  ;;  %v1002_v14 = vadd.f32 %v2118_v42, %v931_v5  ;;  %v904_v12 = vmul.f32 %v1873_v44, %v2113_v40 }
 0x131   : > { %1482 = vst.msk [vmem:[%s2135_s17 + $0x50] sm:$0xf] %vm1461_vm2, %v1750_v57  ;;  %v1164_v15 = vsel %vm1036_vm1, %v972_v0, %v1100_v6  ;;  %v936_v16 = vmul.f32 %v1905_v45, %v2113_v40  ;;  %v902_v17 = vmul.f32 %v2113_v40, %v712_v60  ;;  %vm1068_vm3 = vcmp.gt.f32.partialorder %v1004_v9, 0.0  ;;  %v728_v60 = vpop.f32.mrf.mxu0 }
 0x132   : > { %1514 = vst.msk [vmem:[%s2135_s17 + $0xd0] sm:$0xf] %vm1461_vm2, %v1782_v13  ;;  %v1753_v18 = vpack.c.bf16 %v1164_v15, %v1164_v15  ;;  %v1132_v10 = vmul.f32 0.01, %v1004_v9  ;;  %vm1034_vm4 = vcmp.gt.f32.partialorder %v970_v11, 0.0  ;;  %vm1066_vm5 = vcmp.gt.f32.partialorder %v1002_v14, 0.0 }
 0x133   : > { %v1098_v19 = vmul.f32 0.01, %v970_v11  ;;  %v1130_v20 = vmul.f32 0.01, %v1002_v14  ;;  %v975_v22 = vadd.f32 %v2118_v42, %v904_v12  ;;  %v1007_v27 = vadd.f32 %v2118_v42, %v936_v16 }
 0x134   : > { %1485 = vst.msk [vmem:[%s2135_s17 + $0x5c] sm:$0xf] %vm1461_vm2, %v1753_v18  ;;  %v1196_v26 = vsel %vm1068_vm3, %v1004_v9, %v1132_v10  ;;  %v973_v28 = vadd.f32 %v2118_v42, %v902_v17  ;;  %v934_v29 = vmul.f32 %v2113_v40, %v840_v61  ;;  %v905_v45 = vmul.f32 %v1874_v7, %v2113_v40  ;;  %v856_v61 = vpop.f32.mrf.mxu1  ;;  %v1878_v7 = vpop.f32.mrf.mxu0 }
 0x135   : > { %v1785_v30 = vpack.c.bf16 %v1196_v26, %v1196_v26  ;;  %v1162_v31 = vsel %vm1034_vm4, %v970_v11, %v1098_v19  ;;  %v1194_v32 = vsel %vm1066_vm5, %v1002_v14, %v1130_v20  ;;  %vm1039_vm6 = vcmp.gt.f32.partialorder %v975_v22, 0.0 }
 0x136   : > { %v1751_v33 = vpack.c.bf16 %v1162_v31, %v1162_v31  ;;  %v1783_v24 = vpack.c.bf16 %v1194_v32, %v1194_v32  ;;  %v1103_v21 = vmul.f32 0.01, %v975_v22  ;;  %vm1071_vm7 = vcmp.gt.f32.partialorder %v1007_v27, 0.0 }
 0x137   : > { %1517 = vst.msk [vmem:[%s2135_s17 + $0xdc] sm:$0xf] %vm1461_vm2, %v1785_v30  ;;  %v1135_v34 = vmul.f32 0.01, %v1007_v27  ;;  %vm1037_vm8 = vcmp.gt.f32.partialorder %v973_v28, 0.0  ;;  %v1005_v36 = vadd.f32 %v2118_v42, %v934_v29  ;;  %v937_v39 = vmul.f32 %v1906_v8, %v2113_v40  ;;  %v1910_v8 = vpop.f32.mrf.mxu1 }
 0x138   : > { %v1101_v35 = vmul.f32 0.01, %v973_v28  ;;  %1483 = vst.msk [vmem:[%s2135_s17 + $0x54] sm:$0xf] %vm1461_vm2, %v1751_v33  ;;  %1515 = vst.msk [vmem:[%s2135_s17 + $0xd4] sm:$0xf] %vm1461_vm2, %v1783_v24  ;;  %v1167_v44 = vsel %vm1039_vm6, %v975_v22, %v1103_v21  ;;  %v903_v46 = vmul.f32 %v2113_v40, %v715_v23  ;;  %v976_v54 = vadd.f32 %v2118_v42, %v905_v45  ;;  %v731_v23 = vpop.f32.mrf.mxu0 }
 0x139   : > { %v1756_v43 = vpack.c.bf16 %v1167_v44, %v1167_v44  ;;  %v1199_v47 = vsel %vm1071_vm7, %v1007_v27, %v1135_v34  ;;  %vm1069_vm9 = vcmp.gt.f32.partialorder %v1005_v36, 0.0  ;;  %v1133_v53 = vmul.f32 0.01, %v1005_v36 }
 0x13a   : > { %v1165_v48 = vsel %vm1037_vm8, %v973_v28, %v1101_v35  ;;  %v1788_v51 = vpack.c.bf16 %v1199_v47, %v1199_v47  ;;  %v1008_v55 = vadd.f32 %v2118_v42, %v937_v39  ;;  %v974_v56 = vadd.f32 %v2118_v42, %v903_v46 }
 0x13b   : > { %v1754_v52 = vpack.c.bf16 %v1165_v48, %v1165_v48  ;;  %1488 = vst.msk [vmem:[%s2135_s17 + $0x68] sm:$0xf] %vm1461_vm2, %v1756_v43  ;;  %v935_v41 = vmul.f32 %v2113_v40, %v843_v25  ;;  %v908_v59 = vmul.f32 %v1877_v37, %v2113_v40  ;;  %v1197_v49 = vsel %vm1069_vm9, %v1005_v36, %v1133_v53  ;;  %v859_v25 = vpop.f32.mrf.mxu1 }
 0x13c   : > { %1520 = vst.msk [vmem:[%s2135_s17 + $0xe8] sm:$0xf] %vm1461_vm2, %v1788_v51  ;;  %vm1040_vm10 = vcmp.gt.f32.partialorder %v976_v54, 0.0  ;;  %v1104_v50 = vmul.f32 0.01, %v976_v54  ;;  %v940_v62 = vmul.f32 %v1909_v38, %v2113_v40  ;;  %v1786_v63 = vpack.c.bf16 %v1197_v49, %v1197_v49 }
 0x13d   : > { %1486 = vst.msk [vmem:[%s2135_s17 + $0x60] sm:$0xf] %vm1461_vm2, %v1754_v52  ;;  %vm1072_vm11 = vcmp.gt.f32.partialorder %v1008_v55, 0.0  ;;  %v1136_v0 = vmul.f32 0.01, %v1008_v55  ;;  %vm1038_vm12 = vcmp.gt.f32.partialorder %v974_v56, 0.0  ;;  %v1006_v3 = vadd.f32 %v2118_v42, %v935_v41 }
 0x13e   : > { %v1168_v1 = vsel %vm1040_vm10, %v976_v54, %v1104_v50  ;;  %v1102_v2 = vmul.f32 0.01, %v974_v56  ;;  %v979_v4 = vadd.f32 %v2118_v42, %v908_v59  ;;  %1518 = vst.msk [vmem:[%s2135_s17 + $0xe0] sm:$0xf] %vm1461_vm2, %v1786_v63  ;;  %v1011_v58 = vadd.f32 %v2118_v42, %v940_v62 }
 0x13f   : > { %v1757_v5 = vpack.c.bf16 %v1168_v1, %v1168_v1  ;;  %v1200_v57 = vsel %vm1072_vm11, %v1008_v55, %v1136_v0  ;;  %v906_v6 = vmul.f32 %v2113_v40, %v728_v60  ;;  %vm1070_vm13 = vcmp.gt.f32.partialorder %v1006_v3, 0.0 }
 0x140   : > { %v1789_v13 = vpack.c.bf16 %v1200_v57, %v1200_v57  ;;  %v1166_v9 = vsel %vm1038_vm12, %v974_v56, %v1102_v2  ;;  %v1134_v11 = vmul.f32 0.01, %v1006_v3  ;;  %vm1043_vm14 = vcmp.gt.f32.partialorder %v979_v4, 0.0 }
 0x141   : > { %1489 = vst.msk [vmem:[%s2135_s17 + $0x6c] sm:$0xf] %vm1461_vm2, %v1757_v5  ;;  %v1755_v14 = vpack.c.bf16 %v1166_v9, %v1166_v9  ;;  %v1107_v15 = vmul.f32 0.01, %v979_v4  ;;  %vm1075_vm15 = vcmp.gt.f32.partialorder %v1011_v58, 0.0  ;;  %v977_v17 = vadd.f32 %v2118_v42, %v906_v6 }
 0x142   : > { %1521 = vst.msk [vmem:[%s2135_s17 + $0xec] sm:$0xf] %vm1461_vm2, %v1789_v13  ;;  %v1198_v12 = vsel %vm1070_vm13, %v1006_v3, %v1134_v11  ;;  %v1139_v16 = vmul.f32 0.01, %v1011_v58  ;;  %v938_v18 = vmul.f32 %v2113_v40, %v856_v61  ;;  %v909_v20 = vmul.f32 %v1878_v7, %v2113_v40 }
 0x143   : > { %1487 = vst.msk [vmem:[%s2135_s17 + $0x64] sm:$0xf] %vm1461_vm2, %v1755_v14  ;;  %v1787_v10 = vpack.c.bf16 %v1198_v12, %v1198_v12  ;;  %v1171_v19 = vsel %vm1043_vm14, %v979_v4, %v1107_v15  ;;  %v941_v22 = vmul.f32 %v1910_v8, %v2113_v40  ;;  %vm1041_vm0 = vcmp.gt.f32.partialorder %v977_v17, 0.0 }
 0x144   : > { %v1760_v26 = vpack.c.bf16 %v1171_v19, %v1171_v19  ;;  %v1203_v27 = vsel %vm1075_vm15, %v1011_v58, %v1139_v16  ;;  %v1105_v28 = vmul.f32 0.01, %v977_v17  ;;  %v1009_v30 = vadd.f32 %v2118_v42, %v938_v18 }
 0x145   : > { %1519 = vst.msk [vmem:[%s2135_s17 + $0xe4] sm:$0xf] %vm1461_vm2, %v1787_v10  ;;  %v1792_v29 = vpack.c.bf16 %v1203_v27, %v1203_v27  ;;  %v980_v31 = vadd.f32 %v2118_v42, %v909_v20  ;;  %v1012_v32 = vadd.f32 %v2118_v42, %v941_v22  ;;  %v907_v24 = vmul.f32 %v2113_v40, %v731_v23 }
 0x146   : > { %1492 = vst.msk [vmem:[%s2135_s17 + $0x78] sm:$0xf] %vm1461_vm2, %v1760_v26  ;;  %v1169_v33 = vsel %vm1041_vm0, %v977_v17, %v1105_v28  ;;  %v939_v21 = vmul.f32 %v2113_v40, %v859_v25  ;;  %vm1073_vm1 = vcmp.gt.f32.partialorder %v1009_v30, 0.0  ;;  %v1137_v35 = vmul.f32 0.01, %v1009_v30 }
 0x147   : > { %1524 = vst.msk [vmem:[%s2135_s17 + $0xf8] sm:$0xf] %vm1461_vm2, %v1792_v29  ;;  %v1758_v34 = vpack.c.bf16 %v1169_v33, %v1169_v33  ;;  %vm1044_vm3 = vcmp.gt.f32.partialorder %v980_v31, 0.0  ;;  %v1108_v36 = vmul.f32 0.01, %v980_v31  ;;  %vm1076_vm4 = vcmp.gt.f32.partialorder %v1012_v32, 0.0 }
 0x148   : > { %v1140_v37 = vmul.f32 0.01, %v1012_v32  ;;  %v978_v38 = vadd.f32 %v2118_v42, %v907_v24  ;;  %v1201_v44 = vsel %vm1073_vm1, %v1009_v30, %v1137_v35  ;;  %v1010_v45 = vadd.f32 %v2118_v42, %v939_v21 }
 0x149   : > { %1490 = vst.msk [vmem:[%s2135_s17 + $0x70] sm:$0xf] %vm1461_vm2, %v1758_v34  ;;  %v1790_v40 = vpack.c.bf16 %v1201_v44, %v1201_v44  ;;  %v1172_v39 = vsel %vm1044_vm3, %v980_v31, %v1108_v36 }
 0x14a   : > { %v1204_v46 = vsel %vm1076_vm4, %v1012_v32, %v1140_v37  ;;  %vm1042_vm5 = vcmp.gt.f32.partialorder %v978_v38, 0.0  ;;  %v1761_v43 = vpack.c.bf16 %v1172_v39, %v1172_v39  ;;  %v1106_v48 = vmul.f32 0.01, %v978_v38 }
 0x14b   : > { %v1793_v47 = vpack.c.bf16 %v1204_v46, %v1204_v46  ;;  %vm1074_vm6 = vcmp.gt.f32.partialorder %v1010_v45, 0.0  ;;  %1522 = vst.msk [vmem:[%s2135_s17 + $0xf0] sm:$0xf] %vm1461_vm2, %v1790_v40  ;;  %v1138_v51 = vmul.f32 0.01, %v1010_v45 }
 0x14c   : > { %1493 = vst.msk [vmem:[%s2135_s17 + $0x7c] sm:$0xf] %vm1461_vm2, %v1761_v43  ;;  %v1170_v52 = vsel %vm1042_vm5, %v978_v38, %v1106_v48 }
 0x14d   : > { %1525 = vst.msk [vmem:[%s2135_s17 + $0xfc] sm:$0xf] %vm1461_vm2, %v1793_v47  ;;  %v1759_v53 = vpack.c.bf16 %v1170_v52, %v1170_v52  ;;  %v1202_v42 = vsel %vm1074_vm6, %v1010_v45, %v1138_v51 }
 0x14e   : > { %v1791_v54 = vpack.c.bf16 %v1202_v42, %v1202_v42 }
 0x14f   : > { %1491 = vst.msk [vmem:[%s2135_s17 + $0x74] sm:$0xf] %vm1461_vm2, %v1759_v53 }
 0x150   : > { %1523 = vst.msk [vmem:[%s2135_s17 + $0xf4] sm:$0xf] %vm1461_vm2, %v1791_v54 }
 0x151 PF: > { %s14_s15 = sadd.s32 1, %s1980_s15  }
 0x152   : > { %p11_p4 = scmp.ge.s32.totalorder %s14_s15, 4  }
 0x154   :  { %13 = sbr.rel (!%p11_p4) target bundleno = 1 (0x1), region = 66 }

// kernel: hourglass_att_forward.26
= control target key start
LH: loop header
LB: loop body
LE: loop exit
PB: predicated region body
PF: predicated region fallthrough
CT: control target
= control target key end

     0   :  { %s2202_s15 = smov 0   ;;  %s2653_s0 = inlined_call_operand.vmem [shape: bf16[1024,216], index: 0, kind: input, shape index: {}]   ;;  %s2654_s1 = inlined_call_operand.vmem [shape: bf16[216,8], index: 1, kind: input, shape index: {}]   ;;  %s2655_s2 = inlined_call_operand.vmem [shape: f32[1,8], index: 2, kind: input, shape index: {}]   ;;  %s2656_s3 = inlined_call_operand.vmem [shape: f32[1,8], index: 3, kind: input, shape index: {}]   ;;  %s2657_s4 = inlined_call_operand.vmem [shape: bf16[1024,8], index: 4, kind: output, shape index: {}]  }
   0x1 LB: > { %s1766_s16 = sadd.s32 4294967295, %s2174_s15   ;;  %p1770_p0 = scmp.ge.s32.totalorder %s2174_s15, 1  ;;  %s2174_s15 = sphi %s2202_s15, %s14_s15  }
   0x2   : > { %p164_p1 = scmp.lt.s32.totalorder %s2174_s15, 3 }
   0x4   : > { %p165_p2 = pnand %p1770_p0, %p164_p1 }
   0x5   : > { %s1771_s21 = sshll.u32 (!%p165_p2), %s1766_s16, 6 }
   0x6   : > { %168 = sbr.rel (%p165_p2) target bundleno = 397 (0x18d), region = 36  ;;  %p192_p3 = scmp.lt.s32.totalorder (!%p165_p2), %s1771_s21, 127 }
   0xb   : > { %v2056_v0 = vld [vmem:[%s2654_s1 + $0x38] sm:$0xff]   ;;  %v2176_v1 = vmov 0   ;;  %v2057_v2 = vld [vmem:[%s2654_s1 + $0x30] sm:$0xff]   ;;  %s2659_s21 = smov (!%p192_p3, %s1771_s21), 127  ;;  %v2058_v3 = vld [vmem:[%s2654_s1 + $0x28] sm:$0xff]   ;;  %vm665_vm0 = vcmask 719872  }
   0xc   : > { %766 = vmatprep.subr.bf16.mxu0 %v2176_v1  ;;  %2019 = vmatprep.subr.bf16.mxu1 %v2176_v1  ;;  %s1954_s24 = sshll.u32 %s2659_s21, 3  ;;  %v2059_v4 = vld [vmem:[%s2654_s1 + $0x20] sm:$0xff]   ;;  %v2060_v5 = vld [vmem:[%s2654_s1 + $0x18] sm:$0xff]   ;;  %v2061_v8 = vld [vmem:[%s2654_s1 + $0x10] sm:$0xff]   ;;  %vm762_vm1 = vcmask 1043456   ;;  %vm1645_vm4 = vcmask 60416  }
   0xd   : > { %767 = vmatpush1.bf16.msra.mxu0 %v2056_v0  ;;  %2033 = vmatpush1.bf16.msra.mxu1 %v2056_v0  ;;  %s2236_s29 = scalar_lea.vmem %s2653_s0, %s1954_s24  ;;  %v2062_v9 = vld [vmem:[%s2654_s1 + $0x8] sm:$0xff]   ;;  %v2063_v10 = vld [vmem:[%s2654_s1] sm:$0xff]   ;;  %v2066_v14 = vld [vmem:[%s2654_s1 + $0x58] sm:$0xff]  }
   0xe   : > { %768 = vmatprep.subr.bf16.mxu0 %v2176_v1  ;;  %2020 = vmatprep.subr.bf16.mxu1 %v2176_v1  ;;  %v2072_v6 = vld [vmem:[%s2236_s29 + $0x4] ss:$8 sps:$4 sm:$0xff]   ;;  %v2064_v11 = vld [vmem:[%s2654_s1 + $0x68] ss:$0 sps:$4 sm:$0xff]   ;;  %v2067_v15 = vld [vmem:[%s2654_s1 + $0x50] sm:$0xff]  }
   0xf   : > { %1854 = vmatprep.mubr.msk.bf16.mxu0 %vm665_vm0, %v2072_v6  ;;  %v2075_v7 = vld [vmem:[%s2236_s29 + $0x104] ss:$8 sps:$4 sm:$0xff]   ;;  %v764_v12 = vsel %vm762_vm1, %v2064_v11, 0  ;;  %v2070_v18 = vld [vmem:[%s2236_s29] ss:$8 sps:$4 sm:$0xff]  }
  0x10   : > { %1870 = vmatprep.mubr.msk.bf16.mxu1 %vm665_vm0, %v2075_v7  ;;  %v2065_v13 = vld [vmem:[%s2654_s1 + $0x60] sm:$0xff]   ;;  %v2068_v16 = vld [vmem:[%s2654_s1 + $0x48] sm:$0xff]   ;;  %v2076_v20 = vld [vmem:[%s2236_s29 + $0x14] ss:$8 sps:$4 sm:$0xff]  }
  0x11   : > { %769 = vmatpush1.bf16.msra.mxu0 %v2057_v2  ;;  %2034 = vmatpush1.bf16.msra.mxu1 %v2057_v2  ;;  %v2069_v17 = vld [vmem:[%s2654_s1 + $0x40] sm:$0xff]   ;;  %v2078_v21 = vld [vmem:[%s2236_s29 + $0x114] ss:$8 sps:$4 sm:$0xff]   ;;  %v2080_v22 = vld [vmem:[%s2236_s29 + $0x10] ss:$8 sps:$4 sm:$0xff]  }
  0x12   : > { %770 = vmatprep.subr.bf16.mxu0 %v2176_v1  ;;  %2021 = vmatprep.subr.bf16.mxu1 %v2176_v1  ;;  %v2073_v19 = vld [vmem:[%s2236_s29 + $0x100] ss:$8 sps:$4 sm:$0xff]   ;;  %v2081_v23 = vld [vmem:[%s2236_s29 + $0x110] ss:$8 sps:$4 sm:$0xff]   ;;  %v2082_v24 = vld [vmem:[%s2236_s29 + $0x24] ss:$8 sps:$4 sm:$0xff]  }
  0x13   : > { %v2084_v25 = vld [vmem:[%s2236_s29 + $0x124] ss:$8 sps:$4 sm:$0xff]   ;;  %v2086_v26 = vld [vmem:[%s2236_s29 + $0x20] ss:$8 sps:$4 sm:$0xff]   ;;  %v2088_v28 = vld [vmem:[%s2236_s29 + $0x34] ss:$8 sps:$4 sm:$0xff]  }
  0x14   : > { %v2087_v27 = vld [vmem:[%s2236_s29 + $0x120] ss:$8 sps:$4 sm:$0xff]   ;;  %v2090_v29 = vld [vmem:[%s2236_s29 + $0x134] ss:$8 sps:$4 sm:$0xff]   ;;  %v2092_v30 = vld [vmem:[%s2236_s29 + $0x30] ss:$8 sps:$4 sm:$0xff]  }
  0x15   : > { %771 = vmatpush1.bf16.msra.mxu0 %v2058_v3  ;;  %2035 = vmatpush1.bf16.msra.mxu1 %v2058_v3  ;;  %v2093_v31 = vld [vmem:[%s2236_s29 + $0x130] ss:$8 sps:$4 sm:$0xff]   ;;  %v2094_v32 = vld [vmem:[%s2236_s29 + $0x44] ss:$8 sps:$4 sm:$0xff]   ;;  %v2098_v34 = vld [vmem:[%s2236_s29 + $0x40] ss:$8 sps:$4 sm:$0xff]  }
  0x16   : > { %772 = vmatprep.subr.bf16.mxu0 %v2176_v1  ;;  %2022 = vmatprep.subr.bf16.mxu1 %v2176_v1  ;;  %v2096_v33 = vld [vmem:[%s2236_s29 + $0x144] ss:$8 sps:$4 sm:$0xff]   ;;  %v2099_v35 = vld [vmem:[%s2236_s29 + $0x140] ss:$8 sps:$4 sm:$0xff]   ;;  %v2100_v36 = vld [vmem:[%s2236_s29 + $0x54] ss:$8 sps:$4 sm:$0xff]  }
  0x17   : > { %v2102_v37 = vld [vmem:[%s2236_s29 + $0x154] ss:$8 sps:$4 sm:$0xff]   ;;  %v2104_v38 = vld [vmem:[%s2236_s29 + $0x50] ss:$8 sps:$4 sm:$0xff]   ;;  %v2106_v40 = vld [vmem:[%s2236_s29 + $0x64] ss:$8 sps:$4 sm:$0xff]  }
  0x18   : > { %v2105_v39 = vld [vmem:[%s2236_s29 + $0x150] ss:$8 sps:$4 sm:$0xff]   ;;  %v2108_v41 = vld [vmem:[%s2236_s29 + $0x164] ss:$8 sps:$4 sm:$0xff]   ;;  %v2110_v42 = vld [vmem:[%s2236_s29 + $0x60] ss:$8 sps:$4 sm:$0xff]  }
  0x19   : > { %773 = vmatpush1.bf16.msra.mxu0 %v2059_v4  ;;  %2036 = vmatpush1.bf16.msra.mxu1 %v2059_v4  ;;  %v2111_v43 = vld [vmem:[%s2236_s29 + $0x160] ss:$8 sps:$4 sm:$0xff]   ;;  %v2112_v44 = vld [vmem:[%s2236_s29 + $0x74] ss:$8 sps:$4 sm:$0xff]   ;;  %v2116_v46 = vld [vmem:[%s2236_s29 + $0x70] ss:$8 sps:$4 sm:$0xff]  }
  0x1a   : > { %774 = vmatprep.subr.bf16.mxu0 %v2176_v1  ;;  %2023 = vmatprep.subr.bf16.mxu1 %v2176_v1  ;;  %v2114_v45 = vld [vmem:[%s2236_s29 + $0x174] ss:$8 sps:$4 sm:$0xff]   ;;  %v2117_v47 = vld [vmem:[%s2236_s29 + $0x170] ss:$8 sps:$4 sm:$0xff]   ;;  %v2118_v48 = vld [vmem:[%s2236_s29 + $0x84] ss:$8 sps:$4 sm:$0xff]  }
  0x1b   : > { %v2120_v49 = vld [vmem:[%s2236_s29 + $0x184] ss:$8 sps:$4 sm:$0xff]   ;;  %v2122_v50 = vld [vmem:[%s2236_s29 + $0x80] ss:$8 sps:$4 sm:$0xff]   ;;  %v2124_v52 = vld [vmem:[%s2236_s29 + $0x94] ss:$8 sps:$4 sm:$0xff]  }
  0x1c   : > { %v2123_v51 = vld [vmem:[%s2236_s29 + $0x180] ss:$8 sps:$4 sm:$0xff]   ;;  %v2126_v53 = vld [vmem:[%s2236_s29 + $0x194] ss:$8 sps:$4 sm:$0xff]   ;;  %v2128_v54 = vld [vmem:[%s2236_s29 + $0x90] ss:$8 sps:$4 sm:$0xff]  }
  0x1d   : > { %775 = vmatpush1.bf16.msra.mxu0 %v2060_v5  ;;  %2037 = vmatpush1.bf16.msra.mxu1 %v2060_v5  ;;  %v2129_v55 = vld [vmem:[%s2236_s29 + $0x190] ss:$8 sps:$4 sm:$0xff]   ;;  %v2130_v56 = vld [vmem:[%s2236_s29 + $0xa4] ss:$8 sps:$4 sm:$0xff]   ;;  %v2134_v58 = vld [vmem:[%s2236_s29 + $0xa0] ss:$8 sps:$4 sm:$0xff]  }
  0x1e   : > { %776 = vmatprep.subr.bf16.mxu0 %v2176_v1  ;;  %2024 = vmatprep.subr.bf16.mxu1 %v2176_v1  ;;  %v2132_v57 = vld [vmem:[%s2236_s29 + $0x1a4] ss:$8 sps:$4 sm:$0xff]   ;;  %v2135_v59 = vld [vmem:[%s2236_s29 + $0x1a0] ss:$8 sps:$4 sm:$0xff]   ;;  %v2136_v60 = vld [vmem:[%s2236_s29 + $0xb4] ss:$8 sps:$4 sm:$0xff]  }
  0x1f   : > { %v2138_v61 = vld [vmem:[%s2236_s29 + $0x1b4] ss:$8 sps:$4 sm:$0xff]   ;;  %v2140_v62 = vld [vmem:[%s2236_s29 + $0xb0] ss:$8 sps:$4 sm:$0xff]   ;;  %v2142_v0 = vld [vmem:[%s2236_s29 + $0xc4] ss:$8 sps:$4 sm:$0xff]  }
  0x20   : > { %v2141_v63 = vld [vmem:[%s2236_s29 + $0x1b0] ss:$8 sps:$4 sm:$0xff]   ;;  %v2146_v2 = vld [vmem:[%s2236_s29 + $0xc0] ss:$8 sps:$4 sm:$0xff]   ;;  %v2148_v4 = vld [vmem:[%s2236_s29 + $0xd4] ss:$8 sps:$4 sm:$0xff]  }
  0x21   : > { %777 = vmatpush1.bf16.msra.mxu0 %v2061_v8  ;;  %2038 = vmatpush1.bf16.msra.mxu1 %v2061_v8  ;;  %v2147_v3 = vld [vmem:[%s2236_s29 + $0x1c0] ss:$8 sps:$4 sm:$0xff]   ;;  %v2150_v5 = vld [vmem:[%s2236_s29 + $0x1d4] ss:$8 sps:$4 sm:$0xff]   ;;  %v2152_v6 = vld [vmem:[%s2236_s29 + $0xd0] ss:$8 sps:$4 sm:$0xff]  }
  0x22   : > { %778 = vmatprep.subr.bf16.mxu0 %v2176_v1  ;;  %2025 = vmatprep.subr.bf16.mxu1 %v2176_v1  ;;  %v2153_v7 = vld [vmem:[%s2236_s29 + $0x1d0] ss:$8 sps:$4 sm:$0xff]   ;;  %v2154_v8 = vld [vmem:[%s2236_s29 + $0xe4] ss:$8 sps:$4 sm:$0xff]   ;;  %v2159_v11 = vld [vmem:[%s2236_s29 + $0x1e0] ss:$8 sps:$4 sm:$0xff]  }
  0x25   : > { %779 = vmatpush1.bf16.msra.mxu0 %v2062_v9  ;;  %2039 = vmatpush1.bf16.msra.mxu1 %v2062_v9  ;;  %v2156_v9 = vld [vmem:[%s2236_s29 + $0x1e4] ss:$8 sps:$4 sm:$0xff]  }
  0x26   : > { %780 = vmatprep.subr.bf16.mxu0 %v2176_v1  ;;  %2026 = vmatprep.subr.bf16.mxu1 %v2176_v1 }
  0x29   : > { %781 = vmatpush1.bf16.msra.mxu0 %v2063_v10  ;;  %2040 = vmatpush1.bf16.msra.mxu1 %v2063_v10  ;;  %v2158_v10 = vld [vmem:[%s2236_s29 + $0xe0] ss:$8 sps:$4 sm:$0xff]  }
  0x2a   : > { %786 = vmatprep.subr.bf16.mxu0 %v2176_v1  ;;  %2027 = vmatprep.subr.bf16.mxu1 %v2176_v1 }
  0x2d   : > { %787 = vmatpush2.bf16.msra.mxu0 %v764_v12  ;;  %2041 = vmatpush2.bf16.msra.mxu1 %v764_v12  ;;  %v2160_v12 = vld [vmem:[%s2236_s29 + $0xf4] ss:$8 sps:$4 sm:$0xff]  }
  0x2e   : > { %788 = vmatprep.subr.bf16.mxu0 %v2176_v1  ;;  %2028 = vmatprep.subr.bf16.mxu1 %v2176_v1 }
  0x31   : > { %789 = vmatpush2.bf16.msra.mxu0 %v2065_v13  ;;  %2042 = vmatpush2.bf16.msra.mxu1 %v2065_v13  ;;  %v2162_v13 = vld [vmem:[%s2236_s29 + $0x1f4] ss:$8 sps:$4 sm:$0xff]  }
  0x32   : > { %790 = vmatprep.subr.bf16.mxu0 %v2176_v1  ;;  %2029 = vmatprep.subr.bf16.mxu1 %v2176_v1 }
  0x35   : > { %791 = vmatpush2.bf16.msra.mxu0 %v2066_v14  ;;  %2043 = vmatpush2.bf16.msra.mxu1 %v2066_v14  ;;  %v2164_v14 = vld [vmem:[%s2236_s29 + $0xf0] ss:$8 sps:$4 sm:$0xff]  }
  0x36   : > { %792 = vmatprep.subr.bf16.mxu0 %v2176_v1  ;;  %2030 = vmatprep.subr.bf16.mxu1 %v2176_v1 }
  0x39   : > { %793 = vmatpush2.bf16.msra.mxu0 %v2067_v15  ;;  %2044 = vmatpush2.bf16.msra.mxu1 %v2067_v15  ;;  %v2165_v15 = vld [vmem:[%s2236_s29 + $0x1f0] ss:$8 sps:$4 sm:$0xff]  }
  0x3a   : > { %794 = vmatprep.subr.bf16.mxu0 %v2176_v1  ;;  %2031 = vmatprep.subr.bf16.mxu1 %v2176_v1 }
  0x3d   : > { %795 = vmatpush2.bf16.msra.mxu0 %v2068_v16  ;;  %2045 = vmatpush2.bf16.msra.mxu1 %v2068_v16  ;;  %v2387_v16 = vld [vmem:[%s2655_s2] ss:$0 sm:$0xff] }
  0x3e   : > { %796 = vmatprep.subr.bf16.mxu0 %v2176_v1  ;;  %2032 = vmatprep.subr.bf16.mxu1 %v2176_v1  ;;  %v2144_v1 = vld [vmem:[%s2236_s29 + $0x1c4] ss:$8 sps:$4 sm:$0xff]   ;;  %s1775_s29 = sshll.u32 %s2659_s21, 2 }
  0x3f   : > { %s2404_s7 = scalar_lea.vmem %s2657_s4, %s1775_s29 }
  0x41   : > { %797 = vmatpush2.bf16.msra.mxu0 %v2069_v17  ;;  %2046 = vmatpush2.bf16.msra.mxu1 %v2069_v17 }
  0x44   : > { %799 = vmatmul.mubr.bf16.vlgmr.msra.gmra.mxu0 %v2070_v18  ;;  %927 = vmatmul.mubr.bf16.vlgmr.msra.gmra.mxu1 %v2073_v19  ;;  %v2392_v18 = vld [vmem:[%s2656_s3] ss:$0 sm:$0xff] }
  0x45   : > { %1855 = vmatprep.mubr.msk.bf16.mxu0 %vm665_vm0, %v2076_v20  ;;  %1871 = vmatprep.mubr.msk.bf16.mxu1 %vm665_vm0, %v2078_v21 }
  0x4c   : > { %807 = vmatmul.mubr.bf16.gmra.mxu0 %v2080_v22  ;;  %935 = vmatmul.mubr.bf16.gmra.mxu1 %v2081_v23 }
  0x4d   : > { %1856 = vmatprep.mubr.msk.bf16.mxu0 %vm665_vm0, %v2082_v24  ;;  %1872 = vmatprep.mubr.msk.bf16.mxu1 %vm665_vm0, %v2084_v25 }
  0x54   : > { %815 = vmatmul.mubr.bf16.gmra.mxu0 %v2086_v26  ;;  %943 = vmatmul.mubr.bf16.gmra.mxu1 %v2087_v27 }
  0x55   : > { %1857 = vmatprep.mubr.msk.bf16.mxu0 %vm665_vm0, %v2088_v28  ;;  %1873 = vmatprep.mubr.msk.bf16.mxu1 %vm665_vm0, %v2090_v29 }
  0x5c   : > { %823 = vmatmul.mubr.bf16.gmra.mxu0 %v2092_v30  ;;  %951 = vmatmul.mubr.bf16.gmra.mxu1 %v2093_v31 }
  0x5d   : > { %1858 = vmatprep.mubr.msk.bf16.mxu0 %vm665_vm0, %v2094_v32  ;;  %1874 = vmatprep.mubr.msk.bf16.mxu1 %vm665_vm0, %v2096_v33 }
  0x64   : > { %831 = vmatmul.mubr.bf16.gmra.mxu0 %v2098_v34  ;;  %959 = vmatmul.mubr.bf16.gmra.mxu1 %v2099_v35 }
  0x65   : > { %1859 = vmatprep.mubr.msk.bf16.mxu0 %vm665_vm0, %v2100_v36  ;;  %1875 = vmatprep.mubr.msk.bf16.mxu1 %vm665_vm0, %v2102_v37 }
  0x6c   : > { %839 = vmatmul.mubr.bf16.gmra.mxu0 %v2104_v38  ;;  %967 = vmatmul.mubr.bf16.gmra.mxu1 %v2105_v39 }
  0x6d   : > { %1860 = vmatprep.mubr.msk.bf16.mxu0 %vm665_vm0, %v2106_v40  ;;  %1876 = vmatprep.mubr.msk.bf16.mxu1 %vm665_vm0, %v2108_v41 }
  0x74   : > { %847 = vmatmul.mubr.bf16.gmra.mxu0 %v2110_v42  ;;  %975 = vmatmul.mubr.bf16.gmra.mxu1 %v2111_v43 }
  0x75   : > { %1861 = vmatprep.mubr.msk.bf16.mxu0 %vm665_vm0, %v2112_v44  ;;  %1877 = vmatprep.mubr.msk.bf16.mxu1 %vm665_vm0, %v2114_v45 }
  0x7c   : > { %855 = vmatmul.mubr.bf16.gmra.mxu0 %v2116_v46  ;;  %983 = vmatmul.mubr.bf16.gmra.mxu1 %v2117_v47 }
  0x7d   : > { %1862 = vmatprep.mubr.msk.bf16.mxu0 %vm665_vm0, %v2118_v48  ;;  %1878 = vmatprep.mubr.msk.bf16.mxu1 %vm665_vm0, %v2120_v49 }
  0x84   : > { %863 = vmatmul.mubr.bf16.gmra.mxu0 %v2122_v50  ;;  %991 = vmatmul.mubr.bf16.gmra.mxu1 %v2123_v51 }
  0x85   : > { %1863 = vmatprep.mubr.msk.bf16.mxu0 %vm665_vm0, %v2124_v52  ;;  %1879 = vmatprep.mubr.msk.bf16.mxu1 %vm665_vm0, %v2126_v53 }
  0x8c   : > { %871 = vmatmul.mubr.bf16.gmra.mxu0 %v2128_v54  ;;  %999 = vmatmul.mubr.bf16.gmra.mxu1 %v2129_v55 }
  0x8d   : > { %1864 = vmatprep.mubr.msk.bf16.mxu0 %vm665_vm0, %v2130_v56  ;;  %1880 = vmatprep.mubr.msk.bf16.mxu1 %vm665_vm0, %v2132_v57 }
  0x94   : > { %879 = vmatmul.mubr.bf16.gmra.mxu0 %v2134_v58  ;;  %1007 = vmatmul.mubr.bf16.gmra.mxu1 %v2135_v59 }
  0x95   : > { %1865 = vmatprep.mubr.msk.bf16.mxu0 %vm665_vm0, %v2136_v60  ;;  %1881 = vmatprep.mubr.msk.bf16.mxu1 %vm665_vm0, %v2138_v61 }
  0x9c   : > { %887 = vmatmul.mubr.bf16.gmra.mxu0 %v2140_v62  ;;  %1015 = vmatmul.mubr.bf16.gmra.mxu1 %v2141_v63 }
  0x9d   : > { %1866 = vmatprep.mubr.msk.bf16.mxu0 %vm665_vm0, %v2142_v0  ;;  %1882 = vmatprep.mubr.msk.bf16.mxu1 %vm665_vm0, %v2144_v1 }
  0xa4   : > { %895 = vmatmul.mubr.bf16.gmra.mxu0 %v2146_v2  ;;  %1023 = vmatmul.mubr.bf16.gmra.mxu1 %v2147_v3 }
  0xa5   : > { %1867 = vmatprep.mubr.msk.bf16.mxu0 %vm665_vm0, %v2148_v4  ;;  %1883 = vmatprep.mubr.msk.bf16.mxu1 %vm665_vm0, %v2150_v5 }
  0xac   : > { %903 = vmatmul.mubr.bf16.gmra.mxu0 %v2152_v6  ;;  %1031 = vmatmul.mubr.bf16.gmra.mxu1 %v2153_v7 }
  0xad   : > { %1868 = vmatprep.mubr.msk.bf16.mxu0 %vm665_vm0, %v2154_v8  ;;  %1884 = vmatprep.mubr.msk.bf16.mxu1 %vm665_vm0, %v2156_v9 }
  0xb4   : > { %911 = vmatmul.mubr.bf16.gmra.mxu0 %v2158_v10  ;;  %1039 = vmatmul.mubr.bf16.gmra.mxu1 %v2159_v11 }
  0xb5   : > { %1869 = vmatprep.mubr.msk.bf16.mxu0 %vm665_vm0, %v2160_v12  ;;  %1885 = vmatprep.mubr.msk.bf16.mxu1 %vm665_vm0, %v2162_v13 }
  0xbc   : > { %919 = vmatmul.mubr.bf16.gmra.mxu0 %v2164_v14  ;;  %1047 = vmatmul.mubr.bf16.gmra.mxu1 %v2165_v15 }
 0x104   : > { %v800_v17 = vpop.f32.mrf.mxu0  ;;  %v928_v19 = vpop.f32.mrf.mxu1 }
 0x105   : > { %v1062_v20 = vmul.f32 %v2387_v16, %v800_v17  ;;  %v1094_v21 = vmul.f32 %v2387_v16, %v928_v19 }
 0x106   : > { %v802_v22 = vpop.f32.mrf.mxu0  ;;  %v930_v23 = vpop.f32.mrf.mxu1 }
 0x107   : > { %v1133_v24 = vadd.f32 %v2392_v18, %v1062_v20  ;;  %v1165_v25 = vadd.f32 %v2392_v18, %v1094_v21 }
 0x108   : > { %v803_v26 = vpop.f32.mrf.mxu0  ;;  %v931_v27 = vpop.f32.mrf.mxu1 }
 0x109   : > { %vm1197_vm2 = vcmp.gt.f32.partialorder %v1133_v24, 0.0  ;;  %v1261_v28 = vmul.f32 0.01, %v1133_v24  ;;  %vm1229_vm3 = vcmp.gt.f32.partialorder %v1165_v25, 0.0  ;;  %v1293_v29 = vmul.f32 0.01, %v1165_v25 }
 0x10a   : > { %v1063_v30 = vmul.f32 %v2387_v16, %v803_v26  ;;  %v1095_v31 = vmul.f32 %v2387_v16, %v931_v27  ;;  %v805_v32 = vpop.f32.mrf.mxu0  ;;  %v933_v33 = vpop.f32.mrf.mxu1 }
 0x10b   : > { %v1325_v34 = vsel %vm1197_vm2, %v1133_v24, %v1261_v28  ;;  %v1357_v35 = vsel %vm1229_vm3, %v1165_v25, %v1293_v29 }
 0x10c   : > { %v1955_v36 = vpack.c.bf16 %v1325_v34, %v1325_v34  ;;  %v1987_v37 = vpack.c.bf16 %v1357_v35, %v1357_v35  ;;  %v1134_v38 = vadd.f32 %v2392_v18, %v1063_v30  ;;  %v1166_v39 = vadd.f32 %v2392_v18, %v1095_v31  ;;  %v808_v40 = vpop.f32.mrf.mxu0  ;;  %v936_v41 = vpop.f32.mrf.mxu1 }
 0x10d   : > { %v1064_v42 = vmul.f32 %v2387_v16, %v808_v40  ;;  %v1096_v43 = vmul.f32 %v2387_v16, %v936_v41 }
 0x10e   : > { %1646 = vst.msk [vmem:[%s2404_s7] sm:$0xf] %vm1645_vm4, %v1955_v36  ;;  %1678 = vst.msk [vmem:[%s2404_s7 + $0x80] sm:$0xf] %vm1645_vm4, %v1987_v37  ;;  %vm1198_vm5 = vcmp.gt.f32.partialorder %v1134_v38, 0.0  ;;  %vm1230_vm6 = vcmp.gt.f32.partialorder %v1166_v39, 0.0  ;;  %v810_v46 = vpop.f32.mrf.mxu0  ;;  %v938_v47 = vpop.f32.mrf.mxu1 }
 0x10f   : > { %v1262_v44 = vmul.f32 0.01, %v1134_v38  ;;  %v1294_v45 = vmul.f32 0.01, %v1166_v39  ;;  %v1135_v48 = vadd.f32 %v2392_v18, %v1064_v42  ;;  %v1167_v49 = vadd.f32 %v2392_v18, %v1096_v43 }
 0x110   : > { %v811_v52 = vpop.f32.mrf.mxu0  ;;  %v939_v53 = vpop.f32.mrf.mxu1 }
 0x111   : > { %v1326_v50 = vsel %vm1198_vm5, %v1134_v38, %v1262_v44  ;;  %v1358_v51 = vsel %vm1230_vm6, %v1166_v39, %v1294_v45  ;;  %vm1199_vm7 = vcmp.gt.f32.partialorder %v1135_v48, 0.0  ;;  %v1263_v56 = vmul.f32 0.01, %v1135_v48 }
 0x112   : > { %v1956_v54 = vpack.c.bf16 %v1326_v50, %v1326_v50  ;;  %v1988_v55 = vpack.c.bf16 %v1358_v51, %v1358_v51  ;;  %vm1231_vm8 = vcmp.gt.f32.partialorder %v1167_v49, 0.0  ;;  %v1295_v57 = vmul.f32 0.01, %v1167_v49  ;;  %v813_v60 = vpop.f32.mrf.mxu0  ;;  %v941_v61 = vpop.f32.mrf.mxu1 }
 0x113   : > { %v1065_v58 = vmul.f32 %v2387_v16, %v811_v52  ;;  %v1097_v59 = vmul.f32 %v2387_v16, %v939_v53  ;;  %v1327_v62 = vsel %vm1199_vm7, %v1135_v48, %v1263_v56 }
 0x114   : > { %1647 = vst.msk [vmem:[%s2404_s7 + $0x4] sm:$0xf] %vm1645_vm4, %v1956_v54  ;;  %1679 = vst.msk [vmem:[%s2404_s7 + $0x84] sm:$0xf] %vm1645_vm4, %v1988_v55  ;;  %v1957_v63 = vpack.c.bf16 %v1327_v62, %v1327_v62  ;;  %v1359_v0 = vsel %vm1231_vm8, %v1167_v49, %v1295_v57  ;;  %v816_v3 = vpop.f32.mrf.mxu0  ;;  %v944_v4 = vpop.f32.mrf.mxu1 }
 0x115   : > { %v1136_v1 = vadd.f32 %v2392_v18, %v1065_v58  ;;  %v1168_v2 = vadd.f32 %v2392_v18, %v1097_v59  ;;  %v1989_v5 = vpack.c.bf16 %v1359_v0, %v1359_v0  ;;  %v1066_v6 = vmul.f32 %v2387_v16, %v816_v3 }
 0x116   : > { %v1098_v7 = vmul.f32 %v2387_v16, %v944_v4  ;;  %1648 = vst.msk [vmem:[%s2404_s7 + $0x8] sm:$0xf] %vm1645_vm4, %v1957_v63  ;;  %v818_v10 = vpop.f32.mrf.mxu0  ;;  %v946_v11 = vpop.f32.mrf.mxu1 }
 0x117   : > { %vm1200_vm9 = vcmp.gt.f32.partialorder %v1136_v1, 0.0  ;;  %v1264_v8 = vmul.f32 0.01, %v1136_v1  ;;  %vm1232_vm10 = vcmp.gt.f32.partialorder %v1168_v2, 0.0  ;;  %v1296_v9 = vmul.f32 0.01, %v1168_v2 }
 0x118   : > { %1680 = vst.msk [vmem:[%s2404_s7 + $0x88] sm:$0xf] %vm1645_vm4, %v1989_v5  ;;  %v1137_v12 = vadd.f32 %v2392_v18, %v1066_v6  ;;  %v1169_v13 = vadd.f32 %v2392_v18, %v1098_v7  ;;  %v819_v17 = vpop.f32.mrf.mxu0  ;;  %v947_v19 = vpop.f32.mrf.mxu1 }
 0x119   : > { %v1328_v14 = vsel %vm1200_vm9, %v1136_v1, %v1264_v8  ;;  %v1360_v15 = vsel %vm1232_vm10, %v1168_v2, %v1296_v9  ;;  %v1067_v24 = vmul.f32 %v2387_v16, %v819_v17  ;;  %v1099_v25 = vmul.f32 %v2387_v16, %v947_v19 }
 0x11a   : > { %v1958_v20 = vpack.c.bf16 %v1328_v14, %v1328_v14  ;;  %v1990_v21 = vpack.c.bf16 %v1360_v15, %v1360_v15  ;;  %vm1201_vm11 = vcmp.gt.f32.partialorder %v1137_v12, 0.0  ;;  %v1265_v22 = vmul.f32 0.01, %v1137_v12  ;;  %v821_v26 = vpop.f32.mrf.mxu0  ;;  %v949_v27 = vpop.f32.mrf.mxu1 }
 0x11b   : > { %vm1233_vm12 = vcmp.gt.f32.partialorder %v1169_v13, 0.0  ;;  %v1297_v23 = vmul.f32 0.01, %v1169_v13  ;;  %v1138_v31 = vadd.f32 %v2392_v18, %v1067_v24  ;;  %v1170_v32 = vadd.f32 %v2392_v18, %v1099_v25 }
 0x11c   : > { %1649 = vst.msk [vmem:[%s2404_s7 + $0xc] sm:$0xf] %vm1645_vm4, %v1958_v20  ;;  %1681 = vst.msk [vmem:[%s2404_s7 + $0x8c] sm:$0xf] %vm1645_vm4, %v1990_v21  ;;  %v1329_v28 = vsel %vm1201_vm11, %v1137_v12, %v1265_v22  ;;  %v824_v33 = vpop.f32.mrf.mxu0  ;;  %v952_v34 = vpop.f32.mrf.mxu1 }
 0x11d   : > { %v1959_v29 = vpack.c.bf16 %v1329_v28, %v1329_v28  ;;  %v1361_v30 = vsel %vm1233_vm12, %v1169_v13, %v1297_v23  ;;  %v1068_v36 = vmul.f32 %v2387_v16, %v824_v33  ;;  %v1100_v37 = vmul.f32 %v2387_v16, %v952_v34 }
 0x11e   : > { %v1991_v35 = vpack.c.bf16 %v1361_v30, %v1361_v30  ;;  %vm1202_vm13 = vcmp.gt.f32.partialorder %v1138_v31, 0.0  ;;  %v1266_v38 = vmul.f32 0.01, %v1138_v31  ;;  %vm1234_vm14 = vcmp.gt.f32.partialorder %v1170_v32, 0.0  ;;  %v826_v40 = vpop.f32.mrf.mxu0  ;;  %v954_v41 = vpop.f32.mrf.mxu1 }
 0x11f   : > { %1650 = vst.msk [vmem:[%s2404_s7 + $0x10] sm:$0xf] %vm1645_vm4, %v1959_v29  ;;  %v1298_v39 = vmul.f32 0.01, %v1170_v32  ;;  %v1139_v42 = vadd.f32 %v2392_v18, %v1068_v36  ;;  %v1171_v43 = vadd.f32 %v2392_v18, %v1100_v37 }
 0x120   : > { %1682 = vst.msk [vmem:[%s2404_s7 + $0x90] sm:$0xf] %vm1645_vm4, %v1991_v35  ;;  %v1330_v44 = vsel %vm1202_vm13, %v1138_v31, %v1266_v38  ;;  %v827_v46 = vpop.f32.mrf.mxu0  ;;  %v955_v47 = vpop.f32.mrf.mxu1 }
 0x121   : > { %v1362_v45 = vsel %vm1234_vm14, %v1170_v32, %v1298_v39  ;;  %v1960_v48 = vpack.c.bf16 %v1330_v44, %v1330_v44  ;;  %vm1203_vm15 = vcmp.gt.f32.partialorder %v1139_v42, 0.0  ;;  %v1267_v50 = vmul.f32 0.01, %v1139_v42 }
 0x122   : > { %v1992_v49 = vpack.c.bf16 %v1362_v45, %v1362_v45  ;;  %vm1235_vm0 = vcmp.gt.f32.partialorder %v1171_v43, 0.0  ;;  %v1299_v51 = vmul.f32 0.01, %v1171_v43  ;;  %v1069_v52 = vmul.f32 %v2387_v16, %v827_v46  ;;  %v829_v54 = vpop.f32.mrf.mxu0  ;;  %v957_v55 = vpop.f32.mrf.mxu1 }
 0x123   : > { %v1101_v53 = vmul.f32 %v2387_v16, %v955_v47  ;;  %1651 = vst.msk [vmem:[%s2404_s7 + $0x14] sm:$0xf] %vm1645_vm4, %v1960_v48  ;;  %v1331_v56 = vsel %vm1203_vm15, %v1139_v42, %v1267_v50 }
 0x124   : > { %1683 = vst.msk [vmem:[%s2404_s7 + $0x94] sm:$0xf] %vm1645_vm4, %v1992_v49  ;;  %v1961_v57 = vpack.c.bf16 %v1331_v56, %v1331_v56  ;;  %v1363_v58 = vsel %vm1235_vm0, %v1171_v43, %v1299_v51  ;;  %v1140_v59 = vadd.f32 %v2392_v18, %v1069_v52  ;;  %v832_v61 = vpop.f32.mrf.mxu0  ;;  %v960_v62 = vpop.f32.mrf.mxu1 }
 0x125   : > { %v1172_v60 = vadd.f32 %v2392_v18, %v1101_v53  ;;  %v1993_v63 = vpack.c.bf16 %v1363_v58, %v1363_v58  ;;  %v1070_v0 = vmul.f32 %v2387_v16, %v832_v61  ;;  %v1102_v1 = vmul.f32 %v2387_v16, %v960_v62 }
 0x126   : > { %1652 = vst.msk [vmem:[%s2404_s7 + $0x18] sm:$0xf] %vm1645_vm4, %v1961_v57  ;;  %vm1204_vm1 = vcmp.gt.f32.partialorder %v1140_v59, 0.0  ;;  %v1268_v2 = vmul.f32 0.01, %v1140_v59  ;;  %v834_v4 = vpop.f32.mrf.mxu0  ;;  %v962_v5 = vpop.f32.mrf.mxu1 }
 0x127   : > { %vm1236_vm2 = vcmp.gt.f32.partialorder %v1172_v60, 0.0  ;;  %v1300_v3 = vmul.f32 0.01, %v1172_v60  ;;  %1684 = vst.msk [vmem:[%s2404_s7 + $0x98] sm:$0xf] %vm1645_vm4, %v1993_v63  ;;  %v1141_v6 = vadd.f32 %v2392_v18, %v1070_v0  ;;  %v1173_v7 = vadd.f32 %v2392_v18, %v1102_v1 }
 0x128   : > { %v1332_v8 = vsel %vm1204_vm1, %v1140_v59, %v1268_v2  ;;  %v835_v10 = vpop.f32.mrf.mxu0  ;;  %v963_v11 = vpop.f32.mrf.mxu1 }
 0x129   : > { %v1364_v9 = vsel %vm1236_vm2, %v1172_v60, %v1300_v3  ;;  %v1962_v12 = vpack.c.bf16 %v1332_v8, %v1332_v8  ;;  %vm1205_vm3 = vcmp.gt.f32.partialorder %v1141_v6, 0.0  ;;  %v1269_v14 = vmul.f32 0.01, %v1141_v6 }
 0x12a   : > { %v1994_v13 = vpack.c.bf16 %v1364_v9, %v1364_v9  ;;  %vm1237_vm5 = vcmp.gt.f32.partialorder %v1173_v7, 0.0  ;;  %v1301_v15 = vmul.f32 0.01, %v1173_v7  ;;  %v1071_v17 = vmul.f32 %v2387_v16, %v835_v10  ;;  %v837_v20 = vpop.f32.mrf.mxu0  ;;  %v965_v21 = vpop.f32.mrf.mxu1 }
 0x12b   : > { %v1103_v19 = vmul.f32 %v2387_v16, %v963_v11  ;;  %1653 = vst.msk [vmem:[%s2404_s7 + $0x1c] sm:$0xf] %vm1645_vm4, %v1962_v12  ;;  %v1333_v22 = vsel %vm1205_vm3, %v1141_v6, %v1269_v14 }
 0x12c   : > { %1685 = vst.msk [vmem:[%s2404_s7 + $0x9c] sm:$0xf] %vm1645_vm4, %v1994_v13  ;;  %v1963_v23 = vpack.c.bf16 %v1333_v22, %v1333_v22  ;;  %v1365_v24 = vsel %vm1237_vm5, %v1173_v7, %v1301_v15  ;;  %v1142_v25 = vadd.f32 %v2392_v18, %v1071_v17  ;;  %v840_v27 = vpop.f32.mrf.mxu0  ;;  %v968_v28 = vpop.f32.mrf.mxu1 }
 0x12d   : > { %v1174_v26 = vadd.f32 %v2392_v18, %v1103_v19  ;;  %v1995_v29 = vpack.c.bf16 %v1365_v24, %v1365_v24  ;;  %v1072_v30 = vmul.f32 %v2387_v16, %v840_v27  ;;  %v1104_v31 = vmul.f32 %v2387_v16, %v968_v28 }
 0x12e   : > { %1654 = vst.msk [vmem:[%s2404_s7 + $0x20] sm:$0xf] %vm1645_vm4, %v1963_v23  ;;  %vm1206_vm6 = vcmp.gt.f32.partialorder %v1142_v25, 0.0  ;;  %v1270_v32 = vmul.f32 0.01, %v1142_v25  ;;  %v842_v34 = vpop.f32.mrf.mxu0  ;;  %v970_v35 = vpop.f32.mrf.mxu1 }
 0x12f   : > { %vm1238_vm7 = vcmp.gt.f32.partialorder %v1174_v26, 0.0  ;;  %v1302_v33 = vmul.f32 0.01, %v1174_v26  ;;  %1686 = vst.msk [vmem:[%s2404_s7 + $0xa0] sm:$0xf] %vm1645_vm4, %v1995_v29  ;;  %v1143_v36 = vadd.f32 %v2392_v18, %v1072_v30  ;;  %v1175_v37 = vadd.f32 %v2392_v18, %v1104_v31 }
 0x130   : > { %v1334_v38 = vsel %vm1206_vm6, %v1142_v25, %v1270_v32  ;;  %v843_v40 = vpop.f32.mrf.mxu0  ;;  %v971_v41 = vpop.f32.mrf.mxu1 }
 0x131   : > { %v1366_v39 = vsel %vm1238_vm7, %v1174_v26, %v1302_v33  ;;  %v1964_v42 = vpack.c.bf16 %v1334_v38, %v1334_v38  ;;  %vm1207_vm8 = vcmp.gt.f32.partialorder %v1143_v36, 0.0  ;;  %v1271_v44 = vmul.f32 0.01, %v1143_v36 }
 0x132   : > { %v1996_v43 = vpack.c.bf16 %v1366_v39, %v1366_v39  ;;  %vm1239_vm9 = vcmp.gt.f32.partialorder %v1175_v37, 0.0  ;;  %v1303_v45 = vmul.f32 0.01, %v1175_v37  ;;  %v1073_v46 = vmul.f32 %v2387_v16, %v843_v40  ;;  %v845_v48 = vpop.f32.mrf.mxu0  ;;  %v973_v49 = vpop.f32.mrf.mxu1 }
 0x133   : > { %v1105_v47 = vmul.f32 %v2387_v16, %v971_v41  ;;  %1655 = vst.msk [vmem:[%s2404_s7 + $0x24] sm:$0xf] %vm1645_vm4, %v1964_v42  ;;  %v1335_v50 = vsel %vm1207_vm8, %v1143_v36, %v1271_v44 }
 0x134   : > { %1687 = vst.msk [vmem:[%s2404_s7 + $0xa4] sm:$0xf] %vm1645_vm4, %v1996_v43  ;;  %v1965_v51 = vpack.c.bf16 %v1335_v50, %v1335_v50  ;;  %v1367_v52 = vsel %vm1239_vm9, %v1175_v37, %v1303_v45  ;;  %v1144_v53 = vadd.f32 %v2392_v18, %v1073_v46  ;;  %v848_v55 = vpop.f32.mrf.mxu0  ;;  %v976_v56 = vpop.f32.mrf.mxu1 }
 0x135   : > { %v1176_v54 = vadd.f32 %v2392_v18, %v1105_v47  ;;  %v1997_v57 = vpack.c.bf16 %v1367_v52, %v1367_v52  ;;  %v1074_v58 = vmul.f32 %v2387_v16, %v848_v55  ;;  %v1106_v59 = vmul.f32 %v2387_v16, %v976_v56 }
 0x136   : > { %1656 = vst.msk [vmem:[%s2404_s7 + $0x28] sm:$0xf] %vm1645_vm4, %v1965_v51  ;;  %vm1208_vm10 = vcmp.gt.f32.partialorder %v1144_v53, 0.0  ;;  %v1272_v60 = vmul.f32 0.01, %v1144_v53  ;;  %v850_v62 = vpop.f32.mrf.mxu0  ;;  %v978_v63 = vpop.f32.mrf.mxu1 }
 0x137   : > { %vm1240_vm11 = vcmp.gt.f32.partialorder %v1176_v54, 0.0  ;;  %v1304_v61 = vmul.f32 0.01, %v1176_v54  ;;  %1688 = vst.msk [vmem:[%s2404_s7 + $0xa8] sm:$0xf] %vm1645_vm4, %v1997_v57  ;;  %v1145_v0 = vadd.f32 %v2392_v18, %v1074_v58  ;;  %v1177_v1 = vadd.f32 %v2392_v18, %v1106_v59 }
 0x138   : > { %v1336_v2 = vsel %vm1208_vm10, %v1144_v53, %v1272_v60  ;;  %v851_v4 = vpop.f32.mrf.mxu0  ;;  %v979_v5 = vpop.f32.mrf.mxu1 }
 0x139   : > { %v1368_v3 = vsel %vm1240_vm11, %v1176_v54, %v1304_v61  ;;  %v1966_v6 = vpack.c.bf16 %v1336_v2, %v1336_v2  ;;  %vm1209_vm12 = vcmp.gt.f32.partialorder %v1145_v0, 0.0  ;;  %v1273_v8 = vmul.f32 0.01, %v1145_v0 }
 0x13a   : > { %v1998_v7 = vpack.c.bf16 %v1368_v3, %v1368_v3  ;;  %vm1241_vm13 = vcmp.gt.f32.partialorder %v1177_v1, 0.0  ;;  %v1305_v9 = vmul.f32 0.01, %v1177_v1  ;;  %v1075_v10 = vmul.f32 %v2387_v16, %v851_v4  ;;  %v853_v12 = vpop.f32.mrf.mxu0  ;;  %v981_v13 = vpop.f32.mrf.mxu1 }
 0x13b   : > { %v1107_v11 = vmul.f32 %v2387_v16, %v979_v5  ;;  %1657 = vst.msk [vmem:[%s2404_s7 + $0x2c] sm:$0xf] %vm1645_vm4, %v1966_v6  ;;  %v1337_v14 = vsel %vm1209_vm12, %v1145_v0, %v1273_v8 }
 0x13c   : > { %1689 = vst.msk [vmem:[%s2404_s7 + $0xac] sm:$0xf] %vm1645_vm4, %v1998_v7  ;;  %v1967_v15 = vpack.c.bf16 %v1337_v14, %v1337_v14  ;;  %v1369_v17 = vsel %vm1241_vm13, %v1177_v1, %v1305_v9  ;;  %v1146_v19 = vadd.f32 %v2392_v18, %v1075_v10  ;;  %v856_v21 = vpop.f32.mrf.mxu0  ;;  %v984_v22 = vpop.f32.mrf.mxu1 }
 0x13d   : > { %v1178_v20 = vadd.f32 %v2392_v18, %v1107_v11  ;;  %v1999_v23 = vpack.c.bf16 %v1369_v17, %v1369_v17  ;;  %v1076_v24 = vmul.f32 %v2387_v16, %v856_v21  ;;  %v1108_v25 = vmul.f32 %v2387_v16, %v984_v22 }
 0x13e   : > { %1658 = vst.msk [vmem:[%s2404_s7 + $0x30] sm:$0xf] %vm1645_vm4, %v1967_v15  ;;  %vm1210_vm14 = vcmp.gt.f32.partialorder %v1146_v19, 0.0  ;;  %v1274_v26 = vmul.f32 0.01, %v1146_v19  ;;  %v858_v28 = vpop.f32.mrf.mxu0  ;;  %v986_v29 = vpop.f32.mrf.mxu1 }
 0x13f   : > { %vm1242_vm15 = vcmp.gt.f32.partialorder %v1178_v20, 0.0  ;;  %v1306_v27 = vmul.f32 0.01, %v1178_v20  ;;  %1690 = vst.msk [vmem:[%s2404_s7 + $0xb0] sm:$0xf] %vm1645_vm4, %v1999_v23  ;;  %v1147_v30 = vadd.f32 %v2392_v18, %v1076_v24  ;;  %v1179_v31 = vadd.f32 %v2392_v18, %v1108_v25 }
 0x140   : > { %v1338_v32 = vsel %vm1210_vm14, %v1146_v19, %v1274_v26  ;;  %v859_v34 = vpop.f32.mrf.mxu0  ;;  %v987_v35 = vpop.f32.mrf.mxu1 }
 0x141   : > { %v1370_v33 = vsel %vm1242_vm15, %v1178_v20, %v1306_v27  ;;  %v1968_v36 = vpack.c.bf16 %v1338_v32, %v1338_v32  ;;  %vm1211_vm0 = vcmp.gt.f32.partialorder %v1147_v30, 0.0  ;;  %v1275_v38 = vmul.f32 0.01, %v1147_v30 }
 0x142   : > { %v2000_v37 = vpack.c.bf16 %v1370_v33, %v1370_v33  ;;  %vm1243_vm1 = vcmp.gt.f32.partialorder %v1179_v31, 0.0  ;;  %v1307_v39 = vmul.f32 0.01, %v1179_v31  ;;  %v1077_v40 = vmul.f32 %v2387_v16, %v859_v34  ;;  %v861_v42 = vpop.f32.mrf.mxu0  ;;  %v989_v43 = vpop.f32.mrf.mxu1 }
 0x143   : > { %v1109_v41 = vmul.f32 %v2387_v16, %v987_v35  ;;  %1659 = vst.msk [vmem:[%s2404_s7 + $0x34] sm:$0xf] %vm1645_vm4, %v1968_v36  ;;  %v1339_v44 = vsel %vm1211_vm0, %v1147_v30, %v1275_v38 }
 0x144   : > { %1691 = vst.msk [vmem:[%s2404_s7 + $0xb4] sm:$0xf] %vm1645_vm4, %v2000_v37  ;;  %v1969_v45 = vpack.c.bf16 %v1339_v44, %v1339_v44  ;;  %v1371_v46 = vsel %vm1243_vm1, %v1179_v31, %v1307_v39  ;;  %v1148_v47 = vadd.f32 %v2392_v18, %v1077_v40  ;;  %v864_v49 = vpop.f32.mrf.mxu0  ;;  %v992_v50 = vpop.f32.mrf.mxu1 }
 0x145   : > { %v1180_v48 = vadd.f32 %v2392_v18, %v1109_v41  ;;  %v2001_v51 = vpack.c.bf16 %v1371_v46, %v1371_v46  ;;  %v1078_v52 = vmul.f32 %v2387_v16, %v864_v49  ;;  %v1110_v53 = vmul.f32 %v2387_v16, %v992_v50 }
 0x146   : > { %1660 = vst.msk [vmem:[%s2404_s7 + $0x38] sm:$0xf] %vm1645_vm4, %v1969_v45  ;;  %vm1212_vm2 = vcmp.gt.f32.partialorder %v1148_v47, 0.0  ;;  %v1276_v54 = vmul.f32 0.01, %v1148_v47  ;;  %v866_v56 = vpop.f32.mrf.mxu0  ;;  %v994_v57 = vpop.f32.mrf.mxu1 }
 0x147   : > { %vm1244_vm3 = vcmp.gt.f32.partialorder %v1180_v48, 0.0  ;;  %v1308_v55 = vmul.f32 0.01, %v1180_v48  ;;  %1692 = vst.msk [vmem:[%s2404_s7 + $0xb8] sm:$0xf] %vm1645_vm4, %v2001_v51  ;;  %v1149_v58 = vadd.f32 %v2392_v18, %v1078_v52  ;;  %v1181_v59 = vadd.f32 %v2392_v18, %v1110_v53 }
 0x148   : > { %v1340_v60 = vsel %vm1212_vm2, %v1148_v47, %v1276_v54  ;;  %v867_v62 = vpop.f32.mrf.mxu0  ;;  %v995_v63 = vpop.f32.mrf.mxu1 }
 0x149   : > { %v1372_v61 = vsel %vm1244_vm3, %v1180_v48, %v1308_v55  ;;  %v1970_v0 = vpack.c.bf16 %v1340_v60, %v1340_v60  ;;  %vm1213_vm5 = vcmp.gt.f32.partialorder %v1149_v58, 0.0  ;;  %v1277_v2 = vmul.f32 0.01, %v1149_v58 }
 0x14a   : > { %v2002_v1 = vpack.c.bf16 %v1372_v61, %v1372_v61  ;;  %vm1245_vm6 = vcmp.gt.f32.partialorder %v1181_v59, 0.0  ;;  %v1309_v3 = vmul.f32 0.01, %v1181_v59  ;;  %v1079_v4 = vmul.f32 %v2387_v16, %v867_v62  ;;  %v869_v6 = vpop.f32.mrf.mxu0  ;;  %v997_v7 = vpop.f32.mrf.mxu1 }
 0x14b   : > { %v1111_v5 = vmul.f32 %v2387_v16, %v995_v63  ;;  %1661 = vst.msk [vmem:[%s2404_s7 + $0x3c] sm:$0xf] %vm1645_vm4, %v1970_v0  ;;  %v1341_v8 = vsel %vm1213_vm5, %v1149_v58, %v1277_v2 }
 0x14c   : > { %1693 = vst.msk [vmem:[%s2404_s7 + $0xbc] sm:$0xf] %vm1645_vm4, %v2002_v1  ;;  %v1971_v9 = vpack.c.bf16 %v1341_v8, %v1341_v8  ;;  %v1373_v10 = vsel %vm1245_vm6, %v1181_v59, %v1309_v3  ;;  %v1150_v11 = vadd.f32 %v2392_v18, %v1079_v4  ;;  %v872_v13 = vpop.f32.mrf.mxu0  ;;  %v1000_v14 = vpop.f32.mrf.mxu1 }
 0x14d   : > { %v1182_v12 = vadd.f32 %v2392_v18, %v1111_v5  ;;  %v2003_v15 = vpack.c.bf16 %v1373_v10, %v1373_v10  ;;  %v1080_v17 = vmul.f32 %v2387_v16, %v872_v13  ;;  %v1112_v19 = vmul.f32 %v2387_v16, %v1000_v14 }
 0x14e   : > { %1662 = vst.msk [vmem:[%s2404_s7 + $0x40] sm:$0xf] %vm1645_vm4, %v1971_v9  ;;  %vm1214_vm7 = vcmp.gt.f32.partialorder %v1150_v11, 0.0  ;;  %v1278_v20 = vmul.f32 0.01, %v1150_v11  ;;  %v874_v22 = vpop.f32.mrf.mxu0  ;;  %v1002_v23 = vpop.f32.mrf.mxu1 }
 0x14f   : > { %vm1246_vm8 = vcmp.gt.f32.partialorder %v1182_v12, 0.0  ;;  %v1310_v21 = vmul.f32 0.01, %v1182_v12  ;;  %1694 = vst.msk [vmem:[%s2404_s7 + $0xc0] sm:$0xf] %vm1645_vm4, %v2003_v15  ;;  %v1151_v24 = vadd.f32 %v2392_v18, %v1080_v17  ;;  %v1183_v25 = vadd.f32 %v2392_v18, %v1112_v19 }
 0x150   : > { %v1342_v26 = vsel %vm1214_vm7, %v1150_v11, %v1278_v20  ;;  %v875_v28 = vpop.f32.mrf.mxu0  ;;  %v1003_v29 = vpop.f32.mrf.mxu1 }
 0x151   : > { %v1374_v27 = vsel %vm1246_vm8, %v1182_v12, %v1310_v21  ;;  %v1972_v30 = vpack.c.bf16 %v1342_v26, %v1342_v26  ;;  %vm1215_vm9 = vcmp.gt.f32.partialorder %v1151_v24, 0.0  ;;  %v1279_v32 = vmul.f32 0.01, %v1151_v24 }
 0x152   : > { %v2004_v31 = vpack.c.bf16 %v1374_v27, %v1374_v27  ;;  %vm1247_vm10 = vcmp.gt.f32.partialorder %v1183_v25, 0.0  ;;  %v1311_v33 = vmul.f32 0.01, %v1183_v25  ;;  %v1081_v34 = vmul.f32 %v2387_v16, %v875_v28  ;;  %v877_v36 = vpop.f32.mrf.mxu0  ;;  %v1005_v37 = vpop.f32.mrf.mxu1 }
 0x153   : > { %v1113_v35 = vmul.f32 %v2387_v16, %v1003_v29  ;;  %1663 = vst.msk [vmem:[%s2404_s7 + $0x44] sm:$0xf] %vm1645_vm4, %v1972_v30  ;;  %v1343_v38 = vsel %vm1215_vm9, %v1151_v24, %v1279_v32 }
 0x154   : > { %1695 = vst.msk [vmem:[%s2404_s7 + $0xc4] sm:$0xf] %vm1645_vm4, %v2004_v31  ;;  %v1973_v39 = vpack.c.bf16 %v1343_v38, %v1343_v38  ;;  %v1375_v40 = vsel %vm1247_vm10, %v1183_v25, %v1311_v33  ;;  %v1152_v41 = vadd.f32 %v2392_v18, %v1081_v34  ;;  %v880_v43 = vpop.f32.mrf.mxu0  ;;  %v1008_v44 = vpop.f32.mrf.mxu1 }
 0x155   : > { %v1184_v42 = vadd.f32 %v2392_v18, %v1113_v35  ;;  %v2005_v45 = vpack.c.bf16 %v1375_v40, %v1375_v40  ;;  %v1082_v46 = vmul.f32 %v2387_v16, %v880_v43  ;;  %v1114_v47 = vmul.f32 %v2387_v16, %v1008_v44 }
 0x156   : > { %1664 = vst.msk [vmem:[%s2404_s7 + $0x48] sm:$0xf] %vm1645_vm4, %v1973_v39  ;;  %vm1216_vm11 = vcmp.gt.f32.partialorder %v1152_v41, 0.0  ;;  %v1280_v48 = vmul.f32 0.01, %v1152_v41  ;;  %v882_v50 = vpop.f32.mrf.mxu0  ;;  %v1010_v51 = vpop.f32.mrf.mxu1 }
 0x157   : > { %vm1248_vm12 = vcmp.gt.f32.partialorder %v1184_v42, 0.0  ;;  %v1312_v49 = vmul.f32 0.01, %v1184_v42  ;;  %1696 = vst.msk [vmem:[%s2404_s7 + $0xc8] sm:$0xf] %vm1645_vm4, %v2005_v45  ;;  %v1153_v52 = vadd.f32 %v2392_v18, %v1082_v46  ;;  %v1185_v53 = vadd.f32 %v2392_v18, %v1114_v47 }
 0x158   : > { %v1344_v54 = vsel %vm1216_vm11, %v1152_v41, %v1280_v48  ;;  %v883_v56 = vpop.f32.mrf.mxu0  ;;  %v1011_v57 = vpop.f32.mrf.mxu1 }
 0x159   : > { %v1376_v55 = vsel %vm1248_vm12, %v1184_v42, %v1312_v49  ;;  %v1974_v58 = vpack.c.bf16 %v1344_v54, %v1344_v54  ;;  %vm1217_vm13 = vcmp.gt.f32.partialorder %v1153_v52, 0.0  ;;  %v1281_v60 = vmul.f32 0.01, %v1153_v52 }
 0x15a   : > { %v2006_v59 = vpack.c.bf16 %v1376_v55, %v1376_v55  ;;  %vm1249_vm14 = vcmp.gt.f32.partialorder %v1185_v53, 0.0  ;;  %v1313_v61 = vmul.f32 0.01, %v1185_v53  ;;  %v1083_v62 = vmul.f32 %v2387_v16, %v883_v56  ;;  %v885_v0 = vpop.f32.mrf.mxu0  ;;  %v1013_v1 = vpop.f32.mrf.mxu1 }
 0x15b   : > { %v1115_v63 = vmul.f32 %v2387_v16, %v1011_v57  ;;  %1665 = vst.msk [vmem:[%s2404_s7 + $0x4c] sm:$0xf] %vm1645_vm4, %v1974_v58  ;;  %v1345_v2 = vsel %vm1217_vm13, %v1153_v52, %v1281_v60 }
 0x15c   : > { %1697 = vst.msk [vmem:[%s2404_s7 + $0xcc] sm:$0xf] %vm1645_vm4, %v2006_v59  ;;  %v1975_v3 = vpack.c.bf16 %v1345_v2, %v1345_v2  ;;  %v1377_v4 = vsel %vm1249_vm14, %v1185_v53, %v1313_v61  ;;  %v1154_v5 = vadd.f32 %v2392_v18, %v1083_v62  ;;  %v888_v7 = vpop.f32.mrf.mxu0  ;;  %v1016_v8 = vpop.f32.mrf.mxu1 }
 0x15d   : > { %v1186_v6 = vadd.f32 %v2392_v18, %v1115_v63  ;;  %v2007_v9 = vpack.c.bf16 %v1377_v4, %v1377_v4  ;;  %v1084_v10 = vmul.f32 %v2387_v16, %v888_v7  ;;  %v1116_v11 = vmul.f32 %v2387_v16, %v1016_v8 }
 0x15e   : > { %1666 = vst.msk [vmem:[%s2404_s7 + $0x50] sm:$0xf] %vm1645_vm4, %v1975_v3  ;;  %vm1218_vm15 = vcmp.gt.f32.partialorder %v1154_v5, 0.0  ;;  %v1282_v12 = vmul.f32 0.01, %v1154_v5  ;;  %v890_v14 = vpop.f32.mrf.mxu0  ;;  %v1018_v15 = vpop.f32.mrf.mxu1 }
 0x15f   : > { %vm1250_vm0 = vcmp.gt.f32.partialorder %v1186_v6, 0.0  ;;  %v1314_v13 = vmul.f32 0.01, %v1186_v6  ;;  %1698 = vst.msk [vmem:[%s2404_s7 + $0xd0] sm:$0xf] %vm1645_vm4, %v2007_v9  ;;  %v1155_v17 = vadd.f32 %v2392_v18, %v1084_v10  ;;  %v1187_v19 = vadd.f32 %v2392_v18, %v1116_v11 }
 0x160   : > { %v1346_v20 = vsel %vm1218_vm15, %v1154_v5, %v1282_v12  ;;  %v891_v22 = vpop.f32.mrf.mxu0  ;;  %v1019_v23 = vpop.f32.mrf.mxu1 }
 0x161   : > { %v1378_v21 = vsel %vm1250_vm0, %v1186_v6, %v1314_v13  ;;  %v1976_v24 = vpack.c.bf16 %v1346_v20, %v1346_v20  ;;  %vm1219_vm1 = vcmp.gt.f32.partialorder %v1155_v17, 0.0  ;;  %v1283_v26 = vmul.f32 0.01, %v1155_v17 }
 0x162   : > { %v2008_v25 = vpack.c.bf16 %v1378_v21, %v1378_v21  ;;  %vm1251_vm2 = vcmp.gt.f32.partialorder %v1187_v19, 0.0  ;;  %v1315_v27 = vmul.f32 0.01, %v1187_v19  ;;  %v1085_v28 = vmul.f32 %v2387_v16, %v891_v22  ;;  %v893_v30 = vpop.f32.mrf.mxu0  ;;  %v1021_v31 = vpop.f32.mrf.mxu1 }
 0x163   : > { %v1117_v29 = vmul.f32 %v2387_v16, %v1019_v23  ;;  %1667 = vst.msk [vmem:[%s2404_s7 + $0x54] sm:$0xf] %vm1645_vm4, %v1976_v24  ;;  %v1347_v32 = vsel %vm1219_vm1, %v1155_v17, %v1283_v26 }
 0x164   : > { %1699 = vst.msk [vmem:[%s2404_s7 + $0xd4] sm:$0xf] %vm1645_vm4, %v2008_v25  ;;  %v1977_v33 = vpack.c.bf16 %v1347_v32, %v1347_v32  ;;  %v1379_v34 = vsel %vm1251_vm2, %v1187_v19, %v1315_v27  ;;  %v1156_v35 = vadd.f32 %v2392_v18, %v1085_v28  ;;  %v896_v37 = vpop.f32.mrf.mxu0  ;;  %v1024_v38 = vpop.f32.mrf.mxu1 }
 0x165   : > { %v1188_v36 = vadd.f32 %v2392_v18, %v1117_v29  ;;  %v2009_v39 = vpack.c.bf16 %v1379_v34, %v1379_v34  ;;  %v1086_v40 = vmul.f32 %v2387_v16, %v896_v37  ;;  %v1118_v41 = vmul.f32 %v2387_v16, %v1024_v38 }
 0x166   : > { %1668 = vst.msk [vmem:[%s2404_s7 + $0x58] sm:$0xf] %vm1645_vm4, %v1977_v33  ;;  %vm1220_vm3 = vcmp.gt.f32.partialorder %v1156_v35, 0.0  ;;  %v1284_v42 = vmul.f32 0.01, %v1156_v35  ;;  %v898_v44 = vpop.f32.mrf.mxu0  ;;  %v1026_v45 = vpop.f32.mrf.mxu1 }
 0x167   : > { %vm1252_vm5 = vcmp.gt.f32.partialorder %v1188_v36, 0.0  ;;  %v1316_v43 = vmul.f32 0.01, %v1188_v36  ;;  %1700 = vst.msk [vmem:[%s2404_s7 + $0xd8] sm:$0xf] %vm1645_vm4, %v2009_v39  ;;  %v1157_v46 = vadd.f32 %v2392_v18, %v1086_v40  ;;  %v1189_v47 = vadd.f32 %v2392_v18, %v1118_v41 }
 0x168   : > { %v1348_v48 = vsel %vm1220_vm3, %v1156_v35, %v1284_v42  ;;  %v899_v50 = vpop.f32.mrf.mxu0  ;;  %v1027_v51 = vpop.f32.mrf.mxu1 }
 0x169   : > { %v1380_v49 = vsel %vm1252_vm5, %v1188_v36, %v1316_v43  ;;  %v1978_v52 = vpack.c.bf16 %v1348_v48, %v1348_v48  ;;  %vm1221_vm6 = vcmp.gt.f32.partialorder %v1157_v46, 0.0  ;;  %v1285_v54 = vmul.f32 0.01, %v1157_v46 }
 0x16a   : > { %v2010_v53 = vpack.c.bf16 %v1380_v49, %v1380_v49  ;;  %vm1253_vm7 = vcmp.gt.f32.partialorder %v1189_v47, 0.0  ;;  %v1317_v55 = vmul.f32 0.01, %v1189_v47  ;;  %v1087_v56 = vmul.f32 %v2387_v16, %v899_v50  ;;  %v901_v58 = vpop.f32.mrf.mxu0  ;;  %v1029_v59 = vpop.f32.mrf.mxu1  ;;  %v2166_v49 = vld [vmem:[%s2655_s2] ss:$0 sm:$0xff] }
 0x16b   : > { %v1119_v57 = vmul.f32 %v2387_v16, %v1027_v51  ;;  %1669 = vst.msk [vmem:[%s2404_s7 + $0x5c] sm:$0xf] %vm1645_vm4, %v1978_v52  ;;  %v1349_v60 = vsel %vm1221_vm6, %v1157_v46, %v1285_v54 }
 0x16c   : > { %1701 = vst.msk [vmem:[%s2404_s7 + $0xdc] sm:$0xf] %vm1645_vm4, %v2010_v53  ;;  %v1979_v61 = vpack.c.bf16 %v1349_v60, %v1349_v60  ;;  %v1381_v62 = vsel %vm1253_vm7, %v1189_v47, %v1317_v55  ;;  %v1158_v63 = vadd.f32 %v2392_v18, %v1087_v56  ;;  %v904_v1 = vpop.f32.mrf.mxu0  ;;  %v1032_v2 = vpop.f32.mrf.mxu1  ;;  %v2167_v56 = vld [vmem:[%s2656_s3] ss:$0 sm:$0xff] }
 0x16d   : > { %v1190_v0 = vadd.f32 %v2392_v18, %v1119_v57  ;;  %v2011_v3 = vpack.c.bf16 %v1381_v62, %v1381_v62  ;;  %v1088_v4 = vmul.f32 %v2387_v16, %v904_v1  ;;  %v1120_v5 = vmul.f32 %v2387_v16, %v1032_v2 }
 0x16e   : > { %1670 = vst.msk [vmem:[%s2404_s7 + $0x60] sm:$0xf] %vm1645_vm4, %v1979_v61  ;;  %vm1222_vm8 = vcmp.gt.f32.partialorder %v1158_v63, 0.0  ;;  %v1286_v6 = vmul.f32 0.01, %v1158_v63  ;;  %v906_v8 = vpop.f32.mrf.mxu0  ;;  %v1034_v9 = vpop.f32.mrf.mxu1 }
 0x16f   : > { %vm1254_vm9 = vcmp.gt.f32.partialorder %v1190_v0, 0.0  ;;  %v1318_v7 = vmul.f32 0.01, %v1190_v0  ;;  %1702 = vst.msk [vmem:[%s2404_s7 + $0xe0] sm:$0xf] %vm1645_vm4, %v2011_v3  ;;  %v1159_v10 = vadd.f32 %v2392_v18, %v1088_v4  ;;  %v1191_v11 = vadd.f32 %v2392_v18, %v1120_v5 }
 0x170   : > { %v1350_v12 = vsel %vm1222_vm8, %v1158_v63, %v1286_v6  ;;  %v907_v14 = vpop.f32.mrf.mxu0  ;;  %v1035_v15 = vpop.f32.mrf.mxu1 }
 0x171   : > { %v1382_v13 = vsel %vm1254_vm9, %v1190_v0, %v1318_v7  ;;  %v1980_v17 = vpack.c.bf16 %v1350_v12, %v1350_v12  ;;  %vm1223_vm10 = vcmp.gt.f32.partialorder %v1159_v10, 0.0  ;;  %v1287_v20 = vmul.f32 0.01, %v1159_v10 }
 0x172   : > { %v2012_v19 = vpack.c.bf16 %v1382_v13, %v1382_v13  ;;  %vm1255_vm11 = vcmp.gt.f32.partialorder %v1191_v11, 0.0  ;;  %v1319_v21 = vmul.f32 0.01, %v1191_v11  ;;  %v1089_v22 = vmul.f32 %v2387_v16, %v907_v14  ;;  %v909_v24 = vpop.f32.mrf.mxu0  ;;  %v1037_v25 = vpop.f32.mrf.mxu1 }
 0x173   : > { %v1121_v23 = vmul.f32 %v2387_v16, %v1035_v15  ;;  %1671 = vst.msk [vmem:[%s2404_s7 + $0x64] sm:$0xf] %vm1645_vm4, %v1980_v17  ;;  %v1351_v26 = vsel %vm1223_vm10, %v1159_v10, %v1287_v20 }
 0x174   : > { %1703 = vst.msk [vmem:[%s2404_s7 + $0xe4] sm:$0xf] %vm1645_vm4, %v2012_v19  ;;  %v1981_v27 = vpack.c.bf16 %v1351_v26, %v1351_v26  ;;  %v1383_v28 = vsel %vm1255_vm11, %v1191_v11, %v1319_v21  ;;  %v1160_v29 = vadd.f32 %v2392_v18, %v1089_v22  ;;  %v912_v31 = vpop.f32.mrf.mxu0  ;;  %v1040_v32 = vpop.f32.mrf.mxu1 }
 0x175   : > { %v1192_v30 = vadd.f32 %v2392_v18, %v1121_v23  ;;  %v2013_v33 = vpack.c.bf16 %v1383_v28, %v1383_v28  ;;  %v1090_v34 = vmul.f32 %v2387_v16, %v912_v31  ;;  %v1122_v35 = vmul.f32 %v2387_v16, %v1040_v32 }
 0x176   : > { %1672 = vst.msk [vmem:[%s2404_s7 + $0x68] sm:$0xf] %vm1645_vm4, %v1981_v27  ;;  %vm1224_vm12 = vcmp.gt.f32.partialorder %v1160_v29, 0.0  ;;  %v1288_v36 = vmul.f32 0.01, %v1160_v29  ;;  %v914_v38 = vpop.f32.mrf.mxu0  ;;  %v1042_v39 = vpop.f32.mrf.mxu1 }
 0x177   : > { %vm1256_vm13 = vcmp.gt.f32.partialorder %v1192_v30, 0.0  ;;  %v1320_v37 = vmul.f32 0.01, %v1192_v30  ;;  %1704 = vst.msk [vmem:[%s2404_s7 + $0xe8] sm:$0xf] %vm1645_vm4, %v2013_v33  ;;  %v1161_v40 = vadd.f32 %v2392_v18, %v1090_v34  ;;  %v1193_v41 = vadd.f32 %v2392_v18, %v1122_v35 }
 0x178   : > { %v1352_v42 = vsel %vm1224_vm12, %v1160_v29, %v1288_v36  ;;  %v915_v44 = vpop.f32.mrf.mxu0  ;;  %v1043_v16 = vpop.f32.mrf.mxu1 }
 0x179   : > { %v1384_v43 = vsel %vm1256_vm13, %v1192_v30, %v1320_v37  ;;  %v1982_v45 = vpack.c.bf16 %v1352_v42, %v1352_v42  ;;  %vm1225_vm14 = vcmp.gt.f32.partialorder %v1161_v40, 0.0  ;;  %v1289_v47 = vmul.f32 0.01, %v1161_v40 }
 0x17a   : > { %v2014_v46 = vpack.c.bf16 %v1384_v43, %v1384_v43  ;;  %vm1257_vm15 = vcmp.gt.f32.partialorder %v1193_v41, 0.0  ;;  %v1321_v48 = vmul.f32 0.01, %v1193_v41  ;;  %v1091_v50 = vmul.f32 %v2166_v49, %v915_v44  ;;  %v917_v18 = vpop.f32.mrf.mxu0  ;;  %v1045_v52 = vpop.f32.mrf.mxu1 }
 0x17b   : > { %v1123_v51 = vmul.f32 %v2166_v49, %v1043_v16  ;;  %1673 = vst.msk [vmem:[%s2404_s7 + $0x6c] sm:$0xf] %vm1645_vm4, %v1982_v45  ;;  %v1353_v53 = vsel %vm1225_vm14, %v1161_v40, %v1289_v47 }
 0x17c   : > { %1705 = vst.msk [vmem:[%s2404_s7 + $0xec] sm:$0xf] %vm1645_vm4, %v2014_v46  ;;  %v1983_v54 = vpack.c.bf16 %v1353_v53, %v1353_v53  ;;  %v1385_v55 = vsel %vm1257_vm15, %v1193_v41, %v1321_v48  ;;  %v1162_v57 = vadd.f32 %v2167_v56, %v1091_v50  ;;  %v920_v59 = vpop.f32.mrf.mxu0  ;;  %v1048_v60 = vpop.f32.mrf.mxu1 }
 0x17d   : > { %v1194_v58 = vadd.f32 %v2167_v56, %v1123_v51  ;;  %v2015_v61 = vpack.c.bf16 %v1385_v55, %v1385_v55  ;;  %v1092_v62 = vmul.f32 %v2166_v49, %v920_v59  ;;  %v1124_v63 = vmul.f32 %v2166_v49, %v1048_v60 }
 0x17e   : > { %1674 = vst.msk [vmem:[%s2404_s7 + $0x70] sm:$0xf] %vm1645_vm4, %v1983_v54  ;;  %vm1226_vm0 = vcmp.gt.f32.partialorder %v1162_v57, 0.0  ;;  %v1290_v0 = vmul.f32 0.01, %v1162_v57  ;;  %v922_v2 = vpop.f32.mrf.mxu0  ;;  %v1050_v3 = vpop.f32.mrf.mxu1 }
 0x17f   : > { %vm1258_vm1 = vcmp.gt.f32.partialorder %v1194_v58, 0.0  ;;  %v1322_v1 = vmul.f32 0.01, %v1194_v58  ;;  %1706 = vst.msk [vmem:[%s2404_s7 + $0xf0] sm:$0xf] %vm1645_vm4, %v2015_v61  ;;  %v1163_v4 = vadd.f32 %v2167_v56, %v1092_v62  ;;  %v1195_v5 = vadd.f32 %v2167_v56, %v1124_v63 }
 0x180   : > { %v1354_v6 = vsel %vm1226_vm0, %v1162_v57, %v1290_v0  ;;  %v923_v8 = vpop.f32.mrf.mxu0  ;;  %v1051_v9 = vpop.f32.mrf.mxu1 }
 0x181   : > { %v1386_v7 = vsel %vm1258_vm1, %v1194_v58, %v1322_v1  ;;  %v1984_v10 = vpack.c.bf16 %v1354_v6, %v1354_v6  ;;  %vm1227_vm2 = vcmp.gt.f32.partialorder %v1163_v4, 0.0  ;;  %v1291_v12 = vmul.f32 0.01, %v1163_v4 }
 0x182   : > { %v2016_v11 = vpack.c.bf16 %v1386_v7, %v1386_v7  ;;  %vm1259_vm3 = vcmp.gt.f32.partialorder %v1195_v5, 0.0  ;;  %v1323_v13 = vmul.f32 0.01, %v1195_v5  ;;  %v1093_v14 = vmul.f32 %v2166_v49, %v923_v8  ;;  %v925_v17 = vpop.f32.mrf.mxu0  ;;  %v1053_v19 = vpop.f32.mrf.mxu1 }
 0x183   : > { %v1125_v15 = vmul.f32 %v2166_v49, %v1051_v9  ;;  %1675 = vst.msk [vmem:[%s2404_s7 + $0x74] sm:$0xf] %vm1645_vm4, %v1984_v10  ;;  %v1355_v20 = vsel %vm1227_vm2, %v1163_v4, %v1291_v12 }
 0x184   : > { %1707 = vst.msk [vmem:[%s2404_s7 + $0xf4] sm:$0xf] %vm1645_vm4, %v2016_v11  ;;  %v1985_v21 = vpack.c.bf16 %v1355_v20, %v1355_v20  ;;  %v1387_v22 = vsel %vm1259_vm3, %v1195_v5, %v1323_v13  ;;  %v1164_v23 = vadd.f32 %v2167_v56, %v1093_v14 }
 0x185   : > { %v1196_v24 = vadd.f32 %v2167_v56, %v1125_v15  ;;  %v2017_v25 = vpack.c.bf16 %v1387_v22, %v1387_v22 }
 0x186   : > { %1676 = vst.msk [vmem:[%s2404_s7 + $0x78] sm:$0xf] %vm1645_vm4, %v1985_v21  ;;  %vm1228_vm5 = vcmp.gt.f32.partialorder %v1164_v23, 0.0  ;;  %v1292_v26 = vmul.f32 0.01, %v1164_v23 }
 0x187   : > { %vm1260_vm6 = vcmp.gt.f32.partialorder %v1196_v24, 0.0  ;;  %v1324_v27 = vmul.f32 0.01, %v1196_v24  ;;  %1708 = vst.msk [vmem:[%s2404_s7 + $0xf8] sm:$0xf] %vm1645_vm4, %v2017_v25 }
 0x188   : > { %v1356_v28 = vsel %vm1228_vm5, %v1164_v23, %v1292_v26 }
 0x189   : > { %v1388_v29 = vsel %vm1260_vm6, %v1196_v24, %v1324_v27  ;;  %v1986_v30 = vpack.c.bf16 %v1356_v28, %v1356_v28 }
 0x18a   : > { %v2018_v31 = vpack.c.bf16 %v1388_v29, %v1388_v29 }
 0x18b   : > { %1677 = vst.msk [vmem:[%s2404_s7 + $0x7c] sm:$0xf] %vm1645_vm4, %v1986_v30 }
 0x18c   : > { %1709 = vst.msk [vmem:[%s2404_s7 + $0xfc] sm:$0xf] %vm1645_vm4, %v2018_v31 }
 0x18d PF: > { %s14_s15 = sadd.s32 1, %s2174_s15  }
 0x18e   : > { %p11_p4 = scmp.ge.s32.totalorder %s14_s15, 4  }
 0x190   :  { %13 = sbr.rel (!%p11_p4) target bundleno = 1 (0x1), region = 66 }

// kernel: hourglass_att_forward.28
= control target key start
LH: loop header
LB: loop body
LE: loop exit
PB: predicated region body
PF: predicated region fallthrough
CT: control target
= control target key end

     0   :  { %s455_s9 = smov 0   ;;  %s457_s10 = smov 0   ;;  %s495_s0 = inlined_call_operand.vmem [shape: bf16[2,1,512], index: 0, kind: input, shape index: {}]   ;;  %s496_s1 = inlined_call_operand.vmem [shape: bf16[2,8,512], index: 1, kind: input, shape index: {}]   ;;  %s497_s2 = inlined_call_operand.vmem [shape: bf16[2,8,512], index: 2, kind: output, shape index: {}]  }
   0x1   :  { %s459_s11 = smov 0  }
   0x2 LB: > { %s24_s12 = sadd.s32 1, %s434_s10  ;;  %p376_p0 = scmp.ge.s32.totalorder %s438_s11, 1  ;;  %s438_s11 = sphi %s459_s11, %s12_s11   ;;  %s434_s10 = sphi %s457_s10, %s499_s10   ;;  %s430_s9 = sphi %s455_s9, %s498_s9  }
   0x3   : > { %p26_p1 = scmp.ge.s32.totalorder %s24_s12, 2  ;;  %p141_p2 = scmp.lt.s32.totalorder %s438_s11, 3 }
   0x5   : > { %s501_s12 = smov (%p26_p1, %s24_s12), 0  ;;  %p142_p3 = pnand %p376_p0, %p141_p2 }
   0x6   : > { %p175_p4 = scmp.lt.s32.totalorder (!%p142_p3), %s430_s9, 1 }
   0x7   : > { %145 = sbr.rel (%p142_p3) target bundleno = 47 (0x2f), region = 28 }
   0xc   : > { %s503_s9 = smov (!%p175_p4, %s430_s9), 1  ;;  %v210_v3 = vlaneseq }
   0xd   : > { %s377_s13 = sshll.u32 %s503_s9, 2  ;;  %s386_s17 = sshll.u32 %s503_s9, 4 }
   0xe   : > { %s178_s16 = scalar_lea.vmem %s495_s0, %s377_s13  ;;  %v211_v4 = vshrl.u32 %v210_v3, 7  ;;  %s187_s20 = scalar_lea.vmem %s496_s1, %s386_s17 }
   0xf   : > { %v197_v0 = vld [vmem:[%s178_s16] sm:$0xf]  ;;  %v204_v9 = vld [vmem:[%s187_s20 + $0x8] sm:$0xff]  ;;  %s196_s23 = scalar_lea.vmem %s497_s2, %s386_s17 }
  0x10   : > { %v198_v1 = vunpack.c.l.bf16 %v197_v0  ;;  %v212_v6 = vsub.s32 0, %v211_v4  ;;  %v203_v8 = vld [vmem:[%s187_s20] sm:$0xff]  ;;  %v216_v10 = vsub.s32 2, %v211_v4  ;;  %v220_v11 = vsub.s32 4, %v211_v4 }
  0x11   : > { %v224_v12 = vsub.s32 6, %v211_v4  ;;  %v205_v14 = vunpack.c.l.bf16 %v203_v8  ;;  %v206_v15 = vunpack.c.h.bf16 %v203_v8  ;;  %v207_v16 = vunpack.c.l.bf16 %v204_v9 }
  0x12   : > { %v199_v2 = vmul.f32 0.5, %v198_v1  ;;  %v208_v17 = vunpack.c.h.bf16 %v204_v9 }
  0x14   : > { %414 = vtanh.f32 %v199_v2 }
  0x21   : > { %v415_v5 = vpop.eup %414 }
  0x22   : > { %v201_v7 = vadd.f32 1.0, %v415_v5 }
  0x24   : > { %v202_v13 = vmul.f32 0.5, %v201_v7 }
  0x26   : > { %v213_v18 = vrot.slane %v202_v13, %v212_v6  ;;  %v217_v19 = vrot.slane %v202_v13, %v216_v10  ;;  %v221_v20 = vrot.slane %v202_v13, %v220_v11  ;;  %v225_v21 = vrot.slane %v202_v13, %v224_v12 }
  0x28   : > { %v233_v22 = vrot.slane %v213_v18, %v212_v6  ;;  %v237_v23 = vrot.slane %v217_v19, %v212_v6  ;;  %v241_v24 = vrot.slane %v221_v20, %v212_v6  ;;  %v245_v25 = vrot.slane %v225_v21, %v212_v6 }
  0x2a   : > { %v246_v26 = vmul.f32 %v233_v22, %v205_v14  ;;  %v247_v27 = vmul.f32 %v237_v23, %v206_v15  ;;  %v248_v28 = vmul.f32 %v241_v24, %v207_v16  ;;  %v249_v29 = vmul.f32 %v245_v25, %v208_v17 }
  0x2c   : > { %v388_v30 = vpack.c.bf16 %v247_v27, %v246_v26  ;;  %v389_v31 = vpack.c.bf16 %v249_v29, %v248_v28 }
  0x2e   : > { %266 = vst [vmem:[%s196_s23] sm:$0xff] %v388_v30  ;;  %267 = vst [vmem:[%s196_s23 + $0x8] sm:$0xff] %v389_v31 }
  0x2f PF: > { %s12_s11 = sadd.s32 1, %s438_s11   ;;  %s498_s9 = smov %s434_s10 }
  0x30   : > { %p9_p5 = scmp.ge.s32.totalorder %s12_s11, 4   ;;  %s499_s10 = smov %s501_s12 }
  0x32   :  { %11 = sbr.rel (!%p9_p5) target bundleno = 2 (0x2), region = 61 }

// kernel: hourglass_att_forward.41
= control target key start
LH: loop header
LB: loop body
LE: loop exit
PB: predicated region body
PF: predicated region fallthrough
CT: control target
= control target key end

     0   :  { %s555_s21 = smov 0   ;;  %s594_s0 = inlined_call_operand.vmem [shape: bf16[32,8], index: 0, kind: input, shape index: {}]   ;;  %s595_s1 = inlined_call_operand.vmem [shape: bf16[8,4], index: 1, kind: input, shape index: {}]   ;;  %s596_s2 = inlined_call_operand.vmem [shape: f32[1,4], index: 2, kind: input, shape index: {}]   ;;  %s597_s3 = inlined_call_operand.vmem [shape: f32[1,4], index: 3, kind: input, shape index: {}]   ;;  %s598_s4 = inlined_call_operand.vmem [shape: bf16[4,16], index: 4, kind: input, shape index: {}]   ;;  %s599_s5 = inlined_call_operand.vmem [shape: f32[1,16], index: 5, kind: input, shape index: {}]   ;;  %s600_s6 = inlined_call_operand.vmem [shape: bf16[32,16], index: 6, kind: output, shape index: {}]  }
   0x1 LB: > { %s462_s22 = sadd.s32 4294967295, %s516_s21   ;;  %p466_p0 = scmp.ge.s32.totalorder %s516_s21, 1  ;;  %s516_s21 = sphi %s555_s21, %s16_s21  }
   0x2   : > { %p213_p1 = scmp.lt.s32.totalorder %s516_s21, 3 }
   0x4   : > { %p214_p2 = pnand %p466_p0, %p213_p1 }
   0x5   : > { %s467_s25 = sshll.u32 (!%p214_p2), %s462_s22, 1 }
   0x6   : > { %217 = sbr.rel (%p214_p2) target bundleno = 424 (0x1a8), region = 44  ;;  %p244_p3 = scmp.lt.s32.totalorder (!%p214_p2), %s467_s25, 3 }
   0xb   : > { %v258_v0 = vld [vmem:[%s595_s1] sm:$0xf]  ;;  %vm268_vm0 = vcmask 1043456   ;;  %v518_v1 = vmov 0.0   ;;  %vm519_vm1 = vmmov 0   ;;  %s602_s25 = smov (!%p244_p3, %s467_s25), 3 }
   0xc   : > { %487 = vmatprep.subr.bf16.mxu0 %v518_v1  ;;  %v270_v2 = vsel %vm268_vm0, %v258_v0, 0  ;;  %489 = vmatprep.mubr.msk.bf16.mxu0 %vm519_vm1, %v518_v1  ;;  %s468_s26 = sshll.u32 %s602_s25, 2  ;;  %vm264_vm2 = vcmask 64512   ;;  %v338_v4 = vld [vmem:[%s598_s4] sm:$0x3]  ;;  %vm350_vm3 = vcmask 1041408  }
   0xd   : > { %488 = vmatpush3.bf16.msra.mxu0 %v270_v2  ;;  %493 = vmatprep.subr.bf16.mxu1 %v518_v1  ;;  %s247_s29 = scalar_lea.vmem %s594_s0, %s468_s26  ;;  %v352_v5 = vsel %vm350_vm3, %v338_v4, 0  ;;  %v473_v6 = vld [vmem:[%s596_s2] ss:$0 sm:$0xff]  ;;  %vm346_vm6 = vcmask 31744   ;;  %s253_s16 = scalar_lea.vmem %s600_s6, %s468_s26  ;;  %vm403_vm7 = vcmask 125952  }
   0xe   : > { %495 = vmatprep.mubr.msk.bf16.mxu1 %vm519_vm1, %v518_v1  ;;  %v509_v3 = vld [vmem:[%s247_s29] sm:$0xff]   ;;  %494 = vmatpush3.bf16.msra.mxu1 %v352_v5 }
   0xf   : > { %v474_v8 = vld [vmem:[%s597_s3] ss:$0 sm:$0xff] }
  0x10   : > { %490 = vmatmul.mubr.msk.bf16.vlgmr.msra.gmra.mxu0 %vm264_vm2, %v509_v3  ;;  %v475_v21 = vld [vmem:[%s599_s5] ss:$0 sm:$0xff] }
  0xd0   : > { %v306_v7 = vpop.f32.mrf.mxu0 }
  0xd1   : > { %v320_v9 = vmul.f32 %v473_v6, %v306_v7 }
  0xd2   : > { %v491_v10 = vpop.f32.mrf.mxu0 }
  0xd3   : > { %v329_v11 = vadd.f32 %v474_v8, %v320_v9 }
  0xd4   : > { %v309_v12 = vpop.f32.mrf.mxu0 }
  0xd5   : > { %v321_v13 = vmul.f32 %v473_v6, %v309_v12  ;;  %v333_v15 = vmul.f32 0.01, %v329_v11  ;;  %vm331_vm4 = vcmp.gt.f32.partialorder %v329_v11, 0.0 }
  0xd6   : > { %v492_v14 = vpop.f32.mrf.mxu0 }
  0xd7   : > { %v330_v16 = vadd.f32 %v474_v8, %v321_v13  ;;  %v335_v18 = vsel %vm331_vm4, %v329_v11, %v333_v15 }
  0xd9   : > { %vm332_vm5 = vcmp.gt.f32.partialorder %v330_v16, 0.0  ;;  %v334_v17 = vmul.f32 0.01, %v330_v16 }
  0xdb   : > { %v336_v19 = vsel %vm332_vm5, %v330_v16, %v334_v17 }
  0xdc   : > { %v337_v20 = vpack.c.bf16 %v336_v19, %v335_v18 }
  0xde   : > { %496 = vmatmul.mubr.msk.bf16.vlgmr.msra.gmra.mxu1 %vm346_vm6, %v337_v20 }
 0x19e   : > { %v388_v22 = vpop.f32.mrf.mxu1 }
 0x19f   : > { %v389_v23 = vadd.f32 %v475_v21, %v388_v22 }
 0x1a0   : > { %v497_v24 = vpop.f32.mrf.mxu1 }
 0x1a1   : > { %v481_v25 = vpack.c.bf16 %v389_v23, %v389_v23 }
 0x1a2   : > { %v391_v26 = vpop.f32.mrf.mxu1 }
 0x1a3   : > { %404 = vst.msk [vmem:[%s253_s16] sm:$0xf] %vm403_vm7, %v481_v25  ;;  %v392_v27 = vadd.f32 %v475_v21, %v391_v26 }
 0x1a4   : > { %v498_v28 = vpop.f32.mrf.mxu1 }
 0x1a5   : > { %v482_v29 = vpack.c.bf16 %v392_v27, %v392_v27 }
 0x1a7   : > { %405 = vst.msk [vmem:[%s253_s16 + $0x4] sm:$0xf] %vm403_vm7, %v482_v29 }
 0x1a8 PF: > { %s16_s21 = sadd.s32 1, %s516_s21  }
 0x1a9   : > { %p13_p4 = scmp.ge.s32.totalorder %s16_s21, 4  }
 0x1ab   :  { %15 = sbr.rel (!%p13_p4) target bundleno = 1 (0x1), region = 74 }

// kernel: hourglass_att_forward.29
= control target key start
LH: loop header
LB: loop body
LE: loop exit
PB: predicated region body
PF: predicated region fallthrough
CT: control target
= control target key end

     0   :  { %s952_s15 = smov 0   ;;  %s1145_s0 = inlined_call_operand.vmem [shape: bf16[256,216], index: 0, kind: input, shape index: {}]   ;;  %s1146_s1 = inlined_call_operand.vmem [shape: bf16[216,16], index: 1, kind: input, shape index: {}]   ;;  %s1147_s2 = inlined_call_operand.vmem [shape: f32[1,16], index: 2, kind: input, shape index: {}]   ;;  %s1148_s3 = inlined_call_operand.vmem [shape: f32[1,16], index: 3, kind: input, shape index: {}]   ;;  %s1149_s4 = inlined_call_operand.vmem [shape: bf16[256,16], index: 4, kind: output, shape index: {}]  }
   0x1 LB: > { %s758_s16 = sadd.s32 4294967295, %s924_s15   ;;  %p762_p0 = scmp.ge.s32.totalorder %s924_s15, 1  ;;  %s924_s15 = sphi %s952_s15, %s14_s15  }
   0x2   : > { %p164_p1 = scmp.lt.s32.totalorder %s924_s15, 3 }
   0x4   : > { %p165_p2 = pnand %p762_p0, %p164_p1 }
   0x5   : > { %s763_s21 = sshll.u32 (!%p165_p2), %s758_s16, 4 }
   0x6   : > { %168 = sbr.rel (%p165_p2) target bundleno = 301 (0x12d), region = 36  ;;  %p192_p3 = scmp.lt.s32.totalorder (!%p165_p2), %s763_s21, 31 }
   0xb   : > { %v880_v0 = vld [vmem:[%s1146_s1 + $0x38] sm:$0xff]   ;;  %v926_v1 = vmov 0   ;;  %v881_v2 = vld [vmem:[%s1146_s1 + $0x30] sm:$0xff]   ;;  %s1151_s21 = smov (!%p192_p3, %s763_s21), 31  ;;  %v882_v3 = vld [vmem:[%s1146_s1 + $0x28] sm:$0xff]   ;;  %vm401_vm0 = vcmask 719872  }
   0xc   : > { %430 = vmatprep.subr.bf16.mxu0 %v926_v1  ;;  %843 = vmatprep.subr.bf16.mxu1 %v926_v1  ;;  %s826_s24 = sshll.u32 %s1151_s21, 3  ;;  %v883_v4 = vld [vmem:[%s1146_s1 + $0x20] sm:$0xff]   ;;  %v884_v5 = vld [vmem:[%s1146_s1 + $0x18] sm:$0xff]   ;;  %v885_v8 = vld [vmem:[%s1146_s1 + $0x10] sm:$0xff]   ;;  %vm426_vm1 = vcmask 1043456   ;;  %vm685_vm4 = vcmask 125952  }
   0xd   : > { %431 = vmatpush1.bf16.msra.mxu0 %v880_v0  ;;  %857 = vmatpush1.bf16.msra.mxu1 %v880_v0  ;;  %s986_s29 = scalar_lea.vmem %s1145_s0, %s826_s24  ;;  %v886_v9 = vld [vmem:[%s1146_s1 + $0x8] sm:$0xff]   ;;  %v887_v10 = vld [vmem:[%s1146_s1] sm:$0xff]   ;;  %v890_v14 = vld [vmem:[%s1146_s1 + $0x58] sm:$0xff]  }
   0xe   : > { %432 = vmatprep.subr.bf16.mxu0 %v926_v1  ;;  %844 = vmatprep.subr.bf16.mxu1 %v926_v1  ;;  %v896_v6 = vld [vmem:[%s986_s29 + $0x4] ss:$8 sps:$4 sm:$0xff]   ;;  %v888_v11 = vld [vmem:[%s1146_s1 + $0x68] ss:$0 sps:$4 sm:$0xff]   ;;  %v891_v15 = vld [vmem:[%s1146_s1 + $0x50] sm:$0xff]  }
   0xf   : > { %798 = vmatprep.mubr.msk.bf16.mxu0 %vm401_vm0, %v896_v6  ;;  %v899_v7 = vld [vmem:[%s986_s29 + $0x44] ss:$8 sps:$4 sm:$0xff]   ;;  %v428_v12 = vsel %vm426_vm1, %v888_v11, 0  ;;  %v894_v18 = vld [vmem:[%s986_s29] ss:$8 sps:$4 sm:$0xff]  }
  0x10   : > { %802 = vmatprep.mubr.msk.bf16.mxu1 %vm401_vm0, %v899_v7  ;;  %v889_v13 = vld [vmem:[%s1146_s1 + $0x60] sm:$0xff]   ;;  %v892_v16 = vld [vmem:[%s1146_s1 + $0x48] sm:$0xff]   ;;  %v900_v20 = vld [vmem:[%s986_s29 + $0x14] ss:$8 sps:$4 sm:$0xff]  }
  0x11   : > { %433 = vmatpush1.bf16.msra.mxu0 %v881_v2  ;;  %858 = vmatpush1.bf16.msra.mxu1 %v881_v2  ;;  %v893_v17 = vld [vmem:[%s1146_s1 + $0x40] sm:$0xff]   ;;  %v902_v21 = vld [vmem:[%s986_s29 + $0x54] ss:$8 sps:$4 sm:$0xff]   ;;  %v904_v22 = vld [vmem:[%s986_s29 + $0x10] ss:$8 sps:$4 sm:$0xff]  }
  0x12   : > { %434 = vmatprep.subr.bf16.mxu0 %v926_v1  ;;  %845 = vmatprep.subr.bf16.mxu1 %v926_v1  ;;  %v897_v19 = vld [vmem:[%s986_s29 + $0x40] ss:$8 sps:$4 sm:$0xff]   ;;  %v905_v23 = vld [vmem:[%s986_s29 + $0x50] ss:$8 sps:$4 sm:$0xff]   ;;  %v906_v24 = vld [vmem:[%s986_s29 + $0x24] ss:$8 sps:$4 sm:$0xff]  }
  0x13   : > { %v908_v25 = vld [vmem:[%s986_s29 + $0x64] ss:$8 sps:$4 sm:$0xff]   ;;  %v910_v26 = vld [vmem:[%s986_s29 + $0x20] ss:$8 sps:$4 sm:$0xff]   ;;  %v912_v28 = vld [vmem:[%s986_s29 + $0x34] ss:$8 sps:$4 sm:$0xff]  }
  0x14   : > { %v911_v27 = vld [vmem:[%s986_s29 + $0x60] ss:$8 sps:$4 sm:$0xff]   ;;  %v914_v29 = vld [vmem:[%s986_s29 + $0x74] ss:$8 sps:$4 sm:$0xff]   ;;  %v916_v30 = vld [vmem:[%s986_s29 + $0x30] ss:$8 sps:$4 sm:$0xff]  }
  0x15   : > { %435 = vmatpush1.bf16.msra.mxu0 %v882_v3  ;;  %859 = vmatpush1.bf16.msra.mxu1 %v882_v3  ;;  %v917_v31 = vld [vmem:[%s986_s29 + $0x70] ss:$8 sps:$4 sm:$0xff]   ;;  %v1065_v32 = vld [vmem:[%s1147_s2] ss:$0 sm:$0xff]  ;;  %s767_s29 = sshll.u32 %s1151_s21, 2 }
  0x16   : > { %436 = vmatprep.subr.bf16.mxu0 %v926_v1  ;;  %846 = vmatprep.subr.bf16.mxu1 %v926_v1  ;;  %v1070_v34 = vld [vmem:[%s1148_s3] ss:$0 sm:$0xff]  ;;  %s1082_s7 = scalar_lea.vmem %s1149_s4, %s767_s29 }
  0x19   : > { %437 = vmatpush1.bf16.msra.mxu0 %v883_v4  ;;  %860 = vmatpush1.bf16.msra.mxu1 %v883_v4 }
  0x1a   : > { %438 = vmatprep.subr.bf16.mxu0 %v926_v1  ;;  %847 = vmatprep.subr.bf16.mxu1 %v926_v1 }
  0x1d   : > { %439 = vmatpush1.bf16.msra.mxu0 %v884_v5  ;;  %861 = vmatpush1.bf16.msra.mxu1 %v884_v5 }
  0x1e   : > { %440 = vmatprep.subr.bf16.mxu0 %v926_v1  ;;  %848 = vmatprep.subr.bf16.mxu1 %v926_v1 }
  0x21   : > { %441 = vmatpush1.bf16.msra.mxu0 %v885_v8  ;;  %862 = vmatpush1.bf16.msra.mxu1 %v885_v8 }
  0x22   : > { %442 = vmatprep.subr.bf16.mxu0 %v926_v1  ;;  %849 = vmatprep.subr.bf16.mxu1 %v926_v1 }
  0x25   : > { %443 = vmatpush1.bf16.msra.mxu0 %v886_v9  ;;  %863 = vmatpush1.bf16.msra.mxu1 %v886_v9 }
  0x26   : > { %444 = vmatprep.subr.bf16.mxu0 %v926_v1  ;;  %850 = vmatprep.subr.bf16.mxu1 %v926_v1 }
  0x29   : > { %445 = vmatpush1.bf16.msra.mxu0 %v887_v10  ;;  %864 = vmatpush1.bf16.msra.mxu1 %v887_v10 }
  0x2a   : > { %450 = vmatprep.subr.bf16.mxu0 %v926_v1  ;;  %851 = vmatprep.subr.bf16.mxu1 %v926_v1 }
  0x2d   : > { %451 = vmatpush2.bf16.msra.mxu0 %v428_v12  ;;  %865 = vmatpush2.bf16.msra.mxu1 %v428_v12 }
  0x2e   : > { %452 = vmatprep.subr.bf16.mxu0 %v926_v1  ;;  %852 = vmatprep.subr.bf16.mxu1 %v926_v1 }
  0x31   : > { %453 = vmatpush2.bf16.msra.mxu0 %v889_v13  ;;  %866 = vmatpush2.bf16.msra.mxu1 %v889_v13 }
  0x32   : > { %454 = vmatprep.subr.bf16.mxu0 %v926_v1  ;;  %853 = vmatprep.subr.bf16.mxu1 %v926_v1 }
  0x35   : > { %455 = vmatpush2.bf16.msra.mxu0 %v890_v14  ;;  %867 = vmatpush2.bf16.msra.mxu1 %v890_v14 }
  0x36   : > { %456 = vmatprep.subr.bf16.mxu0 %v926_v1  ;;  %854 = vmatprep.subr.bf16.mxu1 %v926_v1 }
  0x39   : > { %457 = vmatpush2.bf16.msra.mxu0 %v891_v15  ;;  %868 = vmatpush2.bf16.msra.mxu1 %v891_v15 }
  0x3a   : > { %458 = vmatprep.subr.bf16.mxu0 %v926_v1  ;;  %855 = vmatprep.subr.bf16.mxu1 %v926_v1 }
  0x3d   : > { %459 = vmatpush2.bf16.msra.mxu0 %v892_v16  ;;  %869 = vmatpush2.bf16.msra.mxu1 %v892_v16 }
  0x3e   : > { %460 = vmatprep.subr.bf16.mxu0 %v926_v1  ;;  %856 = vmatprep.subr.bf16.mxu1 %v926_v1 }
  0x41   : > { %461 = vmatpush2.bf16.msra.mxu0 %v893_v17  ;;  %870 = vmatpush2.bf16.msra.mxu1 %v893_v17 }
  0x44   : > { %463 = vmatmul.mubr.bf16.vlgmr.msra.gmra.mxu0 %v894_v18  ;;  %495 = vmatmul.mubr.bf16.vlgmr.msra.gmra.mxu1 %v897_v19 }
  0x45   : > { %799 = vmatprep.mubr.msk.bf16.mxu0 %vm401_vm0, %v900_v20  ;;  %803 = vmatprep.mubr.msk.bf16.mxu1 %vm401_vm0, %v902_v21 }
  0x4c   : > { %471 = vmatmul.mubr.bf16.gmra.mxu0 %v904_v22  ;;  %503 = vmatmul.mubr.bf16.gmra.mxu1 %v905_v23 }
  0x4d   : > { %800 = vmatprep.mubr.msk.bf16.mxu0 %vm401_vm0, %v906_v24  ;;  %804 = vmatprep.mubr.msk.bf16.mxu1 %vm401_vm0, %v908_v25 }
  0x54   : > { %479 = vmatmul.mubr.bf16.gmra.mxu0 %v910_v26  ;;  %511 = vmatmul.mubr.bf16.gmra.mxu1 %v911_v27 }
  0x55   : > { %801 = vmatprep.mubr.msk.bf16.mxu0 %vm401_vm0, %v912_v28  ;;  %805 = vmatprep.mubr.msk.bf16.mxu1 %vm401_vm0, %v914_v29 }
  0x5c   : > { %487 = vmatmul.mubr.bf16.gmra.mxu0 %v916_v30  ;;  %519 = vmatmul.mubr.bf16.gmra.mxu1 %v917_v31 }
 0x104   : > { %v464_v33 = vpop.f32.mrf.mxu0  ;;  %v496_v35 = vpop.f32.mrf.mxu1 }
 0x105   : > { %v534_v36 = vmul.f32 %v1065_v32, %v464_v33  ;;  %v542_v37 = vmul.f32 %v1065_v32, %v496_v35 }
 0x106   : > { %v466_v38 = vpop.f32.mrf.mxu0  ;;  %v498_v39 = vpop.f32.mrf.mxu1 }
 0x107   : > { %v557_v40 = vadd.f32 %v1070_v34, %v534_v36  ;;  %v565_v41 = vadd.f32 %v1070_v34, %v542_v37 }
 0x108   : > { %v467_v42 = vpop.f32.mrf.mxu0  ;;  %v499_v43 = vpop.f32.mrf.mxu1 }
 0x109   : > { %vm573_vm2 = vcmp.gt.f32.partialorder %v557_v40, 0.0  ;;  %v589_v44 = vmul.f32 0.01, %v557_v40  ;;  %vm581_vm3 = vcmp.gt.f32.partialorder %v565_v41, 0.0  ;;  %v597_v45 = vmul.f32 0.01, %v565_v41 }
 0x10a   : > { %v535_v46 = vmul.f32 %v1065_v32, %v467_v42  ;;  %v543_v47 = vmul.f32 %v1065_v32, %v499_v43  ;;  %v469_v48 = vpop.f32.mrf.mxu0  ;;  %v501_v49 = vpop.f32.mrf.mxu1 }
 0x10b   : > { %v605_v50 = vsel %vm573_vm2, %v557_v40, %v589_v44  ;;  %v613_v51 = vsel %vm581_vm3, %v565_v41, %v597_v45 }
 0x10c   : > { %v827_v52 = vpack.c.bf16 %v605_v50, %v605_v50  ;;  %v835_v53 = vpack.c.bf16 %v613_v51, %v613_v51  ;;  %v558_v54 = vadd.f32 %v1070_v34, %v535_v46  ;;  %v566_v55 = vadd.f32 %v1070_v34, %v543_v47  ;;  %v472_v56 = vpop.f32.mrf.mxu0  ;;  %v504_v57 = vpop.f32.mrf.mxu1 }
 0x10d   : > { %v536_v58 = vmul.f32 %v1065_v32, %v472_v56  ;;  %v544_v59 = vmul.f32 %v1065_v32, %v504_v57 }
 0x10e   : > { %686 = vst.msk [vmem:[%s1082_s7] sm:$0xf] %vm685_vm4, %v827_v52  ;;  %694 = vst.msk [vmem:[%s1082_s7 + $0x20] sm:$0xf] %vm685_vm4, %v835_v53  ;;  %vm574_vm5 = vcmp.gt.f32.partialorder %v558_v54, 0.0  ;;  %vm582_vm6 = vcmp.gt.f32.partialorder %v566_v55, 0.0  ;;  %v474_v62 = vpop.f32.mrf.mxu0  ;;  %v506_v63 = vpop.f32.mrf.mxu1 }
 0x10f   : > { %v590_v60 = vmul.f32 0.01, %v558_v54  ;;  %v598_v61 = vmul.f32 0.01, %v566_v55  ;;  %v559_v0 = vadd.f32 %v1070_v34, %v536_v58  ;;  %v567_v1 = vadd.f32 %v1070_v34, %v544_v59 }
 0x110   : > { %v475_v4 = vpop.f32.mrf.mxu0  ;;  %v507_v5 = vpop.f32.mrf.mxu1 }
 0x111   : > { %v606_v2 = vsel %vm574_vm5, %v558_v54, %v590_v60  ;;  %v614_v3 = vsel %vm582_vm6, %v566_v55, %v598_v61  ;;  %vm575_vm7 = vcmp.gt.f32.partialorder %v559_v0, 0.0  ;;  %v591_v8 = vmul.f32 0.01, %v559_v0 }
 0x112   : > { %v828_v6 = vpack.c.bf16 %v606_v2, %v606_v2  ;;  %v836_v7 = vpack.c.bf16 %v614_v3, %v614_v3  ;;  %vm583_vm8 = vcmp.gt.f32.partialorder %v567_v1, 0.0  ;;  %v599_v9 = vmul.f32 0.01, %v567_v1  ;;  %v477_v12 = vpop.f32.mrf.mxu0  ;;  %v509_v13 = vpop.f32.mrf.mxu1 }
 0x113   : > { %v537_v10 = vmul.f32 %v1065_v32, %v475_v4  ;;  %v545_v11 = vmul.f32 %v1065_v32, %v507_v5  ;;  %v607_v14 = vsel %vm575_vm7, %v559_v0, %v591_v8 }
 0x114   : > { %687 = vst.msk [vmem:[%s1082_s7 + $0x4] sm:$0xf] %vm685_vm4, %v828_v6  ;;  %695 = vst.msk [vmem:[%s1082_s7 + $0x24] sm:$0xf] %vm685_vm4, %v836_v7  ;;  %v829_v15 = vpack.c.bf16 %v607_v14, %v607_v14  ;;  %v615_v16 = vsel %vm583_vm8, %v567_v1, %v599_v9  ;;  %v480_v19 = vpop.f32.mrf.mxu0  ;;  %v512_v20 = vpop.f32.mrf.mxu1 }
 0x115   : > { %v560_v17 = vadd.f32 %v1070_v34, %v537_v10  ;;  %v568_v18 = vadd.f32 %v1070_v34, %v545_v11  ;;  %v837_v21 = vpack.c.bf16 %v615_v16, %v615_v16  ;;  %v538_v22 = vmul.f32 %v1065_v32, %v480_v19 }
 0x116   : > { %v546_v23 = vmul.f32 %v1065_v32, %v512_v20  ;;  %688 = vst.msk [vmem:[%s1082_s7 + $0x8] sm:$0xf] %vm685_vm4, %v829_v15  ;;  %v482_v26 = vpop.f32.mrf.mxu0  ;;  %v514_v27 = vpop.f32.mrf.mxu1 }
 0x117   : > { %vm576_vm9 = vcmp.gt.f32.partialorder %v560_v17, 0.0  ;;  %v592_v24 = vmul.f32 0.01, %v560_v17  ;;  %vm584_vm10 = vcmp.gt.f32.partialorder %v568_v18, 0.0  ;;  %v600_v25 = vmul.f32 0.01, %v568_v18 }
 0x118   : > { %696 = vst.msk [vmem:[%s1082_s7 + $0x28] sm:$0xf] %vm685_vm4, %v837_v21  ;;  %v561_v28 = vadd.f32 %v1070_v34, %v538_v22  ;;  %v569_v29 = vadd.f32 %v1070_v34, %v546_v23  ;;  %v483_v33 = vpop.f32.mrf.mxu0  ;;  %v515_v35 = vpop.f32.mrf.mxu1 }
 0x119   : > { %v608_v30 = vsel %vm576_vm9, %v560_v17, %v592_v24  ;;  %v616_v31 = vsel %vm584_vm10, %v568_v18, %v600_v25  ;;  %v539_v40 = vmul.f32 %v1065_v32, %v483_v33  ;;  %v547_v41 = vmul.f32 %v1065_v32, %v515_v35 }
 0x11a   : > { %v830_v36 = vpack.c.bf16 %v608_v30, %v608_v30  ;;  %v838_v37 = vpack.c.bf16 %v616_v31, %v616_v31  ;;  %vm577_vm11 = vcmp.gt.f32.partialorder %v561_v28, 0.0  ;;  %v593_v38 = vmul.f32 0.01, %v561_v28  ;;  %v485_v42 = vpop.f32.mrf.mxu0  ;;  %v517_v43 = vpop.f32.mrf.mxu1 }
 0x11b   : > { %vm585_vm12 = vcmp.gt.f32.partialorder %v569_v29, 0.0  ;;  %v601_v39 = vmul.f32 0.01, %v569_v29  ;;  %v562_v47 = vadd.f32 %v1070_v34, %v539_v40  ;;  %v570_v48 = vadd.f32 %v1070_v34, %v547_v41 }
 0x11c   : > { %689 = vst.msk [vmem:[%s1082_s7 + $0xc] sm:$0xf] %vm685_vm4, %v830_v36  ;;  %697 = vst.msk [vmem:[%s1082_s7 + $0x2c] sm:$0xf] %vm685_vm4, %v838_v37  ;;  %v609_v44 = vsel %vm577_vm11, %v561_v28, %v593_v38  ;;  %v488_v49 = vpop.f32.mrf.mxu0  ;;  %v520_v50 = vpop.f32.mrf.mxu1 }
 0x11d   : > { %v831_v45 = vpack.c.bf16 %v609_v44, %v609_v44  ;;  %v617_v46 = vsel %vm585_vm12, %v569_v29, %v601_v39  ;;  %v540_v52 = vmul.f32 %v1065_v32, %v488_v49  ;;  %v548_v53 = vmul.f32 %v1065_v32, %v520_v50 }
 0x11e   : > { %v839_v51 = vpack.c.bf16 %v617_v46, %v617_v46  ;;  %vm578_vm13 = vcmp.gt.f32.partialorder %v562_v47, 0.0  ;;  %v594_v54 = vmul.f32 0.01, %v562_v47  ;;  %vm586_vm14 = vcmp.gt.f32.partialorder %v570_v48, 0.0  ;;  %v490_v56 = vpop.f32.mrf.mxu0  ;;  %v522_v57 = vpop.f32.mrf.mxu1 }
 0x11f   : > { %690 = vst.msk [vmem:[%s1082_s7 + $0x10] sm:$0xf] %vm685_vm4, %v831_v45  ;;  %v602_v55 = vmul.f32 0.01, %v570_v48  ;;  %v563_v58 = vadd.f32 %v1070_v34, %v540_v52  ;;  %v571_v59 = vadd.f32 %v1070_v34, %v548_v53 }
 0x120   : > { %698 = vst.msk [vmem:[%s1082_s7 + $0x30] sm:$0xf] %vm685_vm4, %v839_v51  ;;  %v610_v60 = vsel %vm578_vm13, %v562_v47, %v594_v54  ;;  %v491_v62 = vpop.f32.mrf.mxu0  ;;  %v523_v63 = vpop.f32.mrf.mxu1 }
 0x121   : > { %v618_v61 = vsel %vm586_vm14, %v570_v48, %v602_v55  ;;  %v832_v0 = vpack.c.bf16 %v610_v60, %v610_v60  ;;  %vm579_vm15 = vcmp.gt.f32.partialorder %v563_v58, 0.0  ;;  %v595_v2 = vmul.f32 0.01, %v563_v58 }
 0x122   : > { %v840_v1 = vpack.c.bf16 %v618_v61, %v618_v61  ;;  %vm587_vm0 = vcmp.gt.f32.partialorder %v571_v59, 0.0  ;;  %v603_v3 = vmul.f32 0.01, %v571_v59  ;;  %v541_v4 = vmul.f32 %v1065_v32, %v491_v62  ;;  %v493_v6 = vpop.f32.mrf.mxu0  ;;  %v525_v7 = vpop.f32.mrf.mxu1 }
 0x123   : > { %v549_v5 = vmul.f32 %v1065_v32, %v523_v63  ;;  %691 = vst.msk [vmem:[%s1082_s7 + $0x14] sm:$0xf] %vm685_vm4, %v832_v0  ;;  %v611_v8 = vsel %vm579_vm15, %v563_v58, %v595_v2 }
 0x124   : > { %699 = vst.msk [vmem:[%s1082_s7 + $0x34] sm:$0xf] %vm685_vm4, %v840_v1  ;;  %v833_v9 = vpack.c.bf16 %v611_v8, %v611_v8  ;;  %v619_v10 = vsel %vm587_vm0, %v571_v59, %v603_v3  ;;  %v564_v11 = vadd.f32 %v1070_v34, %v541_v4 }
 0x125   : > { %v572_v12 = vadd.f32 %v1070_v34, %v549_v5  ;;  %v841_v13 = vpack.c.bf16 %v619_v10, %v619_v10 }
 0x126   : > { %692 = vst.msk [vmem:[%s1082_s7 + $0x18] sm:$0xf] %vm685_vm4, %v833_v9  ;;  %vm580_vm1 = vcmp.gt.f32.partialorder %v564_v11, 0.0  ;;  %v596_v32 = vmul.f32 0.01, %v564_v11 }
 0x127   : > { %vm588_vm2 = vcmp.gt.f32.partialorder %v572_v12, 0.0  ;;  %v604_v14 = vmul.f32 0.01, %v572_v12  ;;  %700 = vst.msk [vmem:[%s1082_s7 + $0x38] sm:$0xf] %vm685_vm4, %v841_v13 }
 0x128   : > { %v612_v15 = vsel %vm580_vm1, %v564_v11, %v596_v32 }
 0x129   : > { %v620_v16 = vsel %vm588_vm2, %v572_v12, %v604_v14  ;;  %v834_v17 = vpack.c.bf16 %v612_v15, %v612_v15 }
 0x12a   : > { %v842_v18 = vpack.c.bf16 %v620_v16, %v620_v16 }
 0x12b   : > { %693 = vst.msk [vmem:[%s1082_s7 + $0x1c] sm:$0xf] %vm685_vm4, %v834_v17 }
 0x12c   : > { %701 = vst.msk [vmem:[%s1082_s7 + $0x3c] sm:$0xf] %vm685_vm4, %v842_v18 }
 0x12d PF: > { %s14_s15 = sadd.s32 1, %s924_s15  }
 0x12e   : > { %p11_p4 = scmp.ge.s32.totalorder %s14_s15, 4  }
 0x130   :  { %13 = sbr.rel (!%p11_p4) target bundleno = 1 (0x1), region = 66 }

// kernel: hourglass_att_forward.30
= control target key start
LH: loop header
LB: loop body
LE: loop exit
PB: predicated region body
PF: predicated region fallthrough
CT: control target
= control target key end

     0   :  { %s1351_s15 = smov 0   ;;  %s1582_s0 = inlined_call_operand.vmem [shape: bf16[256,432], index: 0, kind: input, shape index: {}]   ;;  %s1583_s1 = inlined_call_operand.vmem [shape: bf16[432,16], index: 1, kind: input, shape index: {}]   ;;  %s1584_s2 = inlined_call_operand.vmem [shape: f32[1,16], index: 2, kind: input, shape index: {}]   ;;  %s1585_s3 = inlined_call_operand.vmem [shape: f32[1,16], index: 3, kind: input, shape index: {}]   ;;  %s1586_s4 = inlined_call_operand.vmem [shape: bf16[256,16], index: 4, kind: output, shape index: {}]  }
   0x1 LB: > { %s1055_s16 = sadd.s32 4294967295, %s1323_s15   ;;  %p1059_p0 = scmp.ge.s32.totalorder %s1323_s15, 1  ;;  %s1323_s15 = sphi %s1351_s15, %s14_s15  }
   0x2   : > { %p164_p1 = scmp.lt.s32.totalorder %s1323_s15, 3 }
   0x4   : > { %p165_p2 = pnand %p1059_p0, %p164_p1 }
   0x5   : > { %s1060_s9 = sshll.u32 (!%p165_p2), %s1055_s16, 4 }
   0x6   : > { %168 = sbr.rel (%p165_p2) target bundleno = 321 (0x141), region = 36  ;;  %p192_p3 = scmp.lt.s32.totalorder (!%p165_p2), %s1060_s9, 31 }
   0xb   : > { %v1242_v0 = vld [vmem:[%s1583_s1 + $0xb8] sm:$0xff]   ;;  %v1325_v1 = vmov 0   ;;  %v1245_v4 = vld [vmem:[%s1583_s1 + $0xb0] sm:$0xff]   ;;  %v1248_v7 = vld [vmem:[%s1583_s1 + $0xa8] sm:$0xff]   ;;  %s1588_s9 = smov (!%p192_p3, %s1060_s9), 31  ;;  %vm605_vm0 = vcmask 392192  }
   0xc   : > { %727 = vmatprep.subr.bf16.mxu1 %v1325_v1  ;;  %v1243_v2 = vld [vmem:[%s1583_s1 + $0x78] sm:$0xff]   ;;  %v1246_v5 = vld [vmem:[%s1583_s1 + $0x70] sm:$0xff]   ;;  %v1249_v8 = vld [vmem:[%s1583_s1 + $0x68] sm:$0xff]   ;;  %s1152_s27 = sshll.u32 %s1588_s9, 4  ;;  %s1064_s5 = sshll.u32 %s1588_s9, 2  ;;  %vm982_vm2 = vcmask 125952  }
   0xd   : > { %728 = vmatpush1.bf16.msra.mxu1 %v1242_v0  ;;  %v1244_v3 = vld [vmem:[%s1583_s1 + $0x38] sm:$0xff]   ;;  %1169 = vmatprep.subr.bf16.mxu0 %v1243_v2  ;;  %v1247_v6 = vld [vmem:[%s1583_s1 + $0x30] sm:$0xff]   ;;  %v1250_v9 = vld [vmem:[%s1583_s1 + $0x28] sm:$0xff]   ;;  %s1431_s11 = scalar_lea.vmem %s1582_s0, %s1152_s27  ;;  %s1516_s8 = scalar_lea.vmem %s1586_s4, %s1064_s5 }
   0xe   : > { %729 = vmatprep.subr.bf16.mxu1 %v1325_v1  ;;  %1170 = vmatpush3.bf16.msra.mxu0 %v1244_v3  ;;  %v1251_v10 = vld [vmem:[%s1583_s1 + $0xa0] sm:$0xff]   ;;  %v1255_v13 = vld [vmem:[%s1583_s1 + $0x58] sm:$0xff]   ;;  %v1258_v16 = vld [vmem:[%s1583_s1 + $0x50] sm:$0xff]  }
   0xf   : > { %1171 = vmatprep.subr.bf16.mxu0 %v1246_v5  ;;  %v1252_v11 = vld [vmem:[%s1583_s1 + $0x60] sm:$0xff]   ;;  %v1254_v14 = vld [vmem:[%s1583_s1 + $0x98] sm:$0xff]   ;;  %v1257_v17 = vld [vmem:[%s1583_s1 + $0x90] sm:$0xff]  }
  0x10   : > { %v1253_v12 = vld [vmem:[%s1583_s1 + $0x20] sm:$0xff]   ;;  %v1256_v15 = vld [vmem:[%s1583_s1 + $0x18] sm:$0xff]   ;;  %v1259_v18 = vld [vmem:[%s1583_s1 + $0x10] sm:$0xff]  }
  0x11   : > { %730 = vmatpush1.bf16.msra.mxu1 %v1245_v4  ;;  %v1261_v19 = vld [vmem:[%s1583_s1 + $0x48] sm:$0xff]   ;;  %v1264_v22 = vld [vmem:[%s1583_s1 + $0x40] sm:$0xff]   ;;  %v1269_v26 = vld [vmem:[%s1583_s1 + $0xd0] sm:$0xff]  }
  0x12   : > { %731 = vmatprep.subr.bf16.mxu1 %v1325_v1  ;;  %1172 = vmatpush3.bf16.msra.mxu0 %v1247_v6  ;;  %v1260_v20 = vld [vmem:[%s1583_s1 + $0x88] sm:$0xff]   ;;  %v1268_v23 = vld [vmem:[%s1431_s11 + $0x4] ss:$16 sps:$4 sm:$0xff]   ;;  %v1266_v28 = vld [vmem:[%s1431_s11] ss:$16 sps:$4 sm:$0xff]  }
  0x13   : > { %1173 = vmatprep.subr.bf16.mxu0 %v1249_v8  ;;  %v1262_v21 = vld [vmem:[%s1583_s1 + $0x8] sm:$0xff]   ;;  %v1263_v24 = vld [vmem:[%s1583_s1 + $0x80] sm:$0xff]   ;;  %662 = vmatprep.mubr.bf16.mxu0 %v1268_v23 }
  0x14   : > { %v1265_v25 = vld [vmem:[%s1583_s1] sm:$0xff]   ;;  %v1277_v27 = vld [vmem:[%s1431_s11 + $0xc] ss:$16 sps:$4 sm:$0xff]   ;;  %v1275_v34 = vld [vmem:[%s1431_s11 + $0x8] ss:$16 sps:$4 sm:$0xff]  }
  0x15   : > { %732 = vmatpush1.bf16.msra.mxu1 %v1248_v7  ;;  %v1271_v29 = vld [vmem:[%s1431_s11 + $0x24] ss:$16 sps:$4 sm:$0xff]   ;;  %1124 = vmatprep.mubr.msk.bf16.mxu1 %vm605_vm0, %v1277_v27  ;;  %v1270_v30 = vld [vmem:[%s1583_s1 + $0xc8] sm:$0xff]   ;;  %v1274_v32 = vld [vmem:[%s1431_s11 + $0x20] ss:$16 sps:$4 sm:$0xff]  }
  0x16   : > { %733 = vmatprep.subr.bf16.mxu1 %v1325_v1  ;;  %1174 = vmatpush3.bf16.msra.mxu0 %v1250_v9  ;;  %v1273_v31 = vld [vmem:[%s1583_s1 + $0xc0] sm:$0xff]   ;;  %v1281_v35 = vld [vmem:[%s1431_s11 + $0x2c] ss:$16 sps:$4 sm:$0xff]   ;;  %v1283_v38 = vld [vmem:[%s1431_s11 + $0x28] ss:$16 sps:$4 sm:$0xff]  }
  0x17   : > { %1175 = vmatprep.subr.bf16.mxu0 %v1252_v11  ;;  %v1278_v33 = vld [vmem:[%s1431_s11 + $0x44] ss:$16 sps:$4 sm:$0xff]   ;;  %v1280_v36 = vld [vmem:[%s1431_s11 + $0x40] ss:$16 sps:$4 sm:$0xff]   ;;  %v1287_v39 = vld [vmem:[%s1431_s11 + $0x4c] ss:$16 sps:$4 sm:$0xff]  }
  0x18   : > { %v1284_v37 = vld [vmem:[%s1431_s11 + $0x64] ss:$16 sps:$4 sm:$0xff]   ;;  %v1286_v40 = vld [vmem:[%s1431_s11 + $0x60] ss:$16 sps:$4 sm:$0xff]   ;;  %v1289_v42 = vld [vmem:[%s1431_s11 + $0x48] ss:$16 sps:$4 sm:$0xff]  }
  0x19   : > { %734 = vmatpush1.bf16.msra.mxu1 %v1251_v10  ;;  %v1290_v41 = vld [vmem:[%s1431_s11 + $0x84] ss:$16 sps:$4 sm:$0xff]   ;;  %v1293_v43 = vld [vmem:[%s1431_s11 + $0x6c] ss:$16 sps:$4 sm:$0xff]   ;;  %v1292_v44 = vld [vmem:[%s1431_s11 + $0x80] ss:$16 sps:$4 sm:$0xff]  }
  0x1a   : > { %735 = vmatprep.subr.bf16.mxu1 %v1325_v1  ;;  %1176 = vmatpush3.bf16.msra.mxu0 %v1253_v12  ;;  %v1296_v45 = vld [vmem:[%s1431_s11 + $0xa4] ss:$16 sps:$4 sm:$0xff]   ;;  %v1295_v46 = vld [vmem:[%s1431_s11 + $0x68] ss:$16 sps:$4 sm:$0xff]   ;;  %v1299_v47 = vld [vmem:[%s1431_s11 + $0x8c] ss:$16 sps:$4 sm:$0xff]  }
  0x1b   : > { %1177 = vmatprep.subr.bf16.mxu0 %v1255_v13  ;;  %v1298_v48 = vld [vmem:[%s1431_s11 + $0xa0] ss:$16 sps:$4 sm:$0xff]   ;;  %v1302_v49 = vld [vmem:[%s1431_s11 + $0xc4] ss:$16 sps:$4 sm:$0xff]   ;;  %v1301_v50 = vld [vmem:[%s1431_s11 + $0x88] ss:$16 sps:$4 sm:$0xff]  }
  0x1c   : > { %v1305_v51 = vld [vmem:[%s1431_s11 + $0xac] ss:$16 sps:$4 sm:$0xff]   ;;  %v1304_v52 = vld [vmem:[%s1431_s11 + $0xc0] ss:$16 sps:$4 sm:$0xff]   ;;  %v1308_v53 = vld [vmem:[%s1431_s11 + $0xe4] ss:$16 sps:$4 sm:$0xff]  }
  0x1d   : > { %736 = vmatpush1.bf16.msra.mxu1 %v1254_v14  ;;  %v1307_v54 = vld [vmem:[%s1431_s11 + $0xa8] ss:$16 sps:$4 sm:$0xff]   ;;  %v1311_v55 = vld [vmem:[%s1431_s11 + $0xcc] ss:$16 sps:$4 sm:$0xff]   ;;  %v1310_v56 = vld [vmem:[%s1431_s11 + $0xe0] ss:$16 sps:$4 sm:$0xff]  }
  0x1e   : > { %737 = vmatprep.subr.bf16.mxu1 %v1325_v1  ;;  %1178 = vmatpush3.bf16.msra.mxu0 %v1256_v15  ;;  %v1313_v57 = vld [vmem:[%s1431_s11 + $0xc8] ss:$16 sps:$4 sm:$0xff]   ;;  %v1314_v58 = vld [vmem:[%s1431_s11 + $0xec] ss:$16 sps:$4 sm:$0xff]   ;;  %v1502_v4 = vld [vmem:[%s1584_s2] ss:$0 sm:$0xff] }
  0x1f   : > { %1179 = vmatprep.subr.bf16.mxu0 %v1258_v16  ;;  %v1316_v59 = vld [vmem:[%s1431_s11 + $0xe8] ss:$16 sps:$4 sm:$0xff]   ;;  %v1507_v6 = vld [vmem:[%s1585_s3] ss:$0 sm:$0xff] }
  0x21   : > { %738 = vmatpush1.bf16.msra.mxu1 %v1257_v17 }
  0x22   : > { %739 = vmatprep.subr.bf16.mxu1 %v1325_v1  ;;  %1180 = vmatpush3.bf16.msra.mxu0 %v1259_v18 }
  0x23   : > { %1181 = vmatprep.subr.bf16.mxu0 %v1261_v19 }
  0x25   : > { %740 = vmatpush1.bf16.msra.mxu1 %v1260_v20 }
  0x26   : > { %741 = vmatprep.subr.bf16.mxu1 %v1325_v1  ;;  %1182 = vmatpush3.bf16.msra.mxu0 %v1262_v21 }
  0x27   : > { %1183 = vmatprep.subr.bf16.mxu0 %v1264_v22 }
  0x29   : > { %742 = vmatpush1.bf16.msra.mxu1 %v1263_v24 }
  0x2a   : > { %753 = vmatprep.subr.bf16.mxu1 %v1325_v1  ;;  %1184 = vmatpush3.bf16.msra.mxu0 %v1265_v25 }
  0x2d   : > { %754 = vmatpush2.bf16.msra.mxu1 %v1269_v26  ;;  %663 = vmatmul.mubr.bf16.vlgmr.msra.gmra.mxu0 %v1266_v28 }
  0x2e   : > { %755 = vmatprep.subr.bf16.mxu1 %v1325_v1  ;;  %670 = vmatprep.mubr.bf16.mxu0 %v1271_v29 }
  0x31   : > { %756 = vmatpush2.bf16.msra.mxu1 %v1270_v30 }
  0x32   : > { %757 = vmatprep.subr.bf16.mxu1 %v1325_v1 }
  0x35   : > { %758 = vmatpush2.bf16.msra.mxu1 %v1273_v31  ;;  %671 = vmatmul.mubr.bf16.gmra.mxu0 %v1274_v32 }
  0x36   : > { %678 = vmatprep.mubr.bf16.mxu0 %v1278_v33 }
  0x38   : > { %760 = vmatmul.mubr.bf16.vlgmr.msra.gmra.mxu1 %v1275_v34 }
  0x39   : > { %1125 = vmatprep.mubr.msk.bf16.mxu1 %vm605_vm0, %v1281_v35 }
  0x3d   : > { %679 = vmatmul.mubr.bf16.gmra.mxu0 %v1280_v36 }
  0x3e   : > { %686 = vmatprep.mubr.bf16.mxu0 %v1284_v37 }
  0x40   : > { %768 = vmatmul.mubr.bf16.gmra.mxu1 %v1283_v38 }
  0x41   : > { %1126 = vmatprep.mubr.msk.bf16.mxu1 %vm605_vm0, %v1287_v39 }
  0x45   : > { %687 = vmatmul.mubr.bf16.gmra.mxu0 %v1286_v40 }
  0x46   : > { %694 = vmatprep.mubr.bf16.mxu0 %v1290_v41 }
  0x48   : > { %776 = vmatmul.mubr.bf16.gmra.mxu1 %v1289_v42 }
  0x49   : > { %1127 = vmatprep.mubr.msk.bf16.mxu1 %vm605_vm0, %v1293_v43 }
  0x4d   : > { %695 = vmatmul.mubr.bf16.gmra.mxu0 %v1292_v44 }
  0x4e   : > { %702 = vmatprep.mubr.bf16.mxu0 %v1296_v45 }
  0x50   : > { %784 = vmatmul.mubr.bf16.gmra.mxu1 %v1295_v46 }
  0x51   : > { %1128 = vmatprep.mubr.msk.bf16.mxu1 %vm605_vm0, %v1299_v47 }
  0x55   : > { %703 = vmatmul.mubr.bf16.gmra.mxu0 %v1298_v48 }
  0x56   : > { %710 = vmatprep.mubr.bf16.mxu0 %v1302_v49 }
  0x58   : > { %792 = vmatmul.mubr.bf16.gmra.mxu1 %v1301_v50 }
  0x59   : > { %1129 = vmatprep.mubr.msk.bf16.mxu1 %vm605_vm0, %v1305_v51 }
  0x5d   : > { %711 = vmatmul.mubr.bf16.gmra.mxu0 %v1304_v52 }
  0x5e   : > { %718 = vmatprep.mubr.bf16.mxu0 %v1308_v53 }
  0x60   : > { %800 = vmatmul.mubr.bf16.gmra.mxu1 %v1307_v54 }
  0x61   : > { %1130 = vmatprep.mubr.msk.bf16.mxu1 %vm605_vm0, %v1311_v55 }
  0x65   : > { %719 = vmatmul.mubr.bf16.gmra.mxu0 %v1310_v56 }
  0x68   : > { %808 = vmatmul.mubr.bf16.gmra.mxu1 %v1313_v57 }
  0x69   : > { %1131 = vmatprep.mubr.msk.bf16.mxu1 %vm605_vm0, %v1314_v58 }
  0x70   : > { %816 = vmatmul.mubr.bf16.gmra.mxu1 %v1316_v59 }
  0xed   : > { %v1185_v60 = vpop.f32.mrf.mxu0 }
  0xef   : > { %v1186_v61 = vpop.f32.mrf.mxu0 }
  0xf0   : > { %v1187_v1 = vadd.f32 %v1186_v61, %v1185_v60 }
  0xf1   : > { %v1188_v62 = vpop.f32.mrf.mxu0 }
  0xf3   : > { %v1189_v63 = vpop.f32.mrf.mxu0 }
  0xf4   : > { %v1190_v9 = vadd.f32 %v1189_v63, %v1188_v62 }
  0xf5   : > { %v1191_v0 = vpop.f32.mrf.mxu0 }
  0xf7   : > { %v1192_v2 = vpop.f32.mrf.mxu0 }
  0xf8   : > { %v761_v3 = vpop.f32.mrf.mxu1  ;;  %v1193_v17 = vadd.f32 %v1192_v2, %v1191_v0 }
  0xf9   : > { %v762_v5 = vadd.f32 %v1187_v1, %v761_v3  ;;  %v1194_v7 = vpop.f32.mrf.mxu0 }
  0xfa   : > { %v763_v8 = vpop.f32.mrf.mxu1 }
  0xfb   : > { %v831_v10 = vmul.f32 %v1502_v4, %v762_v5  ;;  %v1195_v11 = vpop.f32.mrf.mxu0 }
  0xfc   : > { %v764_v12 = vpop.f32.mrf.mxu1  ;;  %v1196_v28 = vadd.f32 %v1195_v11, %v1194_v7 }
  0xfd   : > { %v854_v13 = vadd.f32 %v1507_v6, %v831_v10  ;;  %v765_v14 = vadd.f32 %v1190_v9, %v764_v12  ;;  %v1197_v15 = vpop.f32.mrf.mxu0 }
  0xfe   : > { %v766_v16 = vpop.f32.mrf.mxu1 }
  0xff   : > { %vm870_vm1 = vcmp.gt.f32.partialorder %v854_v13, 0.0  ;;  %v886_v18 = vmul.f32 0.01, %v854_v13  ;;  %v832_v19 = vmul.f32 %v1502_v4, %v765_v14  ;;  %v1198_v20 = vpop.f32.mrf.mxu0 }
 0x100   : > { %v769_v21 = vpop.f32.mrf.mxu1  ;;  %v1199_v39 = vadd.f32 %v1198_v20, %v1197_v15 }
 0x101   : > { %v902_v22 = vsel %vm870_vm1, %v854_v13, %v886_v18  ;;  %v855_v23 = vadd.f32 %v1507_v6, %v832_v19  ;;  %v770_v24 = vadd.f32 %v1193_v17, %v769_v21  ;;  %v1200_v26 = vpop.f32.mrf.mxu0 }
 0x102   : > { %v1153_v25 = vpack.c.bf16 %v902_v22, %v902_v22  ;;  %v771_v27 = vpop.f32.mrf.mxu1 }
 0x103   : > { %vm871_vm3 = vcmp.gt.f32.partialorder %v855_v23, 0.0  ;;  %v887_v29 = vmul.f32 0.01, %v855_v23  ;;  %v833_v30 = vmul.f32 %v1502_v4, %v770_v24  ;;  %v1201_v31 = vpop.f32.mrf.mxu0 }
 0x104   : > { %983 = vst.msk [vmem:[%s1516_s8] sm:$0xf] %vm982_vm2, %v1153_v25  ;;  %v772_v32 = vpop.f32.mrf.mxu1  ;;  %v1202_v50 = vadd.f32 %v1201_v31, %v1200_v26 }
 0x105   : > { %v903_v33 = vsel %vm871_vm3, %v855_v23, %v887_v29  ;;  %v856_v34 = vadd.f32 %v1507_v6, %v833_v30  ;;  %v773_v35 = vadd.f32 %v1196_v28, %v772_v32  ;;  %v1203_v37 = vpop.f32.mrf.mxu0 }
 0x106   : > { %v1154_v36 = vpack.c.bf16 %v903_v33, %v903_v33  ;;  %v774_v38 = vpop.f32.mrf.mxu1 }
 0x107   : > { %vm872_vm4 = vcmp.gt.f32.partialorder %v856_v34, 0.0  ;;  %v888_v40 = vmul.f32 0.01, %v856_v34  ;;  %v834_v41 = vmul.f32 %v1502_v4, %v773_v35  ;;  %v1204_v42 = vpop.f32.mrf.mxu0 }
 0x108   : > { %984 = vst.msk [vmem:[%s1516_s8 + $0x4] sm:$0xf] %vm982_vm2, %v1154_v36  ;;  %v777_v43 = vpop.f32.mrf.mxu1  ;;  %v1205_v61 = vadd.f32 %v1204_v42, %v1203_v37 }
 0x109   : > { %v904_v44 = vsel %vm872_vm4, %v856_v34, %v888_v40  ;;  %v857_v45 = vadd.f32 %v1507_v6, %v834_v41  ;;  %v778_v46 = vadd.f32 %v1199_v39, %v777_v43  ;;  %v1206_v48 = vpop.f32.mrf.mxu0 }
 0x10a   : > { %v1155_v47 = vpack.c.bf16 %v904_v44, %v904_v44  ;;  %v779_v49 = vpop.f32.mrf.mxu1 }
 0x10b   : > { %vm873_vm5 = vcmp.gt.f32.partialorder %v857_v45, 0.0  ;;  %v889_v51 = vmul.f32 0.01, %v857_v45  ;;  %v835_v52 = vmul.f32 %v1502_v4, %v778_v46  ;;  %v1207_v53 = vpop.f32.mrf.mxu0 }
 0x10c   : > { %985 = vst.msk [vmem:[%s1516_s8 + $0x8] sm:$0xf] %vm982_vm2, %v1155_v47  ;;  %v780_v54 = vpop.f32.mrf.mxu1  ;;  %v1208_v10 = vadd.f32 %v1207_v53, %v1206_v48 }
 0x10d   : > { %v905_v55 = vsel %vm873_vm5, %v857_v45, %v889_v51  ;;  %v858_v56 = vadd.f32 %v1507_v6, %v835_v52  ;;  %v781_v57 = vadd.f32 %v1202_v50, %v780_v54  ;;  %v1209_v59 = vpop.f32.mrf.mxu0 }
 0x10e   : > { %v1156_v58 = vpack.c.bf16 %v905_v55, %v905_v55  ;;  %v782_v60 = vpop.f32.mrf.mxu1 }
 0x10f   : > { %vm874_vm6 = vcmp.gt.f32.partialorder %v858_v56, 0.0  ;;  %v890_v62 = vmul.f32 0.01, %v858_v56  ;;  %v836_v63 = vmul.f32 %v1502_v4, %v781_v57  ;;  %v1210_v0 = vpop.f32.mrf.mxu0 }
 0x110   : > { %986 = vst.msk [vmem:[%s1516_s8 + $0xc] sm:$0xf] %vm982_vm2, %v1156_v58  ;;  %v785_v1 = vpop.f32.mrf.mxu1  ;;  %v1211_v21 = vadd.f32 %v1210_v0, %v1209_v59 }
 0x111   : > { %v906_v2 = vsel %vm874_vm6, %v858_v56, %v890_v62  ;;  %v859_v3 = vadd.f32 %v1507_v6, %v836_v63  ;;  %v786_v5 = vadd.f32 %v1205_v61, %v785_v1  ;;  %v1212_v8 = vpop.f32.mrf.mxu0 }
 0x112   : > { %v1157_v7 = vpack.c.bf16 %v906_v2, %v906_v2  ;;  %v787_v9 = vpop.f32.mrf.mxu1 }
 0x113   : > { %vm875_vm7 = vcmp.gt.f32.partialorder %v859_v3, 0.0  ;;  %v891_v11 = vmul.f32 0.01, %v859_v3  ;;  %v837_v12 = vmul.f32 %v1502_v4, %v786_v5  ;;  %v1213_v13 = vpop.f32.mrf.mxu0 }
 0x114   : > { %987 = vst.msk [vmem:[%s1516_s8 + $0x10] sm:$0xf] %vm982_vm2, %v1157_v7  ;;  %v788_v14 = vpop.f32.mrf.mxu1  ;;  %v1214_v32 = vadd.f32 %v1213_v13, %v1212_v8 }
 0x115   : > { %v907_v15 = vsel %vm875_vm7, %v859_v3, %v891_v11  ;;  %v860_v16 = vadd.f32 %v1507_v6, %v837_v12  ;;  %v789_v17 = vadd.f32 %v1208_v10, %v788_v14  ;;  %v1215_v19 = vpop.f32.mrf.mxu0 }
 0x116   : > { %v1158_v18 = vpack.c.bf16 %v907_v15, %v907_v15  ;;  %v790_v20 = vpop.f32.mrf.mxu1 }
 0x117   : > { %vm876_vm8 = vcmp.gt.f32.partialorder %v860_v16, 0.0  ;;  %v892_v22 = vmul.f32 0.01, %v860_v16  ;;  %v838_v23 = vmul.f32 %v1502_v4, %v789_v17  ;;  %v1216_v24 = vpop.f32.mrf.mxu0 }
 0x118   : > { %988 = vst.msk [vmem:[%s1516_s8 + $0x14] sm:$0xf] %vm982_vm2, %v1158_v18  ;;  %v793_v25 = vpop.f32.mrf.mxu1  ;;  %v1217_v43 = vadd.f32 %v1216_v24, %v1215_v19 }
 0x119   : > { %v908_v26 = vsel %vm876_vm8, %v860_v16, %v892_v22  ;;  %v861_v27 = vadd.f32 %v1507_v6, %v838_v23  ;;  %v794_v28 = vadd.f32 %v1211_v21, %v793_v25  ;;  %v1218_v30 = vpop.f32.mrf.mxu0 }
 0x11a   : > { %v1159_v29 = vpack.c.bf16 %v908_v26, %v908_v26  ;;  %v795_v31 = vpop.f32.mrf.mxu1 }
 0x11b   : > { %vm877_vm9 = vcmp.gt.f32.partialorder %v861_v27, 0.0  ;;  %v893_v33 = vmul.f32 0.01, %v861_v27  ;;  %v839_v34 = vmul.f32 %v1502_v4, %v794_v28  ;;  %v1219_v35 = vpop.f32.mrf.mxu0 }
 0x11c   : > { %989 = vst.msk [vmem:[%s1516_s8 + $0x18] sm:$0xf] %vm982_vm2, %v1159_v29  ;;  %v796_v36 = vpop.f32.mrf.mxu1  ;;  %v1220_v54 = vadd.f32 %v1219_v35, %v1218_v30 }
 0x11d   : > { %v909_v37 = vsel %vm877_vm9, %v861_v27, %v893_v33  ;;  %v862_v38 = vadd.f32 %v1507_v6, %v839_v34  ;;  %v797_v39 = vadd.f32 %v1214_v32, %v796_v36  ;;  %v1221_v41 = vpop.f32.mrf.mxu0 }
 0x11e   : > { %v1160_v40 = vpack.c.bf16 %v909_v37, %v909_v37  ;;  %v798_v42 = vpop.f32.mrf.mxu1 }
 0x11f   : > { %vm878_vm10 = vcmp.gt.f32.partialorder %v862_v38, 0.0  ;;  %v894_v44 = vmul.f32 0.01, %v862_v38  ;;  %v840_v45 = vmul.f32 %v1502_v4, %v797_v39  ;;  %v1222_v46 = vpop.f32.mrf.mxu0 }
 0x120   : > { %990 = vst.msk [vmem:[%s1516_s8 + $0x1c] sm:$0xf] %vm982_vm2, %v1160_v40  ;;  %v801_v47 = vpop.f32.mrf.mxu1  ;;  %v1223_v1 = vadd.f32 %v1222_v46, %v1221_v41 }
 0x121   : > { %v910_v48 = vsel %vm878_vm10, %v862_v38, %v894_v44  ;;  %v863_v49 = vadd.f32 %v1507_v6, %v840_v45  ;;  %v802_v50 = vadd.f32 %v1217_v43, %v801_v47  ;;  %v1224_v52 = vpop.f32.mrf.mxu0 }
 0x122   : > { %v1161_v51 = vpack.c.bf16 %v910_v48, %v910_v48  ;;  %v803_v53 = vpop.f32.mrf.mxu1 }
 0x123   : > { %vm879_vm11 = vcmp.gt.f32.partialorder %v863_v49, 0.0  ;;  %v895_v55 = vmul.f32 0.01, %v863_v49  ;;  %v841_v56 = vmul.f32 %v1502_v4, %v802_v50  ;;  %v1225_v57 = vpop.f32.mrf.mxu0 }
 0x124   : > { %991 = vst.msk [vmem:[%s1516_s8 + $0x20] sm:$0xf] %vm982_vm2, %v1161_v51  ;;  %v804_v58 = vpop.f32.mrf.mxu1  ;;  %v1226_v13 = vadd.f32 %v1225_v57, %v1224_v52 }
 0x125   : > { %v911_v59 = vsel %vm879_vm11, %v863_v49, %v895_v55  ;;  %v864_v60 = vadd.f32 %v1507_v6, %v841_v56  ;;  %v805_v61 = vadd.f32 %v1220_v54, %v804_v58  ;;  %v1227_v63 = vpop.f32.mrf.mxu0 }
 0x126   : > { %v1162_v62 = vpack.c.bf16 %v911_v59, %v911_v59  ;;  %v806_v0 = vpop.f32.mrf.mxu1 }
 0x127   : > { %vm880_vm12 = vcmp.gt.f32.partialorder %v864_v60, 0.0  ;;  %v896_v2 = vmul.f32 0.01, %v864_v60  ;;  %v842_v3 = vmul.f32 %v1502_v4, %v805_v61  ;;  %v1228_v5 = vpop.f32.mrf.mxu0 }
 0x128   : > { %992 = vst.msk [vmem:[%s1516_s8 + $0x24] sm:$0xf] %vm982_vm2, %v1162_v62  ;;  %v809_v7 = vpop.f32.mrf.mxu1  ;;  %v1229_v23 = vadd.f32 %v1228_v5, %v1227_v63 }
 0x129   : > { %v912_v8 = vsel %vm880_vm12, %v864_v60, %v896_v2  ;;  %v865_v9 = vadd.f32 %v1507_v6, %v842_v3  ;;  %v810_v10 = vadd.f32 %v1223_v1, %v809_v7  ;;  %v1230_v16 = vpop.f32.mrf.mxu0 }
 0x12a   : > { %v1163_v11 = vpack.c.bf16 %v912_v8, %v912_v8  ;;  %v811_v12 = vpop.f32.mrf.mxu1 }
 0x12b   : > { %vm881_vm13 = vcmp.gt.f32.partialorder %v865_v9, 0.0  ;;  %v897_v14 = vmul.f32 0.01, %v865_v9  ;;  %v843_v15 = vmul.f32 %v1502_v4, %v810_v10  ;;  %v1231_v26 = vpop.f32.mrf.mxu0 }
 0x12c   : > { %993 = vst.msk [vmem:[%s1516_s8 + $0x28] sm:$0xf] %vm982_vm2, %v1163_v11  ;;  %v812_v17 = vpop.f32.mrf.mxu1  ;;  %v1232_v33 = vadd.f32 %v1231_v26, %v1230_v16 }
 0x12d   : > { %v913_v18 = vsel %vm881_vm13, %v865_v9, %v897_v14  ;;  %v866_v19 = vadd.f32 %v1507_v6, %v843_v15  ;;  %v813_v20 = vadd.f32 %v1226_v13, %v812_v17 }
 0x12e   : > { %v1164_v21 = vpack.c.bf16 %v913_v18, %v913_v18  ;;  %v814_v22 = vpop.f32.mrf.mxu1 }
 0x12f   : > { %vm882_vm14 = vcmp.gt.f32.partialorder %v866_v19, 0.0  ;;  %v898_v24 = vmul.f32 0.01, %v866_v19  ;;  %v844_v25 = vmul.f32 %v1502_v4, %v813_v20 }
 0x130   : > { %994 = vst.msk [vmem:[%s1516_s8 + $0x2c] sm:$0xf] %vm982_vm2, %v1164_v21  ;;  %v817_v27 = vpop.f32.mrf.mxu1 }
 0x131   : > { %v914_v28 = vsel %vm882_vm14, %v866_v19, %v898_v24  ;;  %v867_v29 = vadd.f32 %v1507_v6, %v844_v25  ;;  %v818_v30 = vadd.f32 %v1229_v23, %v817_v27 }
 0x132   : > { %v1165_v31 = vpack.c.bf16 %v914_v28, %v914_v28  ;;  %v819_v32 = vpop.f32.mrf.mxu1 }
 0x133   : > { %vm883_vm15 = vcmp.gt.f32.partialorder %v867_v29, 0.0  ;;  %v899_v34 = vmul.f32 0.01, %v867_v29  ;;  %v845_v35 = vmul.f32 %v1502_v4, %v818_v30 }
 0x134   : > { %995 = vst.msk [vmem:[%s1516_s8 + $0x30] sm:$0xf] %vm982_vm2, %v1165_v31  ;;  %v820_v36 = vpop.f32.mrf.mxu1 }
 0x135   : > { %v915_v37 = vsel %vm883_vm15, %v867_v29, %v899_v34  ;;  %v868_v38 = vadd.f32 %v1507_v6, %v845_v35  ;;  %v821_v39 = vadd.f32 %v1232_v33, %v820_v36 }
 0x136   : > { %v1166_v40 = vpack.c.bf16 %v915_v37, %v915_v37  ;;  %v822_v41 = vpop.f32.mrf.mxu1 }
 0x137   : > { %vm884_vm0 = vcmp.gt.f32.partialorder %v868_v38, 0.0  ;;  %v900_v42 = vmul.f32 0.01, %v868_v38  ;;  %v846_v43 = vmul.f32 %v1502_v4, %v821_v39 }
 0x138   : > { %996 = vst.msk [vmem:[%s1516_s8 + $0x34] sm:$0xf] %vm982_vm2, %v1166_v40 }
 0x139   : > { %v916_v44 = vsel %vm884_vm0, %v868_v38, %v900_v42  ;;  %v869_v45 = vadd.f32 %v1507_v6, %v846_v43 }
 0x13a   : > { %v1167_v46 = vpack.c.bf16 %v916_v44, %v916_v44 }
 0x13b   : > { %vm885_vm1 = vcmp.gt.f32.partialorder %v869_v45, 0.0  ;;  %v901_v47 = vmul.f32 0.01, %v869_v45 }
 0x13c   : > { %997 = vst.msk [vmem:[%s1516_s8 + $0x38] sm:$0xf] %vm982_vm2, %v1167_v46 }
 0x13d   : > { %v917_v48 = vsel %vm885_vm1, %v869_v45, %v901_v47 }
 0x13e   : > { %v1168_v49 = vpack.c.bf16 %v917_v48, %v917_v48 }
 0x140   : > { %998 = vst.msk [vmem:[%s1516_s8 + $0x3c] sm:$0xf] %vm982_vm2, %v1168_v49 }
 0x141 PF: > { %s14_s15 = sadd.s32 1, %s1323_s15  }
 0x142   : > { %p11_p4 = scmp.ge.s32.totalorder %s14_s15, 4  }
 0x144   :  { %13 = sbr.rel (!%p11_p4) target bundleno = 1 (0x1), region = 66 }

// kernel: hourglass_att_forward.32
= control target key start
LH: loop header
LB: loop body
LE: loop exit
PB: predicated region body
PF: predicated region fallthrough
CT: control target
= control target key end

     0   :  { %s421_s9 = smov 0   ;;  %s423_s10 = smov 0   ;;  %s457_s0 = inlined_call_operand.vmem [shape: bf16[2,1,256], index: 0, kind: input, shape index: {}]   ;;  %s458_s1 = inlined_call_operand.vmem [shape: bf16[2,8,256], index: 1, kind: input, shape index: {}]   ;;  %s459_s2 = inlined_call_operand.vmem [shape: bf16[2,8,256], index: 2, kind: output, shape index: {}]  }
   0x1   :  { %s425_s11 = smov 0  }
   0x2 LB: > { %s24_s12 = sadd.s32 1, %s400_s10  ;;  %p344_p0 = scmp.ge.s32.totalorder %s404_s11, 1  ;;  %s404_s11 = sphi %s425_s11, %s12_s11   ;;  %s400_s10 = sphi %s423_s10, %s461_s10   ;;  %s396_s9 = sphi %s421_s9, %s460_s9  }
   0x3   : > { %p26_p1 = scmp.ge.s32.totalorder %s24_s12, 2  ;;  %p141_p2 = scmp.lt.s32.totalorder %s404_s11, 3 }
   0x5   : > { %s463_s12 = smov (%p26_p1, %s24_s12), 0  ;;  %p142_p3 = pnand %p344_p0, %p141_p2 }
   0x6   : > { %p175_p4 = scmp.lt.s32.totalorder (!%p142_p3), %s396_s9, 1 }
   0x7   : > { %145 = sbr.rel (%p142_p3) target bundleno = 47 (0x2f), region = 28 }
   0xc   : > { %s465_s9 = smov (!%p175_p4, %s396_s9), 1  ;;  %v207_v3 = vlaneseq }
   0xd   : > { %s345_s13 = sshll.u32 %s465_s9, 1  ;;  %s353_s17 = sshll.u32 %s465_s9, 3 }
   0xe   : > { %s178_s16 = scalar_lea.vmem %s457_s0, %s345_s13  ;;  %v208_v4 = vshrl.u32 %v207_v3, 7  ;;  %s187_s20 = scalar_lea.vmem %s458_s1, %s353_s17 }
   0xf   : > { %v197_v0 = vld [vmem:[%s178_s16] sm:$0x3]  ;;  %s196_s23 = scalar_lea.vmem %s459_s2, %s353_s17 }
  0x10   : > { %v198_v1 = vunpack.c.l.bf16 %v197_v0  ;;  %v209_v7 = vsub.s32 0, %v208_v4  ;;  %v213_v8 = vsub.s32 2, %v208_v4  ;;  %v203_v9 = vld [vmem:[%s187_s20] sm:$0xff] }
  0x11   : > { %v204_v11 = vunpack.c.l.bf16 %v203_v9  ;;  %v205_v12 = vunpack.c.h.bf16 %v203_v9 }
  0x12   : > { %v199_v2 = vmul.f32 0.5, %v198_v1 }
  0x14   : > { %380 = vtanh.f32 %v199_v2 }
  0x21   : > { %v381_v5 = vpop.eup %380 }
  0x22   : > { %v201_v6 = vadd.f32 1.0, %v381_v5 }
  0x24   : > { %v202_v10 = vmul.f32 0.5, %v201_v6 }
  0x26   : > { %v210_v13 = vrot.slane %v202_v10, %v209_v7  ;;  %v214_v14 = vrot.slane %v202_v10, %v213_v8 }
  0x28   : > { %v220_v15 = vrot.slane %v210_v13, %v209_v7  ;;  %v224_v16 = vrot.slane %v214_v14, %v209_v7 }
  0x2a   : > { %v225_v17 = vmul.f32 %v220_v15, %v204_v11  ;;  %v226_v18 = vmul.f32 %v224_v16, %v205_v12 }
  0x2c   : > { %v355_v19 = vpack.c.bf16 %v226_v18, %v225_v17 }
  0x2e   : > { %235 = vst [vmem:[%s196_s23] sm:$0xff] %v355_v19 }
  0x2f PF: > { %s12_s11 = sadd.s32 1, %s404_s11   ;;  %s460_s9 = smov %s400_s10 }
  0x30   : > { %p9_p5 = scmp.ge.s32.totalorder %s12_s11, 4   ;;  %s461_s10 = smov %s463_s12 }
  0x32   :  { %11 = sbr.rel (!%p9_p5) target bundleno = 2 (0x2), region = 61 }

// kernel: hourglass_att_forward.35
= control target key start
LH: loop header
LB: loop body
LE: loop exit
PB: predicated region body
PF: predicated region fallthrough
CT: control target
= control target key end

     0   :  { %vm36_vm0 = vcmask 1044480   ;;  %v192_v0 = vmov 0.0   ;;  %vm193_vm1 = vmmov 0   ;;  %vm32_vm2 = vcmask 80896   ;;  %s251_s1 = inlined_call_operand.vmem [shape: bf16[10,5], index: 1, kind: input, shape index: {}]   ;;  %s252_s0 = inlined_call_operand.vmem [shape: bf16[8,10], index: 0, kind: input, shape index: {}]   ;;  %s253_s4 = inlined_call_operand.vmem [shape: bf16[5,24], index: 4, kind: input, shape index: {}]   ;;  %s254_s2 = inlined_call_operand.vmem [shape: f32[1,5], index: 2, kind: input, shape index: {}]   ;;  %s255_s3 = inlined_call_operand.vmem [shape: f32[1,5], index: 3, kind: input, shape index: {}]   ;;  %s256_s5 = inlined_call_operand.vmem [shape: f32[1,24], index: 5, kind: input, shape index: {}]   ;;  %s257_s6 = inlined_call_operand.vmem [shape: bf16[8,24], index: 6, kind: output, shape index: {}]  }
   0x1   :  { %176 = vmatprep.subr.bf16.mxu0 %v192_v0  ;;  %v191_v1 = vld [vmem:[%s251_s1] sm:$0x1f]   ;;  %178 = vmatprep.mubr.msk.bf16.mxu0 %vm193_vm1, %v192_v0  ;;  %vm112_vm3 = vcmask 1041408   ;;  %vm113_vm4 = vcmask 1042432   ;;  %v194_v4 = vmov 65535   ;;  %vm108_vm6 = vcmask 39936  }
   0x2   :  { %182 = vmatprep.subr.bf16.mxu1 %v192_v0  ;;  %184 = vmatprep.mubr.msk.bf16.mxu1 %vm193_vm1, %v192_v0  ;;  %v38_v2 = vsel %vm36_vm0, %v191_v1, 0  ;;  %v24_v3 = vld [vmem:[%s252_s0] sm:$0xf]  ;;  %v114_v5 = vsel %vm112_vm3, 4294967295, %v194_v4  ;;  %vm160_vm7 = vcmask 191488  }
   0x3   :  { %177 = vmatpush3.bf16.msra.mxu0 %v38_v2  ;;  %v100_v6 = vld [vmem:[%s253_s4] sm:$0x7]  ;;  %v115_v7 = vsel %vm113_vm4, %v114_v5, 0 }
   0x4   :  { %v117_v8 = vand.u32 %v115_v7, %v100_v6  ;;  %v168_v9 = vld [vmem:[%s254_s2] ss:$0 sm:$0xff] }
   0x5   :  { %v169_v11 = vld [vmem:[%s255_s3] ss:$0 sm:$0xff] }
   0x6   :  { %179 = vmatmul.mubr.msk.bf16.vlgmr.msra.gmra.mxu0 %vm32_vm2, %v24_v3  ;;  %183 = vmatpush3.bf16.msra.mxu1 %v117_v8  ;;  %v170_v20 = vld [vmem:[%s256_s5] ss:$0 sm:$0xff] }
  0xc6   :  { %v74_v10 = vpop.f32.mrf.mxu0 }
  0xc7   :  { %v87_v12 = vmul.f32 %v168_v9, %v74_v10 }
  0xc8   :  { %v180_v13 = vpop.f32.mrf.mxu0 }
  0xc9   :  { %v95_v14 = vadd.f32 %v169_v11, %v87_v12 }
  0xca   :  { %v77_v15 = vpop.f32.mrf.mxu0 }
  0xcb   :  { %vm96_vm5 = vcmp.gt.f32.partialorder %v95_v14, 0.0  ;;  %v97_v16 = vmul.f32 0.01, %v95_v14 }
  0xcc   :  { %v181_v17 = vpop.f32.mrf.mxu0 }
  0xcd   :  { %v98_v18 = vsel %vm96_vm5, %v95_v14, %v97_v16 }
  0xce   :  { %v99_v19 = vpack.c.bf16 %v98_v18, %v98_v18 }
  0xd0   :  { %185 = vmatmul.mubr.msk.bf16.vlgmr.msra.gmra.mxu1 %vm108_vm6, %v99_v19 }
 0x190   :  { %v153_v21 = vpop.f32.mrf.mxu1 }
 0x191   :  { %v154_v22 = vadd.f32 %v170_v20, %v153_v21 }
 0x192   :  { %v186_v23 = vpop.f32.mrf.mxu1 }
 0x193   :  { %v159_v24 = vpack.c.bf16 %v154_v22, %v154_v22 }
 0x194   :  { %v156_v25 = vpop.f32.mrf.mxu1 }
 0x195   :  { %161 = vst.msk [vmem:[%s257_s6] sm:$0xf] %vm160_vm7, %v159_v24 }
 0x196   :  { %v187_v26 = vpop.f32.mrf.mxu1 }

// kernel: hourglass_att_forward.33
= control target key start
LH: loop header
LB: loop body
LE: loop exit
PB: predicated region body
PF: predicated region fallthrough
CT: control target
= control target key end

     0   :  { %s853_s15 = smov 0   ;;  %s988_s0 = inlined_call_operand.vmem [shape: bf16[64,432], index: 0, kind: input, shape index: {}]   ;;  %s989_s1 = inlined_call_operand.vmem [shape: bf16[432,24], index: 1, kind: input, shape index: {}]   ;;  %s990_s2 = inlined_call_operand.vmem [shape: f32[1,24], index: 2, kind: input, shape index: {}]   ;;  %s991_s3 = inlined_call_operand.vmem [shape: f32[1,24], index: 3, kind: input, shape index: {}]   ;;  %s992_s4 = inlined_call_operand.vmem [shape: bf16[64,24], index: 4, kind: output, shape index: {}]  }
   0x1 LB: > { %s683_s16 = sadd.s32 4294967295, %s825_s15   ;;  %p687_p0 = scmp.ge.s32.totalorder %s825_s15, 1  ;;  %s825_s15 = sphi %s853_s15, %s14_s15  }
   0x2   : > { %p164_p1 = scmp.lt.s32.totalorder %s825_s15, 3 }
   0x4   : > { %p165_p2 = pnand %p687_p0, %p164_p1 }
   0x5   : > { %s688_s9 = sshll.u32 (!%p165_p2), %s683_s16, 2 }
   0x6   : > { %168 = sbr.rel (%p165_p2) target bundleno = 273 (0x111), region = 36  ;;  %p192_p3 = scmp.lt.s32.totalorder (!%p165_p2), %s688_s9, 7 }
   0xb   : > { %v780_v0 = vld [vmem:[%s989_s1 + $0xb8] sm:$0xff]   ;;  %v827_v1 = vmov 0   ;;  %v783_v4 = vld [vmem:[%s989_s1 + $0xb0] sm:$0xff]   ;;  %v786_v7 = vld [vmem:[%s989_s1 + $0xa8] sm:$0xff]   ;;  %s994_s9 = smov (!%p192_p3, %s688_s9), 7  ;;  %vm467_vm0 = vcmask 392192  }
   0xc   : > { %523 = vmatprep.subr.bf16.mxu1 %v827_v1  ;;  %v781_v2 = vld [vmem:[%s989_s1 + $0x78] sm:$0xff]   ;;  %v784_v5 = vld [vmem:[%s989_s1 + $0x70] sm:$0xff]   ;;  %v787_v8 = vld [vmem:[%s989_s1 + $0x68] sm:$0xff]   ;;  %s738_s27 = sshll.u32 %s994_s9, 4  ;;  %s692_s5 = sshll.u32 %s994_s9, 2  ;;  %vm622_vm2 = vcmask 191488  }
   0xd   : > { %524 = vmatpush1.bf16.msra.mxu1 %v780_v0  ;;  %v782_v3 = vld [vmem:[%s989_s1 + $0x38] sm:$0xff]   ;;  %743 = vmatprep.subr.bf16.mxu0 %v781_v2  ;;  %v785_v6 = vld [vmem:[%s989_s1 + $0x30] sm:$0xff]   ;;  %v788_v9 = vld [vmem:[%s989_s1 + $0x28] sm:$0xff]   ;;  %s933_s11 = scalar_lea.vmem %s988_s0, %s738_s27  ;;  %s202_s8 = scalar_lea.vmem %s992_s4, %s692_s5 }
   0xe   : > { %525 = vmatprep.subr.bf16.mxu1 %v827_v1  ;;  %744 = vmatpush3.bf16.msra.mxu0 %v782_v3  ;;  %v789_v10 = vld [vmem:[%s989_s1 + $0xa0] sm:$0xff]   ;;  %v793_v13 = vld [vmem:[%s989_s1 + $0x58] sm:$0xff]   ;;  %v796_v16 = vld [vmem:[%s989_s1 + $0x50] sm:$0xff]  }
   0xf   : > { %745 = vmatprep.subr.bf16.mxu0 %v784_v5  ;;  %v790_v11 = vld [vmem:[%s989_s1 + $0x60] sm:$0xff]   ;;  %v792_v14 = vld [vmem:[%s989_s1 + $0x98] sm:$0xff]   ;;  %v795_v17 = vld [vmem:[%s989_s1 + $0x90] sm:$0xff]  }
  0x10   : > { %v791_v12 = vld [vmem:[%s989_s1 + $0x20] sm:$0xff]   ;;  %v794_v15 = vld [vmem:[%s989_s1 + $0x18] sm:$0xff]   ;;  %v797_v18 = vld [vmem:[%s989_s1 + $0x10] sm:$0xff]  }
  0x11   : > { %526 = vmatpush1.bf16.msra.mxu1 %v783_v4  ;;  %v799_v19 = vld [vmem:[%s989_s1 + $0x48] sm:$0xff]   ;;  %v802_v22 = vld [vmem:[%s989_s1 + $0x40] sm:$0xff]   ;;  %v807_v26 = vld [vmem:[%s989_s1 + $0xd0] sm:$0xff]  }
  0x12   : > { %527 = vmatprep.subr.bf16.mxu1 %v827_v1  ;;  %746 = vmatpush3.bf16.msra.mxu0 %v785_v6  ;;  %v798_v20 = vld [vmem:[%s989_s1 + $0x88] sm:$0xff]   ;;  %v806_v23 = vld [vmem:[%s933_s11 + $0x4] ss:$16 sps:$4 sm:$0xff]   ;;  %v804_v28 = vld [vmem:[%s933_s11] ss:$16 sps:$4 sm:$0xff]  }
  0x13   : > { %747 = vmatprep.subr.bf16.mxu0 %v787_v8  ;;  %v800_v21 = vld [vmem:[%s989_s1 + $0x8] sm:$0xff]   ;;  %v801_v24 = vld [vmem:[%s989_s1 + $0x80] sm:$0xff]   ;;  %506 = vmatprep.mubr.bf16.mxu0 %v806_v23 }
  0x14   : > { %v803_v25 = vld [vmem:[%s989_s1] sm:$0xff]   ;;  %v815_v27 = vld [vmem:[%s933_s11 + $0xc] ss:$16 sps:$4 sm:$0xff]   ;;  %v813_v33 = vld [vmem:[%s933_s11 + $0x8] ss:$16 sps:$4 sm:$0xff]  }
  0x15   : > { %528 = vmatpush1.bf16.msra.mxu1 %v786_v7  ;;  %v809_v29 = vld [vmem:[%s933_s11 + $0x24] ss:$16 sps:$4 sm:$0xff]   ;;  %728 = vmatprep.mubr.msk.bf16.mxu1 %vm467_vm0, %v815_v27  ;;  %v808_v30 = vld [vmem:[%s989_s1 + $0xc8] sm:$0xff]   ;;  %v812_v32 = vld [vmem:[%s933_s11 + $0x20] ss:$16 sps:$4 sm:$0xff]  }
  0x16   : > { %529 = vmatprep.subr.bf16.mxu1 %v827_v1  ;;  %748 = vmatpush3.bf16.msra.mxu0 %v788_v9  ;;  %v811_v31 = vld [vmem:[%s989_s1 + $0xc0] sm:$0xff]   ;;  %v816_v34 = vld [vmem:[%s933_s11 + $0x2c] ss:$16 sps:$4 sm:$0xff]   ;;  %v818_v35 = vld [vmem:[%s933_s11 + $0x28] ss:$16 sps:$4 sm:$0xff]  }
  0x17   : > { %749 = vmatprep.subr.bf16.mxu0 %v790_v11  ;;  %v730_v44 = vld [vmem:[%s990_s2] ss:$0 sm:$0xff] }
  0x18   : > { %v731_v46 = vld [vmem:[%s991_s3] ss:$0 sm:$0xff] }
  0x19   : > { %530 = vmatpush1.bf16.msra.mxu1 %v789_v10 }
  0x1a   : > { %531 = vmatprep.subr.bf16.mxu1 %v827_v1  ;;  %750 = vmatpush3.bf16.msra.mxu0 %v791_v12 }
  0x1b   : > { %751 = vmatprep.subr.bf16.mxu0 %v793_v13 }
  0x1d   : > { %532 = vmatpush1.bf16.msra.mxu1 %v792_v14 }
  0x1e   : > { %533 = vmatprep.subr.bf16.mxu1 %v827_v1  ;;  %752 = vmatpush3.bf16.msra.mxu0 %v794_v15 }
  0x1f   : > { %753 = vmatprep.subr.bf16.mxu0 %v796_v16 }
  0x21   : > { %534 = vmatpush1.bf16.msra.mxu1 %v795_v17 }
  0x22   : > { %535 = vmatprep.subr.bf16.mxu1 %v827_v1  ;;  %754 = vmatpush3.bf16.msra.mxu0 %v797_v18 }
  0x23   : > { %755 = vmatprep.subr.bf16.mxu0 %v799_v19 }
  0x25   : > { %536 = vmatpush1.bf16.msra.mxu1 %v798_v20 }
  0x26   : > { %537 = vmatprep.subr.bf16.mxu1 %v827_v1  ;;  %756 = vmatpush3.bf16.msra.mxu0 %v800_v21 }
  0x27   : > { %757 = vmatprep.subr.bf16.mxu0 %v802_v22 }
  0x29   : > { %538 = vmatpush1.bf16.msra.mxu1 %v801_v24 }
  0x2a   : > { %549 = vmatprep.subr.bf16.mxu1 %v827_v1  ;;  %758 = vmatpush3.bf16.msra.mxu0 %v803_v25 }
  0x2d   : > { %550 = vmatpush2.bf16.msra.mxu1 %v807_v26  ;;  %507 = vmatmul.mubr.bf16.vlgmr.msra.gmra.mxu0 %v804_v28 }
  0x2e   : > { %551 = vmatprep.subr.bf16.mxu1 %v827_v1  ;;  %514 = vmatprep.mubr.bf16.mxu0 %v809_v29 }
  0x31   : > { %552 = vmatpush2.bf16.msra.mxu1 %v808_v30 }
  0x32   : > { %553 = vmatprep.subr.bf16.mxu1 %v827_v1 }
  0x35   : > { %554 = vmatpush2.bf16.msra.mxu1 %v811_v31  ;;  %515 = vmatmul.mubr.bf16.gmra.mxu0 %v812_v32 }
  0x38   : > { %556 = vmatmul.mubr.bf16.vlgmr.msra.gmra.mxu1 %v813_v33 }
  0x39   : > { %729 = vmatprep.mubr.msk.bf16.mxu1 %vm467_vm0, %v816_v34 }
  0x40   : > { %564 = vmatmul.mubr.bf16.gmra.mxu1 %v818_v35 }
  0xed   : > { %v759_v36 = vpop.f32.mrf.mxu0 }
  0xef   : > { %v760_v37 = vpop.f32.mrf.mxu0 }
  0xf0   : > { %v761_v41 = vadd.f32 %v760_v37, %v759_v36 }
  0xf1   : > { %v762_v38 = vpop.f32.mrf.mxu0 }
  0xf3   : > { %v763_v39 = vpop.f32.mrf.mxu0 }
  0xf4   : > { %v764_v48 = vadd.f32 %v763_v39, %v762_v38 }
  0xf5   : > { %v765_v40 = vpop.f32.mrf.mxu0 }
  0xf7   : > { %v766_v42 = vpop.f32.mrf.mxu0 }
  0xf8   : > { %v557_v43 = vpop.f32.mrf.mxu1  ;;  %v767_v55 = vadd.f32 %v766_v42, %v765_v40 }
  0xf9   : > { %v558_v45 = vadd.f32 %v761_v41, %v557_v43  ;;  %v768_v50 = vpop.f32.mrf.mxu0 }
  0xfa   : > { %v559_v47 = vpop.f32.mrf.mxu1 }
  0xfb   : > { %v579_v49 = vmul.f32 %v730_v44, %v558_v45  ;;  %v769_v58 = vpop.f32.mrf.mxu0 }
  0xfc   : > { %v560_v51 = vpop.f32.mrf.mxu1  ;;  %v770_v1 = vadd.f32 %v769_v58, %v768_v50 }
  0xfd   : > { %v590_v52 = vadd.f32 %v731_v46, %v579_v49  ;;  %v561_v53 = vadd.f32 %v764_v48, %v560_v51 }
  0xfe   : > { %v562_v54 = vpop.f32.mrf.mxu1 }
  0xff   : > { %vm594_vm1 = vcmp.gt.f32.partialorder %v590_v52, 0.0  ;;  %v598_v56 = vmul.f32 0.01, %v590_v52  ;;  %v580_v57 = vmul.f32 %v730_v44, %v561_v53 }
 0x100   : > { %v565_v59 = vpop.f32.mrf.mxu1 }
 0x101   : > { %v602_v60 = vsel %vm594_vm1, %v590_v52, %v598_v56  ;;  %v591_v61 = vadd.f32 %v731_v46, %v580_v57  ;;  %v566_v62 = vadd.f32 %v767_v55, %v565_v59 }
 0x102   : > { %v739_v63 = vpack.c.bf16 %v602_v60, %v602_v60  ;;  %v567_v0 = vpop.f32.mrf.mxu1 }
 0x103   : > { %vm595_vm3 = vcmp.gt.f32.partialorder %v591_v61, 0.0  ;;  %v599_v2 = vmul.f32 0.01, %v591_v61  ;;  %v581_v3 = vmul.f32 %v730_v44, %v566_v62 }
 0x104   : > { %623 = vst.msk [vmem:[%s202_s8] sm:$0xf] %vm622_vm2, %v739_v63  ;;  %v568_v4 = vpop.f32.mrf.mxu1 }
 0x105   : > { %v603_v5 = vsel %vm595_vm3, %v591_v61, %v599_v2  ;;  %v592_v6 = vadd.f32 %v731_v46, %v581_v3  ;;  %v569_v7 = vadd.f32 %v770_v1, %v568_v4 }
 0x106   : > { %v740_v8 = vpack.c.bf16 %v603_v5, %v603_v5  ;;  %v570_v9 = vpop.f32.mrf.mxu1 }
 0x107   : > { %vm596_vm4 = vcmp.gt.f32.partialorder %v592_v6, 0.0  ;;  %v600_v10 = vmul.f32 0.01, %v592_v6  ;;  %v582_v11 = vmul.f32 %v730_v44, %v569_v7 }
 0x108   : > { %624 = vst.msk [vmem:[%s202_s8 + $0x4] sm:$0xf] %vm622_vm2, %v740_v8 }
 0x109   : > { %v604_v12 = vsel %vm596_vm4, %v592_v6, %v600_v10  ;;  %v593_v13 = vadd.f32 %v731_v46, %v582_v11 }
 0x10a   : > { %v741_v14 = vpack.c.bf16 %v604_v12, %v604_v12 }
 0x10b   : > { %vm597_vm5 = vcmp.gt.f32.partialorder %v593_v13, 0.0  ;;  %v601_v15 = vmul.f32 0.01, %v593_v13 }
 0x10c   : > { %625 = vst.msk [vmem:[%s202_s8 + $0x8] sm:$0xf] %vm622_vm2, %v741_v14 }
 0x10d   : > { %v605_v16 = vsel %vm597_vm5, %v593_v13, %v601_v15 }
 0x10e   : > { %v742_v17 = vpack.c.bf16 %v605_v16, %v605_v16 }
 0x110   : > { %626 = vst.msk [vmem:[%s202_s8 + $0xc] sm:$0xf] %vm622_vm2, %v742_v17 }
 0x111 PF: > { %s14_s15 = sadd.s32 1, %s825_s15  }
 0x112   : > { %p11_p4 = scmp.ge.s32.totalorder %s14_s15, 4  }
 0x114   :  { %13 = sbr.rel (!%p11_p4) target bundleno = 1 (0x1), region = 66 }

// kernel: hourglass_att_forward.34
= control target key start
LH: loop header
LB: loop body
LE: loop exit
PB: predicated region body
PF: predicated region fallthrough
CT: control target
= control target key end

     0   :  { %s1121_s15 = smov 0   ;;  %s1309_s0 = inlined_call_operand.vmem [shape: bf16[64,648], index: 0, kind: input, shape index: {}]   ;;  %s1310_s1 = inlined_call_operand.vmem [shape: bf16[648,24], index: 1, kind: input, shape index: {}]   ;;  %s1311_s2 = inlined_call_operand.vmem [shape: f32[1,24], index: 2, kind: input, shape index: {}]   ;;  %s1312_s3 = inlined_call_operand.vmem [shape: f32[1,24], index: 3, kind: input, shape index: {}]   ;;  %s1313_s4 = inlined_call_operand.vmem [shape: bf16[64,24], index: 4, kind: output, shape index: {}]  }
   0x1 LB: > { %s868_s16 = sadd.s32 4294967295, %s1093_s15   ;;  %p872_p0 = scmp.ge.s32.totalorder %s1093_s15, 1  ;;  %s1093_s15 = sphi %s1121_s15, %s14_s15  }
   0x2   : > { %p164_p1 = scmp.lt.s32.totalorder %s1093_s15, 3 }
   0x4   : > { %p165_p2 = pnand %p872_p0, %p164_p1 }
   0x5   : > { %s873_s23 = sshll.u32 (!%p165_p2), %s868_s16, 2 }
   0x6   : > { %168 = sbr.rel (%p165_p2) target bundleno = 291 (0x123), region = 36  ;;  %p192_p3 = scmp.lt.s32.totalorder (!%p165_p2), %s873_s23, 7 }
   0xb   : > { %v1028_v0 = vld [vmem:[%s1310_s1 + $0x78] sm:$0xff]   ;;  %v1032_v4 = vld [vmem:[%s1310_s1 + $0x70] sm:$0xff]   ;;  %v1036_v8 = vld [vmem:[%s1310_s1 + $0x68] sm:$0xff]   ;;  %s1315_s23 = smov (!%p192_p3, %s873_s23), 7  ;;  %v1095_v34 = vmov 0   ;;  %vm599_vm0 = vcmask 64512  }
   0xc   : > { %v1029_v1 = vld [vmem:[%s1310_s1 + $0xf8] sm:$0xff]   ;;  %944 = vmatprep.subr.bf16.mxu0 %v1028_v0  ;;  %v1033_v5 = vld [vmem:[%s1310_s1 + $0xf0] sm:$0xff]   ;;  %v1037_v9 = vld [vmem:[%s1310_s1 + $0xe8] sm:$0xff]   ;;  %s1018_s21 = smul.u32 24, %s1315_s23  ;;  %vm606_vm1 = vcmask 1043456   ;;  %s876_s9 = sshll.u32 %s1315_s23, 2 }
   0xd   : > { %v1030_v2 = vld [vmem:[%s1310_s1 + $0x38] sm:$0xff]   ;;  %972 = vmatprep.subr.bf16.mxu1 %v1029_v1  ;;  %v1034_v6 = vld [vmem:[%s1310_s1 + $0x30] sm:$0xff]   ;;  %v1038_v10 = vld [vmem:[%s1310_s1 + $0x28] sm:$0xff]   ;;  %s202_s12 = scalar_lea.vmem %s1313_s4, %s876_s9  ;;  %vm807_vm3 = vcmask 191488  }
   0xe   : > { %v1031_v3 = vld [vmem:[%s1310_s1 + $0xb8] sm:$0xff]   ;;  %945 = vmatpush3.bf16.msra.mxu0 %v1030_v2  ;;  %v1035_v7 = vld [vmem:[%s1310_s1 + $0xb0] sm:$0xff]   ;;  %v1039_v11 = vld [vmem:[%s1310_s1 + $0xa8] sm:$0xff]   ;;  %s1227_s6 = scalar_lea.vmem %s1309_s0, %s1018_s21 }
   0xf   : > { %973 = vmatpush3.bf16.msra.mxu1 %v1031_v3  ;;  %946 = vmatprep.subr.bf16.mxu0 %v1032_v4  ;;  %v1040_v12 = vld [vmem:[%s1310_s1 + $0x60] sm:$0xff]   ;;  %v1044_v16 = vld [vmem:[%s1310_s1 + $0x58] sm:$0xff]   ;;  %v1048_v20 = vld [vmem:[%s1310_s1 + $0x50] sm:$0xff]  }
  0x10   : > { %974 = vmatprep.subr.bf16.mxu1 %v1033_v5  ;;  %v1041_v13 = vld [vmem:[%s1310_s1 + $0xe0] sm:$0xff]   ;;  %v1045_v17 = vld [vmem:[%s1310_s1 + $0xd8] sm:$0xff]   ;;  %v1049_v21 = vld [vmem:[%s1310_s1 + $0xd0] sm:$0xff]  }
  0x11   : > { %v1042_v14 = vld [vmem:[%s1310_s1 + $0x20] sm:$0xff]   ;;  %v1046_v18 = vld [vmem:[%s1310_s1 + $0x18] sm:$0xff]   ;;  %v1050_v22 = vld [vmem:[%s1310_s1 + $0x10] sm:$0xff]  }
  0x12   : > { %947 = vmatpush3.bf16.msra.mxu0 %v1034_v6  ;;  %v1043_v15 = vld [vmem:[%s1310_s1 + $0xa0] sm:$0xff]   ;;  %v1047_v19 = vld [vmem:[%s1310_s1 + $0x98] sm:$0xff]   ;;  %v1051_v23 = vld [vmem:[%s1310_s1 + $0x90] sm:$0xff]  }
  0x13   : > { %975 = vmatpush3.bf16.msra.mxu1 %v1035_v7  ;;  %948 = vmatprep.subr.bf16.mxu0 %v1036_v8  ;;  %v1052_v24 = vld [vmem:[%s1310_s1 + $0x48] sm:$0xff]   ;;  %v1056_v28 = vld [vmem:[%s1310_s1 + $0x40] sm:$0xff]   ;;  %v1066_v37 = vld [vmem:[%s1310_s1 + $0x138] sm:$0xff]  }
  0x14   : > { %976 = vmatprep.subr.bf16.mxu1 %v1037_v9  ;;  %v1053_v25 = vld [vmem:[%s1310_s1 + $0xc8] sm:$0xff]   ;;  %v1057_v29 = vld [vmem:[%s1310_s1 + $0xc0] sm:$0xff]   ;;  %v1067_v38 = vld [vmem:[%s1310_s1 + $0x130] sm:$0xff]  }
  0x15   : > { %v1054_v26 = vld [vmem:[%s1310_s1 + $0x8] sm:$0xff]   ;;  %v1058_v30 = vld [vmem:[%s1310_s1] sm:$0xff]   ;;  %v1073_v41 = vld [vmem:[%s1227_s6 + $0x3c] ss:$24 sps:$4 sm:$0xff]  }
  0x16   : > { %949 = vmatpush3.bf16.msra.mxu0 %v1038_v10  ;;  %v1055_v27 = vld [vmem:[%s1310_s1 + $0x88] sm:$0xff]   ;;  %v1059_v31 = vld [vmem:[%s1310_s1 + $0x80] sm:$0xff]   ;;  %v1077_v43 = vld [vmem:[%s1227_s6 + $0x38] ss:$24 sps:$4 sm:$0xff]  }
  0x17   : > { %977 = vmatpush3.bf16.msra.mxu1 %v1039_v11  ;;  %950 = vmatprep.subr.bf16.mxu0 %v1040_v12  ;;  %v1060_v32 = vld [vmem:[%s1227_s6] ss:$24 sps:$4 sm:$0xff]   ;;  %v1062_v33 = vld [vmem:[%s1227_s6 + $0x4] ss:$24 sps:$4 sm:$0xff]   ;;  %v1068_v39 = vld [vmem:[%s1310_s1 + $0x128] sm:$0xff]  }
  0x18   : > { %978 = vmatprep.subr.bf16.mxu1 %v1041_v13  ;;  %v1063_v35 = vld [vmem:[%s1227_s6 + $0x8] ss:$24 sps:$4 sm:$0xff]   ;;  %v1065_v36 = vld [vmem:[%s1227_s6 + $0xc] ss:$24 sps:$4 sm:$0xff]   ;;  %642 = vmatprep.mubr.bf16.mxu0 %v1062_v33  ;;  %v1070_v47 = vld [vmem:[%s1310_s1 + $0x118] sm:$0xff]  }
  0x19   : > { %691 = vmatprep.mubr.bf16.mxu1 %v1065_v36  ;;  %v1071_v40 = vld [vmem:[%s1227_s6 + $0x34] ss:$24 sps:$4 sm:$0xff]   ;;  %v1076_v42 = vld [vmem:[%s1227_s6 + $0x30] ss:$24 sps:$4 sm:$0xff]   ;;  %v1069_v44 = vld [vmem:[%s1310_s1 + $0x120] sm:$0xff]  }
  0x1a   : > { %951 = vmatpush3.bf16.msra.mxu0 %v1042_v14  ;;  %v1083_v45 = vld [vmem:[%s1227_s6 + $0x14] ss:$24 sps:$4 sm:$0xff]   ;;  %v1086_v46 = vld [vmem:[%s1227_s6 + $0x44] ss:$24 sps:$4 sm:$0xff]   ;;  %v1080_v51 = vld [vmem:[%s1310_s1 + $0x140] ss:$0 sps:$4 sm:$0xff]  }
  0x1b   : > { %979 = vmatpush3.bf16.msra.mxu1 %v1043_v15  ;;  %952 = vmatprep.subr.bf16.mxu0 %v1044_v16  ;;  %v1075_v48 = vld [vmem:[%s1310_s1 + $0x110] sm:$0xff]   ;;  %v1078_v49 = vld [vmem:[%s1310_s1 + $0x108] sm:$0xff]   ;;  %v1079_v50 = vld [vmem:[%s1310_s1 + $0x100] sm:$0xff]   ;;  %v608_v52 = vsel %vm606_vm1, %v1080_v51, 0 }
  0x1c   : > { %980 = vmatprep.subr.bf16.mxu1 %v1045_v17  ;;  %v1081_v53 = vld [vmem:[%s1227_s6 + $0x10] ss:$24 sps:$4 sm:$0xff]   ;;  %v1084_v54 = vld [vmem:[%s1227_s6 + $0x40] ss:$24 sps:$4 sm:$0xff]  }
  0x1d   : > { %v932_v17 = vld [vmem:[%s1311_s2] ss:$0 sm:$0xff] }
  0x1e   : > { %953 = vmatpush3.bf16.msra.mxu0 %v1046_v18 }
  0x1f   : > { %981 = vmatpush3.bf16.msra.mxu1 %v1047_v19  ;;  %954 = vmatprep.subr.bf16.mxu0 %v1048_v20 }
  0x20   : > { %982 = vmatprep.subr.bf16.mxu1 %v1049_v21  ;;  %v933_v21 = vld [vmem:[%s1312_s3] ss:$0 sm:$0xff] }
  0x22   : > { %955 = vmatpush3.bf16.msra.mxu0 %v1050_v22 }
  0x23   : > { %983 = vmatpush3.bf16.msra.mxu1 %v1051_v23  ;;  %956 = vmatprep.subr.bf16.mxu0 %v1052_v24 }
  0x24   : > { %984 = vmatprep.subr.bf16.mxu1 %v1053_v25 }
  0x26   : > { %957 = vmatpush3.bf16.msra.mxu0 %v1054_v26 }
  0x27   : > { %985 = vmatpush3.bf16.msra.mxu1 %v1055_v27  ;;  %958 = vmatprep.subr.bf16.mxu0 %v1056_v28 }
  0x28   : > { %986 = vmatprep.subr.bf16.mxu1 %v1057_v29 }
  0x2a   : > { %959 = vmatpush3.bf16.msra.mxu0 %v1058_v30 }
  0x2b   : > { %987 = vmatpush3.bf16.msra.mxu1 %v1059_v31  ;;  %708 = vmatprep.subr.bf16.mxu0 %v1095_v34 }
  0x2c   : > { %1000 = vmatprep.subr.bf16.mxu1 %v1095_v34 }
  0x2d   : > { %643 = vmatmul.mubr.bf16.vlgmr.msra.gmra.mxu0 %v1060_v32 }
  0x2e   : > { %692 = vmatmul.mubr.bf16.vlgmr.msra.gmra.mxu1 %v1063_v35  ;;  %709 = vmatpush1.bf16.msra.mxu0 %v1066_v37 }
  0x2f   : > { %1009 = vmatpush1.bf16.msra.mxu1 %v1066_v37  ;;  %710 = vmatprep.subr.bf16.mxu0 %v1095_v34 }
  0x30   : > { %1001 = vmatprep.subr.bf16.mxu1 %v1095_v34  ;;  %650 = vmatprep.mubr.bf16.mxu0 %v1071_v40 }
  0x31   : > { %699 = vmatprep.mubr.bf16.mxu1 %v1073_v41 }
  0x32   : > { %711 = vmatpush1.bf16.msra.mxu0 %v1067_v38 }
  0x33   : > { %1010 = vmatpush1.bf16.msra.mxu1 %v1067_v38  ;;  %712 = vmatprep.subr.bf16.mxu0 %v1095_v34 }
  0x34   : > { %1002 = vmatprep.subr.bf16.mxu1 %v1095_v34 }
  0x35   : > { %651 = vmatmul.mubr.bf16.gmra.mxu0 %v1076_v42 }
  0x36   : > { %713 = vmatpush1.bf16.msra.mxu0 %v1068_v39  ;;  %700 = vmatmul.mubr.bf16.gmra.mxu1 %v1077_v43 }
  0x37   : > { %1011 = vmatpush1.bf16.msra.mxu1 %v1068_v39  ;;  %714 = vmatprep.subr.bf16.mxu0 %v1095_v34 }
  0x38   : > { %1003 = vmatprep.subr.bf16.mxu1 %v1095_v34  ;;  %930 = vmatprep.mubr.msk.bf16.mxu0 %vm599_vm0, %v1083_v45 }
  0x39   : > { %931 = vmatprep.mubr.msk.bf16.mxu1 %vm599_vm0, %v1086_v46 }
  0x3a   : > { %715 = vmatpush1.bf16.msra.mxu0 %v1069_v44 }
  0x3b   : > { %1012 = vmatpush1.bf16.msra.mxu1 %v1069_v44  ;;  %716 = vmatprep.subr.bf16.mxu0 %v1095_v34 }
  0x3c   : > { %1004 = vmatprep.subr.bf16.mxu1 %v1095_v34 }
  0x3e   : > { %717 = vmatpush1.bf16.msra.mxu0 %v1070_v47 }
  0x3f   : > { %1013 = vmatpush1.bf16.msra.mxu1 %v1070_v47  ;;  %718 = vmatprep.subr.bf16.mxu0 %v1095_v34 }
  0x40   : > { %1005 = vmatprep.subr.bf16.mxu1 %v1095_v34 }
  0x42   : > { %719 = vmatpush1.bf16.msra.mxu0 %v1075_v48 }
  0x43   : > { %1014 = vmatpush1.bf16.msra.mxu1 %v1075_v48  ;;  %720 = vmatprep.subr.bf16.mxu0 %v1095_v34 }
  0x44   : > { %1006 = vmatprep.subr.bf16.mxu1 %v1095_v34 }
  0x46   : > { %721 = vmatpush1.bf16.msra.mxu0 %v1078_v49 }
  0x47   : > { %1015 = vmatpush1.bf16.msra.mxu1 %v1078_v49  ;;  %722 = vmatprep.subr.bf16.mxu0 %v1095_v34 }
  0x48   : > { %1007 = vmatprep.subr.bf16.mxu1 %v1095_v34 }
  0x4a   : > { %723 = vmatpush1.bf16.msra.mxu0 %v1079_v50 }
  0x4b   : > { %1016 = vmatpush1.bf16.msra.mxu1 %v1079_v50  ;;  %738 = vmatprep.subr.bf16.mxu0 %v1095_v34 }
  0x4c   : > { %1008 = vmatprep.subr.bf16.mxu1 %v1095_v34 }
  0x4e   : > { %739 = vmatpush2.bf16.msra.mxu0 %v608_v52 }
  0x4f   : > { %1017 = vmatpush2.bf16.msra.mxu1 %v608_v52 }
  0x51   : > { %741 = vmatmul.mubr.bf16.vlgmr.msra.gmra.mxu0 %v1081_v53 }
  0x52   : > { %749 = vmatmul.mubr.bf16.vlgmr.msra.gmra.mxu1 %v1084_v54 }
  0xed   : > { %v960_v55 = vpop.f32.mrf.mxu0 }
  0xee   : > { %v988_v56 = vpop.f32.mrf.mxu1 }
  0xef   : > { %v961_v57 = vpop.f32.mrf.mxu0 }
  0xf0   : > { %v989_v58 = vpop.f32.mrf.mxu1  ;;  %v962_v5 = vadd.f32 %v961_v57, %v960_v55 }
  0xf1   : > { %v963_v59 = vpop.f32.mrf.mxu0  ;;  %v990_v6 = vadd.f32 %v989_v58, %v988_v56 }
  0xf2   : > { %v991_v60 = vpop.f32.mrf.mxu1 }
  0xf3   : > { %v964_v61 = vpop.f32.mrf.mxu0  ;;  %v694_v13 = vadd.f32 %v990_v6, %v962_v5 }
  0xf4   : > { %v992_v62 = vpop.f32.mrf.mxu1  ;;  %v965_v11 = vadd.f32 %v964_v61, %v963_v59 }
  0xf5   : > { %v966_v63 = vpop.f32.mrf.mxu0  ;;  %v993_v12 = vadd.f32 %v992_v62, %v991_v60 }
  0xf6   : > { %v994_v0 = vpop.f32.mrf.mxu1 }
  0xf7   : > { %v967_v1 = vpop.f32.mrf.mxu0  ;;  %v697_v26 = vadd.f32 %v993_v12, %v965_v11 }
  0xf8   : > { %v995_v2 = vpop.f32.mrf.mxu1  ;;  %v968_v7 = vadd.f32 %v967_v1, %v966_v63 }
  0xf9   : > { %v969_v3 = vpop.f32.mrf.mxu0  ;;  %v996_v8 = vadd.f32 %v995_v2, %v994_v0 }
  0xfa   : > { %v997_v4 = vpop.f32.mrf.mxu1 }
  0xfb   : > { %v970_v9 = vpop.f32.mrf.mxu0  ;;  %v702_v18 = vadd.f32 %v996_v8, %v968_v7 }
  0xfc   : > { %v998_v10 = vpop.f32.mrf.mxu1  ;;  %v971_v14 = vadd.f32 %v970_v9, %v969_v3 }
  0xfd   : > { %v999_v15 = vadd.f32 %v998_v10, %v997_v4 }
  0xff   : > { %v705_v29 = vadd.f32 %v999_v15, %v971_v14 }
 0x111   : > { %v742_v16 = vpop.f32.mrf.mxu0 }
 0x112   : > { %v743_v19 = vadd.f32 %v742_v16, %v694_v13  ;;  %v750_v20 = vpop.f32.mrf.mxu1 }
 0x113   : > { %v751_v22 = vadd.f32 %v750_v20, %v702_v18  ;;  %v744_v23 = vpop.f32.mrf.mxu0 }
 0x114   : > { %v764_v24 = vmul.f32 %v932_v17, %v743_v19  ;;  %v752_v25 = vpop.f32.mrf.mxu1 }
 0x115   : > { %v766_v27 = vmul.f32 %v932_v17, %v751_v22  ;;  %v745_v28 = vpop.f32.mrf.mxu0 }
 0x116   : > { %v775_v30 = vadd.f32 %v933_v21, %v764_v24  ;;  %v746_v31 = vadd.f32 %v745_v28, %v697_v26  ;;  %v753_v32 = vpop.f32.mrf.mxu1 }
 0x117   : > { %v777_v33 = vadd.f32 %v933_v21, %v766_v27  ;;  %v754_v34 = vadd.f32 %v753_v32, %v705_v29  ;;  %v747_v35 = vpop.f32.mrf.mxu0 }
 0x118   : > { %vm779_vm2 = vcmp.gt.f32.partialorder %v775_v30, 0.0  ;;  %v783_v36 = vmul.f32 0.01, %v775_v30  ;;  %v765_v37 = vmul.f32 %v932_v17, %v746_v31  ;;  %v755_v38 = vpop.f32.mrf.mxu1 }
 0x119   : > { %v785_v39 = vmul.f32 0.01, %v777_v33  ;;  %v767_v40 = vmul.f32 %v932_v17, %v754_v34  ;;  %vm781_vm4 = vcmp.gt.f32.partialorder %v777_v33, 0.0 }
 0x11a   : > { %v787_v41 = vsel %vm779_vm2, %v775_v30, %v783_v36  ;;  %v776_v42 = vadd.f32 %v933_v21, %v765_v37 }
 0x11b   : > { %v940_v43 = vpack.c.bf16 %v787_v41, %v787_v41  ;;  %v778_v44 = vadd.f32 %v933_v21, %v767_v40  ;;  %v789_v46 = vsel %vm781_vm4, %v777_v33, %v785_v39 }
 0x11c   : > { %vm780_vm5 = vcmp.gt.f32.partialorder %v776_v42, 0.0  ;;  %v784_v45 = vmul.f32 0.01, %v776_v42  ;;  %v942_v51 = vpack.c.bf16 %v789_v46, %v789_v46 }
 0x11d   : > { %808 = vst.msk [vmem:[%s202_s12] sm:$0xf] %vm807_vm3, %v940_v43  ;;  %vm782_vm6 = vcmp.gt.f32.partialorder %v778_v44, 0.0  ;;  %v786_v47 = vmul.f32 0.01, %v778_v44 }
 0x11e   : > { %v788_v48 = vsel %vm780_vm5, %v776_v42, %v784_v45  ;;  %810 = vst.msk [vmem:[%s202_s12 + $0x8] sm:$0xf] %vm807_vm3, %v942_v51 }
 0x11f   : > { %v941_v49 = vpack.c.bf16 %v788_v48, %v788_v48  ;;  %v790_v50 = vsel %vm782_vm6, %v778_v44, %v786_v47 }
 0x120   : > { %v943_v52 = vpack.c.bf16 %v790_v50, %v790_v50 }
 0x121   : > { %809 = vst.msk [vmem:[%s202_s12 + $0x4] sm:$0xf] %vm807_vm3, %v941_v49 }
 0x122   : > { %811 = vst.msk [vmem:[%s202_s12 + $0xc] sm:$0xf] %vm807_vm3, %v943_v52 }
 0x123 PF: > { %s14_s15 = sadd.s32 1, %s1093_s15  }
 0x124   : > { %p11_p4 = scmp.ge.s32.totalorder %s14_s15, 4  }
 0x126   :  { %13 = sbr.rel (!%p11_p4) target bundleno = 1 (0x1), region = 66 }

// kernel: hourglass_att_forward.36
= control target key start
LH: loop header
LB: loop body
LE: loop exit
PB: predicated region body
PF: predicated region fallthrough
CT: control target
= control target key end

     0   :  { %s357_s9 = smov 0   ;;  %s359_s10 = smov 0   ;;  %s393_s0 = inlined_call_operand.vmem [shape: bf16[2,1,96], index: 0, kind: input, shape index: {}]   ;;  %s394_s1 = inlined_call_operand.vmem [shape: bf16[2,8,96], index: 1, kind: input, shape index: {}]   ;;  %s395_s2 = inlined_call_operand.vmem [shape: bf16[2,8,96], index: 2, kind: output, shape index: {}]  }
   0x1   :  { %s361_s11 = smov 0  }
   0x2 LB: > { %s24_s12 = sadd.s32 1, %s336_s10  ;;  %p287_p0 = scmp.ge.s32.totalorder %s340_s11, 1  ;;  %s340_s11 = sphi %s361_s11, %s12_s11   ;;  %s336_s10 = sphi %s359_s10, %s397_s10   ;;  %s332_s9 = sphi %s357_s9, %s396_s9  }
   0x3   : > { %p26_p1 = scmp.ge.s32.totalorder %s24_s12, 2  ;;  %p138_p2 = scmp.lt.s32.totalorder %s340_s11, 3 }
   0x5   : > { %s399_s12 = smov (%p26_p1, %s24_s12), 0  ;;  %p139_p3 = pnand %p287_p0, %p138_p2 }
   0x6   : > { %p167_p4 = scmp.lt.s32.totalorder (!%p139_p3), %s332_s9, 1 }
   0x7   : > { %142 = sbr.rel (%p139_p3) target bundleno = 44 (0x2c), region = 28 }
   0xc   : > { %s401_s9 = smov (!%p167_p4, %s332_s9), 1  ;;  %v192_v3 = vlaneseq  ;;  %vm198_vm0 = vcmask 781312  }
   0xd   : > { %s169_s15 = scalar_lea.vmem %s393_s0, %s401_s9  ;;  %s288_s16 = sshll.u32 %s401_s9, 2 }
   0xe   : > { %v184_v0 = vld [vmem:[%s169_s15] sm:$0x1]  ;;  %s176_s19 = scalar_lea.vmem %s394_s1, %s288_s16  ;;  %v193_v4 = vshrl.u32 %v192_v3, 7  ;;  %s183_s22 = scalar_lea.vmem %s395_s2, %s288_s16 }
   0xf   : > { %v185_v1 = vunpack.c.l.bf16 %v184_v0  ;;  %v190_v6 = vld [vmem:[%s176_s19] sm:$0xf] }
  0x10   : > { %v194_v8 = vsub.s32 0, %v193_v4  ;;  %v191_v10 = vunpack.c.l.bf16 %v190_v6 }
  0x11   : > { %v186_v2 = vmul.f32 0.5, %v185_v1 }
  0x13   : > { %316 = vtanh.f32 %v186_v2 }
  0x20   : > { %v317_v5 = vpop.eup %316 }
  0x21   : > { %v188_v7 = vadd.f32 1.0, %v317_v5 }
  0x23   : > { %v189_v9 = vmul.f32 0.5, %v188_v7 }
  0x25   : > { %v195_v11 = vrot.slane %v189_v9, %v194_v8 }
  0x27   : > { %v196_v12 = vmul.f32 %v195_v11, %v191_v10 }
  0x29   : > { %v197_v13 = vpack.c.bf16 %v196_v12, %v196_v12 }
  0x2b   : > { %199 = vst.msk [vmem:[%s183_s22] sm:$0xf] %vm198_vm0, %v197_v13 }
  0x2c PF: > { %s12_s11 = sadd.s32 1, %s340_s11   ;;  %s396_s9 = smov %s336_s10 }
  0x2d   : > { %p9_p5 = scmp.ge.s32.totalorder %s12_s11, 4   ;;  %s397_s10 = smov %s399_s12 }
  0x2f   :  { %11 = sbr.rel (!%p9_p5) target bundleno = 2 (0x2), region = 61 }

// kernel: tile.33
= control target key start
LH: loop header
LB: loop body
LE: loop exit
PB: predicated region body
PF: predicated region fallthrough
CT: control target
= control target key end

     0   :  { %s22_s0 = inlined_call_operand.vmem [shape: f32[16], index: 0, kind: input, shape index: {}]   ;;  %s23_s1 = inlined_call_operand.vmem [shape: f32[4,16], index: 1, kind: output, shape index: {}]  }
   0x1   :  { %v4_v0 = vld [vmem:[%s22_s0] ss:$0 sm:$0xff] }
   0x2   :  { %5 = vst [vmem:[%s23_s1] sm:$0xf] %v4_v0 }

// kernel: tile.38
= control target key start
LH: loop header
LB: loop body
LE: loop exit
PB: predicated region body
PF: predicated region fallthrough
CT: control target
= control target key end

     0   :  { %vm8_vm0 = vcmask 130048   ;;  %s40_s8 = smov 16   ;;  %s41_s9 = smov 32   ;;  %vm14_vm1 = vcmask 523648   ;;  %vm20_vm2 = vcmask 392448   ;;  %vm26_vm3 = vcmask 261248   ;;  %s58_s0 = inlined_call_operand.vmem [shape: f32[4,16], index: 0, kind: input, shape index: {}]   ;;  %s59_s1 = inlined_call_operand.vmem [shape: f32[1,64], index: 1, kind: output, shape index: {}]  }
   0x1   :  { %v5_v0 = vld [vmem:[%s58_s0] sm:$0xf]  ;;  %s39_s0 = smov 48  }
   0x2   :  { %6 = vst [vmem:[#allocation1] sm:$0xf] %v5_v0 }
   0x9   :  { %v11_v1 = vld [vmem:[#allocation1 + $0x3] sm:$0x1]   ;;  %v23_v2 = vld [vmem:[#allocation1 + $0x1] sm:$0x1]   ;;  %v7_v3 = vld [vmem:[#allocation1] sm:$0x1]  }
   0xa   :  { %12 = vrot.lane.b32.xlu0 %v11_v1, %s39_s0  ;;  %24 = vrot.lane.b32.xlu1 %v23_v2, %s40_s8  ;;  %v17_v4 = vld [vmem:[#allocation1 + $0x2] sm:$0x1]   ;;  %9 = vst.msk [vmem:[#allocation0] sm:$0x1] %vm8_vm0, %v7_v3  }
   0xe   :  { %18 = vrot.lane.b32.xlu0 %v17_v4, %s41_s9 }
  0x7c   :  { %v13_v5 = vpop.permute.xlu0 %12   ;;  %v25_v6 = vpop.permute.xlu1 %24  }
  0x7d   :  { %15 = vst.msk [vmem:[#allocation0] sm:$0x1] %vm14_vm1, %v13_v5  }
  0x80   :  { %v19_v7 = vpop.permute.xlu0 %18  }
  0x81   :  { %21 = vst.msk [vmem:[#allocation0] sm:$0x1] %vm20_vm2, %v19_v7  }
  0x82   :  { %27 = vst.msk [vmem:[#allocation0] sm:$0x1] %vm26_vm3, %v25_v6  }
  0x89   :  { %v32_v8 = vld [vmem:[#allocation0] sm:$0x1] }
  0x8a   :  { %35 = vst [vmem:[%s59_s1] sm:$0x1] %v32_v8 }

// kernel: hourglass_att_forward.37
= control target key start
LH: loop header
LB: loop body
LE: loop exit
PB: predicated region body
PF: predicated region fallthrough
CT: control target
= control target key end

     0   :  { %s640_s15 = smov 0   ;;  %s747_s0 = inlined_call_operand.vmem [shape: bf16[64,216], index: 0, kind: input, shape index: {}]   ;;  %s748_s1 = inlined_call_operand.vmem [shape: bf16[216,64], index: 1, kind: input, shape index: {}]   ;;  %s749_s2 = inlined_call_operand.vmem [shape: f32[1,64], index: 2, kind: input, shape index: {}]   ;;  %s750_s3 = inlined_call_operand.vmem [shape: f32[1,64], index: 3, kind: input, shape index: {}]   ;;  %s751_s4 = inlined_call_operand.vmem [shape: bf16[64,64], index: 4, kind: output, shape index: {}]  }
   0x1 LB: > { %s506_s16 = sadd.s32 4294967295, %s612_s15   ;;  %p510_p0 = scmp.ge.s32.totalorder %s612_s15, 1  ;;  %s612_s15 = sphi %s640_s15, %s14_s15  }
   0x2   : > { %p164_p1 = scmp.lt.s32.totalorder %s612_s15, 3 }
   0x4   : > { %p165_p2 = pnand %p510_p0, %p164_p1 }
   0x5   : > { %s511_s21 = sshll.u32 (!%p165_p2), %s506_s16, 2 }
   0x6   : > { %168 = sbr.rel (%p165_p2) target bundleno = 275 (0x113), region = 36  ;;  %p192_p3 = scmp.lt.s32.totalorder (!%p165_p2), %s511_s21, 7 }
   0xb   : > { %v586_v0 = vld [vmem:[%s748_s1 + $0x38] sm:$0xff]   ;;  %v614_v1 = vmov 0   ;;  %v587_v2 = vld [vmem:[%s748_s1 + $0x30] sm:$0xff]   ;;  %s753_s21 = smov (!%p192_p3, %s511_s21), 7  ;;  %v588_v3 = vld [vmem:[%s748_s1 + $0x28] sm:$0xff]   ;;  %vm335_vm0 = vcmask 719872  }
   0xc   : > { %346 = vmatprep.subr.bf16.mxu0 %v614_v1  ;;  %549 = vmatprep.subr.bf16.mxu1 %v614_v1  ;;  %s544_s24 = sshll.u32 %s753_s21, 3  ;;  %v589_v4 = vld [vmem:[%s748_s1 + $0x20] sm:$0xff]   ;;  %v590_v5 = vld [vmem:[%s748_s1 + $0x18] sm:$0xff]   ;;  %v591_v8 = vld [vmem:[%s748_s1 + $0x10] sm:$0xff]   ;;  %vm342_vm1 = vcmask 1043456   ;;  %vm445_vm3 = vcmask 519168  }
   0xd   : > { %347 = vmatpush1.bf16.msra.mxu0 %v586_v0  ;;  %563 = vmatpush1.bf16.msra.mxu1 %v586_v0  ;;  %s674_s29 = scalar_lea.vmem %s747_s0, %s544_s24  ;;  %v592_v9 = vld [vmem:[%s748_s1 + $0x8] sm:$0xff]   ;;  %v593_v10 = vld [vmem:[%s748_s1] sm:$0xff]   ;;  %v596_v14 = vld [vmem:[%s748_s1 + $0x58] sm:$0xff]  }
   0xe   : > { %348 = vmatprep.subr.bf16.mxu0 %v614_v1  ;;  %550 = vmatprep.subr.bf16.mxu1 %v614_v1  ;;  %v602_v6 = vld [vmem:[%s674_s29 + $0x4] ss:$8 sps:$4 sm:$0xff]   ;;  %v605_v7 = vld [vmem:[%s674_s29 + $0x14] ss:$8 sps:$4 sm:$0xff]   ;;  %v594_v11 = vld [vmem:[%s748_s1 + $0x68] ss:$0 sps:$4 sm:$0xff]  }
   0xf   : > { %534 = vmatprep.mubr.msk.bf16.mxu0 %vm335_vm0, %v602_v6  ;;  %535 = vmatprep.mubr.msk.bf16.mxu1 %vm335_vm0, %v605_v7  ;;  %v344_v12 = vsel %vm342_vm1, %v594_v11, 0  ;;  %v595_v13 = vld [vmem:[%s748_s1 + $0x60] sm:$0xff]   ;;  %v597_v15 = vld [vmem:[%s748_s1 + $0x50] sm:$0xff]   ;;  %v598_v16 = vld [vmem:[%s748_s1 + $0x48] sm:$0xff]  }
  0x10   : > { %v599_v17 = vld [vmem:[%s748_s1 + $0x40] sm:$0xff]   ;;  %v603_v19 = vld [vmem:[%s674_s29 + $0x10] ss:$8 sps:$4 sm:$0xff]  }
  0x11   : > { %349 = vmatpush1.bf16.msra.mxu0 %v587_v2  ;;  %564 = vmatpush1.bf16.msra.mxu1 %v587_v2  ;;  %v600_v18 = vld [vmem:[%s674_s29] ss:$8 sps:$4 sm:$0xff]   ;;  %s515_s29 = sshll.u32 %s753_s21, 2 }
  0x12   : > { %350 = vmatprep.subr.bf16.mxu0 %v614_v1  ;;  %551 = vmatprep.subr.bf16.mxu1 %v614_v1  ;;  %v536_v20 = vld [vmem:[%s749_s2] ss:$0 sm:$0xff]  ;;  %s202_s7 = scalar_lea.vmem %s751_s4, %s515_s29 }
  0x13   : > { %v537_v22 = vld [vmem:[%s750_s3] ss:$0 sm:$0xff] }
  0x15   : > { %351 = vmatpush1.bf16.msra.mxu0 %v588_v3  ;;  %565 = vmatpush1.bf16.msra.mxu1 %v588_v3 }
  0x16   : > { %352 = vmatprep.subr.bf16.mxu0 %v614_v1  ;;  %552 = vmatprep.subr.bf16.mxu1 %v614_v1 }
  0x19   : > { %353 = vmatpush1.bf16.msra.mxu0 %v589_v4  ;;  %566 = vmatpush1.bf16.msra.mxu1 %v589_v4 }
  0x1a   : > { %354 = vmatprep.subr.bf16.mxu0 %v614_v1  ;;  %553 = vmatprep.subr.bf16.mxu1 %v614_v1 }
  0x1d   : > { %355 = vmatpush1.bf16.msra.mxu0 %v590_v5  ;;  %567 = vmatpush1.bf16.msra.mxu1 %v590_v5 }
  0x1e   : > { %356 = vmatprep.subr.bf16.mxu0 %v614_v1  ;;  %554 = vmatprep.subr.bf16.mxu1 %v614_v1 }
  0x21   : > { %357 = vmatpush1.bf16.msra.mxu0 %v591_v8  ;;  %568 = vmatpush1.bf16.msra.mxu1 %v591_v8 }
  0x22   : > { %358 = vmatprep.subr.bf16.mxu0 %v614_v1  ;;  %555 = vmatprep.subr.bf16.mxu1 %v614_v1 }
  0x25   : > { %359 = vmatpush1.bf16.msra.mxu0 %v592_v9  ;;  %569 = vmatpush1.bf16.msra.mxu1 %v592_v9 }
  0x26   : > { %360 = vmatprep.subr.bf16.mxu0 %v614_v1  ;;  %556 = vmatprep.subr.bf16.mxu1 %v614_v1 }
  0x29   : > { %361 = vmatpush1.bf16.msra.mxu0 %v593_v10  ;;  %570 = vmatpush1.bf16.msra.mxu1 %v593_v10 }
  0x2a   : > { %366 = vmatprep.subr.bf16.mxu0 %v614_v1  ;;  %557 = vmatprep.subr.bf16.mxu1 %v614_v1 }
  0x2d   : > { %367 = vmatpush2.bf16.msra.mxu0 %v344_v12  ;;  %571 = vmatpush2.bf16.msra.mxu1 %v344_v12 }
  0x2e   : > { %368 = vmatprep.subr.bf16.mxu0 %v614_v1  ;;  %558 = vmatprep.subr.bf16.mxu1 %v614_v1 }
  0x31   : > { %369 = vmatpush2.bf16.msra.mxu0 %v595_v13  ;;  %572 = vmatpush2.bf16.msra.mxu1 %v595_v13 }
  0x32   : > { %370 = vmatprep.subr.bf16.mxu0 %v614_v1  ;;  %559 = vmatprep.subr.bf16.mxu1 %v614_v1 }
  0x35   : > { %371 = vmatpush2.bf16.msra.mxu0 %v596_v14  ;;  %573 = vmatpush2.bf16.msra.mxu1 %v596_v14 }
  0x36   : > { %372 = vmatprep.subr.bf16.mxu0 %v614_v1  ;;  %560 = vmatprep.subr.bf16.mxu1 %v614_v1 }
  0x39   : > { %373 = vmatpush2.bf16.msra.mxu0 %v597_v15  ;;  %574 = vmatpush2.bf16.msra.mxu1 %v597_v15 }
  0x3a   : > { %374 = vmatprep.subr.bf16.mxu0 %v614_v1  ;;  %561 = vmatprep.subr.bf16.mxu1 %v614_v1 }
  0x3d   : > { %375 = vmatpush2.bf16.msra.mxu0 %v598_v16  ;;  %575 = vmatpush2.bf16.msra.mxu1 %v598_v16 }
  0x3e   : > { %376 = vmatprep.subr.bf16.mxu0 %v614_v1  ;;  %562 = vmatprep.subr.bf16.mxu1 %v614_v1 }
  0x41   : > { %377 = vmatpush2.bf16.msra.mxu0 %v599_v17  ;;  %576 = vmatpush2.bf16.msra.mxu1 %v599_v17 }
  0x44   : > { %379 = vmatmul.mubr.bf16.vlgmr.msra.gmra.mxu0 %v600_v18  ;;  %387 = vmatmul.mubr.bf16.vlgmr.msra.gmra.mxu1 %v603_v19 }
 0x104   : > { %v380_v21 = vpop.f32.mrf.mxu0  ;;  %v388_v23 = vpop.f32.mrf.mxu1 }
 0x105   : > { %v402_v24 = vmul.f32 %v536_v20, %v380_v21  ;;  %v404_v25 = vmul.f32 %v536_v20, %v388_v23 }
 0x106   : > { %v382_v26 = vpop.f32.mrf.mxu0  ;;  %v390_v27 = vpop.f32.mrf.mxu1 }
 0x107   : > { %v413_v28 = vadd.f32 %v537_v22, %v402_v24  ;;  %v415_v29 = vadd.f32 %v537_v22, %v404_v25 }
 0x108   : > { %v383_v30 = vpop.f32.mrf.mxu0  ;;  %v391_v31 = vpop.f32.mrf.mxu1 }
 0x109   : > { %vm417_vm2 = vcmp.gt.f32.partialorder %v413_v28, 0.0  ;;  %v421_v32 = vmul.f32 0.01, %v413_v28  ;;  %v403_v33 = vmul.f32 %v536_v20, %v383_v30  ;;  %v405_v34 = vmul.f32 %v536_v20, %v391_v31 }
 0x10a   : > { %v385_v35 = vpop.f32.mrf.mxu0  ;;  %v393_v36 = vpop.f32.mrf.mxu1  ;;  %v423_v38 = vmul.f32 0.01, %v415_v29  ;;  %vm419_vm4 = vcmp.gt.f32.partialorder %v415_v29, 0.0 }
 0x10b   : > { %v425_v37 = vsel %vm417_vm2, %v413_v28, %v421_v32  ;;  %v414_v40 = vadd.f32 %v537_v22, %v403_v33  ;;  %v416_v41 = vadd.f32 %v537_v22, %v405_v34 }
 0x10c   : > { %v545_v39 = vpack.c.bf16 %v425_v37, %v425_v37  ;;  %v427_v44 = vsel %vm419_vm4, %v415_v29, %v423_v38 }
 0x10d   : > { %vm418_vm5 = vcmp.gt.f32.partialorder %v414_v40, 0.0  ;;  %v422_v42 = vmul.f32 0.01, %v414_v40  ;;  %vm420_vm6 = vcmp.gt.f32.partialorder %v416_v41, 0.0  ;;  %v424_v43 = vmul.f32 0.01, %v416_v41 }
 0x10e   : > { %446 = vst.msk [vmem:[%s202_s7] sm:$0xf] %vm445_vm3, %v545_v39  ;;  %v547_v48 = vpack.c.bf16 %v427_v44, %v427_v44 }
 0x10f   : > { %v426_v45 = vsel %vm418_vm5, %v414_v40, %v422_v42  ;;  %v428_v46 = vsel %vm420_vm6, %v416_v41, %v424_v43 }
 0x110   : > { %v546_v47 = vpack.c.bf16 %v426_v45, %v426_v45  ;;  %v548_v49 = vpack.c.bf16 %v428_v46, %v428_v46  ;;  %448 = vst.msk [vmem:[%s202_s7 + $0x8] sm:$0xf] %vm445_vm3, %v547_v48 }
 0x112   : > { %447 = vst.msk [vmem:[%s202_s7 + $0x4] sm:$0xf] %vm445_vm3, %v546_v47  ;;  %449 = vst.msk [vmem:[%s202_s7 + $0xc] sm:$0xf] %vm445_vm3, %v548_v49 }
 0x113 PF: > { %s14_s15 = sadd.s32 1, %s612_s15  }
 0x114   : > { %p11_p4 = scmp.ge.s32.totalorder %s14_s15, 4  }
 0x116   :  { %13 = sbr.rel (!%p11_p4) target bundleno = 1 (0x1), region = 66 }

// kernel: hourglass_att_forward.38
= control target key start
LH: loop header
LB: loop body
LE: loop exit
PB: predicated region body
PF: predicated region fallthrough
CT: control target
= control target key end

     0   :  { %s775_s15 = smov 0   ;;  %s889_s0 = inlined_call_operand.vmem [shape: bf16[256,32], index: 0, kind: input, shape index: {}]   ;;  %s890_s1 = inlined_call_operand.vmem [shape: bf16[32,16], index: 1, kind: input, shape index: {}]   ;;  %s891_s2 = inlined_call_operand.vmem [shape: f32[1,16], index: 2, kind: input, shape index: {}]   ;;  %s892_s3 = inlined_call_operand.vmem [shape: f32[1,16], index: 3, kind: input, shape index: {}]   ;;  %s893_s4 = inlined_call_operand.vmem [shape: bf16[256,16], index: 4, kind: output, shape index: {}]  }
   0x1 LB: > { %s627_s16 = sadd.s32 4294967295, %s748_s15   ;;  %p631_p0 = scmp.ge.s32.totalorder %s748_s15, 1  ;;  %s748_s15 = sphi %s775_s15, %s14_s15  }
   0x2   : > { %p163_p1 = scmp.lt.s32.totalorder %s748_s15, 3 }
   0x4   : > { %p164_p2 = pnand %p631_p0, %p163_p1 }
   0x5   : > { %s632_s19 = sshll.u32 (!%p164_p2), %s627_s16, 4 }
   0x6   : > { %167 = sbr.rel (%p164_p2) target bundleno = 244 (0xf4), region = 36  ;;  %p190_p3 = scmp.lt.s32.totalorder (!%p164_p2), %s632_s19, 31 }
   0xb   : > { %v732_v0 = vld [vmem:[%s890_s1 + $0x8] sm:$0xff]   ;;  %v733_v1 = vld [vmem:[%s890_s1] sm:$0xff]   ;;  %s895_s19 = smov (!%p190_p3, %s632_s19), 31  ;;  %vm274_vm0 = vcmask 261120   ;;  %vm554_vm1 = vcmask 125952  }
   0xc   : > { %700 = vmatprep.subr.bf16.mxu0 %v732_v0  ;;  %720 = vmatprep.subr.bf16.mxu1 %v732_v0  ;;  %s633_s22 = sshll.u32 %s895_s19, 2  ;;  %v808_v10 = vld [vmem:[%s891_s2] ss:$0 sm:$0xff] }
   0xd   : > { %701 = vmatpush3.bf16.msra.mxu0 %v732_v0  ;;  %722 = vmatpush3.bf16.msra.mxu1 %v732_v0  ;;  %s193_s25 = scalar_lea.vmem %s889_s0, %s633_s22  ;;  %v813_v12 = vld [vmem:[%s892_s3] ss:$0 sm:$0xff]  ;;  %s830_s6 = scalar_lea.vmem %s893_s4, %s633_s22 }
   0xe   : > { %702 = vmatprep.subr.bf16.mxu0 %v733_v1  ;;  %721 = vmatprep.subr.bf16.mxu1 %v733_v1  ;;  %v734_v2 = vld [vmem:[%s193_s25] sm:$0xff]   ;;  %v736_v4 = vld [vmem:[%s193_s25 + $0x8] sm:$0xff]   ;;  %v738_v6 = vld [vmem:[%s193_s25 + $0x10] sm:$0xff]  }
   0xf   : > { %v735_v3 = vld [vmem:[%s193_s25 + $0x20] sm:$0xff]   ;;  %704 = vmatprep.mubr.msk.bf16.mxu0 %vm274_vm0, %v734_v2  ;;  %v737_v5 = vld [vmem:[%s193_s25 + $0x28] sm:$0xff]   ;;  %v739_v7 = vld [vmem:[%s193_s25 + $0x30] sm:$0xff]  }
  0x10   : > { %712 = vmatprep.mubr.msk.bf16.mxu1 %vm274_vm0, %v735_v3  ;;  %v740_v8 = vld [vmem:[%s193_s25 + $0x18] sm:$0xff]  }
  0x11   : > { %703 = vmatpush3.bf16.msra.mxu0 %v733_v1  ;;  %723 = vmatpush3.bf16.msra.mxu1 %v733_v1  ;;  %v741_v9 = vld [vmem:[%s193_s25 + $0x38] sm:$0xff]  }
  0x14   : > { %705 = vmatmul.mubr.msk.bf16.vlgmr.msra.gmra.mxu0 %vm274_vm0, %v736_v4  ;;  %713 = vmatmul.mubr.msk.bf16.vlgmr.msra.gmra.mxu1 %vm274_vm0, %v737_v5 }
  0x15   : > { %708 = vmatprep.mubr.msk.bf16.mxu0 %vm274_vm0, %v738_v6  ;;  %716 = vmatprep.mubr.msk.bf16.mxu1 %vm274_vm0, %v739_v7 }
  0x1c   : > { %709 = vmatmul.mubr.msk.bf16.gmra.mxu0 %vm274_vm0, %v740_v8  ;;  %717 = vmatmul.mubr.msk.bf16.gmra.mxu1 %vm274_vm0, %v741_v9 }
  0xd4   : > { %v706_v11 = vpop.f32.mrf.mxu0  ;;  %v714_v14 = vpop.f32.mrf.mxu1 }
  0xd5   : > { %v405_v13 = vmul.f32 %v706_v11, %v808_v10  ;;  %v413_v15 = vmul.f32 %v714_v14, %v808_v10 }
  0xd6   : > { %v333_v16 = vpop.f32.mrf.mxu0  ;;  %v365_v19 = vpop.f32.mrf.mxu1 }
  0xd7   : > { %v428_v17 = vadd.f32 %v813_v12, %v405_v13  ;;  %v403_v18 = vmul.f32 %v808_v10, %v333_v16  ;;  %v436_v20 = vadd.f32 %v813_v12, %v413_v15  ;;  %v411_v21 = vmul.f32 %v808_v10, %v365_v19 }
  0xd8   : > { %v707_v22 = vpop.f32.mrf.mxu0  ;;  %v715_v26 = vpop.f32.mrf.mxu1 }
  0xd9   : > { %vm444_vm2 = vcmp.gt.f32.partialorder %v428_v17, 0.0  ;;  %v460_v23 = vmul.f32 0.01, %v428_v17  ;;  %v426_v24 = vadd.f32 %v813_v12, %v403_v18  ;;  %v406_v25 = vmul.f32 %v707_v22, %v808_v10 }
  0xda   : > { %vm452_vm3 = vcmp.gt.f32.partialorder %v436_v20, 0.0  ;;  %v468_v27 = vmul.f32 0.01, %v436_v20  ;;  %v434_v28 = vadd.f32 %v813_v12, %v411_v21  ;;  %v414_v29 = vmul.f32 %v715_v26, %v808_v10  ;;  %v336_v30 = vpop.f32.mrf.mxu0  ;;  %v368_v34 = vpop.f32.mrf.mxu1 }
  0xdb   : > { %v476_v31 = vsel %vm444_vm2, %v428_v17, %v460_v23  ;;  %vm442_vm4 = vcmp.gt.f32.partialorder %v426_v24, 0.0  ;;  %v458_v32 = vmul.f32 0.01, %v426_v24  ;;  %v429_v33 = vadd.f32 %v813_v12, %v406_v25 }
  0xdc   : > { %v676_v35 = vpack.c.bf16 %v476_v31, %v476_v31  ;;  %v484_v36 = vsel %vm452_vm3, %v436_v20, %v468_v27  ;;  %vm450_vm5 = vcmp.gt.f32.partialorder %v434_v28, 0.0  ;;  %v466_v37 = vmul.f32 0.01, %v434_v28  ;;  %v710_v38 = vpop.f32.mrf.mxu0  ;;  %v718_v42 = vpop.f32.mrf.mxu1 }
  0xdd   : > { %v684_v39 = vpack.c.bf16 %v484_v36, %v484_v36  ;;  %v474_v40 = vsel %vm442_vm4, %v426_v24, %v458_v32  ;;  %vm445_vm6 = vcmp.gt.f32.partialorder %v429_v33, 0.0  ;;  %v461_v41 = vmul.f32 0.01, %v429_v33 }
  0xde   : > { %557 = vst.msk [vmem:[%s830_s6 + $0x8] sm:$0xf] %vm554_vm1, %v676_v35  ;;  %v674_v43 = vpack.c.bf16 %v474_v40, %v474_v40  ;;  %v482_v44 = vsel %vm450_vm5, %v434_v28, %v466_v37  ;;  %v437_v45 = vadd.f32 %v813_v12, %v414_v29  ;;  %v404_v46 = vmul.f32 %v808_v10, %v336_v30  ;;  %v349_v47 = vpop.f32.mrf.mxu0  ;;  %v381_v52 = vpop.f32.mrf.mxu1 }
  0xdf   : > { %565 = vst.msk [vmem:[%s830_s6 + $0x28] sm:$0xf] %vm554_vm1, %v684_v39  ;;  %v682_v48 = vpack.c.bf16 %v482_v44, %v482_v44  ;;  %v477_v49 = vsel %vm445_vm6, %v429_v33, %v461_v41  ;;  %v412_v50 = vmul.f32 %v808_v10, %v368_v34  ;;  %v409_v51 = vmul.f32 %v710_v38, %v808_v10 }
  0xe0   : > { %555 = vst.msk [vmem:[%s830_s6] sm:$0xf] %vm554_vm1, %v674_v43  ;;  %v677_v53 = vpack.c.bf16 %v477_v49, %v477_v49  ;;  %vm453_vm7 = vcmp.gt.f32.partialorder %v437_v45, 0.0  ;;  %v469_v54 = vmul.f32 0.01, %v437_v45  ;;  %v427_v55 = vadd.f32 %v813_v12, %v404_v46  ;;  %v711_v63 = vpop.f32.mrf.mxu0  ;;  %v719_v0 = vpop.f32.mrf.mxu1 }
  0xe1   : > { %563 = vst.msk [vmem:[%s830_s6 + $0x20] sm:$0xf] %vm554_vm1, %v682_v48  ;;  %v435_v56 = vadd.f32 %v813_v12, %v412_v50  ;;  %v432_v57 = vadd.f32 %v813_v12, %v409_v51  ;;  %v417_v58 = vmul.f32 %v718_v42, %v808_v10  ;;  %v407_v59 = vmul.f32 %v808_v10, %v349_v47 }
  0xe2   : > { %558 = vst.msk [vmem:[%s830_s6 + $0xc] sm:$0xf] %vm554_vm1, %v677_v53  ;;  %v485_v60 = vsel %vm453_vm7, %v437_v45, %v469_v54  ;;  %vm443_vm8 = vcmp.gt.f32.partialorder %v427_v55, 0.0  ;;  %v459_v61 = vmul.f32 0.01, %v427_v55  ;;  %v415_v62 = vmul.f32 %v808_v10, %v381_v52  ;;  %v352_v16 = vpop.f32.mrf.mxu0  ;;  %v384_v17 = vpop.f32.mrf.mxu1 }
  0xe3   : > { %v685_v1 = vpack.c.bf16 %v485_v60, %v485_v60  ;;  %vm451_vm9 = vcmp.gt.f32.partialorder %v435_v56, 0.0  ;;  %v467_v2 = vmul.f32 0.01, %v435_v56  ;;  %vm448_vm10 = vcmp.gt.f32.partialorder %v432_v57, 0.0 }
  0xe4   : > { %v475_v3 = vsel %vm443_vm8, %v427_v55, %v459_v61  ;;  %v464_v4 = vmul.f32 0.01, %v432_v57  ;;  %v440_v5 = vadd.f32 %v813_v12, %v417_v58  ;;  %v430_v6 = vadd.f32 %v813_v12, %v407_v59 }
  0xe5   : > { %566 = vst.msk [vmem:[%s830_s6 + $0x2c] sm:$0xf] %vm554_vm1, %v685_v1  ;;  %v675_v7 = vpack.c.bf16 %v475_v3, %v475_v3  ;;  %v483_v8 = vsel %vm451_vm9, %v435_v56, %v467_v2  ;;  %v438_v9 = vadd.f32 %v813_v12, %v415_v62  ;;  %v410_v11 = vmul.f32 %v711_v63, %v808_v10 }
  0xe6   : > { %v683_v13 = vpack.c.bf16 %v483_v8, %v483_v8  ;;  %v480_v14 = vsel %vm448_vm10, %v432_v57, %v464_v4  ;;  %vm456_vm11 = vcmp.gt.f32.partialorder %v440_v5, 0.0  ;;  %v472_v15 = vmul.f32 0.01, %v440_v5 }
  0xe7   : > { %556 = vst.msk [vmem:[%s830_s6 + $0x4] sm:$0xf] %vm554_vm1, %v675_v7  ;;  %v680_v18 = vpack.c.bf16 %v480_v14, %v480_v14  ;;  %vm446_vm12 = vcmp.gt.f32.partialorder %v430_v6, 0.0  ;;  %v462_v19 = vmul.f32 0.01, %v430_v6  ;;  %vm454_vm13 = vcmp.gt.f32.partialorder %v438_v9, 0.0 }
  0xe8   : > { %564 = vst.msk [vmem:[%s830_s6 + $0x24] sm:$0xf] %vm554_vm1, %v683_v13  ;;  %v488_v20 = vsel %vm456_vm11, %v440_v5, %v472_v15  ;;  %v470_v21 = vmul.f32 0.01, %v438_v9  ;;  %v433_v22 = vadd.f32 %v813_v12, %v410_v11  ;;  %v418_v23 = vmul.f32 %v719_v0, %v808_v10 }
  0xe9   : > { %561 = vst.msk [vmem:[%s830_s6 + $0x18] sm:$0xf] %vm554_vm1, %v680_v18  ;;  %v688_v24 = vpack.c.bf16 %v488_v20, %v488_v20  ;;  %v478_v25 = vsel %vm446_vm12, %v430_v6, %v462_v19  ;;  %v408_v26 = vmul.f32 %v808_v10, %v352_v16  ;;  %v416_v27 = vmul.f32 %v808_v10, %v384_v17 }
  0xea   : > { %v678_v28 = vpack.c.bf16 %v478_v25, %v478_v25  ;;  %v486_v29 = vsel %vm454_vm13, %v438_v9, %v470_v21  ;;  %vm449_vm14 = vcmp.gt.f32.partialorder %v433_v22, 0.0  ;;  %v465_v30 = vmul.f32 0.01, %v433_v22 }
  0xeb   : > { %569 = vst.msk [vmem:[%s830_s6 + $0x38] sm:$0xf] %vm554_vm1, %v688_v24  ;;  %v686_v31 = vpack.c.bf16 %v486_v29, %v486_v29  ;;  %v441_v32 = vadd.f32 %v813_v12, %v418_v23  ;;  %v431_v33 = vadd.f32 %v813_v12, %v408_v26  ;;  %v439_v34 = vadd.f32 %v813_v12, %v416_v27 }
  0xec   : > { %559 = vst.msk [vmem:[%s830_s6 + $0x10] sm:$0xf] %vm554_vm1, %v678_v28  ;;  %v481_v35 = vsel %vm449_vm14, %v433_v22, %v465_v30 }
  0xed   : > { %567 = vst.msk [vmem:[%s830_s6 + $0x30] sm:$0xf] %vm554_vm1, %v686_v31  ;;  %v681_v10 = vpack.c.bf16 %v481_v35, %v481_v35  ;;  %vm457_vm15 = vcmp.gt.f32.partialorder %v441_v32, 0.0  ;;  %v473_v36 = vmul.f32 0.01, %v441_v32  ;;  %vm447_vm0 = vcmp.gt.f32.partialorder %v431_v33, 0.0 }
  0xee   : > { %v463_v37 = vmul.f32 0.01, %v431_v33  ;;  %vm455_vm2 = vcmp.gt.f32.partialorder %v439_v34, 0.0  ;;  %v471_v38 = vmul.f32 0.01, %v439_v34 }
  0xef   : > { %562 = vst.msk [vmem:[%s830_s6 + $0x1c] sm:$0xf] %vm554_vm1, %v681_v10  ;;  %v489_v39 = vsel %vm457_vm15, %v441_v32, %v473_v36 }
  0xf0   : > { %v689_v40 = vpack.c.bf16 %v489_v39, %v489_v39  ;;  %v479_v12 = vsel %vm447_vm0, %v431_v33, %v463_v37  ;;  %v487_v41 = vsel %vm455_vm2, %v439_v34, %v471_v38 }
  0xf1   : > { %v679_v42 = vpack.c.bf16 %v479_v12, %v479_v12  ;;  %v687_v43 = vpack.c.bf16 %v487_v41, %v487_v41 }
  0xf2   : > { %570 = vst.msk [vmem:[%s830_s6 + $0x3c] sm:$0xf] %vm554_vm1, %v689_v40 }
  0xf3   : > { %560 = vst.msk [vmem:[%s830_s6 + $0x14] sm:$0xf] %vm554_vm1, %v679_v42  ;;  %568 = vst.msk [vmem:[%s830_s6 + $0x34] sm:$0xf] %vm554_vm1, %v687_v43 }
  0xf4 PF: > { %s14_s15 = sadd.s32 1, %s748_s15  }
  0xf5   : > { %p11_p4 = scmp.ge.s32.totalorder %s14_s15, 4  }
  0xf7   :  { %13 = sbr.rel (!%p11_p4) target bundleno = 1 (0x1), region = 66 }

// kernel: tile.43
= control target key start
LH: loop header
LB: loop body
LE: loop exit
PB: predicated region body
PF: predicated region fallthrough
CT: control target
= control target key end

     0   :  { %s22_s0 = inlined_call_operand.vmem [shape: f32[8], index: 0, kind: input, shape index: {}]   ;;  %s23_s1 = inlined_call_operand.vmem [shape: f32[4,8], index: 1, kind: output, shape index: {}]  }
   0x1   :  { %v4_v0 = vld [vmem:[%s22_s0] ss:$0 sm:$0xff] }
   0x2   :  { %5 = vst [vmem:[%s23_s1] sm:$0xf] %v4_v0 }

// kernel: tile.48
= control target key start
LH: loop header
LB: loop body
LE: loop exit
PB: predicated region body
PF: predicated region fallthrough
CT: control target
= control target key end

     0   :  { %vm8_vm0 = vcmask 64512   ;;  %s40_s8 = smov 8   ;;  %s41_s9 = smov 16   ;;  %vm14_vm1 = vcmask 261312   ;;  %vm20_vm2 = vcmask 195712   ;;  %vm26_vm3 = vcmask 130112   ;;  %s58_s0 = inlined_call_operand.vmem [shape: f32[4,8], index: 0, kind: input, shape index: {}]   ;;  %s59_s1 = inlined_call_operand.vmem [shape: f32[1,32], index: 1, kind: output, shape index: {}]  }
   0x1   :  { %v5_v0 = vld [vmem:[%s58_s0] sm:$0xf]  ;;  %s39_s0 = smov 24  }
   0x2   :  { %6 = vst [vmem:[#allocation1] sm:$0xf] %v5_v0 }
   0x9   :  { %v11_v1 = vld [vmem:[#allocation1 + $0x3] sm:$0x1]   ;;  %v23_v2 = vld [vmem:[#allocation1 + $0x1] sm:$0x1]   ;;  %v7_v3 = vld [vmem:[#allocation1] sm:$0x1]  }
   0xa   :  { %12 = vrot.lane.b32.xlu0 %v11_v1, %s39_s0  ;;  %24 = vrot.lane.b32.xlu1 %v23_v2, %s40_s8  ;;  %v17_v4 = vld [vmem:[#allocation1 + $0x2] sm:$0x1]   ;;  %9 = vst.msk [vmem:[#allocation0] sm:$0x1] %vm8_vm0, %v7_v3  }
   0xe   :  { %18 = vrot.lane.b32.xlu0 %v17_v4, %s41_s9 }
  0x7c   :  { %v13_v5 = vpop.permute.xlu0 %12   ;;  %v25_v6 = vpop.permute.xlu1 %24  }
  0x7d   :  { %15 = vst.msk [vmem:[#allocation0] sm:$0x1] %vm14_vm1, %v13_v5  }
  0x80   :  { %v19_v7 = vpop.permute.xlu0 %18  }
  0x81   :  { %21 = vst.msk [vmem:[#allocation0] sm:$0x1] %vm20_vm2, %v19_v7  }
  0x82   :  { %27 = vst.msk [vmem:[#allocation0] sm:$0x1] %vm26_vm3, %v25_v6  }
  0x89   :  { %v32_v8 = vld [vmem:[#allocation0] sm:$0x1] }
  0x8a   :  { %35 = vst [vmem:[%s59_s1] sm:$0x1] %v32_v8 }

// kernel: hourglass_att_forward.43
= control target key start
LH: loop header
LB: loop body
LE: loop exit
PB: predicated region body
PF: predicated region fallthrough
CT: control target
= control target key end

     0   :  { %s892_s15 = smov 0   ;;  %s1042_s0 = inlined_call_operand.vmem [shape: bf16[256,144], index: 0, kind: input, shape index: {}]   ;;  %s1043_s1 = inlined_call_operand.vmem [shape: bf16[144,32], index: 1, kind: input, shape index: {}]   ;;  %s1044_s2 = inlined_call_operand.vmem [shape: f32[1,32], index: 2, kind: input, shape index: {}]   ;;  %s1045_s3 = inlined_call_operand.vmem [shape: f32[1,32], index: 3, kind: input, shape index: {}]   ;;  %s1046_s4 = inlined_call_operand.vmem [shape: bf16[256,32], index: 4, kind: output, shape index: {}]  }
   0x1 LB: > { %s718_s16 = sadd.s32 4294967295, %s864_s15   ;;  %p722_p0 = scmp.ge.s32.totalorder %s864_s15, 1  ;;  %s864_s15 = sphi %s892_s15, %s14_s15  }
   0x2   : > { %p164_p1 = scmp.lt.s32.totalorder %s864_s15, 3 }
   0x4   : > { %p165_p2 = pnand %p722_p0, %p164_p1 }
   0x5   : > { %s723_s19 = sshll.u32 (!%p165_p2), %s718_s16, 4 }
   0x6   : > { %168 = sbr.rel (%p165_p2) target bundleno = 281 (0x119), region = 36  ;;  %p192_p3 = scmp.lt.s32.totalorder (!%p165_p2), %s723_s19, 31 }
   0xb   : > { %v825_v0 = vld [vmem:[%s1043_s1 + $0x38] sm:$0xff]   ;;  %v866_v1 = vmov 0   ;;  %v826_v2 = vld [vmem:[%s1043_s1 + $0x30] sm:$0xff]   ;;  %s1048_s19 = smov (!%p192_p3, %s723_s19), 31  ;;  %v827_v3 = vld [vmem:[%s1043_s1 + $0x28] sm:$0xff]   ;;  %vm365_vm0 = vcmask 130048  }
   0xc   : > { %390 = vmatprep.subr.bf16.mxu0 %v866_v1  ;;  %798 = vmatprep.subr.bf16.mxu1 %v866_v1  ;;  %s781_s24 = sshll.u32 %s1048_s19, 3  ;;  %v828_v4 = vld [vmem:[%s1043_s1 + $0x20] sm:$0xff]   ;;  %v829_v7 = vld [vmem:[%s1043_s1 + $0x18] sm:$0xff]   ;;  %v830_v8 = vld [vmem:[%s1043_s1 + $0x10] sm:$0xff]   ;;  %s727_s20 = sshll.u32 %s1048_s19, 2  ;;  %vm645_vm3 = vcmask 257024  }
   0xd   : > { %391 = vmatpush1.bf16.msra.mxu0 %v825_v0  ;;  %807 = vmatpush1.bf16.msra.mxu1 %v825_v0  ;;  %s915_s27 = scalar_lea.vmem %s1042_s0, %s781_s24  ;;  %v831_v9 = vld [vmem:[%s1043_s1 + $0x8] sm:$0xff]   ;;  %v832_v10 = vld [vmem:[%s1043_s1] sm:$0xff]   ;;  %s979_s23 = scalar_lea.vmem %s1046_s4, %s727_s20 }
   0xe   : > { %392 = vmatprep.subr.bf16.mxu0 %v866_v1  ;;  %799 = vmatprep.subr.bf16.mxu1 %v866_v1  ;;  %v836_v5 = vld [vmem:[%s915_s27 + $0x4] ss:$8 sps:$4 sm:$0xff]   ;;  %v834_v12 = vld [vmem:[%s915_s27] ss:$8 sps:$4 sm:$0xff]   ;;  %v840_v14 = vld [vmem:[%s915_s27 + $0x14] ss:$8 sps:$4 sm:$0xff]  }
   0xf   : > { %v839_v6 = vld [vmem:[%s915_s27 + $0x44] ss:$8 sps:$4 sm:$0xff]   ;;  %753 = vmatprep.mubr.msk.bf16.mxu0 %vm365_vm0, %v836_v5  ;;  %v837_v13 = vld [vmem:[%s915_s27 + $0x40] ss:$8 sps:$4 sm:$0xff]   ;;  %v842_v15 = vld [vmem:[%s915_s27 + $0x54] ss:$8 sps:$4 sm:$0xff]  }
  0x10   : > { %757 = vmatprep.mubr.msk.bf16.mxu1 %vm365_vm0, %v839_v6  ;;  %v833_v11 = vld [vmem:[%s1043_s1 + $0x40] sm:$0xff]   ;;  %v844_v16 = vld [vmem:[%s915_s27 + $0x10] ss:$8 sps:$4 sm:$0xff]   ;;  %v852_v22 = vld [vmem:[%s915_s27 + $0x34] ss:$8 sps:$4 sm:$0xff]  }
  0x11   : > { %393 = vmatpush1.bf16.msra.mxu0 %v826_v2  ;;  %808 = vmatpush1.bf16.msra.mxu1 %v826_v2  ;;  %v845_v17 = vld [vmem:[%s915_s27 + $0x50] ss:$8 sps:$4 sm:$0xff]   ;;  %v846_v18 = vld [vmem:[%s915_s27 + $0x24] ss:$8 sps:$4 sm:$0xff]   ;;  %v850_v20 = vld [vmem:[%s915_s27 + $0x20] ss:$8 sps:$4 sm:$0xff]  }
  0x12   : > { %394 = vmatprep.subr.bf16.mxu0 %v866_v1  ;;  %800 = vmatprep.subr.bf16.mxu1 %v866_v1  ;;  %v848_v19 = vld [vmem:[%s915_s27 + $0x64] ss:$8 sps:$4 sm:$0xff]   ;;  %v851_v21 = vld [vmem:[%s915_s27 + $0x60] ss:$8 sps:$4 sm:$0xff]   ;;  %v854_v23 = vld [vmem:[%s915_s27 + $0x74] ss:$8 sps:$4 sm:$0xff]  }
  0x13   : > { %v856_v24 = vld [vmem:[%s915_s27 + $0x30] ss:$8 sps:$4 sm:$0xff]   ;;  %v962_v26 = vld [vmem:[%s1044_s2] ss:$0 sm:$0xff] }
  0x14   : > { %v857_v25 = vld [vmem:[%s915_s27 + $0x70] ss:$8 sps:$4 sm:$0xff]   ;;  %v967_v28 = vld [vmem:[%s1045_s3] ss:$0 sm:$0xff] }
  0x15   : > { %395 = vmatpush1.bf16.msra.mxu0 %v827_v3  ;;  %809 = vmatpush1.bf16.msra.mxu1 %v827_v3 }
  0x16   : > { %396 = vmatprep.subr.bf16.mxu0 %v866_v1  ;;  %801 = vmatprep.subr.bf16.mxu1 %v866_v1 }
  0x19   : > { %397 = vmatpush1.bf16.msra.mxu0 %v828_v4  ;;  %810 = vmatpush1.bf16.msra.mxu1 %v828_v4 }
  0x1a   : > { %398 = vmatprep.subr.bf16.mxu0 %v866_v1  ;;  %802 = vmatprep.subr.bf16.mxu1 %v866_v1 }
  0x1d   : > { %399 = vmatpush1.bf16.msra.mxu0 %v829_v7  ;;  %811 = vmatpush1.bf16.msra.mxu1 %v829_v7 }
  0x1e   : > { %400 = vmatprep.subr.bf16.mxu0 %v866_v1  ;;  %803 = vmatprep.subr.bf16.mxu1 %v866_v1 }
  0x21   : > { %401 = vmatpush1.bf16.msra.mxu0 %v830_v8  ;;  %812 = vmatpush1.bf16.msra.mxu1 %v830_v8 }
  0x22   : > { %402 = vmatprep.subr.bf16.mxu0 %v866_v1  ;;  %804 = vmatprep.subr.bf16.mxu1 %v866_v1 }
  0x25   : > { %403 = vmatpush1.bf16.msra.mxu0 %v831_v9  ;;  %813 = vmatpush1.bf16.msra.mxu1 %v831_v9 }
  0x26   : > { %404 = vmatprep.subr.bf16.mxu0 %v866_v1  ;;  %805 = vmatprep.subr.bf16.mxu1 %v866_v1 }
  0x29   : > { %405 = vmatpush1.bf16.msra.mxu0 %v832_v10  ;;  %814 = vmatpush1.bf16.msra.mxu1 %v832_v10 }
  0x2a   : > { %420 = vmatprep.subr.bf16.mxu0 %v866_v1  ;;  %806 = vmatprep.subr.bf16.mxu1 %v866_v1 }
  0x2d   : > { %421 = vmatpush2.bf16.msra.mxu0 %v833_v11  ;;  %815 = vmatpush2.bf16.msra.mxu1 %v833_v11 }
  0x30   : > { %423 = vmatmul.mubr.bf16.vlgmr.msra.gmra.mxu0 %v834_v12  ;;  %455 = vmatmul.mubr.bf16.vlgmr.msra.gmra.mxu1 %v837_v13 }
  0x31   : > { %754 = vmatprep.mubr.msk.bf16.mxu0 %vm365_vm0, %v840_v14  ;;  %758 = vmatprep.mubr.msk.bf16.mxu1 %vm365_vm0, %v842_v15 }
  0x38   : > { %431 = vmatmul.mubr.bf16.gmra.mxu0 %v844_v16  ;;  %463 = vmatmul.mubr.bf16.gmra.mxu1 %v845_v17 }
  0x39   : > { %755 = vmatprep.mubr.msk.bf16.mxu0 %vm365_vm0, %v846_v18  ;;  %759 = vmatprep.mubr.msk.bf16.mxu1 %vm365_vm0, %v848_v19 }
  0x40   : > { %439 = vmatmul.mubr.bf16.gmra.mxu0 %v850_v20  ;;  %471 = vmatmul.mubr.bf16.gmra.mxu1 %v851_v21 }
  0x41   : > { %756 = vmatprep.mubr.msk.bf16.mxu0 %vm365_vm0, %v852_v22  ;;  %760 = vmatprep.mubr.msk.bf16.mxu1 %vm365_vm0, %v854_v23 }
  0x48   : > { %447 = vmatmul.mubr.bf16.gmra.mxu0 %v856_v24  ;;  %479 = vmatmul.mubr.bf16.gmra.mxu1 %v857_v25 }
  0xf0   : > { %v424_v27 = vpop.f32.mrf.mxu0  ;;  %v456_v29 = vpop.f32.mrf.mxu1 }
  0xf1   : > { %v494_v30 = vmul.f32 %v962_v26, %v424_v27  ;;  %v502_v31 = vmul.f32 %v962_v26, %v456_v29 }
  0xf2   : > { %v426_v32 = vpop.f32.mrf.mxu0  ;;  %v458_v33 = vpop.f32.mrf.mxu1 }
  0xf3   : > { %v517_v34 = vadd.f32 %v967_v28, %v494_v30  ;;  %v525_v35 = vadd.f32 %v967_v28, %v502_v31 }
  0xf4   : > { %v427_v36 = vpop.f32.mrf.mxu0  ;;  %v459_v37 = vpop.f32.mrf.mxu1 }
  0xf5   : > { %vm533_vm1 = vcmp.gt.f32.partialorder %v517_v34, 0.0  ;;  %v549_v38 = vmul.f32 0.01, %v517_v34  ;;  %vm541_vm2 = vcmp.gt.f32.partialorder %v525_v35, 0.0  ;;  %v557_v39 = vmul.f32 0.01, %v525_v35 }
  0xf6   : > { %v495_v40 = vmul.f32 %v962_v26, %v427_v36  ;;  %v503_v41 = vmul.f32 %v962_v26, %v459_v37  ;;  %v429_v42 = vpop.f32.mrf.mxu0  ;;  %v461_v43 = vpop.f32.mrf.mxu1 }
  0xf7   : > { %v565_v44 = vsel %vm533_vm1, %v517_v34, %v549_v38  ;;  %v573_v45 = vsel %vm541_vm2, %v525_v35, %v557_v39 }
  0xf8   : > { %v782_v46 = vpack.c.bf16 %v565_v44, %v565_v44  ;;  %v790_v47 = vpack.c.bf16 %v573_v45, %v573_v45  ;;  %v518_v48 = vadd.f32 %v967_v28, %v495_v40  ;;  %v526_v49 = vadd.f32 %v967_v28, %v503_v41  ;;  %v432_v50 = vpop.f32.mrf.mxu0  ;;  %v464_v51 = vpop.f32.mrf.mxu1 }
  0xf9   : > { %v496_v52 = vmul.f32 %v962_v26, %v432_v50  ;;  %v504_v53 = vmul.f32 %v962_v26, %v464_v51 }
  0xfa   : > { %646 = vst.msk [vmem:[%s979_s23] sm:$0xf] %vm645_vm3, %v782_v46  ;;  %654 = vst.msk [vmem:[%s979_s23 + $0x20] sm:$0xf] %vm645_vm3, %v790_v47  ;;  %vm534_vm4 = vcmp.gt.f32.partialorder %v518_v48, 0.0  ;;  %vm542_vm5 = vcmp.gt.f32.partialorder %v526_v49, 0.0  ;;  %v434_v56 = vpop.f32.mrf.mxu0  ;;  %v466_v57 = vpop.f32.mrf.mxu1 }
  0xfb   : > { %v550_v54 = vmul.f32 0.01, %v518_v48  ;;  %v558_v55 = vmul.f32 0.01, %v526_v49  ;;  %v519_v58 = vadd.f32 %v967_v28, %v496_v52  ;;  %v527_v59 = vadd.f32 %v967_v28, %v504_v53 }
  0xfc   : > { %v435_v62 = vpop.f32.mrf.mxu0  ;;  %v467_v63 = vpop.f32.mrf.mxu1 }
  0xfd   : > { %v566_v60 = vsel %vm534_vm4, %v518_v48, %v550_v54  ;;  %v574_v61 = vsel %vm542_vm5, %v526_v49, %v558_v55  ;;  %vm535_vm6 = vcmp.gt.f32.partialorder %v519_v58, 0.0  ;;  %v551_v2 = vmul.f32 0.01, %v519_v58 }
  0xfe   : > { %v783_v0 = vpack.c.bf16 %v566_v60, %v566_v60  ;;  %v791_v1 = vpack.c.bf16 %v574_v61, %v574_v61  ;;  %vm543_vm7 = vcmp.gt.f32.partialorder %v527_v59, 0.0  ;;  %v559_v3 = vmul.f32 0.01, %v527_v59  ;;  %v437_v6 = vpop.f32.mrf.mxu0  ;;  %v469_v7 = vpop.f32.mrf.mxu1 }
  0xff   : > { %v497_v4 = vmul.f32 %v962_v26, %v435_v62  ;;  %v505_v5 = vmul.f32 %v962_v26, %v467_v63  ;;  %v567_v8 = vsel %vm535_vm6, %v519_v58, %v551_v2 }
 0x100   : > { %647 = vst.msk [vmem:[%s979_s23 + $0x4] sm:$0xf] %vm645_vm3, %v783_v0  ;;  %655 = vst.msk [vmem:[%s979_s23 + $0x24] sm:$0xf] %vm645_vm3, %v791_v1  ;;  %v784_v9 = vpack.c.bf16 %v567_v8, %v567_v8  ;;  %v575_v10 = vsel %vm543_vm7, %v527_v59, %v559_v3  ;;  %v440_v13 = vpop.f32.mrf.mxu0  ;;  %v472_v14 = vpop.f32.mrf.mxu1 }
 0x101   : > { %v520_v11 = vadd.f32 %v967_v28, %v497_v4  ;;  %v528_v12 = vadd.f32 %v967_v28, %v505_v5  ;;  %v792_v15 = vpack.c.bf16 %v575_v10, %v575_v10  ;;  %v498_v16 = vmul.f32 %v962_v26, %v440_v13 }
 0x102   : > { %v506_v17 = vmul.f32 %v962_v26, %v472_v14  ;;  %648 = vst.msk [vmem:[%s979_s23 + $0x8] sm:$0xf] %vm645_vm3, %v784_v9  ;;  %v442_v20 = vpop.f32.mrf.mxu0  ;;  %v474_v21 = vpop.f32.mrf.mxu1 }
 0x103   : > { %vm536_vm8 = vcmp.gt.f32.partialorder %v520_v11, 0.0  ;;  %v552_v18 = vmul.f32 0.01, %v520_v11  ;;  %vm544_vm9 = vcmp.gt.f32.partialorder %v528_v12, 0.0  ;;  %v560_v19 = vmul.f32 0.01, %v528_v12 }
 0x104   : > { %656 = vst.msk [vmem:[%s979_s23 + $0x28] sm:$0xf] %vm645_vm3, %v792_v15  ;;  %v521_v22 = vadd.f32 %v967_v28, %v498_v16  ;;  %v529_v23 = vadd.f32 %v967_v28, %v506_v17  ;;  %v443_v27 = vpop.f32.mrf.mxu0  ;;  %v475_v29 = vpop.f32.mrf.mxu1 }
 0x105   : > { %v568_v24 = vsel %vm536_vm8, %v520_v11, %v552_v18  ;;  %v576_v25 = vsel %vm544_vm9, %v528_v12, %v560_v19  ;;  %v499_v34 = vmul.f32 %v962_v26, %v443_v27  ;;  %v507_v35 = vmul.f32 %v962_v26, %v475_v29 }
 0x106   : > { %v785_v30 = vpack.c.bf16 %v568_v24, %v568_v24  ;;  %v793_v31 = vpack.c.bf16 %v576_v25, %v576_v25  ;;  %vm537_vm10 = vcmp.gt.f32.partialorder %v521_v22, 0.0  ;;  %v553_v32 = vmul.f32 0.01, %v521_v22  ;;  %v445_v36 = vpop.f32.mrf.mxu0  ;;  %v477_v37 = vpop.f32.mrf.mxu1 }
 0x107   : > { %vm545_vm11 = vcmp.gt.f32.partialorder %v529_v23, 0.0  ;;  %v561_v33 = vmul.f32 0.01, %v529_v23  ;;  %v522_v41 = vadd.f32 %v967_v28, %v499_v34  ;;  %v530_v42 = vadd.f32 %v967_v28, %v507_v35 }
 0x108   : > { %649 = vst.msk [vmem:[%s979_s23 + $0xc] sm:$0xf] %vm645_vm3, %v785_v30  ;;  %657 = vst.msk [vmem:[%s979_s23 + $0x2c] sm:$0xf] %vm645_vm3, %v793_v31  ;;  %v569_v38 = vsel %vm537_vm10, %v521_v22, %v553_v32  ;;  %v448_v43 = vpop.f32.mrf.mxu0  ;;  %v480_v44 = vpop.f32.mrf.mxu1 }
 0x109   : > { %v786_v39 = vpack.c.bf16 %v569_v38, %v569_v38  ;;  %v577_v40 = vsel %vm545_vm11, %v529_v23, %v561_v33  ;;  %v500_v46 = vmul.f32 %v962_v26, %v448_v43  ;;  %v508_v47 = vmul.f32 %v962_v26, %v480_v44 }
 0x10a   : > { %v794_v45 = vpack.c.bf16 %v577_v40, %v577_v40  ;;  %vm538_vm12 = vcmp.gt.f32.partialorder %v522_v41, 0.0  ;;  %v554_v48 = vmul.f32 0.01, %v522_v41  ;;  %vm546_vm13 = vcmp.gt.f32.partialorder %v530_v42, 0.0  ;;  %v450_v50 = vpop.f32.mrf.mxu0  ;;  %v482_v51 = vpop.f32.mrf.mxu1 }
 0x10b   : > { %650 = vst.msk [vmem:[%s979_s23 + $0x10] sm:$0xf] %vm645_vm3, %v786_v39  ;;  %v562_v49 = vmul.f32 0.01, %v530_v42  ;;  %v523_v52 = vadd.f32 %v967_v28, %v500_v46  ;;  %v531_v53 = vadd.f32 %v967_v28, %v508_v47 }
 0x10c   : > { %658 = vst.msk [vmem:[%s979_s23 + $0x30] sm:$0xf] %vm645_vm3, %v794_v45  ;;  %v570_v54 = vsel %vm538_vm12, %v522_v41, %v554_v48  ;;  %v451_v56 = vpop.f32.mrf.mxu0  ;;  %v483_v57 = vpop.f32.mrf.mxu1 }
 0x10d   : > { %v578_v55 = vsel %vm546_vm13, %v530_v42, %v562_v49  ;;  %v787_v58 = vpack.c.bf16 %v570_v54, %v570_v54  ;;  %vm539_vm14 = vcmp.gt.f32.partialorder %v523_v52, 0.0  ;;  %v555_v60 = vmul.f32 0.01, %v523_v52 }
 0x10e   : > { %v795_v59 = vpack.c.bf16 %v578_v55, %v578_v55  ;;  %vm547_vm15 = vcmp.gt.f32.partialorder %v531_v53, 0.0  ;;  %v563_v61 = vmul.f32 0.01, %v531_v53  ;;  %v501_v62 = vmul.f32 %v962_v26, %v451_v56  ;;  %v453_v0 = vpop.f32.mrf.mxu0  ;;  %v485_v1 = vpop.f32.mrf.mxu1 }
 0x10f   : > { %v509_v63 = vmul.f32 %v962_v26, %v483_v57  ;;  %651 = vst.msk [vmem:[%s979_s23 + $0x14] sm:$0xf] %vm645_vm3, %v787_v58  ;;  %v571_v2 = vsel %vm539_vm14, %v523_v52, %v555_v60 }
 0x110   : > { %659 = vst.msk [vmem:[%s979_s23 + $0x34] sm:$0xf] %vm645_vm3, %v795_v59  ;;  %v788_v3 = vpack.c.bf16 %v571_v2, %v571_v2  ;;  %v579_v4 = vsel %vm547_vm15, %v531_v53, %v563_v61  ;;  %v524_v5 = vadd.f32 %v967_v28, %v501_v62 }
 0x111   : > { %v532_v6 = vadd.f32 %v967_v28, %v509_v63  ;;  %v796_v7 = vpack.c.bf16 %v579_v4, %v579_v4 }
 0x112   : > { %652 = vst.msk [vmem:[%s979_s23 + $0x18] sm:$0xf] %vm645_vm3, %v788_v3  ;;  %vm540_vm0 = vcmp.gt.f32.partialorder %v524_v5, 0.0  ;;  %v556_v26 = vmul.f32 0.01, %v524_v5 }
 0x113   : > { %vm548_vm1 = vcmp.gt.f32.partialorder %v532_v6, 0.0  ;;  %v564_v8 = vmul.f32 0.01, %v532_v6  ;;  %660 = vst.msk [vmem:[%s979_s23 + $0x38] sm:$0xf] %vm645_vm3, %v796_v7 }
 0x114   : > { %v572_v9 = vsel %vm540_vm0, %v524_v5, %v556_v26 }
 0x115   : > { %v580_v10 = vsel %vm548_vm1, %v532_v6, %v564_v8  ;;  %v789_v11 = vpack.c.bf16 %v572_v9, %v572_v9 }
 0x116   : > { %v797_v12 = vpack.c.bf16 %v580_v10, %v580_v10 }
 0x117   : > { %653 = vst.msk [vmem:[%s979_s23 + $0x1c] sm:$0xf] %vm645_vm3, %v789_v11 }
 0x118   : > { %661 = vst.msk [vmem:[%s979_s23 + $0x3c] sm:$0xf] %vm645_vm3, %v797_v12 }
 0x119 PF: > { %s14_s15 = sadd.s32 1, %s864_s15  }
 0x11a   : > { %p11_p4 = scmp.ge.s32.totalorder %s14_s15, 4  }
 0x11c   :  { %13 = sbr.rel (!%p11_p4) target bundleno = 1 (0x1), region = 66 }

// kernel: hourglass_att_forward.44
= control target key start
LH: loop header
LB: loop body
LE: loop exit
PB: predicated region body
PF: predicated region fallthrough
CT: control target
= control target key end

     0   :  { %s1912_s15 = smov 0   ;;  %s2331_s0 = inlined_call_operand.vmem [shape: bf16[1024,16], index: 0, kind: input, shape index: {}]   ;;  %s2332_s1 = inlined_call_operand.vmem [shape: bf16[16,8], index: 1, kind: input, shape index: {}]   ;;  %s2333_s2 = inlined_call_operand.vmem [shape: f32[1,8], index: 2, kind: input, shape index: {}]   ;;  %s2334_s3 = inlined_call_operand.vmem [shape: f32[1,8], index: 3, kind: input, shape index: {}]   ;;  %s2335_s4 = inlined_call_operand.vmem [shape: bf16[1024,8], index: 4, kind: output, shape index: {}]  }
   0x1 LB: > { %s1531_s16 = sadd.s32 4294967295, %s1885_s15   ;;  %p1535_p0 = scmp.ge.s32.totalorder %s1885_s15, 1  ;;  %s1885_s15 = sphi %s1912_s15, %s14_s15  }
   0x2   : > { %p163_p1 = scmp.lt.s32.totalorder %s1885_s15, 3 }
   0x4   : > { %p164_p2 = pnand %p1535_p0, %p163_p1 }
   0x5   : > { %s1536_s19 = sshll.u32 (!%p164_p2), %s1531_s16, 6 }
   0x6   : > { %167 = sbr.rel (%p164_p2) target bundleno = 313 (0x139), region = 36  ;;  %p190_p3 = scmp.lt.s32.totalorder (!%p164_p2), %s1536_s19, 127 }
   0xb   : > { %v1846_v0 = vld [vmem:[%s2332_s1] sm:$0xff]   ;;  %s2337_s19 = smov (!%p190_p3, %s1536_s19), 127  ;;  %vm434_vm0 = vcmask 130048   ;;  %vm1410_vm1 = vcmask 60416  }
   0xc   : > { %1770 = vmatprep.subr.bf16.mxu0 %v1846_v0  ;;  %1836 = vmatprep.subr.bf16.mxu1 %v1846_v0  ;;  %s1537_s20 = sshll.u32 %s2337_s19, 2  ;;  %v2000_v33 = vld [vmem:[%s2333_s2] ss:$0 sm:$0xff] }
   0xd   : > { %1771 = vmatpush3.bf16.msra.mxu0 %v1846_v0  ;;  %1837 = vmatpush3.bf16.msra.mxu1 %v1846_v0  ;;  %s1931_s23 = scalar_lea.vmem %s2331_s0, %s1537_s20  ;;  %v2005_v35 = vld [vmem:[%s2334_s3] ss:$0 sm:$0xff]  ;;  %s2022_s30 = scalar_lea.vmem %s2335_s4, %s1537_s20 }
   0xe   : > { %v1847_v1 = vld [vmem:[%s1931_s23] sm:$0xff]   ;;  %v1849_v3 = vld [vmem:[%s1931_s23 + $0x8] sm:$0xff]   ;;  %v1851_v5 = vld [vmem:[%s1931_s23 + $0x10] sm:$0xff]  }
   0xf   : > { %v1848_v2 = vld [vmem:[%s1931_s23 + $0x80] sm:$0xff]   ;;  %1772 = vmatprep.mubr.msk.bf16.mxu0 %vm434_vm0, %v1847_v1  ;;  %v1850_v4 = vld [vmem:[%s1931_s23 + $0x88] sm:$0xff]   ;;  %v1852_v6 = vld [vmem:[%s1931_s23 + $0x90] sm:$0xff]  }
  0x10   : > { %1804 = vmatprep.mubr.msk.bf16.mxu1 %vm434_vm0, %v1848_v2  ;;  %1773 = vmatmul.mubr.msk.bf16.vlgmr.msra.gmra.mxu0 %vm434_vm0, %v1849_v3  ;;  %v1853_v7 = vld [vmem:[%s1931_s23 + $0x18] sm:$0xff]   ;;  %v1855_v9 = vld [vmem:[%s1931_s23 + $0x20] sm:$0xff]   ;;  %v1857_v11 = vld [vmem:[%s1931_s23 + $0x28] sm:$0xff]  }
  0x11   : > { %1805 = vmatmul.mubr.msk.bf16.vlgmr.msra.gmra.mxu1 %vm434_vm0, %v1850_v4  ;;  %1776 = vmatprep.mubr.msk.bf16.mxu0 %vm434_vm0, %v1851_v5  ;;  %v1854_v8 = vld [vmem:[%s1931_s23 + $0x98] sm:$0xff]   ;;  %v1856_v10 = vld [vmem:[%s1931_s23 + $0xa0] sm:$0xff]   ;;  %v1858_v12 = vld [vmem:[%s1931_s23 + $0xa8] sm:$0xff]  }
  0x12   : > { %1808 = vmatprep.mubr.msk.bf16.mxu1 %vm434_vm0, %v1852_v6  ;;  %v1859_v13 = vld [vmem:[%s1931_s23 + $0x30] sm:$0xff]   ;;  %v1861_v15 = vld [vmem:[%s1931_s23 + $0x38] sm:$0xff]   ;;  %v1863_v17 = vld [vmem:[%s1931_s23 + $0x40] sm:$0xff]  }
  0x13   : > { %v1860_v14 = vld [vmem:[%s1931_s23 + $0xb0] sm:$0xff]   ;;  %v1862_v16 = vld [vmem:[%s1931_s23 + $0xb8] sm:$0xff]   ;;  %v1864_v18 = vld [vmem:[%s1931_s23 + $0xc0] sm:$0xff]  }
  0x14   : > { %v1865_v19 = vld [vmem:[%s1931_s23 + $0x48] sm:$0xff]   ;;  %v1867_v21 = vld [vmem:[%s1931_s23 + $0x50] sm:$0xff]   ;;  %v1869_v23 = vld [vmem:[%s1931_s23 + $0x58] sm:$0xff]  }
  0x15   : > { %v1866_v20 = vld [vmem:[%s1931_s23 + $0xc8] sm:$0xff]   ;;  %v1868_v22 = vld [vmem:[%s1931_s23 + $0xd0] sm:$0xff]   ;;  %v1870_v24 = vld [vmem:[%s1931_s23 + $0xd8] sm:$0xff]  }
  0x16   : > { %v1871_v25 = vld [vmem:[%s1931_s23 + $0x60] sm:$0xff]   ;;  %v1873_v27 = vld [vmem:[%s1931_s23 + $0x68] sm:$0xff]   ;;  %v1875_v29 = vld [vmem:[%s1931_s23 + $0x70] sm:$0xff]  }
  0x17   : > { %v1872_v26 = vld [vmem:[%s1931_s23 + $0xe0] sm:$0xff]   ;;  %v1874_v28 = vld [vmem:[%s1931_s23 + $0xe8] sm:$0xff]   ;;  %v1876_v30 = vld [vmem:[%s1931_s23 + $0xf0] sm:$0xff]  }
  0x18   : > { %1777 = vmatmul.mubr.msk.bf16.gmra.mxu0 %vm434_vm0, %v1853_v7  ;;  %v1877_v31 = vld [vmem:[%s1931_s23 + $0x78] sm:$0xff]  }
  0x19   : > { %1809 = vmatmul.mubr.msk.bf16.gmra.mxu1 %vm434_vm0, %v1854_v8  ;;  %1780 = vmatprep.mubr.msk.bf16.mxu0 %vm434_vm0, %v1855_v9  ;;  %v1878_v32 = vld [vmem:[%s1931_s23 + $0xf8] sm:$0xff]  }
  0x1a   : > { %1812 = vmatprep.mubr.msk.bf16.mxu1 %vm434_vm0, %v1856_v10 }
  0x20   : > { %1781 = vmatmul.mubr.msk.bf16.gmra.mxu0 %vm434_vm0, %v1857_v11 }
  0x21   : > { %1813 = vmatmul.mubr.msk.bf16.gmra.mxu1 %vm434_vm0, %v1858_v12  ;;  %1784 = vmatprep.mubr.msk.bf16.mxu0 %vm434_vm0, %v1859_v13 }
  0x22   : > { %1816 = vmatprep.mubr.msk.bf16.mxu1 %vm434_vm0, %v1860_v14 }
  0x28   : > { %1785 = vmatmul.mubr.msk.bf16.gmra.mxu0 %vm434_vm0, %v1861_v15 }
  0x29   : > { %1817 = vmatmul.mubr.msk.bf16.gmra.mxu1 %vm434_vm0, %v1862_v16  ;;  %1788 = vmatprep.mubr.msk.bf16.mxu0 %vm434_vm0, %v1863_v17 }
  0x2a   : > { %1820 = vmatprep.mubr.msk.bf16.mxu1 %vm434_vm0, %v1864_v18 }
  0x30   : > { %1789 = vmatmul.mubr.msk.bf16.gmra.mxu0 %vm434_vm0, %v1865_v19 }
  0x31   : > { %1821 = vmatmul.mubr.msk.bf16.gmra.mxu1 %vm434_vm0, %v1866_v20  ;;  %1792 = vmatprep.mubr.msk.bf16.mxu0 %vm434_vm0, %v1867_v21 }
  0x32   : > { %1824 = vmatprep.mubr.msk.bf16.mxu1 %vm434_vm0, %v1868_v22 }
  0x38   : > { %1793 = vmatmul.mubr.msk.bf16.gmra.mxu0 %vm434_vm0, %v1869_v23 }
  0x39   : > { %1825 = vmatmul.mubr.msk.bf16.gmra.mxu1 %vm434_vm0, %v1870_v24  ;;  %1796 = vmatprep.mubr.msk.bf16.mxu0 %vm434_vm0, %v1871_v25 }
  0x3a   : > { %1828 = vmatprep.mubr.msk.bf16.mxu1 %vm434_vm0, %v1872_v26 }
  0x40   : > { %1797 = vmatmul.mubr.msk.bf16.gmra.mxu0 %vm434_vm0, %v1873_v27 }
  0x41   : > { %1829 = vmatmul.mubr.msk.bf16.gmra.mxu1 %vm434_vm0, %v1874_v28  ;;  %1800 = vmatprep.mubr.msk.bf16.mxu0 %vm434_vm0, %v1875_v29 }
  0x42   : > { %1832 = vmatprep.mubr.msk.bf16.mxu1 %vm434_vm0, %v1876_v30 }
  0x48   : > { %1801 = vmatmul.mubr.msk.bf16.gmra.mxu0 %vm434_vm0, %v1877_v31 }
  0x49   : > { %1833 = vmatmul.mubr.msk.bf16.gmra.mxu1 %vm434_vm0, %v1878_v32 }
  0xd0   : > { %v1774_v34 = vpop.f32.mrf.mxu0 }
  0xd1   : > { %v829_v36 = vmul.f32 %v1774_v34, %v2000_v33  ;;  %v1806_v37 = vpop.f32.mrf.mxu1 }
  0xd2   : > { %v861_v38 = vmul.f32 %v1806_v37, %v2000_v33  ;;  %v565_v39 = vpop.f32.mrf.mxu0 }
  0xd3   : > { %v900_v40 = vadd.f32 %v2005_v35, %v829_v36  ;;  %v827_v41 = vmul.f32 %v2000_v33, %v565_v39  ;;  %v693_v42 = vpop.f32.mrf.mxu1 }
  0xd4   : > { %v932_v43 = vadd.f32 %v2005_v35, %v861_v38  ;;  %v859_v44 = vmul.f32 %v2000_v33, %v693_v42  ;;  %v1775_v45 = vpop.f32.mrf.mxu0 }
  0xd5   : > { %vm964_vm2 = vcmp.gt.f32.partialorder %v900_v40, 0.0  ;;  %v1028_v46 = vmul.f32 0.01, %v900_v40  ;;  %v898_v47 = vadd.f32 %v2005_v35, %v827_v41  ;;  %v830_v48 = vmul.f32 %v1775_v45, %v2000_v33  ;;  %v1807_v49 = vpop.f32.mrf.mxu1 }
  0xd6   : > { %vm996_vm3 = vcmp.gt.f32.partialorder %v932_v43, 0.0  ;;  %v1060_v50 = vmul.f32 0.01, %v932_v43  ;;  %v930_v51 = vadd.f32 %v2005_v35, %v859_v44  ;;  %v862_v52 = vmul.f32 %v1807_v49, %v2000_v33  ;;  %v568_v53 = vpop.f32.mrf.mxu0 }
  0xd7   : > { %v1092_v54 = vsel %vm964_vm2, %v900_v40, %v1028_v46  ;;  %vm962_vm4 = vcmp.gt.f32.partialorder %v898_v47, 0.0  ;;  %v1026_v55 = vmul.f32 0.01, %v898_v47  ;;  %v901_v56 = vadd.f32 %v2005_v35, %v830_v48  ;;  %v696_v57 = vpop.f32.mrf.mxu1 }
  0xd8   : > { %v1675_v58 = vpack.c.bf16 %v1092_v54, %v1092_v54  ;;  %v1124_v59 = vsel %vm996_vm3, %v932_v43, %v1060_v50  ;;  %vm994_vm5 = vcmp.gt.f32.partialorder %v930_v51, 0.0  ;;  %v1058_v60 = vmul.f32 0.01, %v930_v51  ;;  %v1778_v61 = vpop.f32.mrf.mxu0 }
  0xd9   : > { %v1707_v62 = vpack.c.bf16 %v1124_v59, %v1124_v59  ;;  %v1090_v63 = vsel %vm962_vm4, %v898_v47, %v1026_v55  ;;  %vm965_vm6 = vcmp.gt.f32.partialorder %v901_v56, 0.0  ;;  %v1029_v0 = vmul.f32 0.01, %v901_v56  ;;  %v1810_v1 = vpop.f32.mrf.mxu1 }
  0xda   : > { %1413 = vst.msk [vmem:[%s2022_s30 + $0x8] sm:$0xf] %vm1410_vm1, %v1675_v58  ;;  %v1673_v2 = vpack.c.bf16 %v1090_v63, %v1090_v63  ;;  %v1122_v3 = vsel %vm994_vm5, %v930_v51, %v1058_v60  ;;  %v933_v4 = vadd.f32 %v2005_v35, %v862_v52  ;;  %v828_v5 = vmul.f32 %v2000_v33, %v568_v53  ;;  %v581_v6 = vpop.f32.mrf.mxu0 }
  0xdb   : > { %1445 = vst.msk [vmem:[%s2022_s30 + $0x88] sm:$0xf] %vm1410_vm1, %v1707_v62  ;;  %v1705_v7 = vpack.c.bf16 %v1122_v3, %v1122_v3  ;;  %v1093_v8 = vsel %vm965_vm6, %v901_v56, %v1029_v0  ;;  %v860_v9 = vmul.f32 %v2000_v33, %v696_v57  ;;  %v833_v10 = vmul.f32 %v1778_v61, %v2000_v33  ;;  %v709_v11 = vpop.f32.mrf.mxu1 }
  0xdc   : > { %1411 = vst.msk [vmem:[%s2022_s30] sm:$0xf] %vm1410_vm1, %v1673_v2  ;;  %v1676_v12 = vpack.c.bf16 %v1093_v8, %v1093_v8  ;;  %vm997_vm7 = vcmp.gt.f32.partialorder %v933_v4, 0.0  ;;  %v1061_v13 = vmul.f32 0.01, %v933_v4  ;;  %v899_v14 = vadd.f32 %v2005_v35, %v828_v5  ;;  %v1779_v15 = vpop.f32.mrf.mxu0 }
  0xdd   : > { %1443 = vst.msk [vmem:[%s2022_s30 + $0x80] sm:$0xf] %vm1410_vm1, %v1705_v7  ;;  %v931_v16 = vadd.f32 %v2005_v35, %v860_v9  ;;  %v904_v17 = vadd.f32 %v2005_v35, %v833_v10  ;;  %v865_v18 = vmul.f32 %v1810_v1, %v2000_v33  ;;  %v831_v19 = vmul.f32 %v2000_v33, %v581_v6  ;;  %v1811_v20 = vpop.f32.mrf.mxu1 }
  0xde   : > { %1414 = vst.msk [vmem:[%s2022_s30 + $0xc] sm:$0xf] %vm1410_vm1, %v1676_v12  ;;  %v1125_v21 = vsel %vm997_vm7, %v933_v4, %v1061_v13  ;;  %vm963_vm8 = vcmp.gt.f32.partialorder %v899_v14, 0.0  ;;  %v1027_v22 = vmul.f32 0.01, %v899_v14  ;;  %v863_v23 = vmul.f32 %v2000_v33, %v709_v11  ;;  %v584_v24 = vpop.f32.mrf.mxu0 }
  0xdf   : > { %v1708_v25 = vpack.c.bf16 %v1125_v21, %v1125_v21  ;;  %vm995_vm9 = vcmp.gt.f32.partialorder %v931_v16, 0.0  ;;  %v1059_v26 = vmul.f32 0.01, %v931_v16  ;;  %vm968_vm10 = vcmp.gt.f32.partialorder %v904_v17, 0.0  ;;  %v712_v27 = vpop.f32.mrf.mxu1 }
  0xe0   : > { %v1091_v28 = vsel %vm963_vm8, %v899_v14, %v1027_v22  ;;  %v1032_v29 = vmul.f32 0.01, %v904_v17  ;;  %v936_v30 = vadd.f32 %v2005_v35, %v865_v18  ;;  %v902_v31 = vadd.f32 %v2005_v35, %v831_v19  ;;  %v1782_v32 = vpop.f32.mrf.mxu0 }
  0xe1   : > { %1446 = vst.msk [vmem:[%s2022_s30 + $0x8c] sm:$0xf] %vm1410_vm1, %v1708_v25  ;;  %v1674_v34 = vpack.c.bf16 %v1091_v28, %v1091_v28  ;;  %v1123_v36 = vsel %vm995_vm9, %v931_v16, %v1059_v26  ;;  %v934_v37 = vadd.f32 %v2005_v35, %v863_v23  ;;  %v834_v38 = vmul.f32 %v1779_v15, %v2000_v33  ;;  %v1814_v39 = vpop.f32.mrf.mxu1 }
  0xe2   : > { %v1706_v40 = vpack.c.bf16 %v1123_v36, %v1123_v36  ;;  %v1096_v41 = vsel %vm968_vm10, %v904_v17, %v1032_v29  ;;  %vm1000_vm11 = vcmp.gt.f32.partialorder %v936_v30, 0.0  ;;  %v1064_v42 = vmul.f32 0.01, %v936_v30  ;;  %v597_v43 = vpop.f32.mrf.mxu0 }
  0xe3   : > { %1412 = vst.msk [vmem:[%s2022_s30 + $0x4] sm:$0xf] %vm1410_vm1, %v1674_v34  ;;  %v1679_v44 = vpack.c.bf16 %v1096_v41, %v1096_v41  ;;  %vm966_vm12 = vcmp.gt.f32.partialorder %v902_v31, 0.0  ;;  %v1030_v45 = vmul.f32 0.01, %v902_v31  ;;  %vm998_vm13 = vcmp.gt.f32.partialorder %v934_v37, 0.0  ;;  %v725_v46 = vpop.f32.mrf.mxu1 }
  0xe4   : > { %1444 = vst.msk [vmem:[%s2022_s30 + $0x84] sm:$0xf] %vm1410_vm1, %v1706_v40  ;;  %v1128_v47 = vsel %vm1000_vm11, %v936_v30, %v1064_v42  ;;  %v1062_v48 = vmul.f32 0.01, %v934_v37  ;;  %v905_v49 = vadd.f32 %v2005_v35, %v834_v38  ;;  %v866_v50 = vmul.f32 %v1811_v20, %v2000_v33  ;;  %v1783_v51 = vpop.f32.mrf.mxu0 }
  0xe5   : > { %1417 = vst.msk [vmem:[%s2022_s30 + $0x18] sm:$0xf] %vm1410_vm1, %v1679_v44  ;;  %v1711_v52 = vpack.c.bf16 %v1128_v47, %v1128_v47  ;;  %v1094_v53 = vsel %vm966_vm12, %v902_v31, %v1030_v45  ;;  %v832_v54 = vmul.f32 %v2000_v33, %v584_v24  ;;  %v864_v55 = vmul.f32 %v2000_v33, %v712_v27  ;;  %v1815_v56 = vpop.f32.mrf.mxu1 }
  0xe6   : > { %v1677_v57 = vpack.c.bf16 %v1094_v53, %v1094_v53  ;;  %v1126_v58 = vsel %vm998_vm13, %v934_v37, %v1062_v48  ;;  %vm969_vm14 = vcmp.gt.f32.partialorder %v905_v49, 0.0  ;;  %v1033_v59 = vmul.f32 0.01, %v905_v49  ;;  %v600_v60 = vpop.f32.mrf.mxu0 }
  0xe7   : > { %1449 = vst.msk [vmem:[%s2022_s30 + $0x98] sm:$0xf] %vm1410_vm1, %v1711_v52  ;;  %v1709_v61 = vpack.c.bf16 %v1126_v58, %v1126_v58  ;;  %v937_v62 = vadd.f32 %v2005_v35, %v866_v50  ;;  %v903_v63 = vadd.f32 %v2005_v35, %v832_v54  ;;  %v935_v0 = vadd.f32 %v2005_v35, %v864_v55  ;;  %v728_v1 = vpop.f32.mrf.mxu1 }
  0xe8   : > { %1415 = vst.msk [vmem:[%s2022_s30 + $0x10] sm:$0xf] %vm1410_vm1, %v1677_v57  ;;  %v1097_v2 = vsel %vm969_vm14, %v905_v49, %v1033_v59  ;;  %v837_v3 = vmul.f32 %v1782_v32, %v2000_v33  ;;  %v869_v4 = vmul.f32 %v1814_v39, %v2000_v33  ;;  %v835_v5 = vmul.f32 %v2000_v33, %v597_v43  ;;  %v1786_v6 = vpop.f32.mrf.mxu0 }
  0xe9   : > { %1447 = vst.msk [vmem:[%s2022_s30 + $0x90] sm:$0xf] %vm1410_vm1, %v1709_v61  ;;  %v1680_v7 = vpack.c.bf16 %v1097_v2, %v1097_v2  ;;  %vm1001_vm15 = vcmp.gt.f32.partialorder %v937_v62, 0.0  ;;  %v1065_v8 = vmul.f32 0.01, %v937_v62  ;;  %vm967_vm0 = vcmp.gt.f32.partialorder %v903_v63, 0.0  ;;  %v1818_v9 = vpop.f32.mrf.mxu1 }
  0xea   : > { %v1031_v10 = vmul.f32 0.01, %v903_v63  ;;  %vm999_vm2 = vcmp.gt.f32.partialorder %v935_v0, 0.0  ;;  %v1063_v11 = vmul.f32 0.01, %v935_v0  ;;  %v908_v12 = vadd.f32 %v2005_v35, %v837_v3  ;;  %v2074_v13 = vpop.f32.mrf.mxu0 }
  0xeb   : > { %1418 = vst.msk [vmem:[%s2022_s30 + $0x1c] sm:$0xf] %vm1410_vm1, %v1680_v7  ;;  %v1129_v14 = vsel %vm1001_vm15, %v937_v62, %v1065_v8  ;;  %v940_v15 = vadd.f32 %v2005_v35, %v869_v4  ;;  %v906_v16 = vadd.f32 %v2005_v35, %v835_v5  ;;  %v867_v17 = vmul.f32 %v2000_v33, %v725_v46  ;;  %v2081_v18 = vpop.f32.mrf.mxu1 }
  0xec   : > { %v1712_v19 = vpack.c.bf16 %v1129_v14, %v1129_v14  ;;  %v1095_v20 = vsel %vm967_vm0, %v903_v63, %v1031_v10  ;;  %v1127_v21 = vsel %vm999_vm2, %v935_v0, %v1063_v11  ;;  %vm972_vm3 = vcmp.gt.f32.partialorder %v908_v12, 0.0  ;;  %v2083_v22 = vpop.f32.mrf.mxu0 }
  0xed   : > { %v1678_v23 = vpack.c.bf16 %v1095_v20, %v1095_v20  ;;  %v1710_v24 = vpack.c.bf16 %v1127_v21, %v1127_v21  ;;  %v1036_v25 = vmul.f32 0.01, %v908_v12  ;;  %vm1004_vm4 = vcmp.gt.f32.partialorder %v940_v15, 0.0  ;;  %v2085_v26 = vpop.f32.mrf.mxu1 }
  0xee   : > { %1450 = vst.msk [vmem:[%s2022_s30 + $0x9c] sm:$0xf] %vm1410_vm1, %v1712_v19  ;;  %v1068_v27 = vmul.f32 0.01, %v940_v15  ;;  %vm970_vm5 = vcmp.gt.f32.partialorder %v906_v16, 0.0  ;;  %v938_v29 = vadd.f32 %v2005_v35, %v867_v17  ;;  %v2090_v30 = vpop.f32.mrf.mxu0  ;;  %v838_v32 = vmul.f32 %v1783_v51, %v2000_v33 }
  0xef   : > { %v1034_v28 = vmul.f32 0.01, %v906_v16  ;;  %1416 = vst.msk [vmem:[%s2022_s30 + $0x14] sm:$0xf] %vm1410_vm1, %v1678_v23  ;;  %1448 = vst.msk [vmem:[%s2022_s30 + $0x94] sm:$0xf] %vm1410_vm1, %v1710_v24  ;;  %v1100_v31 = vsel %vm972_vm3, %v908_v12, %v1036_v25  ;;  %v870_v34 = vmul.f32 %v1815_v56, %v2000_v33  ;;  %v836_v36 = vmul.f32 %v2000_v33, %v600_v60  ;;  %v2099_v37 = vpop.f32.mrf.mxu1 }
  0xf0   : > { %v1683_v38 = vpack.c.bf16 %v1100_v31, %v1100_v31  ;;  %v1132_v39 = vsel %vm1004_vm4, %v940_v15, %v1068_v27  ;;  %vm1002_vm6 = vcmp.gt.f32.partialorder %v938_v29, 0.0  ;;  %v2102_v41 = vpop.f32.mrf.mxu0  ;;  %v1066_v44 = vmul.f32 0.01, %v938_v29 }
  0xf1   : > { %v1098_v40 = vsel %vm970_vm5, %v906_v16, %v1034_v28  ;;  %v1715_v42 = vpack.c.bf16 %v1132_v39, %v1132_v39  ;;  %v909_v45 = vadd.f32 %v2005_v35, %v838_v32  ;;  %v2105_v46 = vpop.f32.mrf.mxu1  ;;  %v941_v47 = vadd.f32 %v2005_v35, %v870_v34 }
  0xf2   : > { %v1681_v43 = vpack.c.bf16 %v1098_v40, %v1098_v40  ;;  %1421 = vst.msk [vmem:[%s2022_s30 + $0x28] sm:$0xf] %vm1410_vm1, %v1683_v38  ;;  %v907_v48 = vadd.f32 %v2005_v35, %v836_v36  ;;  %v868_v49 = vmul.f32 %v2000_v33, %v728_v1  ;;  %v841_v50 = vmul.f32 %v1786_v6, %v2000_v33  ;;  %v2113_v51 = vpop.f32.mrf.mxu0 }
  0xf3   : > { %1453 = vst.msk [vmem:[%s2022_s30 + $0xa8] sm:$0xf] %vm1410_vm1, %v1715_v42  ;;  %v1130_v52 = vsel %vm1002_vm6, %v938_v29, %v1066_v44  ;;  %vm973_vm7 = vcmp.gt.f32.partialorder %v909_v45, 0.0  ;;  %v1037_v53 = vmul.f32 0.01, %v909_v45  ;;  %v873_v54 = vmul.f32 %v1818_v9, %v2000_v33  ;;  %v2120_v55 = vpop.f32.mrf.mxu1 }
  0xf4   : > { %1419 = vst.msk [vmem:[%s2022_s30 + $0x20] sm:$0xf] %vm1410_vm1, %v1681_v43  ;;  %v1713_v56 = vpack.c.bf16 %v1130_v52, %v1130_v52  ;;  %vm1005_vm8 = vcmp.gt.f32.partialorder %v941_v47, 0.0  ;;  %v1069_v57 = vmul.f32 0.01, %v941_v47  ;;  %vm971_vm9 = vcmp.gt.f32.partialorder %v907_v48, 0.0  ;;  %v2122_v58 = vpop.f32.mrf.mxu0 }
  0xf5   : > { %v1101_v59 = vsel %vm973_vm7, %v909_v45, %v1037_v53  ;;  %v1035_v60 = vmul.f32 0.01, %v907_v48  ;;  %v939_v61 = vadd.f32 %v2005_v35, %v868_v49  ;;  %v912_v62 = vadd.f32 %v2005_v35, %v841_v50  ;;  %v2131_v6 = vpop.f32.mrf.mxu1 }
  0xf6   : > { %1451 = vst.msk [vmem:[%s2022_s30 + $0xa0] sm:$0xf] %vm1410_vm1, %v1713_v56  ;;  %v1684_v63 = vpack.c.bf16 %v1101_v59, %v1101_v59  ;;  %v1133_v0 = vsel %vm1005_vm8, %v941_v47, %v1069_v57  ;;  %v944_v1 = vadd.f32 %v2005_v35, %v873_v54  ;;  %v839_v2 = vmul.f32 %v2000_v33, %v2074_v13  ;;  %v2135_v9 = vpop.f32.mrf.mxu0 }
  0xf7   : > { %v1716_v3 = vpack.c.bf16 %v1133_v0, %v1133_v0  ;;  %v1099_v4 = vsel %vm971_vm9, %v907_v48, %v1035_v60  ;;  %vm1003_vm10 = vcmp.gt.f32.partialorder %v939_v61, 0.0  ;;  %v1067_v5 = vmul.f32 0.01, %v939_v61  ;;  %v2148_v23 = vpop.f32.mrf.mxu1 }
  0xf8   : > { %1422 = vst.msk [vmem:[%s2022_s30 + $0x2c] sm:$0xf] %vm1410_vm1, %v1684_v63  ;;  %v1682_v7 = vpack.c.bf16 %v1099_v4, %v1099_v4  ;;  %vm976_vm11 = vcmp.gt.f32.partialorder %v912_v62, 0.0  ;;  %v1040_v8 = vmul.f32 0.01, %v912_v62  ;;  %vm1008_vm12 = vcmp.gt.f32.partialorder %v944_v1, 0.0 }
  0xf9   : > { %1454 = vst.msk [vmem:[%s2022_s30 + $0xac] sm:$0xf] %vm1410_vm1, %v1716_v3  ;;  %v1131_v10 = vsel %vm1003_vm10, %v939_v61, %v1067_v5  ;;  %v1072_v11 = vmul.f32 0.01, %v944_v1  ;;  %v910_v12 = vadd.f32 %v2005_v35, %v839_v2  ;;  %v871_v13 = vmul.f32 %v2000_v33, %v2081_v18  ;;  %v2168_v40 = vpop.f32.mrf.mxu1 }
  0xfa   : > { %1420 = vst.msk [vmem:[%s2022_s30 + $0x24] sm:$0xf] %vm1410_vm1, %v1682_v7  ;;  %v1714_v14 = vpack.c.bf16 %v1131_v10, %v1131_v10  ;;  %v1104_v15 = vsel %vm976_vm11, %v912_v62, %v1040_v8  ;;  %v842_v16 = vmul.f32 %v2083_v22, %v2000_v33  ;;  %v874_v17 = vmul.f32 %v2085_v26, %v2000_v33  ;;  %v2155_v22 = vpop.f32.mrf.mxu0 }
  0xfb   : > { %v1687_v19 = vpack.c.bf16 %v1104_v15, %v1104_v15  ;;  %v1136_v20 = vsel %vm1008_vm12, %v944_v1, %v1072_v11  ;;  %vm974_vm13 = vcmp.gt.f32.partialorder %v910_v12, 0.0  ;;  %v1038_v21 = vmul.f32 0.01, %v910_v12 }
  0xfc   : > { %1452 = vst.msk [vmem:[%s2022_s30 + $0xa4] sm:$0xf] %vm1410_vm1, %v1714_v14  ;;  %v1719_v18 = vpack.c.bf16 %v1136_v20, %v1136_v20  ;;  %v942_v24 = vadd.f32 %v2005_v35, %v871_v13  ;;  %v913_v25 = vadd.f32 %v2005_v35, %v842_v16  ;;  %v945_v27 = vadd.f32 %v2005_v35, %v874_v17  ;;  %v2176_v43 = vpop.f32.mrf.mxu0 }
  0xfd   : > { %1425 = vst.msk [vmem:[%s2022_s30 + $0x38] sm:$0xf] %vm1410_vm1, %v1687_v19  ;;  %v1102_v26 = vsel %vm974_vm13, %v910_v12, %v1038_v21  ;;  %v840_v28 = vmul.f32 %v2000_v33, %v2090_v30  ;;  %v872_v29 = vmul.f32 %v2000_v33, %v2099_v37  ;;  %v845_v31 = vmul.f32 %v2102_v41, %v2000_v33 }
  0xfe   : > { %1457 = vst.msk [vmem:[%s2022_s30 + $0xb8] sm:$0xf] %vm1410_vm1, %v1719_v18  ;;  %v1685_v32 = vpack.c.bf16 %v1102_v26, %v1102_v26  ;;  %vm1006_vm14 = vcmp.gt.f32.partialorder %v942_v24, 0.0  ;;  %v1070_v34 = vmul.f32 0.01, %v942_v24  ;;  %vm977_vm15 = vcmp.gt.f32.partialorder %v913_v25, 0.0  ;;  %v2191_v61 = vpop.f32.mrf.mxu0 }
  0xff   : > { %v1041_v36 = vmul.f32 0.01, %v913_v25  ;;  %vm1009_vm0 = vcmp.gt.f32.partialorder %v945_v27, 0.0  ;;  %v1073_v38 = vmul.f32 0.01, %v945_v27  ;;  %v911_v39 = vadd.f32 %v2005_v35, %v840_v28 }
 0x100   : > { %1423 = vst.msk [vmem:[%s2022_s30 + $0x30] sm:$0xf] %vm1410_vm1, %v1685_v32  ;;  %v1134_v30 = vsel %vm1006_vm14, %v942_v24, %v1070_v34  ;;  %v943_v37 = vadd.f32 %v2005_v35, %v872_v29  ;;  %v916_v41 = vadd.f32 %v2005_v35, %v845_v31  ;;  %v877_v42 = vmul.f32 %v2105_v46, %v2000_v33  ;;  %v773_v46 = vpop.f32.mrf.mxu1  ;;  %v648_v12 = vpop.f32.mrf.mxu0 }
 0x101   : > { %v1717_v44 = vpack.c.bf16 %v1134_v30, %v1134_v30  ;;  %v1105_v45 = vsel %vm977_vm15, %v913_v25, %v1041_v36  ;;  %v1137_v47 = vsel %vm1009_vm0, %v945_v27, %v1073_v38  ;;  %vm975_vm2 = vcmp.gt.f32.partialorder %v911_v39, 0.0 }
 0x102   : > { %v1688_v48 = vpack.c.bf16 %v1105_v45, %v1105_v45  ;;  %v1720_v49 = vpack.c.bf16 %v1137_v47, %v1137_v47  ;;  %v1039_v50 = vmul.f32 0.01, %v911_v39  ;;  %vm1007_vm3 = vcmp.gt.f32.partialorder %v943_v37, 0.0  ;;  %v1827_v7 = vpop.f32.mrf.mxu1  ;;  %v2215_v27 = vpop.f32.mrf.mxu0 }
 0x103   : > { %1455 = vst.msk [vmem:[%s2022_s30 + $0xb0] sm:$0xf] %vm1410_vm1, %v1717_v44  ;;  %v1071_v52 = vmul.f32 0.01, %v943_v37  ;;  %vm980_vm4 = vcmp.gt.f32.partialorder %v916_v41, 0.0  ;;  %v948_v54 = vadd.f32 %v2005_v35, %v877_v42  ;;  %v843_v57 = vmul.f32 %v2000_v33, %v2113_v51 }
 0x104   : > { %v1044_v53 = vmul.f32 0.01, %v916_v41  ;;  %1426 = vst.msk [vmem:[%s2022_s30 + $0x3c] sm:$0xf] %vm1410_vm1, %v1688_v48  ;;  %1458 = vst.msk [vmem:[%s2022_s30 + $0xbc] sm:$0xf] %vm1410_vm1, %v1720_v49  ;;  %v1103_v56 = vsel %vm975_vm2, %v911_v39, %v1039_v50  ;;  %v875_v59 = vmul.f32 %v2000_v33, %v2120_v55  ;;  %v846_v60 = vmul.f32 %v2122_v58, %v2000_v33  ;;  %v661_v44 = vpop.f32.mrf.mxu0 }
 0x105   : > { %v1686_v62 = vpack.c.bf16 %v1103_v56, %v1103_v56  ;;  %v1135_v63 = vsel %vm1007_vm3, %v943_v37, %v1071_v52  ;;  %vm1012_vm5 = vcmp.gt.f32.partialorder %v948_v54, 0.0  ;;  %v1076_v3 = vmul.f32 0.01, %v948_v54 }
 0x106   : > { %v1108_v0 = vsel %vm980_vm4, %v916_v41, %v1044_v53  ;;  %v1718_v1 = vpack.c.bf16 %v1135_v63, %v1135_v63  ;;  %v914_v4 = vadd.f32 %v2005_v35, %v843_v57  ;;  %v946_v51 = vadd.f32 %v2005_v35, %v875_v59 }
 0x107   : > { %v1691_v2 = vpack.c.bf16 %v1108_v0, %v1108_v0  ;;  %1424 = vst.msk [vmem:[%s2022_s30 + $0x34] sm:$0xf] %vm1410_vm1, %v1686_v62  ;;  %v917_v55 = vadd.f32 %v2005_v35, %v846_v60  ;;  %v878_v58 = vmul.f32 %v2131_v6, %v2000_v33  ;;  %v844_v5 = vmul.f32 %v2000_v33, %v2135_v9  ;;  %v1799_v60 = vpop.f32.mrf.mxu0 }
 0x108   : > { %1456 = vst.msk [vmem:[%s2022_s30 + $0xb4] sm:$0xf] %vm1410_vm1, %v1718_v1  ;;  %v1140_v8 = vsel %vm1012_vm5, %v948_v54, %v1076_v3  ;;  %vm978_vm6 = vcmp.gt.f32.partialorder %v914_v4, 0.0  ;;  %v1042_v10 = vmul.f32 0.01, %v914_v4  ;;  %v876_v11 = vmul.f32 %v2000_v33, %v2148_v23  ;;  %v776_v23 = vpop.f32.mrf.mxu1 }
 0x109   : > { %1429 = vst.msk [vmem:[%s2022_s30 + $0x48] sm:$0xf] %vm1410_vm1, %v1691_v2  ;;  %v1723_v13 = vpack.c.bf16 %v1140_v8, %v1140_v8  ;;  %vm1010_vm7 = vcmp.gt.f32.partialorder %v946_v51, 0.0  ;;  %v1074_v14 = vmul.f32 0.01, %v946_v51  ;;  %vm981_vm8 = vcmp.gt.f32.partialorder %v917_v55, 0.0 }
 0x10a   : > { %v1106_v6 = vsel %vm978_vm6, %v914_v4, %v1042_v10  ;;  %v1045_v9 = vmul.f32 0.01, %v917_v55  ;;  %v949_v15 = vadd.f32 %v2005_v35, %v878_v58  ;;  %v915_v16 = vadd.f32 %v2005_v35, %v844_v5  ;;  %v1830_v30 = vpop.f32.mrf.mxu1  ;;  %v664_v10 = vpop.f32.mrf.mxu0 }
 0x10b   : > { %1461 = vst.msk [vmem:[%s2022_s30 + $0xc8] sm:$0xf] %vm1410_vm1, %v1723_v13  ;;  %v1689_v17 = vpack.c.bf16 %v1106_v6, %v1106_v6  ;;  %v1138_v19 = vsel %vm1010_vm7, %v946_v51, %v1074_v14  ;;  %v947_v20 = vadd.f32 %v2005_v35, %v876_v11  ;;  %v849_v21 = vmul.f32 %v2155_v22, %v2000_v33 }
 0x10c   : > { %v1721_v18 = vpack.c.bf16 %v1138_v19, %v1138_v19  ;;  %v1109_v24 = vsel %vm981_vm8, %v917_v55, %v1045_v9  ;;  %vm1013_vm9 = vcmp.gt.f32.partialorder %v949_v15, 0.0  ;;  %v1077_v25 = vmul.f32 0.01, %v949_v15 }
 0x10d   : > { %1427 = vst.msk [vmem:[%s2022_s30 + $0x40] sm:$0xf] %vm1410_vm1, %v1689_v17  ;;  %v1692_v26 = vpack.c.bf16 %v1109_v24, %v1109_v24  ;;  %vm979_vm10 = vcmp.gt.f32.partialorder %v915_v16, 0.0  ;;  %v1043_v28 = vmul.f32 0.01, %v915_v16  ;;  %vm1011_vm11 = vcmp.gt.f32.partialorder %v947_v20, 0.0 }
 0x10e   : > { %1459 = vst.msk [vmem:[%s2022_s30 + $0xc0] sm:$0xf] %vm1410_vm1, %v1721_v18  ;;  %v1141_v29 = vsel %vm1013_vm9, %v949_v15, %v1077_v25  ;;  %v1075_v31 = vmul.f32 0.01, %v947_v20  ;;  %v920_v22 = vadd.f32 %v2005_v35, %v849_v21  ;;  %v881_v32 = vmul.f32 %v2168_v40, %v2000_v33 }
 0x10f   : > { %1430 = vst.msk [vmem:[%s2022_s30 + $0x4c] sm:$0xf] %vm1410_vm1, %v1692_v26  ;;  %v1724_v34 = vpack.c.bf16 %v1141_v29, %v1141_v29  ;;  %v1107_v36 = vsel %vm979_vm10, %v915_v16, %v1043_v28  ;;  %v847_v38 = vmul.f32 %v2000_v33, %v2176_v43  ;;  %v879_v39 = vmul.f32 %v2000_v33, %v773_v46  ;;  %v789_v46 = vpop.f32.mrf.mxu1 }
 0x110   : > { %v1690_v37 = vpack.c.bf16 %v1107_v36, %v1107_v36  ;;  %v1139_v41 = vsel %vm1011_vm11, %v947_v20, %v1075_v31  ;;  %vm984_vm12 = vcmp.gt.f32.partialorder %v920_v22, 0.0  ;;  %v1048_v42 = vmul.f32 0.01, %v920_v22 }
 0x111   : > { %1462 = vst.msk [vmem:[%s2022_s30 + $0xcc] sm:$0xf] %vm1410_vm1, %v1724_v34  ;;  %v1722_v40 = vpack.c.bf16 %v1139_v41, %v1139_v41  ;;  %v952_v45 = vadd.f32 %v2005_v35, %v881_v32  ;;  %v918_v47 = vadd.f32 %v2005_v35, %v847_v38  ;;  %v950_v48 = vadd.f32 %v2005_v35, %v879_v39  ;;  %v1831_v58 = vpop.f32.mrf.mxu1 }
 0x112   : > { %1428 = vst.msk [vmem:[%s2022_s30 + $0x44] sm:$0xf] %vm1410_vm1, %v1690_v37  ;;  %v1112_v43 = vsel %vm984_vm12, %v920_v22, %v1048_v42  ;;  %v850_v49 = vmul.f32 %v2191_v61, %v2000_v33  ;;  %v882_v50 = vmul.f32 %v1827_v7, %v2000_v33  ;;  %v848_v52 = vmul.f32 %v2000_v33, %v648_v12 }
 0x113   : > { %1460 = vst.msk [vmem:[%s2022_s30 + $0xc4] sm:$0xf] %vm1410_vm1, %v1722_v40  ;;  %v1695_v53 = vpack.c.bf16 %v1112_v43, %v1112_v43  ;;  %vm1016_vm13 = vcmp.gt.f32.partialorder %v952_v45, 0.0  ;;  %v1080_v54 = vmul.f32 0.01, %v952_v45  ;;  %vm982_vm14 = vcmp.gt.f32.partialorder %v918_v47, 0.0  ;;  %v792_v21 = vpop.f32.mrf.mxu1 }
 0x114   : > { %v1046_v56 = vmul.f32 0.01, %v918_v47  ;;  %vm1014_vm15 = vcmp.gt.f32.partialorder %v950_v48, 0.0  ;;  %v1078_v57 = vmul.f32 0.01, %v950_v48  ;;  %v921_v59 = vadd.f32 %v2005_v35, %v850_v49 }
 0x115   : > { %1433 = vst.msk [vmem:[%s2022_s30 + $0x58] sm:$0xf] %vm1410_vm1, %v1695_v53  ;;  %v1144_v61 = vsel %vm1016_vm13, %v952_v45, %v1080_v54  ;;  %v953_v62 = vadd.f32 %v2005_v35, %v882_v50  ;;  %v919_v63 = vadd.f32 %v2005_v35, %v848_v52  ;;  %v880_v0 = vmul.f32 %v2000_v33, %v776_v23  ;;  %v1834_v39 = vpop.f32.mrf.mxu1 }
 0x116   : > { %v1727_v1 = vpack.c.bf16 %v1144_v61, %v1144_v61  ;;  %v1110_v2 = vsel %vm982_vm14, %v918_v47, %v1046_v56  ;;  %v1142_v3 = vsel %vm1014_vm15, %v950_v48, %v1078_v57  ;;  %vm985_vm0 = vcmp.gt.f32.partialorder %v921_v59, 0.0 }
 0x117   : > { %v1693_v4 = vpack.c.bf16 %v1110_v2, %v1110_v2  ;;  %v1725_v51 = vpack.c.bf16 %v1142_v3, %v1142_v3  ;;  %v1049_v55 = vmul.f32 0.01, %v921_v59  ;;  %vm1017_vm2 = vcmp.gt.f32.partialorder %v953_v62, 0.0  ;;  %v805_v54 = vpop.f32.mrf.mxu1 }
 0x118   : > { %1465 = vst.msk [vmem:[%s2022_s30 + $0xd8] sm:$0xf] %vm1410_vm1, %v1727_v1  ;;  %v1081_v5 = vmul.f32 0.01, %v953_v62  ;;  %vm983_vm3 = vcmp.gt.f32.partialorder %v919_v63, 0.0  ;;  %v951_v8 = vadd.f32 %v2005_v35, %v880_v0  ;;  %v853_v12 = vmul.f32 %v2215_v27, %v2000_v33  ;;  %v1802_v27 = vpop.f32.mrf.mxu0 }
 0x119   : > { %v1047_v7 = vmul.f32 0.01, %v919_v63  ;;  %1431 = vst.msk [vmem:[%s2022_s30 + $0x50] sm:$0xf] %vm1410_vm1, %v1693_v4  ;;  %1463 = vst.msk [vmem:[%s2022_s30 + $0xd0] sm:$0xf] %vm1410_vm1, %v1725_v51  ;;  %v1113_v11 = vsel %vm985_vm0, %v921_v59, %v1049_v55  ;;  %v885_v13 = vmul.f32 %v1830_v30, %v2000_v33  ;;  %v851_v14 = vmul.f32 %v2000_v33, %v661_v44 }
 0x11a   : > { %v1696_v6 = vpack.c.bf16 %v1113_v11, %v1113_v11  ;;  %v1145_v9 = vsel %vm1017_vm2, %v953_v62, %v1081_v5  ;;  %vm1015_vm4 = vcmp.gt.f32.partialorder %v951_v8, 0.0  ;;  %v1079_v19 = vmul.f32 0.01, %v951_v8  ;;  %v677_v44 = vpop.f32.mrf.mxu0  ;;  %v1835_v5 = vpop.f32.mrf.mxu1 }
 0x11b   : > { %v1111_v15 = vsel %vm983_vm3, %v919_v63, %v1047_v7  ;;  %v1728_v16 = vpack.c.bf16 %v1145_v9, %v1145_v9  ;;  %v924_v20 = vadd.f32 %v2005_v35, %v853_v12  ;;  %v956_v23 = vadd.f32 %v2005_v35, %v885_v13 }
 0x11c   : > { %v1694_v17 = vpack.c.bf16 %v1111_v15, %v1111_v15  ;;  %1434 = vst.msk [vmem:[%s2022_s30 + $0x5c] sm:$0xf] %vm1410_vm1, %v1696_v6  ;;  %v922_v18 = vadd.f32 %v2005_v35, %v851_v14  ;;  %v883_v24 = vmul.f32 %v2000_v33, %v789_v46  ;;  %v854_v25 = vmul.f32 %v1799_v60, %v2000_v33  ;;  %v1803_v60 = vpop.f32.mrf.mxu0 }
 0x11d   : > { %1466 = vst.msk [vmem:[%s2022_s30 + $0xdc] sm:$0xf] %vm1410_vm1, %v1728_v16  ;;  %v1143_v26 = vsel %vm1015_vm4, %v951_v8, %v1079_v19  ;;  %vm988_vm5 = vcmp.gt.f32.partialorder %v924_v20, 0.0  ;;  %v1052_v28 = vmul.f32 0.01, %v924_v20  ;;  %v886_v29 = vmul.f32 %v1831_v58, %v2000_v33 }
 0x11e   : > { %1432 = vst.msk [vmem:[%s2022_s30 + $0x54] sm:$0xf] %vm1410_vm1, %v1694_v17  ;;  %v1726_v31 = vpack.c.bf16 %v1143_v26, %v1143_v26  ;;  %vm1020_vm6 = vcmp.gt.f32.partialorder %v956_v23, 0.0  ;;  %v1084_v22 = vmul.f32 0.01, %v956_v23  ;;  %vm986_vm7 = vcmp.gt.f32.partialorder %v922_v18, 0.0  ;;  %v680_v19 = vpop.f32.mrf.mxu0 }
 0x11f   : > { %v1116_v32 = vsel %vm988_vm5, %v924_v20, %v1052_v28  ;;  %v1050_v34 = vmul.f32 0.01, %v922_v18  ;;  %v954_v36 = vadd.f32 %v2005_v35, %v883_v24  ;;  %v925_v38 = vadd.f32 %v2005_v35, %v854_v25  ;;  %v808_v20 = vpop.f32.mrf.mxu1 }
 0x120   : > { %1464 = vst.msk [vmem:[%s2022_s30 + $0xd4] sm:$0xf] %vm1410_vm1, %v1726_v31  ;;  %v1699_v30 = vpack.c.bf16 %v1116_v32, %v1116_v32  ;;  %v1148_v37 = vsel %vm1020_vm6, %v956_v23, %v1084_v22  ;;  %v957_v41 = vadd.f32 %v2005_v35, %v886_v29  ;;  %v852_v42 = vmul.f32 %v2000_v33, %v664_v10 }
 0x121   : > { %v1731_v40 = vpack.c.bf16 %v1148_v37, %v1148_v37  ;;  %v1114_v45 = vsel %vm986_vm7, %v922_v18, %v1050_v34  ;;  %vm1018_vm8 = vcmp.gt.f32.partialorder %v954_v36, 0.0  ;;  %v1082_v47 = vmul.f32 0.01, %v954_v36 }
 0x122   : > { %1437 = vst.msk [vmem:[%s2022_s30 + $0x68] sm:$0xf] %vm1410_vm1, %v1699_v30  ;;  %v1697_v48 = vpack.c.bf16 %v1114_v45, %v1114_v45  ;;  %vm989_vm9 = vcmp.gt.f32.partialorder %v925_v38, 0.0  ;;  %v1053_v43 = vmul.f32 0.01, %v925_v38  ;;  %vm1021_vm10 = vcmp.gt.f32.partialorder %v957_v41, 0.0 }
 0x123   : > { %1469 = vst.msk [vmem:[%s2022_s30 + $0xe8] sm:$0xf] %vm1410_vm1, %v1731_v40  ;;  %v1146_v49 = vsel %vm1018_vm8, %v954_v36, %v1082_v47  ;;  %v1085_v50 = vmul.f32 0.01, %v957_v41  ;;  %v923_v52 = vadd.f32 %v2005_v35, %v852_v42  ;;  %v884_v53 = vmul.f32 %v2000_v33, %v792_v21 }
 0x124   : > { %1435 = vst.msk [vmem:[%s2022_s30 + $0x60] sm:$0xf] %vm1410_vm1, %v1697_v48  ;;  %v1729_v46 = vpack.c.bf16 %v1146_v49, %v1146_v49  ;;  %v1117_v56 = vsel %vm989_vm9, %v925_v38, %v1053_v43  ;;  %v857_v57 = vmul.f32 %v1802_v27, %v2000_v33  ;;  %v889_v59 = vmul.f32 %v1834_v39, %v2000_v33 }
 0x125   : > { %v1700_v61 = vpack.c.bf16 %v1117_v56, %v1117_v56  ;;  %v1149_v62 = vsel %vm1021_vm10, %v957_v41, %v1085_v50  ;;  %vm987_vm11 = vcmp.gt.f32.partialorder %v923_v52, 0.0  ;;  %v1051_v63 = vmul.f32 0.01, %v923_v52 }
 0x126   : > { %1467 = vst.msk [vmem:[%s2022_s30 + $0xe0] sm:$0xf] %vm1410_vm1, %v1729_v46  ;;  %v1732_v0 = vpack.c.bf16 %v1149_v62, %v1149_v62  ;;  %v955_v1 = vadd.f32 %v2005_v35, %v884_v53  ;;  %v928_v2 = vadd.f32 %v2005_v35, %v857_v57  ;;  %v960_v3 = vadd.f32 %v2005_v35, %v889_v59 }
 0x127   : > { %1438 = vst.msk [vmem:[%s2022_s30 + $0x6c] sm:$0xf] %vm1410_vm1, %v1700_v61  ;;  %v1115_v4 = vsel %vm987_vm11, %v923_v52, %v1051_v63  ;;  %v855_v51 = vmul.f32 %v2000_v33, %v677_v44  ;;  %v887_v55 = vmul.f32 %v2000_v33, %v805_v54  ;;  %v858_v58 = vmul.f32 %v1803_v60, %v2000_v33 }
 0x128   : > { %1470 = vst.msk [vmem:[%s2022_s30 + $0xec] sm:$0xf] %vm1410_vm1, %v1732_v0  ;;  %v1698_v7 = vpack.c.bf16 %v1115_v4, %v1115_v4  ;;  %vm1019_vm12 = vcmp.gt.f32.partialorder %v955_v1, 0.0  ;;  %v1083_v8 = vmul.f32 0.01, %v955_v1  ;;  %vm992_vm13 = vcmp.gt.f32.partialorder %v928_v2, 0.0 }
 0x129   : > { %v1056_v10 = vmul.f32 0.01, %v928_v2  ;;  %vm1024_vm14 = vcmp.gt.f32.partialorder %v960_v3, 0.0  ;;  %v1088_v11 = vmul.f32 0.01, %v960_v3  ;;  %v926_v12 = vadd.f32 %v2005_v35, %v855_v51 }
 0x12a   : > { %1436 = vst.msk [vmem:[%s2022_s30 + $0x64] sm:$0xf] %vm1410_vm1, %v1698_v7  ;;  %v1147_v13 = vsel %vm1019_vm12, %v955_v1, %v1083_v8  ;;  %v958_v14 = vadd.f32 %v2005_v35, %v887_v55  ;;  %v929_v6 = vadd.f32 %v2005_v35, %v858_v58  ;;  %v890_v9 = vmul.f32 %v1835_v5, %v2000_v33 }
 0x12b   : > { %v1730_v15 = vpack.c.bf16 %v1147_v13, %v1147_v13  ;;  %v1120_v16 = vsel %vm992_vm13, %v928_v2, %v1056_v10  ;;  %v1152_v17 = vsel %vm1024_vm14, %v960_v3, %v1088_v11  ;;  %vm990_vm15 = vcmp.gt.f32.partialorder %v926_v12, 0.0 }
 0x12c   : > { %v1703_v21 = vpack.c.bf16 %v1120_v16, %v1120_v16  ;;  %v1735_v23 = vpack.c.bf16 %v1152_v17, %v1152_v17  ;;  %v1054_v18 = vmul.f32 0.01, %v926_v12  ;;  %vm1022_vm0 = vcmp.gt.f32.partialorder %v958_v14, 0.0 }
 0x12d   : > { %1468 = vst.msk [vmem:[%s2022_s30 + $0xe4] sm:$0xf] %vm1410_vm1, %v1730_v15  ;;  %v1086_v24 = vmul.f32 0.01, %v958_v14  ;;  %vm993_vm2 = vcmp.gt.f32.partialorder %v929_v6, 0.0  ;;  %v961_v27 = vadd.f32 %v2005_v35, %v890_v9  ;;  %v856_v28 = vmul.f32 %v2000_v33, %v680_v19 }
 0x12e   : > { %v1057_v25 = vmul.f32 0.01, %v929_v6  ;;  %1441 = vst.msk [vmem:[%s2022_s30 + $0x78] sm:$0xf] %vm1410_vm1, %v1703_v21  ;;  %1473 = vst.msk [vmem:[%s2022_s30 + $0xf8] sm:$0xf] %vm1410_vm1, %v1735_v23  ;;  %v1118_v26 = vsel %vm990_vm15, %v926_v12, %v1054_v18  ;;  %v888_v29 = vmul.f32 %v2000_v33, %v808_v20 }
 0x12f   : > { %v1701_v31 = vpack.c.bf16 %v1118_v26, %v1118_v26  ;;  %v1150_v22 = vsel %vm1022_vm0, %v958_v14, %v1086_v24  ;;  %vm1025_vm3 = vcmp.gt.f32.partialorder %v961_v27, 0.0  ;;  %v1089_v38 = vmul.f32 0.01, %v961_v27 }
 0x130   : > { %v1121_v32 = vsel %vm993_vm2, %v929_v6, %v1057_v25  ;;  %v1733_v34 = vpack.c.bf16 %v1150_v22, %v1150_v22  ;;  %v927_v39 = vadd.f32 %v2005_v35, %v856_v28  ;;  %v959_v30 = vadd.f32 %v2005_v35, %v888_v29 }
 0x131   : > { %v1704_v36 = vpack.c.bf16 %v1121_v32, %v1121_v32  ;;  %1439 = vst.msk [vmem:[%s2022_s30 + $0x70] sm:$0xf] %vm1410_vm1, %v1701_v31  ;;  %v1153_v33 = vsel %vm1025_vm3, %v961_v27, %v1089_v38 }
 0x132   : > { %1471 = vst.msk [vmem:[%s2022_s30 + $0xf0] sm:$0xf] %vm1410_vm1, %v1733_v34  ;;  %vm991_vm4 = vcmp.gt.f32.partialorder %v927_v39, 0.0  ;;  %v1055_v37 = vmul.f32 0.01, %v927_v39  ;;  %v1736_v41 = vpack.c.bf16 %v1153_v33, %v1153_v33  ;;  %vm1023_vm5 = vcmp.gt.f32.partialorder %v959_v30, 0.0 }
 0x133   : > { %1442 = vst.msk [vmem:[%s2022_s30 + $0x7c] sm:$0xf] %vm1410_vm1, %v1704_v36  ;;  %v1087_v42 = vmul.f32 0.01, %v959_v30 }
 0x134   : > { %v1119_v44 = vsel %vm991_vm4, %v927_v39, %v1055_v37  ;;  %1474 = vst.msk [vmem:[%s2022_s30 + $0xfc] sm:$0xf] %vm1410_vm1, %v1736_v41 }
 0x135   : > { %v1702_v40 = vpack.c.bf16 %v1119_v44, %v1119_v44  ;;  %v1151_v45 = vsel %vm1023_vm5, %v959_v30, %v1087_v42 }
 0x136   : > { %v1734_v47 = vpack.c.bf16 %v1151_v45, %v1151_v45 }
 0x137   : > { %1440 = vst.msk [vmem:[%s2022_s30 + $0x74] sm:$0xf] %vm1410_vm1, %v1702_v40 }
 0x138   : > { %1472 = vst.msk [vmem:[%s2022_s30 + $0xf4] sm:$0xf] %vm1410_vm1, %v1734_v47 }
 0x139 PF: > { %s14_s15 = sadd.s32 1, %s1885_s15  }
 0x13a   : > { %p11_p4 = scmp.ge.s32.totalorder %s14_s15, 4  }
 0x13c   :  { %13 = sbr.rel (!%p11_p4) target bundleno = 1 (0x1), region = 66 }

// kernel: hourglass_att_forward.49
= control target key start
LH: loop header
LB: loop body
LE: loop exit
PB: predicated region body
PF: predicated region fallthrough
CT: control target
= control target key end

     0   :  { %s1782_s15 = smov 0   ;;  %s2155_s0 = inlined_call_operand.vmem [shape: bf16[1024,72], index: 0, kind: input, shape index: {}]   ;;  %s2156_s1 = inlined_call_operand.vmem [shape: bf16[72,4], index: 1, kind: input, shape index: {}]   ;;  %s2157_s2 = inlined_call_operand.vmem [shape: f32[1,4], index: 2, kind: input, shape index: {}]   ;;  %s2158_s3 = inlined_call_operand.vmem [shape: f32[1,4], index: 3, kind: input, shape index: {}]   ;;  %s2159_s4 = inlined_call_operand.vmem [shape: bf16[1024,4], index: 4, kind: output, shape index: {}]  }
   0x1 LB: > { %s1371_s16 = sadd.s32 4294967295, %s1755_s15   ;;  %p1375_p0 = scmp.ge.s32.totalorder %s1755_s15, 1  ;;  %s1755_s15 = sphi %s1782_s15, %s14_s15  }
   0x2   : > { %p163_p1 = scmp.lt.s32.totalorder %s1755_s15, 3 }
   0x4   : > { %p164_p2 = pnand %p1375_p0, %p163_p1 }
   0x5   : > { %s1376_s21 = sshll.u32 (!%p164_p2), %s1371_s16, 6 }
   0x6   : > { %167 = sbr.rel (%p164_p2) target bundleno = 294 (0x126), region = 36  ;;  %p190_p3 = scmp.lt.s32.totalorder (!%p164_p2), %s1376_s21, 127 }
   0xb   : > { %v1712_v0 = vld [vmem:[%s2156_s1 + $0x20] ss:$0 sps:$4 sm:$0xff]   ;;  %vm559_vm0 = vcmask 1043456   ;;  %v1713_v1 = vld [vmem:[%s2156_s1 + $0x18] sm:$0xff]   ;;  %v1714_v3 = vld [vmem:[%s2156_s1 + $0x10] sm:$0xff]   ;;  %s2161_s21 = smov (!%p190_p3, %s1376_s21), 127 }
   0xc   : > { %1702 = vmatprep.subr.msk.bf16.mxu0 %vm559_vm0, %v1712_v0  ;;  %1703 = vmatprep.subr.msk.bf16.mxu1 %vm559_vm0, %v1712_v0  ;;  %v561_v2 = vsel %vm559_vm0, %v1712_v0, 0  ;;  %v1715_v4 = vld [vmem:[%s2156_s1 + $0x8] sm:$0xff]   ;;  %s1377_s26 = sshll.u32 %s2161_s21, 2  ;;  %vm462_vm1 = vcmask 588800   ;;  %v1716_v7 = vld [vmem:[%s2156_s1] sm:$0xff]   ;;  %vm1250_vm2 = vcmask 27648  }
   0xd   : > { %1619 = vmatpush3.bf16.msra.mxu0 %v561_v2  ;;  %1697 = vmatpush3.bf16.msra.mxu1 %v561_v2  ;;  %s1810_s29 = scalar_lea.vmem %s2155_s0, %s1377_s26  ;;  %v1882_v38 = vld [vmem:[%s2157_s2] ss:$0 sm:$0xff]  ;;  %s1900_s12 = scalar_lea.vmem %s2159_s4, %s1377_s26 }
   0xe   : > { %1620 = vmatprep.subr.bf16.mxu0 %v1713_v1  ;;  %1693 = vmatprep.subr.bf16.mxu1 %v1713_v1  ;;  %v1717_v5 = vld [vmem:[%s1810_s29] sm:$0xff]   ;;  %v1719_v8 = vld [vmem:[%s1810_s29 + $0x8] sm:$0xff]   ;;  %v1721_v10 = vld [vmem:[%s1810_s29 + $0x10] sm:$0xff]  }
   0xf   : > { %v1718_v6 = vld [vmem:[%s1810_s29 + $0x80] sm:$0xff]   ;;  %1628 = vmatprep.mubr.msk.bf16.mxu0 %vm462_vm1, %v1717_v5  ;;  %v1720_v9 = vld [vmem:[%s1810_s29 + $0x88] sm:$0xff]   ;;  %v1722_v11 = vld [vmem:[%s1810_s29 + $0x90] sm:$0xff]  }
  0x10   : > { %1660 = vmatprep.mubr.msk.bf16.mxu1 %vm462_vm1, %v1718_v6  ;;  %v1723_v12 = vld [vmem:[%s1810_s29 + $0x18] sm:$0xff]   ;;  %v1725_v14 = vld [vmem:[%s1810_s29 + $0x20] sm:$0xff]   ;;  %v1727_v16 = vld [vmem:[%s1810_s29 + $0x28] sm:$0xff]  }
  0x11   : > { %1621 = vmatpush3.bf16.msra.mxu0 %v1713_v1  ;;  %1698 = vmatpush3.bf16.msra.mxu1 %v1713_v1  ;;  %v1724_v13 = vld [vmem:[%s1810_s29 + $0x98] sm:$0xff]   ;;  %v1726_v15 = vld [vmem:[%s1810_s29 + $0xa0] sm:$0xff]   ;;  %v1728_v17 = vld [vmem:[%s1810_s29 + $0xa8] sm:$0xff]  }
  0x12   : > { %1622 = vmatprep.subr.bf16.mxu0 %v1714_v3  ;;  %1694 = vmatprep.subr.bf16.mxu1 %v1714_v3  ;;  %v1729_v18 = vld [vmem:[%s1810_s29 + $0x30] sm:$0xff]   ;;  %v1731_v20 = vld [vmem:[%s1810_s29 + $0x38] sm:$0xff]   ;;  %v1733_v22 = vld [vmem:[%s1810_s29 + $0x40] sm:$0xff]  }
  0x13   : > { %v1730_v19 = vld [vmem:[%s1810_s29 + $0xb0] sm:$0xff]   ;;  %v1732_v21 = vld [vmem:[%s1810_s29 + $0xb8] sm:$0xff]   ;;  %v1734_v23 = vld [vmem:[%s1810_s29 + $0xc0] sm:$0xff]  }
  0x14   : > { %v1735_v24 = vld [vmem:[%s1810_s29 + $0x48] sm:$0xff]   ;;  %v1737_v26 = vld [vmem:[%s1810_s29 + $0x50] sm:$0xff]   ;;  %v1739_v28 = vld [vmem:[%s1810_s29 + $0x58] sm:$0xff]  }
  0x15   : > { %1623 = vmatpush3.bf16.msra.mxu0 %v1714_v3  ;;  %1699 = vmatpush3.bf16.msra.mxu1 %v1714_v3  ;;  %v1736_v25 = vld [vmem:[%s1810_s29 + $0xc8] sm:$0xff]   ;;  %v1738_v27 = vld [vmem:[%s1810_s29 + $0xd0] sm:$0xff]   ;;  %v1740_v29 = vld [vmem:[%s1810_s29 + $0xd8] sm:$0xff]  }
  0x16   : > { %1624 = vmatprep.subr.bf16.mxu0 %v1715_v4  ;;  %1695 = vmatprep.subr.bf16.mxu1 %v1715_v4  ;;  %v1741_v30 = vld [vmem:[%s1810_s29 + $0x60] sm:$0xff]   ;;  %v1743_v32 = vld [vmem:[%s1810_s29 + $0x68] sm:$0xff]   ;;  %v1745_v34 = vld [vmem:[%s1810_s29 + $0x70] sm:$0xff]  }
  0x17   : > { %v1742_v31 = vld [vmem:[%s1810_s29 + $0xe0] sm:$0xff]   ;;  %v1744_v33 = vld [vmem:[%s1810_s29 + $0xe8] sm:$0xff]   ;;  %v1746_v35 = vld [vmem:[%s1810_s29 + $0xf0] sm:$0xff]  }
  0x18   : > { %v1747_v36 = vld [vmem:[%s1810_s29 + $0x78] sm:$0xff]   ;;  %v1887_v40 = vld [vmem:[%s2158_s3] ss:$0 sm:$0xff] }
  0x19   : > { %1625 = vmatpush3.bf16.msra.mxu0 %v1715_v4  ;;  %1700 = vmatpush3.bf16.msra.mxu1 %v1715_v4  ;;  %v1748_v37 = vld [vmem:[%s1810_s29 + $0xf8] sm:$0xff]  }
  0x1a   : > { %1626 = vmatprep.subr.bf16.mxu0 %v1716_v7  ;;  %1696 = vmatprep.subr.bf16.mxu1 %v1716_v7 }
  0x1d   : > { %1627 = vmatpush3.bf16.msra.mxu0 %v1716_v7  ;;  %1701 = vmatpush3.bf16.msra.mxu1 %v1716_v7 }
  0x20   : > { %1629 = vmatmul.mubr.msk.bf16.vlgmr.msra.gmra.mxu0 %vm462_vm1, %v1719_v8  ;;  %1661 = vmatmul.mubr.msk.bf16.vlgmr.msra.gmra.mxu1 %vm462_vm1, %v1720_v9 }
  0x21   : > { %1632 = vmatprep.mubr.msk.bf16.mxu0 %vm462_vm1, %v1721_v10  ;;  %1664 = vmatprep.mubr.msk.bf16.mxu1 %vm462_vm1, %v1722_v11 }
  0x28   : > { %1633 = vmatmul.mubr.msk.bf16.gmra.mxu0 %vm462_vm1, %v1723_v12  ;;  %1665 = vmatmul.mubr.msk.bf16.gmra.mxu1 %vm462_vm1, %v1724_v13 }
  0x29   : > { %1636 = vmatprep.mubr.msk.bf16.mxu0 %vm462_vm1, %v1725_v14  ;;  %1668 = vmatprep.mubr.msk.bf16.mxu1 %vm462_vm1, %v1726_v15 }
  0x30   : > { %1637 = vmatmul.mubr.msk.bf16.gmra.mxu0 %vm462_vm1, %v1727_v16  ;;  %1669 = vmatmul.mubr.msk.bf16.gmra.mxu1 %vm462_vm1, %v1728_v17 }
  0x31   : > { %1640 = vmatprep.mubr.msk.bf16.mxu0 %vm462_vm1, %v1729_v18  ;;  %1672 = vmatprep.mubr.msk.bf16.mxu1 %vm462_vm1, %v1730_v19 }
  0x38   : > { %1641 = vmatmul.mubr.msk.bf16.gmra.mxu0 %vm462_vm1, %v1731_v20  ;;  %1673 = vmatmul.mubr.msk.bf16.gmra.mxu1 %vm462_vm1, %v1732_v21 }
  0x39   : > { %1644 = vmatprep.mubr.msk.bf16.mxu0 %vm462_vm1, %v1733_v22  ;;  %1676 = vmatprep.mubr.msk.bf16.mxu1 %vm462_vm1, %v1734_v23 }
  0x40   : > { %1645 = vmatmul.mubr.msk.bf16.gmra.mxu0 %vm462_vm1, %v1735_v24  ;;  %1677 = vmatmul.mubr.msk.bf16.gmra.mxu1 %vm462_vm1, %v1736_v25 }
  0x41   : > { %1648 = vmatprep.mubr.msk.bf16.mxu0 %vm462_vm1, %v1737_v26  ;;  %1680 = vmatprep.mubr.msk.bf16.mxu1 %vm462_vm1, %v1738_v27 }
  0x48   : > { %1649 = vmatmul.mubr.msk.bf16.gmra.mxu0 %vm462_vm1, %v1739_v28  ;;  %1681 = vmatmul.mubr.msk.bf16.gmra.mxu1 %vm462_vm1, %v1740_v29 }
  0x49   : > { %1652 = vmatprep.mubr.msk.bf16.mxu0 %vm462_vm1, %v1741_v30  ;;  %1684 = vmatprep.mubr.msk.bf16.mxu1 %vm462_vm1, %v1742_v31 }
  0x50   : > { %1653 = vmatmul.mubr.msk.bf16.gmra.mxu0 %vm462_vm1, %v1743_v32  ;;  %1685 = vmatmul.mubr.msk.bf16.gmra.mxu1 %vm462_vm1, %v1744_v33 }
  0x51   : > { %1656 = vmatprep.mubr.msk.bf16.mxu0 %vm462_vm1, %v1745_v34  ;;  %1688 = vmatprep.mubr.msk.bf16.mxu1 %vm462_vm1, %v1746_v35 }
  0x58   : > { %1657 = vmatmul.mubr.msk.bf16.gmra.mxu0 %vm462_vm1, %v1747_v36  ;;  %1689 = vmatmul.mubr.msk.bf16.gmra.mxu1 %vm462_vm1, %v1748_v37 }
  0xe0   : > { %v1630_v39 = vpop.f32.mrf.mxu0  ;;  %v1662_v41 = vpop.f32.mrf.mxu1 }
  0xe1   : > { %v861_v42 = vmul.f32 %v1630_v39, %v1882_v38  ;;  %v893_v43 = vmul.f32 %v1662_v41, %v1882_v38 }
  0xe2   : > { %v597_v44 = vpop.f32.mrf.mxu0  ;;  %v725_v45 = vpop.f32.mrf.mxu1 }
  0xe3   : > { %v932_v46 = vadd.f32 %v1887_v40, %v861_v42  ;;  %v964_v47 = vadd.f32 %v1887_v40, %v893_v43  ;;  %v859_v48 = vmul.f32 %v1882_v38, %v597_v44  ;;  %v891_v49 = vmul.f32 %v1882_v38, %v725_v45 }
  0xe4   : > { %v1631_v50 = vpop.f32.mrf.mxu0  ;;  %v1663_v51 = vpop.f32.mrf.mxu1 }
  0xe5   : > { %v1519_v52 = vpack.c.bf16 %v932_v46, %v932_v46  ;;  %v1551_v53 = vpack.c.bf16 %v964_v47, %v964_v47  ;;  %v930_v54 = vadd.f32 %v1887_v40, %v859_v48  ;;  %v962_v55 = vadd.f32 %v1887_v40, %v891_v49 }
  0xe6   : > { %v862_v56 = vmul.f32 %v1631_v50, %v1882_v38  ;;  %v894_v57 = vmul.f32 %v1663_v51, %v1882_v38  ;;  %v600_v58 = vpop.f32.mrf.mxu0  ;;  %v728_v59 = vpop.f32.mrf.mxu1 }
  0xe7   : > { %1253 = vst.msk [vmem:[%s1900_s12 + $0x8] sm:$0xf] %vm1250_vm2, %v1519_v52  ;;  %1285 = vst.msk [vmem:[%s1900_s12 + $0x88] sm:$0xf] %vm1250_vm2, %v1551_v53  ;;  %v1517_v60 = vpack.c.bf16 %v930_v54, %v930_v54  ;;  %v1549_v61 = vpack.c.bf16 %v962_v55, %v962_v55  ;;  %v860_v62 = vmul.f32 %v1882_v38, %v600_v58 }
  0xe8   : > { %v892_v63 = vmul.f32 %v1882_v38, %v728_v59  ;;  %v933_v0 = vadd.f32 %v1887_v40, %v862_v56  ;;  %v965_v1 = vadd.f32 %v1887_v40, %v894_v57  ;;  %v1634_v2 = vpop.f32.mrf.mxu0  ;;  %v1666_v3 = vpop.f32.mrf.mxu1 }
  0xe9   : > { %1251 = vst.msk [vmem:[%s1900_s12] sm:$0xf] %vm1250_vm2, %v1517_v60  ;;  %1283 = vst.msk [vmem:[%s1900_s12 + $0x80] sm:$0xf] %vm1250_vm2, %v1549_v61  ;;  %v931_v4 = vadd.f32 %v1887_v40, %v860_v62  ;;  %v865_v6 = vmul.f32 %v1634_v2, %v1882_v38  ;;  %v897_v7 = vmul.f32 %v1666_v3, %v1882_v38 }
  0xea   : > { %v963_v5 = vadd.f32 %v1887_v40, %v892_v63  ;;  %v1520_v8 = vpack.c.bf16 %v933_v0, %v933_v0  ;;  %v1552_v9 = vpack.c.bf16 %v965_v1, %v965_v1  ;;  %v613_v10 = vpop.f32.mrf.mxu0  ;;  %v741_v11 = vpop.f32.mrf.mxu1 }
  0xeb   : > { %v1518_v12 = vpack.c.bf16 %v931_v4, %v931_v4  ;;  %v936_v14 = vadd.f32 %v1887_v40, %v865_v6  ;;  %v968_v15 = vadd.f32 %v1887_v40, %v897_v7  ;;  %v863_v16 = vmul.f32 %v1882_v38, %v613_v10 }
  0xec   : > { %v1550_v13 = vpack.c.bf16 %v963_v5, %v963_v5  ;;  %1254 = vst.msk [vmem:[%s1900_s12 + $0xc] sm:$0xf] %vm1250_vm2, %v1520_v8  ;;  %1286 = vst.msk [vmem:[%s1900_s12 + $0x8c] sm:$0xf] %vm1250_vm2, %v1552_v9  ;;  %v895_v17 = vmul.f32 %v1882_v38, %v741_v11  ;;  %v1635_v18 = vpop.f32.mrf.mxu0  ;;  %v1667_v19 = vpop.f32.mrf.mxu1 }
  0xed   : > { %1252 = vst.msk [vmem:[%s1900_s12 + $0x4] sm:$0xf] %vm1250_vm2, %v1518_v12  ;;  %v1523_v20 = vpack.c.bf16 %v936_v14, %v936_v14  ;;  %v1555_v21 = vpack.c.bf16 %v968_v15, %v968_v15  ;;  %v866_v22 = vmul.f32 %v1635_v18, %v1882_v38  ;;  %v898_v23 = vmul.f32 %v1667_v19, %v1882_v38 }
  0xee   : > { %1284 = vst.msk [vmem:[%s1900_s12 + $0x84] sm:$0xf] %vm1250_vm2, %v1550_v13  ;;  %v934_v24 = vadd.f32 %v1887_v40, %v863_v16  ;;  %v966_v25 = vadd.f32 %v1887_v40, %v895_v17  ;;  %v616_v26 = vpop.f32.mrf.mxu0  ;;  %v744_v27 = vpop.f32.mrf.mxu1 }
  0xef   : > { %1257 = vst.msk [vmem:[%s1900_s12 + $0x18] sm:$0xf] %vm1250_vm2, %v1523_v20  ;;  %1289 = vst.msk [vmem:[%s1900_s12 + $0x98] sm:$0xf] %vm1250_vm2, %v1555_v21  ;;  %v937_v28 = vadd.f32 %v1887_v40, %v866_v22  ;;  %v969_v29 = vadd.f32 %v1887_v40, %v898_v23  ;;  %v864_v30 = vmul.f32 %v1882_v38, %v616_v26 }
  0xf0   : > { %v896_v31 = vmul.f32 %v1882_v38, %v744_v27  ;;  %v1521_v32 = vpack.c.bf16 %v934_v24, %v934_v24  ;;  %v1553_v33 = vpack.c.bf16 %v966_v25, %v966_v25  ;;  %v1638_v34 = vpop.f32.mrf.mxu0  ;;  %v1670_v35 = vpop.f32.mrf.mxu1 }
  0xf1   : > { %v1524_v36 = vpack.c.bf16 %v937_v28, %v937_v28  ;;  %v1556_v37 = vpack.c.bf16 %v969_v29, %v969_v29  ;;  %v935_v39 = vadd.f32 %v1887_v40, %v864_v30  ;;  %v869_v42 = vmul.f32 %v1638_v34, %v1882_v38 }
  0xf2   : > { %v967_v41 = vadd.f32 %v1887_v40, %v896_v31  ;;  %1255 = vst.msk [vmem:[%s1900_s12 + $0x10] sm:$0xf] %vm1250_vm2, %v1521_v32  ;;  %1287 = vst.msk [vmem:[%s1900_s12 + $0x90] sm:$0xf] %vm1250_vm2, %v1553_v33  ;;  %v901_v43 = vmul.f32 %v1670_v35, %v1882_v38  ;;  %v629_v44 = vpop.f32.mrf.mxu0  ;;  %v757_v45 = vpop.f32.mrf.mxu1 }
  0xf3   : > { %1258 = vst.msk [vmem:[%s1900_s12 + $0x1c] sm:$0xf] %vm1250_vm2, %v1524_v36  ;;  %1290 = vst.msk [vmem:[%s1900_s12 + $0x9c] sm:$0xf] %vm1250_vm2, %v1556_v37  ;;  %v1522_v46 = vpack.c.bf16 %v935_v39, %v935_v39  ;;  %v867_v48 = vmul.f32 %v1882_v38, %v629_v44  ;;  %v899_v49 = vmul.f32 %v1882_v38, %v757_v45 }
  0xf4   : > { %v1554_v47 = vpack.c.bf16 %v967_v41, %v967_v41  ;;  %v940_v50 = vadd.f32 %v1887_v40, %v869_v42  ;;  %v972_v51 = vadd.f32 %v1887_v40, %v901_v43  ;;  %v1639_v52 = vpop.f32.mrf.mxu0  ;;  %v1671_v53 = vpop.f32.mrf.mxu1 }
  0xf5   : > { %1256 = vst.msk [vmem:[%s1900_s12 + $0x14] sm:$0xf] %vm1250_vm2, %v1522_v46  ;;  %v938_v54 = vadd.f32 %v1887_v40, %v867_v48  ;;  %v970_v55 = vadd.f32 %v1887_v40, %v899_v49  ;;  %v870_v56 = vmul.f32 %v1639_v52, %v1882_v38  ;;  %v902_v57 = vmul.f32 %v1671_v53, %v1882_v38 }
  0xf6   : > { %1288 = vst.msk [vmem:[%s1900_s12 + $0x94] sm:$0xf] %vm1250_vm2, %v1554_v47  ;;  %v1527_v58 = vpack.c.bf16 %v940_v50, %v940_v50  ;;  %v1559_v59 = vpack.c.bf16 %v972_v51, %v972_v51  ;;  %v632_v60 = vpop.f32.mrf.mxu0  ;;  %v760_v61 = vpop.f32.mrf.mxu1 }
  0xf7   : > { %v1525_v62 = vpack.c.bf16 %v938_v54, %v938_v54  ;;  %v1557_v63 = vpack.c.bf16 %v970_v55, %v970_v55  ;;  %v941_v0 = vadd.f32 %v1887_v40, %v870_v56  ;;  %v973_v1 = vadd.f32 %v1887_v40, %v902_v57 }
  0xf8   : > { %1261 = vst.msk [vmem:[%s1900_s12 + $0x28] sm:$0xf] %vm1250_vm2, %v1527_v58  ;;  %1293 = vst.msk [vmem:[%s1900_s12 + $0xa8] sm:$0xf] %vm1250_vm2, %v1559_v59  ;;  %v868_v2 = vmul.f32 %v1882_v38, %v632_v60  ;;  %v900_v3 = vmul.f32 %v1882_v38, %v760_v61  ;;  %v1642_v4 = vpop.f32.mrf.mxu0  ;;  %v1674_v5 = vpop.f32.mrf.mxu1 }
  0xf9   : > { %1259 = vst.msk [vmem:[%s1900_s12 + $0x20] sm:$0xf] %vm1250_vm2, %v1525_v62  ;;  %1291 = vst.msk [vmem:[%s1900_s12 + $0xa0] sm:$0xf] %vm1250_vm2, %v1557_v63  ;;  %v1528_v6 = vpack.c.bf16 %v941_v0, %v941_v0  ;;  %v1560_v7 = vpack.c.bf16 %v973_v1, %v973_v1  ;;  %v873_v8 = vmul.f32 %v1642_v4, %v1882_v38 }
  0xfa   : > { %v905_v9 = vmul.f32 %v1674_v5, %v1882_v38  ;;  %v939_v10 = vadd.f32 %v1887_v40, %v868_v2  ;;  %v971_v11 = vadd.f32 %v1887_v40, %v900_v3  ;;  %v645_v12 = vpop.f32.mrf.mxu0  ;;  %v773_v13 = vpop.f32.mrf.mxu1 }
  0xfb   : > { %1262 = vst.msk [vmem:[%s1900_s12 + $0x2c] sm:$0xf] %vm1250_vm2, %v1528_v6  ;;  %1294 = vst.msk [vmem:[%s1900_s12 + $0xac] sm:$0xf] %vm1250_vm2, %v1560_v7  ;;  %v944_v14 = vadd.f32 %v1887_v40, %v873_v8  ;;  %v871_v16 = vmul.f32 %v1882_v38, %v645_v12  ;;  %v903_v17 = vmul.f32 %v1882_v38, %v773_v13 }
  0xfc   : > { %v976_v15 = vadd.f32 %v1887_v40, %v905_v9  ;;  %v1526_v18 = vpack.c.bf16 %v939_v10, %v939_v10  ;;  %v1558_v19 = vpack.c.bf16 %v971_v11, %v971_v11  ;;  %v1643_v20 = vpop.f32.mrf.mxu0  ;;  %v1675_v21 = vpop.f32.mrf.mxu1 }
  0xfd   : > { %v1531_v22 = vpack.c.bf16 %v944_v14, %v944_v14  ;;  %v942_v24 = vadd.f32 %v1887_v40, %v871_v16  ;;  %v974_v25 = vadd.f32 %v1887_v40, %v903_v17  ;;  %v874_v26 = vmul.f32 %v1643_v20, %v1882_v38 }
  0xfe   : > { %v1563_v23 = vpack.c.bf16 %v976_v15, %v976_v15  ;;  %1260 = vst.msk [vmem:[%s1900_s12 + $0x24] sm:$0xf] %vm1250_vm2, %v1526_v18  ;;  %1292 = vst.msk [vmem:[%s1900_s12 + $0xa4] sm:$0xf] %vm1250_vm2, %v1558_v19  ;;  %v906_v27 = vmul.f32 %v1675_v21, %v1882_v38  ;;  %v648_v28 = vpop.f32.mrf.mxu0  ;;  %v776_v29 = vpop.f32.mrf.mxu1 }
  0xff   : > { %1265 = vst.msk [vmem:[%s1900_s12 + $0x38] sm:$0xf] %vm1250_vm2, %v1531_v22  ;;  %v1529_v30 = vpack.c.bf16 %v942_v24, %v942_v24  ;;  %v1561_v31 = vpack.c.bf16 %v974_v25, %v974_v25  ;;  %v872_v32 = vmul.f32 %v1882_v38, %v648_v28  ;;  %v904_v33 = vmul.f32 %v1882_v38, %v776_v29 }
 0x100   : > { %1297 = vst.msk [vmem:[%s1900_s12 + $0xb8] sm:$0xf] %vm1250_vm2, %v1563_v23  ;;  %v945_v34 = vadd.f32 %v1887_v40, %v874_v26  ;;  %v977_v35 = vadd.f32 %v1887_v40, %v906_v27  ;;  %v1646_v36 = vpop.f32.mrf.mxu0  ;;  %v1678_v37 = vpop.f32.mrf.mxu1 }
 0x101   : > { %1263 = vst.msk [vmem:[%s1900_s12 + $0x30] sm:$0xf] %vm1250_vm2, %v1529_v30  ;;  %1295 = vst.msk [vmem:[%s1900_s12 + $0xb0] sm:$0xf] %vm1250_vm2, %v1561_v31  ;;  %v943_v39 = vadd.f32 %v1887_v40, %v872_v32  ;;  %v975_v41 = vadd.f32 %v1887_v40, %v904_v33  ;;  %v877_v42 = vmul.f32 %v1646_v36, %v1882_v38 }
 0x102   : > { %v909_v43 = vmul.f32 %v1678_v37, %v1882_v38  ;;  %v1532_v44 = vpack.c.bf16 %v945_v34, %v945_v34  ;;  %v1564_v45 = vpack.c.bf16 %v977_v35, %v977_v35  ;;  %v661_v46 = vpop.f32.mrf.mxu0  ;;  %v789_v47 = vpop.f32.mrf.mxu1 }
 0x103   : > { %v1530_v48 = vpack.c.bf16 %v943_v39, %v943_v39  ;;  %v1562_v49 = vpack.c.bf16 %v975_v41, %v975_v41  ;;  %v948_v50 = vadd.f32 %v1887_v40, %v877_v42  ;;  %v875_v52 = vmul.f32 %v1882_v38, %v661_v46 }
 0x104   : > { %v980_v51 = vadd.f32 %v1887_v40, %v909_v43  ;;  %1266 = vst.msk [vmem:[%s1900_s12 + $0x3c] sm:$0xf] %vm1250_vm2, %v1532_v44  ;;  %1298 = vst.msk [vmem:[%s1900_s12 + $0xbc] sm:$0xf] %vm1250_vm2, %v1564_v45  ;;  %v907_v53 = vmul.f32 %v1882_v38, %v789_v47  ;;  %v1647_v54 = vpop.f32.mrf.mxu0  ;;  %v1679_v55 = vpop.f32.mrf.mxu1 }
 0x105   : > { %1264 = vst.msk [vmem:[%s1900_s12 + $0x34] sm:$0xf] %vm1250_vm2, %v1530_v48  ;;  %1296 = vst.msk [vmem:[%s1900_s12 + $0xb4] sm:$0xf] %vm1250_vm2, %v1562_v49  ;;  %v1535_v56 = vpack.c.bf16 %v948_v50, %v948_v50  ;;  %v878_v58 = vmul.f32 %v1647_v54, %v1882_v38  ;;  %v910_v59 = vmul.f32 %v1679_v55, %v1882_v38 }
 0x106   : > { %v1567_v57 = vpack.c.bf16 %v980_v51, %v980_v51  ;;  %v946_v60 = vadd.f32 %v1887_v40, %v875_v52  ;;  %v978_v61 = vadd.f32 %v1887_v40, %v907_v53  ;;  %v664_v62 = vpop.f32.mrf.mxu0  ;;  %v792_v63 = vpop.f32.mrf.mxu1 }
 0x107   : > { %1269 = vst.msk [vmem:[%s1900_s12 + $0x48] sm:$0xf] %vm1250_vm2, %v1535_v56  ;;  %v949_v0 = vadd.f32 %v1887_v40, %v878_v58  ;;  %v981_v1 = vadd.f32 %v1887_v40, %v910_v59  ;;  %v876_v2 = vmul.f32 %v1882_v38, %v664_v62  ;;  %v908_v3 = vmul.f32 %v1882_v38, %v792_v63 }
 0x108   : > { %1301 = vst.msk [vmem:[%s1900_s12 + $0xc8] sm:$0xf] %vm1250_vm2, %v1567_v57  ;;  %v1533_v4 = vpack.c.bf16 %v946_v60, %v946_v60  ;;  %v1565_v5 = vpack.c.bf16 %v978_v61, %v978_v61  ;;  %v1650_v6 = vpop.f32.mrf.mxu0  ;;  %v1682_v7 = vpop.f32.mrf.mxu1 }
 0x109   : > { %v1536_v8 = vpack.c.bf16 %v949_v0, %v949_v0  ;;  %v1568_v9 = vpack.c.bf16 %v981_v1, %v981_v1  ;;  %v947_v10 = vadd.f32 %v1887_v40, %v876_v2  ;;  %v979_v11 = vadd.f32 %v1887_v40, %v908_v3 }
 0x10a   : > { %1267 = vst.msk [vmem:[%s1900_s12 + $0x40] sm:$0xf] %vm1250_vm2, %v1533_v4  ;;  %1299 = vst.msk [vmem:[%s1900_s12 + $0xc0] sm:$0xf] %vm1250_vm2, %v1565_v5  ;;  %v881_v12 = vmul.f32 %v1650_v6, %v1882_v38  ;;  %v913_v13 = vmul.f32 %v1682_v7, %v1882_v38  ;;  %v677_v14 = vpop.f32.mrf.mxu0  ;;  %v805_v15 = vpop.f32.mrf.mxu1 }
 0x10b   : > { %1270 = vst.msk [vmem:[%s1900_s12 + $0x4c] sm:$0xf] %vm1250_vm2, %v1536_v8  ;;  %1302 = vst.msk [vmem:[%s1900_s12 + $0xcc] sm:$0xf] %vm1250_vm2, %v1568_v9  ;;  %v1534_v16 = vpack.c.bf16 %v947_v10, %v947_v10  ;;  %v1566_v17 = vpack.c.bf16 %v979_v11, %v979_v11  ;;  %v879_v18 = vmul.f32 %v1882_v38, %v677_v14 }
 0x10c   : > { %v911_v19 = vmul.f32 %v1882_v38, %v805_v15  ;;  %v952_v20 = vadd.f32 %v1887_v40, %v881_v12  ;;  %v984_v21 = vadd.f32 %v1887_v40, %v913_v13  ;;  %v1651_v22 = vpop.f32.mrf.mxu0  ;;  %v1683_v23 = vpop.f32.mrf.mxu1 }
 0x10d   : > { %1268 = vst.msk [vmem:[%s1900_s12 + $0x44] sm:$0xf] %vm1250_vm2, %v1534_v16  ;;  %1300 = vst.msk [vmem:[%s1900_s12 + $0xc4] sm:$0xf] %vm1250_vm2, %v1566_v17  ;;  %v950_v24 = vadd.f32 %v1887_v40, %v879_v18  ;;  %v882_v26 = vmul.f32 %v1651_v22, %v1882_v38  ;;  %v914_v27 = vmul.f32 %v1683_v23, %v1882_v38 }
 0x10e   : > { %v982_v25 = vadd.f32 %v1887_v40, %v911_v19  ;;  %v1539_v28 = vpack.c.bf16 %v952_v20, %v952_v20  ;;  %v1571_v29 = vpack.c.bf16 %v984_v21, %v984_v21  ;;  %v680_v30 = vpop.f32.mrf.mxu0  ;;  %v808_v31 = vpop.f32.mrf.mxu1 }
 0x10f   : > { %v1537_v32 = vpack.c.bf16 %v950_v24, %v950_v24  ;;  %v953_v34 = vadd.f32 %v1887_v40, %v882_v26  ;;  %v985_v35 = vadd.f32 %v1887_v40, %v914_v27  ;;  %v880_v36 = vmul.f32 %v1882_v38, %v680_v30 }
 0x110   : > { %v1569_v33 = vpack.c.bf16 %v982_v25, %v982_v25  ;;  %1273 = vst.msk [vmem:[%s1900_s12 + $0x58] sm:$0xf] %vm1250_vm2, %v1539_v28  ;;  %1305 = vst.msk [vmem:[%s1900_s12 + $0xd8] sm:$0xf] %vm1250_vm2, %v1571_v29  ;;  %v912_v37 = vmul.f32 %v1882_v38, %v808_v31  ;;  %v1654_v39 = vpop.f32.mrf.mxu0  ;;  %v1686_v41 = vpop.f32.mrf.mxu1 }
 0x111   : > { %1271 = vst.msk [vmem:[%s1900_s12 + $0x50] sm:$0xf] %vm1250_vm2, %v1537_v32  ;;  %v1540_v42 = vpack.c.bf16 %v953_v34, %v953_v34  ;;  %v1572_v43 = vpack.c.bf16 %v985_v35, %v985_v35  ;;  %v885_v44 = vmul.f32 %v1654_v39, %v1882_v38  ;;  %v917_v45 = vmul.f32 %v1686_v41, %v1882_v38 }
 0x112   : > { %1303 = vst.msk [vmem:[%s1900_s12 + $0xd0] sm:$0xf] %vm1250_vm2, %v1569_v33  ;;  %v951_v46 = vadd.f32 %v1887_v40, %v880_v36  ;;  %v983_v47 = vadd.f32 %v1887_v40, %v912_v37  ;;  %v693_v48 = vpop.f32.mrf.mxu0  ;;  %v821_v49 = vpop.f32.mrf.mxu1 }
 0x113   : > { %1274 = vst.msk [vmem:[%s1900_s12 + $0x5c] sm:$0xf] %vm1250_vm2, %v1540_v42  ;;  %1306 = vst.msk [vmem:[%s1900_s12 + $0xdc] sm:$0xf] %vm1250_vm2, %v1572_v43  ;;  %v956_v50 = vadd.f32 %v1887_v40, %v885_v44  ;;  %v988_v51 = vadd.f32 %v1887_v40, %v917_v45  ;;  %v883_v52 = vmul.f32 %v1882_v38, %v693_v48 }
 0x114   : > { %v915_v53 = vmul.f32 %v1882_v38, %v821_v49  ;;  %v1538_v54 = vpack.c.bf16 %v951_v46, %v951_v46  ;;  %v1570_v55 = vpack.c.bf16 %v983_v47, %v983_v47  ;;  %v1655_v56 = vpop.f32.mrf.mxu0  ;;  %v1687_v57 = vpop.f32.mrf.mxu1 }
 0x115   : > { %v1543_v58 = vpack.c.bf16 %v956_v50, %v956_v50  ;;  %v1575_v59 = vpack.c.bf16 %v988_v51, %v988_v51  ;;  %v954_v60 = vadd.f32 %v1887_v40, %v883_v52  ;;  %v886_v62 = vmul.f32 %v1655_v56, %v1882_v38 }
 0x116   : > { %v986_v61 = vadd.f32 %v1887_v40, %v915_v53  ;;  %1272 = vst.msk [vmem:[%s1900_s12 + $0x54] sm:$0xf] %vm1250_vm2, %v1538_v54  ;;  %1304 = vst.msk [vmem:[%s1900_s12 + $0xd4] sm:$0xf] %vm1250_vm2, %v1570_v55  ;;  %v918_v63 = vmul.f32 %v1687_v57, %v1882_v38  ;;  %v696_v0 = vpop.f32.mrf.mxu0  ;;  %v824_v1 = vpop.f32.mrf.mxu1 }
 0x117   : > { %1277 = vst.msk [vmem:[%s1900_s12 + $0x68] sm:$0xf] %vm1250_vm2, %v1543_v58  ;;  %1309 = vst.msk [vmem:[%s1900_s12 + $0xe8] sm:$0xf] %vm1250_vm2, %v1575_v59  ;;  %v1541_v2 = vpack.c.bf16 %v954_v60, %v954_v60  ;;  %v884_v4 = vmul.f32 %v1882_v38, %v696_v0  ;;  %v916_v5 = vmul.f32 %v1882_v38, %v824_v1 }
 0x118   : > { %v1573_v3 = vpack.c.bf16 %v986_v61, %v986_v61  ;;  %v957_v6 = vadd.f32 %v1887_v40, %v886_v62  ;;  %v989_v7 = vadd.f32 %v1887_v40, %v918_v63  ;;  %v1658_v8 = vpop.f32.mrf.mxu0  ;;  %v1690_v9 = vpop.f32.mrf.mxu1 }
 0x119   : > { %1275 = vst.msk [vmem:[%s1900_s12 + $0x60] sm:$0xf] %vm1250_vm2, %v1541_v2  ;;  %v955_v10 = vadd.f32 %v1887_v40, %v884_v4  ;;  %v987_v11 = vadd.f32 %v1887_v40, %v916_v5  ;;  %v889_v12 = vmul.f32 %v1658_v8, %v1882_v38  ;;  %v921_v13 = vmul.f32 %v1690_v9, %v1882_v38 }
 0x11a   : > { %1307 = vst.msk [vmem:[%s1900_s12 + $0xe0] sm:$0xf] %vm1250_vm2, %v1573_v3  ;;  %v1544_v14 = vpack.c.bf16 %v957_v6, %v957_v6  ;;  %v1576_v15 = vpack.c.bf16 %v989_v7, %v989_v7  ;;  %v709_v16 = vpop.f32.mrf.mxu0  ;;  %v837_v17 = vpop.f32.mrf.mxu1 }
 0x11b   : > { %v1542_v18 = vpack.c.bf16 %v955_v10, %v955_v10  ;;  %v1574_v19 = vpack.c.bf16 %v987_v11, %v987_v11  ;;  %v960_v20 = vadd.f32 %v1887_v40, %v889_v12  ;;  %v992_v21 = vadd.f32 %v1887_v40, %v921_v13 }
 0x11c   : > { %1278 = vst.msk [vmem:[%s1900_s12 + $0x6c] sm:$0xf] %vm1250_vm2, %v1544_v14  ;;  %1310 = vst.msk [vmem:[%s1900_s12 + $0xec] sm:$0xf] %vm1250_vm2, %v1576_v15  ;;  %v887_v22 = vmul.f32 %v1882_v38, %v709_v16  ;;  %v919_v23 = vmul.f32 %v1882_v38, %v837_v17  ;;  %v1659_v24 = vpop.f32.mrf.mxu0  ;;  %v1691_v25 = vpop.f32.mrf.mxu1 }
 0x11d   : > { %1276 = vst.msk [vmem:[%s1900_s12 + $0x64] sm:$0xf] %vm1250_vm2, %v1542_v18  ;;  %1308 = vst.msk [vmem:[%s1900_s12 + $0xe4] sm:$0xf] %vm1250_vm2, %v1574_v19  ;;  %v1547_v26 = vpack.c.bf16 %v960_v20, %v960_v20  ;;  %v1579_v27 = vpack.c.bf16 %v992_v21, %v992_v21  ;;  %v890_v28 = vmul.f32 %v1659_v24, %v1882_v38 }
 0x11e   : > { %v922_v29 = vmul.f32 %v1691_v25, %v1882_v38  ;;  %v958_v30 = vadd.f32 %v1887_v40, %v887_v22  ;;  %v990_v31 = vadd.f32 %v1887_v40, %v919_v23  ;;  %v712_v32 = vpop.f32.mrf.mxu0  ;;  %v840_v33 = vpop.f32.mrf.mxu1 }
 0x11f   : > { %1281 = vst.msk [vmem:[%s1900_s12 + $0x78] sm:$0xf] %vm1250_vm2, %v1547_v26  ;;  %1313 = vst.msk [vmem:[%s1900_s12 + $0xf8] sm:$0xf] %vm1250_vm2, %v1579_v27  ;;  %v961_v34 = vadd.f32 %v1887_v40, %v890_v28  ;;  %v888_v36 = vmul.f32 %v1882_v38, %v712_v32  ;;  %v920_v37 = vmul.f32 %v1882_v38, %v840_v33 }
 0x120   : > { %v993_v35 = vadd.f32 %v1887_v40, %v922_v29  ;;  %v1545_v39 = vpack.c.bf16 %v958_v30, %v958_v30  ;;  %v1577_v41 = vpack.c.bf16 %v990_v31, %v990_v31 }
 0x121   : > { %v1548_v42 = vpack.c.bf16 %v961_v34, %v961_v34  ;;  %v959_v44 = vadd.f32 %v1887_v40, %v888_v36  ;;  %v991_v45 = vadd.f32 %v1887_v40, %v920_v37 }
 0x122   : > { %v1580_v43 = vpack.c.bf16 %v993_v35, %v993_v35  ;;  %1279 = vst.msk [vmem:[%s1900_s12 + $0x70] sm:$0xf] %vm1250_vm2, %v1545_v39  ;;  %1311 = vst.msk [vmem:[%s1900_s12 + $0xf0] sm:$0xf] %vm1250_vm2, %v1577_v41 }
 0x123   : > { %1282 = vst.msk [vmem:[%s1900_s12 + $0x7c] sm:$0xf] %vm1250_vm2, %v1548_v42  ;;  %v1546_v46 = vpack.c.bf16 %v959_v44, %v959_v44  ;;  %v1578_v47 = vpack.c.bf16 %v991_v45, %v991_v45 }
 0x124   : > { %1314 = vst.msk [vmem:[%s1900_s12 + $0xfc] sm:$0xf] %vm1250_vm2, %v1580_v43 }
 0x125   : > { %1280 = vst.msk [vmem:[%s1900_s12 + $0x74] sm:$0xf] %vm1250_vm2, %v1546_v46  ;;  %1312 = vst.msk [vmem:[%s1900_s12 + $0xf4] sm:$0xf] %vm1250_vm2, %v1578_v47 }
 0x126 PF: > { %s14_s15 = sadd.s32 1, %s1755_s15  }
 0x127   : > { %p11_p4 = scmp.ge.s32.totalorder %s14_s15, 4  }
 0x129   :  { %13 = sbr.rel (!%p11_p4) target bundleno = 1 (0x1), region = 66 }

</bundles_post_ra>
